<compile_context>
chip_gen: v7x
topology: tpu7x:2x2x1
jax: 0.10.0
libtpu: 0.0.40
codegen_flags: <defaults>
</compile_context>

<pallas_src>
import jax
import jax.numpy as jnp
from jax.experimental import pallas as pl
from jax.experimental.pallas import tpu as pltpu


def _round_up(x: int, m: int) -> int:
    return ((x + m - 1) // m) * m


def _largest_divisor(p: int, candidates, default: int) -> int:
    for c in candidates:
        if c <= p and p % c == 0:
            return c
    return default


def _mm_cat3_kernel(a_ref, b_ref, o_ref, acc_ref):
    """One (i, j, k) grid step of y = x @ x, replicated 3x along dim 1.

    a_ref  : (tm, tk) tile of x at block (i, k)
    b_ref  : (tk, tn) tile of x at block (k, j)
    o_ref  : (tm, 3, tn) output block at (i, :, j), resident across k only
    acc_ref: (tm, tn) f32 accumulator scratch
    """
    k = pl.program_id(2)           # read grid ids at top level only
    nk = pl.num_programs(2)

    @pl.when(k == 0)
    def _init():
        acc_ref[...] = jnp.zeros_like(acc_ref)

    acc_ref[...] += jnp.dot(a_ref[...], b_ref[...],
                            preferred_element_type=jnp.float32)

    @pl.when(k == nk - 1)
    def _epilogue():
        y = acc_ref[...].astype(o_ref.dtype)
        # Three lane-dense replica stores (no concat, no p-wide slab).
        o_ref[:, 0, :] = y
        o_ref[:, 1, :] = y
        o_ref[:, 2, :] = y


def mm_cat3(x1: jax.Array) -> jax.Array:
    n, m = x1.shape
    assert n == m, "torch.mm(x1, x1) requires a square matrix"
    dtype = x1.dtype
    item = jnp.dtype(dtype).itemsize

    # Small-n fast path: padding + a pipelined Pallas grid is pure overhead
    # for tiny problems (e.g. the spec's 5x5).
    if n <= 128:
        y = jnp.dot(x1, x1, preferred_element_type=jnp.float32).astype(dtype)
        return jnp.concatenate([y, y, y], axis=1)

    # Pad only to lane/sublane alignment (128), never to 256.
    p = _round_up(n, 128)
    xp = x1 if p == n else jnp.pad(x1, ((0, p - n), (0, p - n)))

    # Tile selection: biggest MXU-friendly tiles that divide p exactly.
    if p <= 512:
        tm = tn = p
    else:
        tm = tn = _largest_divisor(p, (512, 384, 256), 128)
    if p <= 1024:
        tk = p                      # full-K reduction: single k step
    else:
        tk = _largest_divisor(p, (1024, 512, 384, 256), 128)

    grid = (p // tm, p // tn, p // tk)

    # VMEM: double-buffered A/B tiles + double-buffered per-(i, j) output
    # block + f32 accumulator, plus headroom; capped below physical VMEM.
    vmem_need = (2 * tm * tk * item          # A tiles (double buffered)
                 + 2 * tk * tn * item        # B tiles (double buffered)
                 + 2 * tm * 3 * tn * item    # output block (double buffered)
                 + tm * tn * 4)              # f32 accumulator
    try:
        cap = int(pltpu.get_tpu_info().vmem_capacity_bytes) - (12 << 20)
    except Exception:
        cap = 48 << 20
    cap = max(cap, 32 << 20)
    vmem_limit = int(min(max(vmem_need + (8 << 20), 32 << 20), cap))

    out = pl.pallas_call(
        _mm_cat3_kernel,
        out_shape=jax.ShapeDtypeStruct((p, 3, p), dtype),
        grid_spec=pltpu.PrefetchScalarGridSpec(
            num_scalar_prefetch=0,
            grid=grid,
            in_specs=[
                pl.BlockSpec((tm, tk), lambda i, j, k: (i, k)),
                pl.BlockSpec((tk, tn), lambda i, j, k: (k, j)),
            ],
            # Per-(i, j) output block: p-independent VMEM footprint, written
            # back to HBM exactly once (after the last k step).
            out_specs=pl.BlockSpec((tm, 3, tn), lambda i, j, k: (i, 0, j)),
            scratch_shapes=[pltpu.VMEM((tm, tn), jnp.float32)],
        ),
        compiler_params=pltpu.CompilerParams(
            dimension_semantics=("parallel", "parallel", "arbitrary"),
            vmem_limit_bytes=vmem_limit,
        ),
        cost_estimate=pl.CostEstimate(
            flops=2 * p * p * p,
            transcendentals=0,
            bytes_accessed=(p * p * item * (p // tn)     # A re-read per j
                            + p * p * item * (p // tm)   # B re-read per i
                            + 3 * p * p * item),         # output writes
        ),
    )(xp, xp)

    if p == n:
        return out.reshape(n, 3 * n)        # contiguous, free reshape
    return out[:n, :, :n].reshape(n, 3 * n)


def mm_cat3_reference(x1: jax.Array) -> jax.Array:
    y = jnp.dot(x1, x1, preferred_element_type=jnp.float32).astype(x1.dtype)
    return jnp.concatenate([y, y, y], axis=1)


if __name__ == "__main__":
    key = jax.random.PRNGKey(0)
    k0, k1, k2 = jax.random.split(key, 3)

    # Spec-shaped input: x1 = torch.randn(5, 5)  (small-n fast path).
    x_small = jax.random.normal(k0, (5, 5), dtype=jnp.float32)
    out_small = jax.block_until_ready(mm_cat3(x_small))
    ref_small = mm_cat3_reference(x_small)
    assert out_small.shape == (5, 15), out_small.shape
    assert jnp.allclose(out_small, ref_small, atol=1e-4, rtol=1e-4), \
        "mismatch vs reference (5x5)"

    # Single-block Pallas path: 128-multiple but not 256-multiple size.
    x_mid = jax.random.normal(k1, (384, 384), dtype=jnp.float32)
    out_mid = jax.block_until_ready(mm_cat3(x_mid))
    ref_mid = mm_cat3_reference(x_mid)
    assert out_mid.shape == (384, 1152), out_mid.shape
    assert jnp.allclose(out_mid, ref_mid, atol=2e-2, rtol=2e-2), \
        "mismatch vs reference (384x384)"

    # Multi-tile (i, j, k) grid: exercises the k-axis accumulator, epilogue,
    # and the de-slabbed per-(i, j) output blocks.
    x_big = jax.random.normal(k2, (1536, 1536), dtype=jnp.float32)
    out_big = jax.block_until_ready(mm_cat3(x_big))
    ref_big = mm_cat3_reference(x_big)
    assert out_big.shape == (1536, 4608), out_big.shape
    assert jnp.allclose(out_big, ref_big, atol=5e-2, rtol=5e-2), \
        "mismatch vs reference (1536x1536)"

    print("KERNEL_OK")
</pallas_src>

<mosaic_0001>
module attributes {stable_mosaic.version = 11 : i64} {
  func.func @_mm_cat3_kernel(%arg0: i32, %arg1: i32, %arg2: i32, %arg3: memref<384x384xf32, #tpu.memory_space<vmem>>, %arg4: memref<384x384xf32, #tpu.memory_space<vmem>>, %arg5: memref<384x3x384xf32, #tpu.memory_space<vmem>>, %arg6: memref<384x384xf32, #tpu.memory_space<vmem>>) attributes {dimension_semantics = [#tpu.dimension_semantics<parallel>, #tpu.dimension_semantics<parallel>, #tpu.dimension_semantics<arbitrary>], iteration_bounds = array<i64: 1, 1, 1>, scalar_prefetch = 0 : i64, scratch_operands = 1 : i64, tpu.core_type = #tpu.core_type<tc>, window_params = [{transform_indices = @transform_0, window_bounds = array<i64: 384, 384>}, {transform_indices = @transform_1, window_bounds = array<i64: 384, 384>}, {transform_indices = @transform_2, window_bounds = array<i64: 384, 3, 384>}]} {
    %c0_i32 = arith.constant 0 : i32
    %0 = arith.cmpi eq, %arg2, %c0_i32 : i32
    %1 = arith.extui %0 : i1 to i32
    %c0_i32_0 = arith.constant 0 : i32
    %2 = arith.cmpi ne, %1, %c0_i32_0 : i32
    scf.if %2 {
      %cst_10 = arith.constant 0.000000e+00 : f32
      %12 = vector.broadcast %cst_10 : f32 to vector<384x384xf32>
      %c0_11 = arith.constant 0 : index
      %c0_12 = arith.constant 0 : index
      %13 = vector.load %arg6[%c0_11, %c0_12] : memref<384x384xf32, #tpu.memory_space<vmem>>, vector<384x384xf32>
      tpu.vector_store %arg6[%c0_11, %c0_12], %12 {strides = array<i32>} : memref<384x384xf32, #tpu.memory_space<vmem>>, vector<384x384xf32>,
    } else {
    }
    %c0 = arith.constant 0 : index
    %c0_1 = arith.constant 0 : index
    %3 = vector.load %arg6[%c0, %c0_1] : memref<384x384xf32, #tpu.memory_space<vmem>>, vector<384x384xf32>
    %c0_2 = arith.constant 0 : index
    %c0_3 = arith.constant 0 : index
    %4 = vector.load %arg3[%c0_2, %c0_3] : memref<384x384xf32, #tpu.memory_space<vmem>>, vector<384x384xf32>
    %c0_4 = arith.constant 0 : index
    %c0_5 = arith.constant 0 : index
    %5 = vector.load %arg4[%c0_4, %c0_5] : memref<384x384xf32, #tpu.memory_space<vmem>>, vector<384x384xf32>
    %cst = arith.constant dense<0.000000e+00> : vector<384x384xf32>
    %6 = tpu.matmul %4, %5, %cst {dimension_numbers = #tpu.dot_dimension_numbers<[1], [0], [0], [1], [0, 0, 1, 1], [], []>} : vector<384x384xf32>, vector<384x384xf32>, vector<384x384xf32> -> vector<384x384xf32>
    %7 = arith.addf %3, %6 : vector<384x384xf32>
    %c0_6 = arith.constant 0 : index
    %c0_7 = arith.constant 0 : index
    %8 = vector.load %arg6[%c0_6, %c0_7] : memref<384x384xf32, #tpu.memory_space<vmem>>, vector<384x384xf32>
    tpu.vector_store %arg6[%c0_6, %c0_7], %7 {strides = array<i32>} : memref<384x384xf32, #tpu.memory_space<vmem>>, vector<384x384xf32>,
    %c0_i32_8 = arith.constant 0 : i32
    %9 = arith.cmpi eq, %arg2, %c0_i32_8 : i32
    %10 = arith.extui %9 : i1 to i32
    %c0_i32_9 = arith.constant 0 : i32
    %11 = arith.cmpi ne, %10, %c0_i32_9 : i32
    scf.if %11 {
      %c0_10 = arith.constant 0 : index
      %c0_11 = arith.constant 0 : index
      %12 = vector.load %arg6[%c0_10, %c0_11] : memref<384x384xf32, #tpu.memory_space<vmem>>, vector<384x384xf32>
      %c0_12 = arith.constant 0 : index
      %c0_13 = arith.constant 0 : index
      %c0_14 = arith.constant 0 : index
      %13 = vector.load %arg5[%c0_12, %c0_13, %c0_14] : memref<384x3x384xf32, #tpu.memory_space<vmem>>, vector<384x1x384xf32>
      %14 = vector.shape_cast %13 : vector<384x1x384xf32> to vector<384x384xf32>
      %15 = vector.shape_cast %12 : vector<384x384xf32> to vector<384x1x384xf32>
      tpu.vector_store %arg5[%c0_12, %c0_13, %c0_14], %15 {strides = array<i32>} : memref<384x3x384xf32, #tpu.memory_space<vmem>>, vector<384x1x384xf32>,
      %c0_15 = arith.constant 0 : index
      %c1 = arith.constant 1 : index
      %c0_16 = arith.constant 0 : index
      %16 = vector.load %arg5[%c0_15, %c1, %c0_16] : memref<384x3x384xf32, #tpu.memory_space<vmem>>, vector<384x1x384xf32>
      %17 = vector.shape_cast %16 : vector<384x1x384xf32> to vector<384x384xf32>
      %18 = vector.shape_cast %12 : vector<384x384xf32> to vector<384x1x384xf32>
      tpu.vector_store %arg5[%c0_15, %c1, %c0_16], %18 {strides = array<i32>} : memref<384x3x384xf32, #tpu.memory_space<vmem>>, vector<384x1x384xf32>,
      %c0_17 = arith.constant 0 : index
      %c2 = arith.constant 2 : index
      %c0_18 = arith.constant 0 : index
      %19 = vector.load %arg5[%c0_17, %c2, %c0_18] : memref<384x3x384xf32, #tpu.memory_space<vmem>>, vector<384x1x384xf32>
      %20 = vector.shape_cast %19 : vector<384x1x384xf32> to vector<384x384xf32>
      %21 = vector.shape_cast %12 : vector<384x384xf32> to vector<384x1x384xf32>
      tpu.vector_store %arg5[%c0_17, %c2, %c0_18], %21 {strides = array<i32>} : memref<384x3x384xf32, #tpu.memory_space<vmem>>, vector<384x1x384xf32>,
    } else {
    }
    return
  }
  func.func @transform_0(%arg0: i32, %arg1: i32, %arg2: i32) -> (i32, i32) {
    %c0_i32 = arith.constant 0 : i32
    return %arg0, %arg2 : i32, i32
  }
  func.func @transform_1(%arg0: i32, %arg1: i32, %arg2: i32) -> (i32, i32) {
    %c0_i32 = arith.constant 0 : i32
    return %arg2, %arg1 : i32, i32
  }
  func.func @transform_2(%arg0: i32, %arg1: i32, %arg2: i32) -> (i32, i32, i32) {
    %c0_i32 = arith.constant 0 : i32
    %c0_i32_0 = arith.constant 0 : i32
    return %arg0, %c0_i32, %arg1 : i32, i32, i32
  }
}

</mosaic_0001>

<bundles_post_ra>
// kernel: tpu_custom_call.1
= control target key start
LH: loop header
LB: loop body
LE: loop exit
PB: predicated region body
PF: predicated region fallthrough
CT: control target
= control target key end

     0   :  { %7 = vsyncpa [#allocation4], 0  ;;  %s17909_s0 = inlined_call_operand.hbm [shape: f32[384,384], index: 0, kind: input, shape index: {}]   ;;  %s17910_s1 = inlined_call_operand.hbm [shape: f32[384,384], index: 1, kind: input, shape index: {}]   ;;  %s17911_s2 = inlined_call_operand.vmem [shape: f32[384,3,384], index: 2, kind: output, shape index: {}]  }
   0x1   :  { %8 = vsyncpa [#allocation6], 0  ;;  %s10105_s9 = smov [#allocation3]   ;;  %s10057_s13 = scalar_lea.hbm %s17909_s0, 18432 }
   0x2   :  { %s14_s10 = sshll.u32 %s10105_s9, 4  ;;  %p10058_p0 = scmp.ne.s32.totalorder %s17909_s0, %s10057_s13  ;;  %s15_s10 = int_to_ptr.vmem [resolvable:$true] %s14_s10 }
   0x3   :  { %p10061_p1 = scmp.lt.u32.totalorder %s10057_s13, %s17909_s0 }
   0x5   :  { %p10063_p2 = pnand %p10061_p1, %p10058_p0 }
   0x7   :  { %10066 = shalt.err (!%p10063_p2)
}
   0x8   :  { %s10067_s18 = scalar_lea.vmem %s15_s10, 18432  ;;  %p10072_p4 = scmp.lt.s32.totalorder %s15_s10, %s15_s10 }
   0x9   :  { %p10068_p3 = scmp.ne.s32.totalorder %s15_s10, %s10067_s18  ;;  %p10073_p5 = scmp.lt.s32.totalorder %s10067_s18, %s10067_s18 }
   0xb   :  { %p10074_p6 = por %p10073_p5, %p10072_p4 }
   0xd   :  { %p10075_p7 = pnand %p10074_p6, %p10068_p3 }
   0xf   :  { %10078 = shalt.err (!%p10075_p7)
}
  0x10   :  { %s10106_s19 = smov 384   ;;  %s10107_s20 = smov 24  }
  0x11   :  { %20 = dma.hbm_to_vmem [thread:$0]  %s17909_s0, 18432, %s15_s10, [#allocation4], %s10106_s19, %s10106_s19, %s10107_s20  }
  0x12   :  { %s10108_s23 = smov [#allocation5]   ;;  %s10079_s27 = scalar_lea.hbm %s17910_s1, 18432 }
  0x13   :  { %s26_s24 = sshll.u32 %s10108_s23, 4  ;;  %p10080_p8 = scmp.ne.s32.totalorder %s17910_s1, %s10079_s27  ;;  %s27_s24 = int_to_ptr.vmem [resolvable:$true] %s26_s24 }
  0x14   :  { %p10083_p9 = scmp.lt.u32.totalorder %s10079_s27, %s17910_s1 }
  0x16   :  { %p10085_p10 = pnand %p10083_p9, %p10080_p8 }
  0x18   :  { %10088 = shalt.err (!%p10085_p10)
}
  0x19   :  { %s10089_s4 = scalar_lea.vmem %s27_s24, 18432  ;;  %p10094_p12 = scmp.lt.s32.totalorder %s27_s24, %s27_s24 }
  0x1a   :  { %p10090_p11 = scmp.ne.s32.totalorder %s27_s24, %s10089_s4  ;;  %p10095_p13 = scmp.lt.s32.totalorder %s10089_s4, %s10089_s4 }
  0x1c   :  { %p10096_p0 = por %p10095_p13, %p10094_p12 }
  0x1e   :  { %p10097_p1 = pnand %p10096_p0, %p10090_p11 }
  0x20   :  { %10100 = shalt.err (!%p10097_p1)
}
  0x21   :  { %32 = dma.hbm_to_vmem [thread:$0]  %s17910_s1, 18432, %s27_s24, [#allocation6], %s10106_s19, %s10106_s19, %s10107_s20  }
  0x22   :  { %10101 = dma.done.wait [#allocation4], 18432  }
  0x23   :  { %10102 = vsyncadd [#allocation4], 4294948864 }
  0x24   :  { %10103 = dma.done.wait [#allocation6], 18432  }
  0x25   :  { %10104 = vsyncadd [#allocation6], 4294948864  ;;  %v10109_v0 = vmov 0.0   ;;  %v476_v1 = vld [vmem:[#allocation5 + $0x8] sm:$0xff]  ;;  %v479_v2 = vld [vmem:[#allocation5 + $0x20] sm:$0xff] }
  0x26   :  { %1228 = vmatprep.mubr.f32.mxu1 %v10109_v0  ;;  %v572_v3 = vld [vmem:[#allocation5 + $0x308] sm:$0xff]  ;;  %v9746_v4 = vpack.c.bf16 %v479_v2, %v476_v1  ;;  %v575_v5 = vld [vmem:[#allocation5 + $0x320] sm:$0xff]  ;;  %v478_v7 = vld [vmem:[#allocation5 + $0x18] sm:$0xff] }
  0x27   :  { %v475_v6 = vld [vmem:[#allocation5] sm:$0xff]  ;;  %v10152_v8 = vpack.c.bf16 %v575_v5, %v572_v3  ;;  %v574_v11 = vld [vmem:[#allocation5 + $0x318] sm:$0xff]  ;;  %v485_v14 = vld [vmem:[#allocation5 + $0x50] sm:$0xff] }
  0x28   :  { %v9748_v9 = vpack.c.bf16 %v478_v7, %v475_v6  ;;  %v571_v10 = vld [vmem:[#allocation5 + $0x300] sm:$0xff]  ;;  %v482_v12 = vld [vmem:[#allocation5 + $0x38] sm:$0xff]  ;;  %9747 = vmatprep.subr.bf16.mxu0 %v9746_v4  ;;  %v581_v16 = vld [vmem:[#allocation5 + $0x350] sm:$0xff] }
  0x29   :  { %v10154_v13 = vpack.c.bf16 %v574_v11, %v571_v10  ;;  %v578_v15 = vld [vmem:[#allocation5 + $0x338] sm:$0xff]  ;;  %9922 = vmatprep.subr.bf16.mxu1 %v10152_v8  ;;  %v9750_v17 = vpack.c.bf16 %v485_v14, %v482_v12  ;;  %v481_v19 = vld [vmem:[#allocation5 + $0x30] sm:$0xff]  ;;  %v484_v20 = vld [vmem:[#allocation5 + $0x48] sm:$0xff] }
  0x2a   :  { %9749 = vmatpush1.bf16.msra.mxu0 %v9748_v9  ;;  %v10157_v18 = vpack.c.bf16 %v581_v16, %v578_v15  ;;  %v577_v21 = vld [vmem:[#allocation5 + $0x330] sm:$0xff]  ;;  %v9752_v22 = vpack.c.bf16 %v484_v20, %v481_v19  ;;  %v580_v23 = vld [vmem:[#allocation5 + $0x348] sm:$0xff]  ;;  %v491_v25 = vld [vmem:[#allocation5 + $0x80] sm:$0xff] }
  0x2b   :  { %9930 = vmatpush1.bf16.msra.mxu1 %v10154_v13  ;;  %v488_v24 = vld [vmem:[#allocation5 + $0x68] sm:$0xff]  ;;  %9751 = vmatprep.subr.bf16.mxu0 %v9750_v17  ;;  %v10161_v26 = vpack.c.bf16 %v580_v23, %v577_v21  ;;  %v587_v29 = vld [vmem:[#allocation5 + $0x380] sm:$0xff]  ;;  %v490_v32 = vld [vmem:[#allocation5 + $0x78] sm:$0xff] }
  0x2c   :  { %9923 = vmatprep.subr.bf16.mxu1 %v10157_v18  ;;  %v9754_v27 = vpack.c.bf16 %v491_v25, %v488_v24  ;;  %v584_v28 = vld [vmem:[#allocation5 + $0x368] sm:$0xff]  ;;  %v487_v30 = vld [vmem:[#allocation5 + $0x60] sm:$0xff]  ;;  %v586_v34 = vld [vmem:[#allocation5 + $0x378] sm:$0xff] }
  0x2d   :  { %v10163_v31 = vpack.c.bf16 %v587_v29, %v584_v28  ;;  %v583_v33 = vld [vmem:[#allocation5 + $0x360] sm:$0xff]  ;;  %v9756_v35 = vpack.c.bf16 %v490_v32, %v487_v30  ;;  %v494_v36 = vld [vmem:[#allocation5 + $0x98] sm:$0xff]  ;;  %v497_v37 = vld [vmem:[#allocation5 + $0xb0] sm:$0xff] }
  0x2e   :  { %9753 = vmatpush1.bf16.msra.mxu0 %v9752_v22  ;;  %v590_v38 = vld [vmem:[#allocation5 + $0x398] sm:$0xff]  ;;  %v10166_v39 = vpack.c.bf16 %v586_v34, %v583_v33  ;;  %v9758_v40 = vpack.c.bf16 %v497_v37, %v494_v36  ;;  %v593_v41 = vld [vmem:[#allocation5 + $0x3b0] sm:$0xff]  ;;  %v496_v43 = vld [vmem:[#allocation5 + $0xa8] sm:$0xff] }
  0x2f   :  { %9931 = vmatpush1.bf16.msra.mxu1 %v10161_v26  ;;  %9755 = vmatprep.subr.bf16.mxu0 %v9754_v27  ;;  %v493_v42 = vld [vmem:[#allocation5 + $0x90] sm:$0xff]  ;;  %v10169_v44 = vpack.c.bf16 %v593_v41, %v590_v38  ;;  %v592_v46 = vld [vmem:[#allocation5 + $0x3a8] sm:$0xff]  ;;  %v503_v48 = vld [vmem:[#allocation5 + $0xe0] sm:$0xff] }
  0x30   :  { %9924 = vmatprep.subr.bf16.mxu1 %v10163_v31  ;;  %v589_v45 = vld [vmem:[#allocation5 + $0x390] sm:$0xff]  ;;  %v500_v47 = vld [vmem:[#allocation5 + $0xc8] sm:$0xff]  ;;  %v599_v50 = vld [vmem:[#allocation5 + $0x3e0] sm:$0xff]  ;;  %v9760_v51 = vpack.c.bf16 %v496_v43, %v493_v42 }
  0x31   :  { %v596_v49 = vld [vmem:[#allocation5 + $0x3c8] sm:$0xff]  ;;  %v10172_v52 = vpack.c.bf16 %v592_v46, %v589_v45  ;;  %v9762_v53 = vpack.c.bf16 %v503_v48, %v500_v47  ;;  %v499_v54 = vld [vmem:[#allocation5 + $0xc0] sm:$0xff]  ;;  %v502_v55 = vld [vmem:[#allocation5 + $0xd8] sm:$0xff] }
  0x32   :  { %9757 = vmatpush1.bf16.msra.mxu0 %v9756_v35  ;;  %v595_v56 = vld [vmem:[#allocation5 + $0x3c0] sm:$0xff]  ;;  %v10175_v57 = vpack.c.bf16 %v599_v50, %v596_v49  ;;  %v598_v58 = vld [vmem:[#allocation5 + $0x3d8] sm:$0xff]  ;;  %v509_v60 = vld [vmem:[#allocation5 + $0x110] sm:$0xff]  ;;  %v9764_v63 = vpack.c.bf16 %v502_v55, %v499_v54 }
  0x33   :  { %9932 = vmatpush1.bf16.msra.mxu1 %v10166_v39  ;;  %9759 = vmatprep.subr.bf16.mxu0 %v9758_v40  ;;  %v506_v59 = vld [vmem:[#allocation5 + $0xf8] sm:$0xff]  ;;  %v605_v62 = vld [vmem:[#allocation5 + $0x410] sm:$0xff]  ;;  %v10178_v1 = vpack.c.bf16 %v598_v58, %v595_v56  ;;  %v508_v4 = vld [vmem:[#allocation5 + $0x108] sm:$0xff]  ;;  %v10110_v56 = vmov 0.0|0.0  }
  0x34   :  { %9925 = vmatprep.subr.bf16.mxu1 %v10169_v44  ;;  %v602_v61 = vld [vmem:[#allocation5 + $0x3f8] sm:$0xff]  ;;  %v9766_v2 = vpack.c.bf16 %v509_v60, %v506_v59  ;;  %v505_v3 = vld [vmem:[#allocation5 + $0xf0] sm:$0xff]  ;;  %v604_v7 = vld [vmem:[#allocation5 + $0x408] sm:$0xff] }
  0x35   :  { %v601_v5 = vld [vmem:[#allocation5 + $0x3f0] sm:$0xff]  ;;  %v10181_v6 = vpack.c.bf16 %v605_v62, %v602_v61  ;;  %v512_v9 = vld [vmem:[#allocation5 + $0x128] sm:$0xff]  ;;  %v515_v10 = vld [vmem:[#allocation5 + $0x140] sm:$0xff]  ;;  %v9768_v14 = vpack.c.bf16 %v508_v4, %v505_v3 }
  0x36   :  { %9761 = vmatpush1.bf16.msra.mxu0 %v9760_v51  ;;  %v608_v11 = vld [vmem:[#allocation5 + $0x428] sm:$0xff]  ;;  %v611_v12 = vld [vmem:[#allocation5 + $0x440] sm:$0xff]  ;;  %v10184_v15 = vpack.c.bf16 %v604_v7, %v601_v5  ;;  %v9770_v16 = vpack.c.bf16 %v515_v10, %v512_v9  ;;  %v514_v19 = vld [vmem:[#allocation5 + $0x138] sm:$0xff] }
  0x37   :  { %9933 = vmatpush1.bf16.msra.mxu1 %v10172_v52  ;;  %9763 = vmatprep.subr.bf16.mxu0 %v9762_v53  ;;  %v511_v17 = vld [vmem:[#allocation5 + $0x120] sm:$0xff]  ;;  %v10187_v21 = vpack.c.bf16 %v611_v12, %v608_v11  ;;  %v610_v22 = vld [vmem:[#allocation5 + $0x438] sm:$0xff]  ;;  %v521_v24 = vld [vmem:[#allocation5 + $0x170] sm:$0xff] }
  0x38   :  { %9926 = vmatprep.subr.bf16.mxu1 %v10175_v57  ;;  %v607_v20 = vld [vmem:[#allocation5 + $0x420] sm:$0xff]  ;;  %v518_v23 = vld [vmem:[#allocation5 + $0x158] sm:$0xff]  ;;  %v617_v27 = vld [vmem:[#allocation5 + $0x470] sm:$0xff]  ;;  %v9772_v28 = vpack.c.bf16 %v514_v19, %v511_v17 }
  0x39   :  { %v614_v25 = vld [vmem:[#allocation5 + $0x458] sm:$0xff]  ;;  %v10190_v29 = vpack.c.bf16 %v610_v22, %v607_v20  ;;  %v9774_v30 = vpack.c.bf16 %v521_v24, %v518_v23  ;;  %v517_v32 = vld [vmem:[#allocation5 + $0x150] sm:$0xff]  ;;  %v520_v33 = vld [vmem:[#allocation5 + $0x168] sm:$0xff] }
  0x3a   :  { %9765 = vmatpush1.bf16.msra.mxu0 %v9764_v63  ;;  %v613_v34 = vld [vmem:[#allocation5 + $0x450] sm:$0xff]  ;;  %v10193_v35 = vpack.c.bf16 %v617_v27, %v614_v25  ;;  %v616_v36 = vld [vmem:[#allocation5 + $0x468] sm:$0xff]  ;;  %v527_v38 = vld [vmem:[#allocation5 + $0x1a0] sm:$0xff]  ;;  %v9776_v40 = vpack.c.bf16 %v520_v33, %v517_v32 }
  0x3b   :  { %9934 = vmatpush1.bf16.msra.mxu1 %v10178_v1  ;;  %9767 = vmatprep.subr.bf16.mxu0 %v9766_v2  ;;  %v524_v37 = vld [vmem:[#allocation5 + $0x188] sm:$0xff]  ;;  %v10196_v41 = vpack.c.bf16 %v616_v36, %v613_v34  ;;  %v523_v43 = vld [vmem:[#allocation5 + $0x180] sm:$0xff]  ;;  %v526_v45 = vld [vmem:[#allocation5 + $0x198] sm:$0xff] }
  0x3c   :  { %9927 = vmatprep.subr.bf16.mxu1 %v10181_v6  ;;  %v9778_v42 = vpack.c.bf16 %v527_v38, %v524_v37  ;;  %v477_v46 = vld [vmem:[#allocation5 + $0x10] sm:$0xff]  ;;  %v480_v47 = vld [vmem:[#allocation5 + $0x28] sm:$0xff]  ;;  %v530_v48 = vld [vmem:[#allocation5 + $0x1b8] sm:$0xff]  ;;  %v9780_v50 = vpack.c.bf16 %v526_v45, %v523_v43 }
  0x3d   :  { %v533_v49 = vld [vmem:[#allocation5 + $0x1d0] sm:$0xff]  ;;  %v9843_v53 = vpack.c.bf16 %v480_v47, %v477_v46  ;;  %v532_v55 = vld [vmem:[#allocation5 + $0x1c8] sm:$0xff]  ;;  %v483_v59 = vld [vmem:[#allocation5 + $0x40] sm:$0xff] }
  0x3e   :  { %9769 = vmatpush1.bf16.msra.mxu0 %v9768_v14  ;;  %v429_v51 = vld [vmem:[#allocation3 + $0x310] sm:$0xff]  ;;  %v9782_v58 = vpack.c.bf16 %v533_v49, %v530_v48  ;;  %v486_v60 = vld [vmem:[#allocation5 + $0x58] sm:$0xff]  ;;  %v536_v61 = vld [vmem:[#allocation5 + $0x1e8] sm:$0xff] }
  0x3f   :  { %9935 = vmatpush1.bf16.msra.mxu1 %v10184_v15  ;;  %9771 = vmatprep.subr.bf16.mxu0 %v9770_v16  ;;  %v529_v54 = vld [vmem:[#allocation5 + $0x1b0] sm:$0xff]  ;;  %v539_v62 = vld [vmem:[#allocation5 + $0x200] sm:$0xff]  ;;  %v432_v2 = vld [vmem:[#allocation3 + $0x328] sm:$0xff]  ;;  %v9846_v3 = vpack.c.bf16 %v486_v60, %v483_v59 }
  0x40   :  { %9928 = vmatprep.subr.bf16.mxu1 %v10187_v21  ;;  %v9784_v63 = vpack.c.bf16 %v532_v55, %v529_v54  ;;  %v535_v4 = vld [vmem:[#allocation5 + $0x1e0] sm:$0xff]  ;;  %v538_v5 = vld [vmem:[#allocation5 + $0x1f8] sm:$0xff]  ;;  %v9786_v7 = vpack.c.bf16 %v539_v62, %v536_v61  ;;  %v489_v9 = vld [vmem:[#allocation5 + $0x70] sm:$0xff] }
  0x41   :  { %v492_v10 = vld [vmem:[#allocation5 + $0x88] sm:$0xff]  ;;  %v542_v11 = vld [vmem:[#allocation5 + $0x218] sm:$0xff]  ;;  %v545_v12 = vld [vmem:[#allocation5 + $0x230] sm:$0xff]  ;;  %v9788_v14 = vpack.c.bf16 %v538_v5, %v535_v4 }
  0x42   :  { %9773 = vmatpush1.bf16.msra.mxu0 %v9772_v28  ;;  %v10203_v16 = vld [vmem:[#allocation3 + $0x8] sm:$0xff]  ;;  %v435_v17 = vld [vmem:[#allocation3 + $0x340] sm:$0xff]  ;;  %v9849_v19 = vpack.c.bf16 %v492_v10, %v489_v9  ;;  %v541_v20 = vld [vmem:[#allocation5 + $0x210] sm:$0xff]  ;;  %v9790_v23 = vpack.c.bf16 %v545_v12, %v542_v11 }
  0x43   :  { %9936 = vmatpush1.bf16.msra.mxu1 %v10190_v29  ;;  %9775 = vmatprep.subr.bf16.mxu0 %v9774_v30  ;;  %v544_v22 = vld [vmem:[#allocation5 + $0x228] sm:$0xff]  ;;  %v495_v24 = vld [vmem:[#allocation5 + $0xa0] sm:$0xff]  ;;  %v498_v25 = vld [vmem:[#allocation5 + $0xb8] sm:$0xff] }
  0x44   :  { %9929 = vmatprep.subr.bf16.mxu1 %v10193_v35  ;;  %v548_v27 = vld [vmem:[#allocation5 + $0x248] sm:$0xff]  ;;  %v551_v28 = vld [vmem:[#allocation5 + $0x260] sm:$0xff]  ;;  %683 = vmatprep.mubr.f32.mxu0 %v10203_v16  ;;  %v9792_v30 = vpack.c.bf16 %v544_v22, %v541_v20  ;;  %v438_v32 = vld [vmem:[#allocation3 + $0x358] sm:$0xff]  ;;  %v9852_v33 = vpack.c.bf16 %v498_v25, %v495_v24 }
  0x45   :  { %v547_v34 = vld [vmem:[#allocation5 + $0x240] sm:$0xff]  ;;  %v550_v36 = vld [vmem:[#allocation5 + $0x258] sm:$0xff]  ;;  %v9794_v37 = vpack.c.bf16 %v551_v28, %v548_v27  ;;  %v501_v38 = vld [vmem:[#allocation5 + $0xd0] sm:$0xff] }
  0x46   :  { %9777 = vmatpush1.bf16.msra.mxu0 %v9776_v40  ;;  %v504_v40 = vld [vmem:[#allocation5 + $0xe8] sm:$0xff]  ;;  %v557_v43 = vld [vmem:[#allocation5 + $0x290] sm:$0xff]  ;;  %v9796_v45 = vpack.c.bf16 %v550_v36, %v547_v34  ;;  %v563_v55 = vld [vmem:[#allocation5 + $0x2c0] sm:$0xff] }
  0x47   :  { %9937 = vmatpush1.bf16.msra.mxu1 %v10196_v41  ;;  %9779 = vmatprep.subr.bf16.mxu0 %v9778_v42  ;;  %v554_v42 = vld [vmem:[#allocation5 + $0x278] sm:$0xff]  ;;  %v441_v46 = vld [vmem:[#allocation3 + $0x370] sm:$0xff]  ;;  %v9855_v47 = vpack.c.bf16 %v504_v40, %v501_v38  ;;  %v556_v49 = vld [vmem:[#allocation5 + $0x288] sm:$0xff] }
  0x48   :  { %9842 = vmatprep.subr.bf16.mxu1 %v10110_v56  ;;  %v553_v48 = vld [vmem:[#allocation5 + $0x270] sm:$0xff]  ;;  %v560_v54 = vld [vmem:[#allocation5 + $0x2a8] sm:$0xff]  ;;  %v559_v61 = vld [vmem:[#allocation5 + $0x2a0] sm:$0xff] }
  0x49   :  { %v444_v59 = vld [vmem:[#allocation3 + $0x388] sm:$0xff]  ;;  %v562_v62 = vld [vmem:[#allocation5 + $0x2b8] sm:$0xff]  ;;  %v569_v5 = vld [vmem:[#allocation5 + $0x2f0] sm:$0xff] }
  0x4a   :  { %1229 = vmatmul.mubr.f32.vlgmr.msra.gmra.mrb[0].mxu1 %v429_v51  ;;  %9781 = vmatpush1.bf16.msra.mxu0 %v9780_v50  ;;  %v9798_v50 = vpack.c.bf16 %v557_v43, %v554_v42  ;;  %v507_v51 = vld [vmem:[#allocation5 + $0x100] sm:$0xff]  ;;  %v566_v4 = vld [vmem:[#allocation5 + $0x2d8] sm:$0xff]  ;;  %v565_v11 = vld [vmem:[#allocation5 + $0x2d0] sm:$0xff] }
  0x4b   :  { %9844 = vmatpush1.bf16.msra.mxu1 %v9843_v53  ;;  %1234 = vmatprep.mubr.f32.mxu1 %v10109_v0  ;;  %v510_v53 = vld [vmem:[#allocation5 + $0x118] sm:$0xff]  ;;  %v447_v9 = vld [vmem:[#allocation3 + $0x3a0] sm:$0xff]  ;;  %v568_v12 = vld [vmem:[#allocation5 + $0x2e8] sm:$0xff] }
  0x4c   :  { %9783 = vmatprep.subr.bf16.mxu0 %v9782_v58  ;;  %9845 = vmatprep.subr.bf16.mxu1 %v10110_v56  ;;  %v9800_v58 = vpack.c.bf16 %v556_v49, %v553_v48  ;;  %v9858_v60 = vpack.c.bf16 %v510_v53, %v507_v51  ;;  %v9808_v20 = vpack.c.bf16 %v568_v12, %v565_v11  ;;  %v450_v22 = vld [vmem:[#allocation3 + $0x3b8] sm:$0xff]  ;;  %v525_v24 = vld [vmem:[#allocation5 + $0x190] sm:$0xff]  ;;  %v528_v25 = vld [vmem:[#allocation5 + $0x1a8] sm:$0xff] }
  0x4d   :  { %v10218_v27 = vld [vmem:[#allocation3] sm:$0xff]  ;;  %v453_v28 = vld [vmem:[#allocation3 + $0x3d0] sm:$0xff]  ;;  %v534_v34 = vld [vmem:[#allocation5 + $0x1d8] sm:$0xff] }
  0x4e   :  { %1235 = vmatmul.mubr.f32.gmra.mrb[2].mxu1 %v432_v2  ;;  %9785 = vmatpush1.bf16.msra.mxu0 %v9784_v63  ;;  %v9802_v63 = vpack.c.bf16 %v563_v55, %v560_v54  ;;  %v513_v2 = vld [vmem:[#allocation5 + $0x130] sm:$0xff]  ;;  %v10227_v36 = vld [vmem:[#allocation3 + $0x18] sm:$0xff]  ;;  %v540_v42 = vld [vmem:[#allocation5 + $0x208] sm:$0xff] }
  0x4f   :  { %9847 = vmatpush1.bf16.msra.mxu1 %v9846_v3  ;;  %1240 = vmatprep.mubr.f32.mxu1 %v10109_v0  ;;  %v516_v3 = vld [vmem:[#allocation5 + $0x148] sm:$0xff]  ;;  %v10230_v40 = vld [vmem:[#allocation3 + $0x38] sm:$0xff]  ;;  %v10237_v43 = vld [vmem:[#allocation3 + $0x30] sm:$0xff] }
  0x50   :  { %9787 = vmatprep.subr.bf16.mxu0 %v9786_v7  ;;  %9848 = vmatprep.subr.bf16.mxu1 %v10110_v56  ;;  %v9804_v7 = vpack.c.bf16 %v562_v62, %v559_v61  ;;  %v9861_v10 = vpack.c.bf16 %v516_v3, %v513_v2  ;;  %v546_v48 = vld [vmem:[#allocation5 + $0x238] sm:$0xff]  ;;  %v10250_v51 = vld [vmem:[#allocation3 + $0x68] sm:$0xff]  ;;  %v549_v53 = vld [vmem:[#allocation5 + $0x250] sm:$0xff] }
  0x51   :  { %v462_v49 = vld [vmem:[#allocation3 + $0x418] sm:$0xff]  ;;  %v465_v54 = vld [vmem:[#allocation3 + $0x430] sm:$0xff]  ;;  %v471_v2 = vld [vmem:[#allocation3 + $0x460] sm:$0xff] }
  0x52   :  { %1241 = vmatmul.mubr.f32.gmra.mrb[4].mxu1 %v435_v17  ;;  %9789 = vmatpush1.bf16.msra.mxu0 %v9788_v14  ;;  %v9806_v14 = vpack.c.bf16 %v569_v5, %v566_v4  ;;  %v519_v17 = vld [vmem:[#allocation5 + $0x160] sm:$0xff]  ;;  %v10270_v62 = vld [vmem:[#allocation3 + $0x98] sm:$0xff]  ;;  %v10280_v4 = vld [vmem:[#allocation3 + $0xb0] sm:$0xff] }
  0x53   :  { %9850 = vmatpush1.bf16.msra.mxu1 %v9849_v19  ;;  %1246 = vmatprep.mubr.f32.mxu1 %v10109_v0  ;;  %v522_v19 = vld [vmem:[#allocation5 + $0x178] sm:$0xff]  ;;  %v567_v5 = vld [vmem:[#allocation5 + $0x2e0] sm:$0xff]  ;;  %v10290_v12 = vld [vmem:[#allocation3 + $0xc8] sm:$0xff] }
  0x54   :  { %9791 = vmatprep.subr.bf16.mxu0 %v9790_v23  ;;  %9851 = vmatprep.subr.bf16.mxu1 %v10110_v56  ;;  %v9864_v23 = vpack.c.bf16 %v522_v19, %v519_v17  ;;  %v10297_v17 = vld [vmem:[#allocation3 + $0xc0] sm:$0xff] }
  0x55   :  { %v10300_v19 = vld [vmem:[#allocation3 + $0xe0] sm:$0xff] }
  0x56   :  { %1247 = vmatmul.mubr.f32.gmra.mrb[6].mxu1 %v438_v32  ;;  %9793 = vmatpush1.bf16.msra.mxu0 %v9792_v30  ;;  %v9867_v30 = vpack.c.bf16 %v528_v25, %v525_v24  ;;  %v10221_v32 = vld [vmem:[#allocation3 + $0x20] sm:$0xff]  ;;  %v10314_v24 = vld [vmem:[#allocation3 + $0xf0] sm:$0xff] }
  0x57   :  { %9853 = vmatpush1.bf16.msra.mxu1 %v9852_v33  ;;  %1252 = vmatprep.mubr.f32.mxu1 %v10109_v0  ;;  %v531_v33 = vld [vmem:[#allocation5 + $0x1c0] sm:$0xff]  ;;  %v10317_v25 = vld [vmem:[#allocation3 + $0x110] sm:$0xff] }
  0x58   :  { %9795 = vmatprep.subr.bf16.mxu0 %v9794_v37  ;;  %9854 = vmatprep.subr.bf16.mxu1 %v10110_v56  ;;  %v456_v37 = vld [vmem:[#allocation3 + $0x3e8] sm:$0xff]  ;;  %v9870_v38 = vpack.c.bf16 %v534_v34, %v531_v33 }
  0x59   :  { %v10325_v33 = vld [vmem:[#allocation3 + $0x128] sm:$0xff] }
  0x5a   :  { %1253 = vmatmul.mubr.f32.gmra.mrb[8].mxu1 %v441_v46  ;;  %9797 = vmatpush1.bf16.msra.mxu0 %v9796_v45  ;;  %v10240_v46 = vld [vmem:[#allocation3 + $0x50] sm:$0xff] }
  0x5b   :  { %9856 = vmatpush1.bf16.msra.mxu1 %v9855_v47  ;;  %1258 = vmatprep.mubr.f32.mxu1 %v10109_v0  ;;  %v543_v47 = vld [vmem:[#allocation5 + $0x220] sm:$0xff] }
  0x5c   :  { %9799 = vmatprep.subr.bf16.mxu0 %v9798_v50  ;;  %9857 = vmatprep.subr.bf16.mxu1 %v10110_v56  ;;  %v9876_v50 = vpack.c.bf16 %v546_v48, %v543_v47  ;;  %v373_v47 = vld [vmem:[#allocation3 + $0x150] sm:$0xff] }
  0x5d   :  { %v377_v48 = vld [vmem:[#allocation3 + $0x170] sm:$0xff] }
  0x5e   :  { %1259 = vmatmul.mubr.f32.gmra.mrb[10].mxu1 %v444_v59  ;;  %9801 = vmatpush1.bf16.msra.mxu0 %v9800_v58  ;;  %v10260_v58 = vld [vmem:[#allocation3 + $0x80] sm:$0xff] }
  0x5f   :  { %9859 = vmatpush1.bf16.msra.mxu1 %v9858_v60  ;;  %1264 = vmatprep.mubr.f32.mxu1 %v10109_v0  ;;  %v555_v59 = vld [vmem:[#allocation5 + $0x280] sm:$0xff]  ;;  %v468_v60 = vld [vmem:[#allocation3 + $0x448] sm:$0xff] }
  0x60   :  { %9803 = vmatprep.subr.bf16.mxu0 %v9802_v63  ;;  %9860 = vmatprep.subr.bf16.mxu1 %v10110_v56  ;;  %v561_v63 = vld [vmem:[#allocation5 + $0x2b0] sm:$0xff] }
  0x62   :  { %1265 = vmatmul.mubr.f32.gmra.mrb[12].mxu1 %v447_v9  ;;  %9805 = vmatpush1.bf16.msra.mxu0 %v9804_v7  ;;  %v576_v7 = vld [vmem:[#allocation5 + $0x328] sm:$0xff] }
  0x63   :  { %9862 = vmatpush1.bf16.msra.mxu1 %v9861_v10  ;;  %1270 = vmatprep.mubr.f32.mxu1 %v10109_v0  ;;  %v10287_v9 = vld [vmem:[#allocation3 + $0xa8] sm:$0xff]  ;;  %v474_v10 = vld [vmem:[#allocation3 + $0x478] sm:$0xff] }
  0x64   :  { %9807 = vmatprep.subr.bf16.mxu0 %v9806_v14  ;;  %9863 = vmatprep.subr.bf16.mxu1 %v10110_v56  ;;  %v582_v14 = vld [vmem:[#allocation5 + $0x358] sm:$0xff] }
  0x66   :  { %1271 = vmatmul.mubr.f32.gmra.mrb[14].mxu1 %v450_v22  ;;  %9809 = vmatpush1.bf16.msra.mxu0 %v9808_v20  ;;  %v588_v20 = vld [vmem:[#allocation5 + $0x388] sm:$0xff] }
  0x67   :  { %9865 = vmatpush1.bf16.msra.mxu1 %v9864_v23  ;;  %1276 = vmatprep.mubr.f32.mxu1 %v10109_v0  ;;  %v594_v23 = vld [vmem:[#allocation5 + $0x3b8] sm:$0xff] }
  0x68   :  { %9866 = vmatprep.subr.bf16.mxu1 %v10110_v56  ;;  %9811 = vmatprep.subr.bf16.mxu0 %v10152_v8  ;;  %v537_v8 = vld [vmem:[#allocation5 + $0x1f0] sm:$0xff] }
  0x69   :  { %684 = vmatmul.mubr.f32.vlgmr.msra.gmra.mrb[0].mxu0 %v10218_v27  ;;  %v9873_v45 = vpack.c.bf16 %v540_v42, %v537_v8  ;;  %v10338_v42 = vld [vmem:[#allocation3 + $0x138] sm:$0xff] }
  0x6a   :  { %1277 = vmatmul.mubr.f32.gmra.mrb[16].mxu1 %v453_v28  ;;  %689 = vmatprep.mubr.f32.mxu0 %v10221_v32  ;;  %v597_v28 = vld [vmem:[#allocation5 + $0x3d0] sm:$0xff] }
  0x6b   :  { %9868 = vmatpush1.bf16.msra.mxu1 %v9867_v30  ;;  %9813 = vmatpush1.bf16.msra.mxu0 %v10154_v13  ;;  %v459_v13 = vld [vmem:[#allocation3 + $0x400] sm:$0xff]  ;;  %v600_v30 = vld [vmem:[#allocation5 + $0x3e8] sm:$0xff] }
  0x6c   :  { %1282 = vmatprep.mubr.f32.mxu1 %v10109_v0  ;;  %9869 = vmatprep.subr.bf16.mxu1 %v10110_v56  ;;  %v9906_v34 = vpack.c.bf16 %v600_v30, %v597_v28  ;;  %v443_v28 = vld [vmem:[#allocation3 + $0x380] sm:$0xff]  ;;  %v442_v30 = vld [vmem:[#allocation3 + $0x378] sm:$0xff] }
  0x6d   :  { %690 = vmatmul.mubr.f32.gmra.mrb[2].mxu0 %v10227_v36  ;;  %9815 = vmatprep.subr.bf16.mxu0 %v10157_v18  ;;  %v10247_v18 = vld [vmem:[#allocation3 + $0x48] sm:$0xff] }
  0x6e   :  { %1283 = vmatmul.mubr.f32.gmra.mrb[18].mxu1 %v456_v37  ;;  %695 = vmatprep.mubr.f32.mxu0 %v10230_v40  ;;  %v606_v37 = vld [vmem:[#allocation5 + $0x418] sm:$0xff] }
  0x6f   :  { %9871 = vmatpush1.bf16.msra.mxu1 %v9870_v38  ;;  %1288 = vmatprep.mubr.f32.mxu1 %v10109_v0  ;;  %v10330_v38 = vld [vmem:[#allocation3 + $0x120] sm:$0xff] }
  0x70   :  { %9872 = vmatprep.subr.bf16.mxu1 %v10110_v56  ;;  %9817 = vmatpush1.bf16.msra.mxu0 %v10161_v26  ;;  %v552_v26 = vld [vmem:[#allocation5 + $0x268] sm:$0xff] }
  0x71   :  { %696 = vmatmul.mubr.f32.gmra.mrb[4].mxu0 %v10237_v43  ;;  %9819 = vmatprep.subr.bf16.mxu0 %v10163_v31  ;;  %v10257_v31 = vld [vmem:[#allocation3 + $0x60] sm:$0xff]  ;;  %v9879_v55 = vpack.c.bf16 %v552_v26, %v549_v53  ;;  %v382_v53 = vld [vmem:[#allocation3 + $0x198] sm:$0xff] }
  0x72   :  { %1289 = vmatmul.mubr.f32.gmra.mrb[20].mxu1 %v459_v13  ;;  %701 = vmatprep.mubr.f32.mxu0 %v10240_v46  ;;  %v612_v13 = vld [vmem:[#allocation5 + $0x448] sm:$0xff]  ;;  %v386_v26 = vld [vmem:[#allocation3 + $0x1b8] sm:$0xff] }
  0x73   :  { %9874 = vmatpush1.bf16.msra.mxu1 %v9873_v45  ;;  %1294 = vmatprep.mubr.f32.mxu1 %v10109_v0  ;;  %v10341_v45 = vld [vmem:[#allocation3 + $0x158] sm:$0xff] }
  0x74   :  { %9875 = vmatprep.subr.bf16.mxu1 %v10110_v56  ;;  %9821 = vmatpush1.bf16.msra.mxu0 %v10166_v39  ;;  %v558_v39 = vld [vmem:[#allocation5 + $0x298] sm:$0xff] }
  0x75   :  { %702 = vmatmul.mubr.f32.gmra.mrb[6].mxu0 %v10247_v18  ;;  %9823 = vmatprep.subr.bf16.mxu0 %v10169_v44  ;;  %v10267_v44 = vld [vmem:[#allocation3 + $0x78] sm:$0xff]  ;;  %v9882_v61 = vpack.c.bf16 %v558_v39, %v555_v59  ;;  %v392_v39 = vld [vmem:[#allocation3 + $0x1e8] sm:$0xff] }
  0x76   :  { %1295 = vmatmul.mubr.f32.gmra.mrb[22].mxu1 %v462_v49  ;;  %707 = vmatprep.mubr.f32.mxu0 %v10250_v51  ;;  %v380_v49 = vld [vmem:[#allocation3 + $0x188] sm:$0xff]  ;;  %v618_v59 = vld [vmem:[#allocation5 + $0x478] sm:$0xff] }
  0x77   :  { %9877 = vmatpush1.bf16.msra.mxu1 %v9876_v50  ;;  %1300 = vmatprep.mubr.f32.mxu1 %v10109_v0  ;;  %v379_v50 = vld [vmem:[#allocation3 + $0x180] sm:$0xff] }
  0x78   :  { %9878 = vmatprep.subr.bf16.mxu1 %v10110_v56  ;;  %9825 = vmatpush1.bf16.msra.mxu0 %v10172_v52  ;;  %v564_v52 = vld [vmem:[#allocation5 + $0x2c8] sm:$0xff] }
  0x79   :  { %708 = vmatmul.mubr.f32.gmra.mrb[8].mxu0 %v10257_v31  ;;  %9827 = vmatprep.subr.bf16.mxu0 %v10175_v57  ;;  %v10277_v57 = vld [vmem:[#allocation3 + $0x90] sm:$0xff]  ;;  %v9885_v3 = vpack.c.bf16 %v564_v52, %v561_v63  ;;  %v398_v63 = vld [vmem:[#allocation3 + $0x218] sm:$0xff] }
  0x7a   :  { %1301 = vmatmul.mubr.f32.gmra.mrb[24].mxu1 %v465_v54  ;;  %713 = vmatprep.mubr.f32.mxu0 %v10260_v58  ;;  %v389_v54 = vld [vmem:[#allocation3 + $0x1d0] sm:$0xff] }
  0x7b   :  { %9880 = vmatpush1.bf16.msra.mxu1 %v9879_v55  ;;  %1306 = vmatprep.mubr.f32.mxu1 %v10109_v0  ;;  %v388_v55 = vld [vmem:[#allocation3 + $0x1c8] sm:$0xff]  ;;  %v397_v52 = vld [vmem:[#allocation3 + $0x210] sm:$0xff] }
  0x7c   :  { %9881 = vmatprep.subr.bf16.mxu1 %v10110_v56  ;;  %9829 = vmatpush1.bf16.msra.mxu0 %v10178_v1  ;;  %v570_v1 = vld [vmem:[#allocation5 + $0x2f8] sm:$0xff] }
  0x7d   :  { %714 = vmatmul.mubr.f32.gmra.mrb[10].mxu0 %v10267_v44  ;;  %9831 = vmatprep.subr.bf16.mxu0 %v10181_v6  ;;  %v573_v6 = vld [vmem:[#allocation5 + $0x310] sm:$0xff]  ;;  %v9888_v11 = vpack.c.bf16 %v570_v1, %v567_v5  ;;  %v407_v5 = vld [vmem:[#allocation3 + $0x260] sm:$0xff]  ;;  %v406_v1 = vld [vmem:[#allocation3 + $0x258] sm:$0xff] }
  0x7e   :  { %1307 = vmatmul.mubr.f32.gmra.mrb[26].mxu1 %v468_v60  ;;  %719 = vmatprep.mubr.f32.mxu0 %v10270_v62  ;;  %v391_v60 = vld [vmem:[#allocation3 + $0x1e0] sm:$0xff] }
  0x7f   :  { %9883 = vmatpush1.bf16.msra.mxu1 %v9882_v61  ;;  %1312 = vmatprep.mubr.f32.mxu1 %v10109_v0  ;;  %v395_v61 = vld [vmem:[#allocation3 + $0x200] sm:$0xff] }
  0x80   :  { %9884 = vmatprep.subr.bf16.mxu1 %v10110_v56  ;;  %9833 = vmatpush1.bf16.msra.mxu0 %v10184_v15  ;;  %v9890_v15 = vpack.c.bf16 %v576_v7, %v573_v6  ;;  %v410_v6 = vld [vmem:[#allocation3 + $0x278] sm:$0xff]  ;;  %v409_v7 = vld [vmem:[#allocation3 + $0x270] sm:$0xff] }
  0x81   :  { %720 = vmatmul.mubr.f32.gmra.mrb[12].mxu0 %v10277_v57  ;;  %9835 = vmatprep.subr.bf16.mxu0 %v10187_v21  ;;  %v579_v21 = vld [vmem:[#allocation5 + $0x340] sm:$0xff] }
  0x82   :  { %1313 = vmatmul.mubr.f32.gmra.mrb[28].mxu1 %v471_v2  ;;  %725 = vmatprep.mubr.f32.mxu0 %v10280_v4  ;;  %v400_v2 = vld [vmem:[#allocation3 + $0x228] sm:$0xff] }
  0x83   :  { %9886 = vmatpush1.bf16.msra.mxu1 %v9885_v3  ;;  %1318 = vmatprep.mubr.f32.mxu1 %v10109_v0  ;;  %v404_v3 = vld [vmem:[#allocation3 + $0x248] sm:$0xff] }
  0x84   :  { %9887 = vmatprep.subr.bf16.mxu1 %v10110_v56  ;;  %9837 = vmatpush1.bf16.msra.mxu0 %v10190_v29  ;;  %v9894_v56 = vpack.c.bf16 %v582_v14, %v579_v21  ;;  %v585_v29 = vld [vmem:[#allocation5 + $0x370] sm:$0xff]  ;;  %v418_v21 = vld [vmem:[#allocation3 + $0x2b8] sm:$0xff] }
  0x85   :  { %726 = vmatmul.mubr.f32.gmra.mrb[14].mxu0 %v10287_v9  ;;  %9839 = vmatprep.subr.bf16.mxu0 %v10193_v35  ;;  %v10306_v35 = vld [vmem:[#allocation3 + $0xd8] sm:$0xff]  ;;  %v9898_v22 = vpack.c.bf16 %v588_v20, %v585_v29  ;;  %v428_v29 = vld [vmem:[#allocation3 + $0x308] sm:$0xff]  ;;  %v427_v20 = vld [vmem:[#allocation3 + $0x300] sm:$0xff] }
  0x86   :  { %1319 = vmatmul.mubr.f32.gmra.mrb[30].mxu1 %v474_v10  ;;  %731 = vmatprep.mubr.f32.mxu0 %v10290_v12  ;;  %v412_v10 = vld [vmem:[#allocation3 + $0x288] sm:$0xff]  ;;  %v422_v14 = vld [vmem:[#allocation3 + $0x2d8] sm:$0xff] }
  0x87   :  { %9889 = vmatpush1.bf16.msra.mxu1 %v9888_v11  ;;  %1389 = vmatprep.mubr.f32.mxu1 %v10203_v16  ;;  %v10309_v16 = vld [vmem:[#allocation3 + $0xf8] sm:$0xff]  ;;  %v416_v11 = vld [vmem:[#allocation3 + $0x2a8] sm:$0xff] }
  0x88   :  { %9891 = vmatprep.subr.bf16.mxu1 %v9890_v15  ;;  %9841 = vmatpush1.bf16.msra.mxu0 %v10196_v41  ;;  %v591_v41 = vld [vmem:[#allocation5 + $0x3a0] sm:$0xff] }
  0x89   :  { %732 = vmatmul.mubr.f32.gmra.mrb[16].mxu0 %v10297_v17 }
  0x8a   :  { %1390 = vmatmul.mubr.f32.vlgmr.msra.gmra.mrb[32].mxu1 %v10218_v27  ;;  %737 = vmatprep.mubr.f32.mxu0 %v10300_v19  ;;  %v9902_v27 = vpack.c.bf16 %v594_v23, %v591_v41  ;;  %v433_v41 = vld [vmem:[#allocation3 + $0x330] sm:$0xff] }
  0x8b   :  { %9893 = vmatpush3.bf16.msra.mxu1 %v9890_v15  ;;  %1394 = vmatprep.mubr.f32.mxu1 %v10221_v32  ;;  %v10322_v32 = vld [vmem:[#allocation3 + $0x108] sm:$0xff]  ;;  %v419_v15 = vld [vmem:[#allocation3 + $0x2c0] sm:$0xff]  ;;  %v437_v23 = vld [vmem:[#allocation3 + $0x350] sm:$0xff] }
  0x8c   :  { %9895 = vmatprep.subr.bf16.mxu1 %v9894_v56 }
  0x8d   :  { %738 = vmatmul.mubr.f32.gmra.mrb[18].mxu0 %v10306_v35 }
  0x8e   :  { %1395 = vmatmul.mubr.f32.gmra.mrb[34].mxu1 %v10227_v36  ;;  %743 = vmatprep.mubr.f32.mxu0 %v10309_v16  ;;  %v603_v36 = vld [vmem:[#allocation5 + $0x400] sm:$0xff] }
  0x8f   :  { %1399 = vmatprep.mubr.f32.mxu1 %v10230_v40  ;;  %9897 = vmatpush3.bf16.msra.mxu1 %v9894_v56  ;;  %v10333_v40 = vld [vmem:[#allocation3 + $0x140] sm:$0xff]  ;;  %v9910_v8 = vpack.c.bf16 %v606_v37, %v603_v36  ;;  %v424_v56 = vld [vmem:[#allocation3 + $0x2e8] sm:$0xff] }
  0x90   :  { %9899 = vmatprep.subr.bf16.mxu1 %v9898_v22  ;;  %v448_v36 = vld [vmem:[#allocation3 + $0x3a8] sm:$0xff] }
  0x91   :  { %744 = vmatmul.mubr.f32.gmra.mrb[20].mxu0 %v10314_v24  ;;  %v452_v37 = vld [vmem:[#allocation3 + $0x3c8] sm:$0xff] }
  0x92   :  { %1400 = vmatmul.mubr.f32.gmra.mrb[36].mxu1 %v10237_v43  ;;  %749 = vmatprep.mubr.f32.mxu0 %v10317_v25  ;;  %v609_v43 = vld [vmem:[#allocation5 + $0x430] sm:$0xff] }
  0x93   :  { %1404 = vmatprep.mubr.f32.mxu1 %v10240_v46  ;;  %9901 = vmatpush3.bf16.msra.mxu1 %v9898_v22  ;;  %v9914_v46 = vpack.c.bf16 %v612_v13, %v609_v43  ;;  %v434_v22 = vld [vmem:[#allocation3 + $0x338] sm:$0xff]  ;;  %v457_v43 = vld [vmem:[#allocation3 + $0x3f0] sm:$0xff] }
  0x94   :  { %9903 = vmatprep.subr.bf16.mxu1 %v9902_v27  ;;  %v461_v13 = vld [vmem:[#allocation3 + $0x410] sm:$0xff] }
  0x95   :  { %750 = vmatmul.mubr.f32.gmra.mrb[22].mxu0 %v10322_v32 }
  0x96   :  { %1405 = vmatmul.mubr.f32.gmra.mrb[38].mxu1 %v10247_v18  ;;  %755 = vmatprep.mubr.f32.mxu0 %v10325_v33  ;;  %v376_v18 = vld [vmem:[#allocation3 + $0x168] sm:$0xff] }
  0x97   :  { %1409 = vmatprep.mubr.f32.mxu1 %v10250_v51  ;;  %9905 = vmatpush3.bf16.msra.mxu1 %v9902_v27  ;;  %v383_v51 = vld [vmem:[#allocation3 + $0x1a0] sm:$0xff] }
  0x98   :  { %9907 = vmatprep.subr.bf16.mxu1 %v9906_v34  ;;  %v439_v27 = vld [vmem:[#allocation3 + $0x360] sm:$0xff] }
  0x99   :  { %756 = vmatmul.mubr.f32.gmra.mrb[24].mxu0 %v10330_v38 }
  0x9a   :  { %1410 = vmatmul.mubr.f32.gmra.mrb[40].mxu1 %v10257_v31  ;;  %761 = vmatprep.mubr.f32.mxu0 %v10333_v40  ;;  %v385_v31 = vld [vmem:[#allocation3 + $0x1b0] sm:$0xff] }
  0x9b   :  { %1414 = vmatprep.mubr.f32.mxu1 %v10260_v58  ;;  %9909 = vmatpush3.bf16.msra.mxu1 %v9906_v34  ;;  %v615_v58 = vld [vmem:[#allocation5 + $0x460] sm:$0xff]  ;;  %v449_v34 = vld [vmem:[#allocation3 + $0x3b0] sm:$0xff] }
  0x9c   :  { %9911 = vmatprep.subr.bf16.mxu1 %v9910_v8 }
  0x9d   :  { %762 = vmatmul.mubr.f32.gmra.mrb[26].mxu0 %v10338_v42 }
  0x9e   :  { %1415 = vmatmul.mubr.f32.gmra.mrb[42].mxu1 %v10267_v44  ;;  %767 = vmatprep.mubr.f32.mxu0 %v10341_v45  ;;  %v9918_v44 = vpack.c.bf16 %v618_v59, %v615_v58 }
  0x9f   :  { %1419 = vmatprep.mubr.f32.mxu1 %v10270_v62  ;;  %9913 = vmatpush3.bf16.msra.mxu1 %v9910_v8  ;;  %v394_v62 = vld [vmem:[#allocation3 + $0x1f8] sm:$0xff] }
  0xa0   :  { %9915 = vmatprep.subr.bf16.mxu1 %v9914_v46  ;;  %v454_v8 = vld [vmem:[#allocation3 + $0x3d8] sm:$0xff] }
  0xa1   :  { %768 = vmatmul.mubr.f32.gmra.mrb[28].mxu0 %v373_v47 }
  0xa2   :  { %1420 = vmatmul.mubr.f32.gmra.mrb[44].mxu1 %v10277_v57  ;;  %773 = vmatprep.mubr.f32.mxu0 %v377_v48  ;;  %v401_v57 = vld [vmem:[#allocation3 + $0x230] sm:$0xff] }
  0xa3   :  { %1424 = vmatprep.mubr.f32.mxu1 %v10280_v4  ;;  %9917 = vmatpush3.bf16.msra.mxu1 %v9914_v46  ;;  %v403_v4 = vld [vmem:[#allocation3 + $0x240] sm:$0xff]  ;;  %v464_v46 = vld [vmem:[#allocation3 + $0x428] sm:$0xff] }
  0xa4   :  { %9919 = vmatprep.subr.bf16.mxu1 %v9918_v44 }
  0xa5   :  { %774 = vmatmul.mubr.f32.gmra.mrb[30].mxu0 %v376_v18 }
  0xa6   :  { %1425 = vmatmul.mubr.f32.gmra.mrb[46].mxu1 %v10287_v9  ;;  %779 = vmatprep.mubr.f32.mxu0 %v380_v49  ;;  %v413_v9 = vld [vmem:[#allocation3 + $0x290] sm:$0xff] }
  0xa7   :  { %1429 = vmatprep.mubr.f32.mxu1 %v10290_v12  ;;  %9921 = vmatpush3.bf16.msra.mxu1 %v9918_v44  ;;  %v415_v12 = vld [vmem:[#allocation3 + $0x2a0] sm:$0xff] }
  0xa9   :  { %780 = vmatmul.mubr.f32.gmra.mrb[32].mxu0 %v379_v50 }
  0xaa   :  { %1430 = vmatmul.mubr.f32.gmra.mrb[48].mxu1 %v10297_v17  ;;  %785 = vmatprep.mubr.f32.mxu0 %v383_v51  ;;  %v421_v17 = vld [vmem:[#allocation3 + $0x2d0] sm:$0xff] }
  0xab   :  { %1434 = vmatprep.mubr.f32.mxu1 %v10300_v19  ;;  %v425_v19 = vld [vmem:[#allocation3 + $0x2f0] sm:$0xff] }
  0xad   :  { %786 = vmatmul.mubr.f32.gmra.mrb[34].mxu0 %v382_v53 }
  0xae   :  { %1435 = vmatmul.mubr.f32.gmra.mrb[50].mxu1 %v10306_v35  ;;  %791 = vmatprep.mubr.f32.mxu0 %v386_v26  ;;  %v431_v35 = vld [vmem:[#allocation3 + $0x320] sm:$0xff] }
  0xaf   :  { %1439 = vmatprep.mubr.f32.mxu1 %v10309_v16  ;;  %v430_v16 = vld [vmem:[#allocation3 + $0x318] sm:$0xff] }
  0xb1   :  { %792 = vmatmul.mubr.f32.gmra.mrb[36].mxu0 %v385_v31 }
  0xb2   :  { %1440 = vmatmul.mubr.f32.gmra.mrb[52].mxu1 %v10314_v24  ;;  %797 = vmatprep.mubr.f32.mxu0 %v389_v54  ;;  %v436_v24 = vld [vmem:[#allocation3 + $0x348] sm:$0xff] }
  0xb3   :  { %1444 = vmatprep.mubr.f32.mxu1 %v10317_v25  ;;  %v440_v25 = vld [vmem:[#allocation3 + $0x368] sm:$0xff] }
  0xb5   :  { %798 = vmatmul.mubr.f32.gmra.mrb[38].mxu0 %v388_v55 }
  0xb6   :  { %1445 = vmatmul.mubr.f32.gmra.mrb[54].mxu1 %v10322_v32  ;;  %803 = vmatprep.mubr.f32.mxu0 %v392_v39  ;;  %v446_v32 = vld [vmem:[#allocation3 + $0x398] sm:$0xff] }
  0xb7   :  { %1449 = vmatprep.mubr.f32.mxu1 %v10325_v33  ;;  %v445_v33 = vld [vmem:[#allocation3 + $0x390] sm:$0xff] }
  0xb9   :  { %804 = vmatmul.mubr.f32.gmra.mrb[40].mxu0 %v391_v60 }
  0xba   :  { %1450 = vmatmul.mubr.f32.gmra.mrb[56].mxu1 %v10330_v38  ;;  %809 = vmatprep.mubr.f32.mxu0 %v395_v61  ;;  %v451_v38 = vld [vmem:[#allocation3 + $0x3c0] sm:$0xff] }
  0xbb   :  { %1454 = vmatprep.mubr.f32.mxu1 %v10333_v40  ;;  %v455_v40 = vld [vmem:[#allocation3 + $0x3e0] sm:$0xff] }
  0xbd   :  { %810 = vmatmul.mubr.f32.gmra.mrb[42].mxu0 %v394_v62 }
  0xbe   :  { %1455 = vmatmul.mubr.f32.gmra.mrb[58].mxu1 %v10338_v42  ;;  %815 = vmatprep.mubr.f32.mxu0 %v398_v63  ;;  %v458_v42 = vld [vmem:[#allocation3 + $0x3f8] sm:$0xff] }
  0xbf   :  { %1459 = vmatprep.mubr.f32.mxu1 %v10341_v45  ;;  %v460_v45 = vld [vmem:[#allocation3 + $0x408] sm:$0xff] }
  0xc1   :  { %816 = vmatmul.mubr.f32.gmra.mrb[44].mxu0 %v397_v52 }
  0xc2   :  { %1460 = vmatmul.mubr.f32.gmra.mrb[60].mxu1 %v373_v47  ;;  %821 = vmatprep.mubr.f32.mxu0 %v401_v57  ;;  %v463_v47 = vld [vmem:[#allocation3 + $0x420] sm:$0xff] }
  0xc3   :  { %1464 = vmatprep.mubr.f32.mxu1 %v377_v48  ;;  %v467_v48 = vld [vmem:[#allocation3 + $0x440] sm:$0xff] }
  0xc5   :  { %822 = vmatmul.mubr.f32.gmra.mrb[46].mxu0 %v400_v2 }
  0xc6   :  { %1465 = vmatmul.mubr.f32.gmra.mrb[62].mxu1 %v376_v18  ;;  %827 = vmatprep.mubr.f32.mxu0 %v404_v3  ;;  %v466_v18 = vld [vmem:[#allocation3 + $0x438] sm:$0xff] }
  0xc7   :  { %1469 = vmatprep.mubr.f32.mxu1 %v380_v49  ;;  %v10363_v49 = vld [vmem:[#allocation3 + $0x458] sm:$0xff] }
  0xc9   :  { %828 = vmatmul.mubr.f32.gmra.mrb[48].mxu0 %v403_v4 }
  0xca   :  { %1470 = vmatmul.mubr.f32.gmra.mrb[64].mxu1 %v379_v50  ;;  %833 = vmatprep.mubr.f32.mxu0 %v407_v5 }
  0xcb   :  { %1474 = vmatprep.mubr.f32.mxu1 %v383_v51 }
  0xcd   :  { %834 = vmatmul.mubr.f32.gmra.mrb[50].mxu0 %v406_v1 }
  0xce   :  { %1475 = vmatmul.mubr.f32.gmra.mrb[66].mxu1 %v382_v53  ;;  %839 = vmatprep.mubr.f32.mxu0 %v410_v6  ;;  %v469_v53 = vld [vmem:[#allocation3 + $0x450] sm:$0xff] }
  0xcf   :  { %1479 = vmatprep.mubr.f32.mxu1 %v386_v26  ;;  %v473_v26 = vld [vmem:[#allocation3 + $0x470] sm:$0xff] }
  0xd1   :  { %840 = vmatmul.mubr.f32.gmra.mrb[52].mxu0 %v409_v7 }
  0xd2   :  { %1480 = vmatmul.mubr.f32.gmra.mrb[68].mxu1 %v385_v31  ;;  %845 = vmatprep.mubr.f32.mxu0 %v413_v9 }
  0xd3   :  { %1484 = vmatprep.mubr.f32.mxu1 %v389_v54 }
  0xd5   :  { %846 = vmatmul.mubr.f32.gmra.mrb[54].mxu0 %v412_v10 }
  0xd6   :  { %1485 = vmatmul.mubr.f32.gmra.mrb[70].mxu1 %v388_v55  ;;  %851 = vmatprep.mubr.f32.mxu0 %v416_v11  ;;  %v472_v55 = vld [vmem:[#allocation3 + $0x468] sm:$0xff] }
  0xd7   :  { %1489 = vmatprep.mubr.f32.mxu1 %v392_v39  ;;  %v333_v39 = vld [vmem:[#allocation3 + $0x10] sm:$0xff] }
  0xd9   :  { %852 = vmatmul.mubr.f32.gmra.mrb[56].mxu0 %v415_v12 }
  0xda   :  { %1490 = vmatmul.mubr.f32.gmra.mrb[72].mxu1 %v391_v60  ;;  %857 = vmatprep.mubr.f32.mxu0 %v419_v15 }
  0xdb   :  { %1494 = vmatprep.mubr.f32.mxu1 %v395_v61  ;;  %v336_v61 = vld [vmem:[#allocation3 + $0x28] sm:$0xff] }
  0xdd   :  { %858 = vmatmul.mubr.f32.gmra.mrb[58].mxu0 %v418_v21 }
  0xde   :  { %1495 = vmatmul.mubr.f32.gmra.mrb[74].mxu1 %v394_v62  ;;  %863 = vmatprep.mubr.f32.mxu0 %v422_v14 }
  0xdf   :  { %1499 = vmatprep.mubr.f32.mxu1 %v398_v63 }
  0xe1   :  { %864 = vmatmul.mubr.f32.gmra.mrb[60].mxu0 %v421_v17 }
  0xe2   :  { %1500 = vmatmul.mubr.f32.gmra.mrb[76].mxu1 %v397_v52  ;;  %869 = vmatprep.mubr.f32.mxu0 %v425_v19  ;;  %v339_v52 = vld [vmem:[#allocation3 + $0x40] sm:$0xff] }
  0xe3   :  { %1504 = vmatprep.mubr.f32.mxu1 %v401_v57 }
  0xe5   :  { %870 = vmatmul.mubr.f32.gmra.mrb[62].mxu0 %v424_v56 }
  0xe6   :  { %1505 = vmatmul.mubr.f32.gmra.mrb[78].mxu1 %v400_v2  ;;  %875 = vmatprep.mubr.f32.mxu0 %v428_v29 }
  0xe7   :  { %1509 = vmatprep.mubr.f32.mxu1 %v404_v3  ;;  %v342_v3 = vld [vmem:[#allocation3 + $0x58] sm:$0xff] }
  0xe9   :  { %876 = vmatmul.mubr.f32.gmra.mrb[64].mxu0 %v427_v20 }
  0xea   :  { %1510 = vmatmul.mubr.f32.gmra.mrb[80].mxu1 %v403_v4  ;;  %881 = vmatprep.mubr.f32.mxu0 %v431_v35 }
  0xeb   :  { %1514 = vmatprep.mubr.f32.mxu1 %v407_v5 }
  0xed   :  { %882 = vmatmul.mubr.f32.gmra.mrb[66].mxu0 %v430_v16 }
  0xee   :  { %1515 = vmatmul.mubr.f32.gmra.mrb[82].mxu1 %v406_v1  ;;  %887 = vmatprep.mubr.f32.mxu0 %v434_v22  ;;  %v345_v1 = vld [vmem:[#allocation3 + $0x70] sm:$0xff] }
  0xef   :  { %1519 = vmatprep.mubr.f32.mxu1 %v410_v6 }
  0xf1   :  { %888 = vmatmul.mubr.f32.gmra.mrb[68].mxu0 %v433_v41 }
  0xf2   :  { %1520 = vmatmul.mubr.f32.gmra.mrb[84].mxu1 %v409_v7  ;;  %893 = vmatprep.mubr.f32.mxu0 %v437_v23 }
  0xf3   :  { %1524 = vmatprep.mubr.f32.mxu1 %v413_v9  ;;  %v348_v9 = vld [vmem:[#allocation3 + $0x88] sm:$0xff] }
  0xf5   :  { %894 = vmatmul.mubr.f32.gmra.mrb[70].mxu0 %v436_v24 }
  0xf6   :  { %1525 = vmatmul.mubr.f32.gmra.mrb[86].mxu1 %v412_v10  ;;  %899 = vmatprep.mubr.f32.mxu0 %v440_v25 }
  0xf7   :  { %1529 = vmatprep.mubr.f32.mxu1 %v416_v11 }
  0xf9   :  { %900 = vmatmul.mubr.f32.gmra.mrb[72].mxu0 %v439_v27 }
  0xfa   :  { %1530 = vmatmul.mubr.f32.gmra.mrb[88].mxu1 %v415_v12  ;;  %905 = vmatprep.mubr.f32.mxu0 %v443_v28  ;;  %v351_v12 = vld [vmem:[#allocation3 + $0xa0] sm:$0xff] }
  0xfb   :  { %1534 = vmatprep.mubr.f32.mxu1 %v419_v15 }
  0xfd   :  { %906 = vmatmul.mubr.f32.gmra.mrb[74].mxu0 %v442_v30 }
  0xfe   :  { %1535 = vmatmul.mubr.f32.gmra.mrb[90].mxu1 %v418_v21  ;;  %911 = vmatprep.mubr.f32.mxu0 %v446_v32 }
  0xff   :  { %1539 = vmatprep.mubr.f32.mxu1 %v422_v14  ;;  %v354_v14 = vld [vmem:[#allocation3 + $0xb8] sm:$0xff] }
 0x101   :  { %912 = vmatmul.mubr.f32.gmra.mrb[76].mxu0 %v445_v33 }
 0x102   :  { %1540 = vmatmul.mubr.f32.gmra.mrb[92].mxu1 %v421_v17  ;;  %917 = vmatprep.mubr.f32.mxu0 %v449_v34 }
 0x103   :  { %1544 = vmatprep.mubr.f32.mxu1 %v425_v19 }
 0x105   :  { %918 = vmatmul.mubr.f32.gmra.mrb[78].mxu0 %v448_v36 }
 0x106   :  { %1545 = vmatmul.mubr.f32.gmra.mrb[94].mxu1 %v424_v56  ;;  %923 = vmatprep.mubr.f32.mxu0 %v452_v37  ;;  %v357_v56 = vld [vmem:[#allocation3 + $0xd0] sm:$0xff] }
 0x107   :  { %1549 = vmatprep.mubr.f32.mxu1 %v428_v29 }
 0x109   :  { %924 = vmatmul.mubr.f32.gmra.mrb[80].mxu0 %v451_v38 }
 0x10a   :  { %1550 = vmatmul.mubr.f32.gmra.mrb[96].mxu1 %v427_v20  ;;  %929 = vmatprep.mubr.f32.mxu0 %v455_v40 }
 0x10b   :  { %1554 = vmatprep.mubr.f32.mxu1 %v431_v35  ;;  %v360_v35 = vld [vmem:[#allocation3 + $0xe8] sm:$0xff] }
 0x10d   :  { %930 = vmatmul.mubr.f32.gmra.mrb[82].mxu0 %v454_v8 }
 0x10e   :  { %1555 = vmatmul.mubr.f32.gmra.mrb[98].mxu1 %v430_v16  ;;  %935 = vmatprep.mubr.f32.mxu0 %v458_v42 }
 0x10f   :  { %1559 = vmatprep.mubr.f32.mxu1 %v434_v22 }
 0x111   :  { %936 = vmatmul.mubr.f32.gmra.mrb[84].mxu0 %v457_v43 }
 0x112   :  { %1560 = vmatmul.mubr.f32.gmra.mrb[100].mxu1 %v433_v41  ;;  %941 = vmatprep.mubr.f32.mxu0 %v461_v13  ;;  %v363_v41 = vld [vmem:[#allocation3 + $0x100] sm:$0xff] }
 0x113   :  { %1564 = vmatprep.mubr.f32.mxu1 %v437_v23 }
 0x115   :  { %942 = vmatmul.mubr.f32.gmra.mrb[86].mxu0 %v460_v45 }
 0x116   :  { %1565 = vmatmul.mubr.f32.gmra.mrb[102].mxu1 %v436_v24  ;;  %947 = vmatprep.mubr.f32.mxu0 %v464_v46 }
 0x117   :  { %1569 = vmatprep.mubr.f32.mxu1 %v440_v25  ;;  %v366_v25 = vld [vmem:[#allocation3 + $0x118] sm:$0xff] }
 0x119   :  { %948 = vmatmul.mubr.f32.gmra.mrb[88].mxu0 %v463_v47 }
 0x11a   :  { %1570 = vmatmul.mubr.f32.gmra.mrb[104].mxu1 %v439_v27  ;;  %953 = vmatprep.mubr.f32.mxu0 %v467_v48 }
 0x11b   :  { %1574 = vmatprep.mubr.f32.mxu1 %v443_v28 }
 0x11d   :  { %v10365_v50 = vpop.f32.mrb[0].mxu1  ;;  %954 = vmatmul.mubr.f32.gmra.mrb[90].mxu0 %v466_v18 }
 0x11e   :  { %v10367_v51 = vpop.f32.mrb[1].mxu1  ;;  %1575 = vmatmul.mubr.f32.gmra.mrb[106].mxu1 %v442_v30  ;;  %959 = vmatprep.mubr.f32.mxu0 %v10363_v49  ;;  %v369_v30 = vld [vmem:[#allocation3 + $0x130] sm:$0xff] }
 0x11f   :  { %1579 = vmatprep.mubr.f32.mxu1 %v446_v32 }
 0x121   :  { %v10370_v31 = vpop.f32.mrb[2].mxu1  ;;  %960 = vmatmul.mubr.f32.gmra.mrb[92].mxu0 %v469_v53 }
 0x122   :  { %v10372_v54 = vpop.f32.mrb[3].mxu1  ;;  %1580 = vmatmul.mubr.f32.gmra.mrb[108].mxu1 %v445_v33  ;;  %965 = vmatprep.mubr.f32.mxu0 %v473_v26 }
 0x123   :  { %1584 = vmatprep.mubr.f32.mxu1 %v449_v34  ;;  %v372_v34 = vld [vmem:[#allocation3 + $0x148] sm:$0xff] }
 0x125   :  { %v10374_v58 = vpop.f32.mrb[4].mxu1  ;;  %966 = vmatmul.mubr.f32.gmra.mrb[94].mxu0 %v472_v55 }
 0x126   :  { %v10376_v59 = vpop.f32.mrb[5].mxu1  ;;  %1585 = vmatmul.mubr.f32.gmra.mrb[110].mxu1 %v448_v36  ;;  %1036 = vmatprep.mubr.f32.mxu0 %v10109_v0 }
 0x127   :  { %1589 = vmatprep.mubr.f32.mxu1 %v452_v37 }
 0x129   :  { %v10379_v44 = vpop.f32.mrb[6].mxu1  ;;  %1037 = vmatmul.mubr.f32.vlgmr.msra.gmra.mrb[0].mxu0 %v333_v39 }
 0x12a   :  { %v10381_v60 = vpop.f32.mrb[7].mxu1  ;;  %1590 = vmatmul.mubr.f32.gmra.mrb[112].mxu1 %v451_v38  ;;  %1042 = vmatprep.mubr.f32.mxu0 %v10109_v0  ;;  %v375_v38 = vld [vmem:[#allocation3 + $0x160] sm:$0xff] }
 0x12b   :  { %1594 = vmatprep.mubr.f32.mxu1 %v455_v40 }
 0x12d   :  { %v10384_v62 = vpop.f32.mrb[8].mxu1  ;;  %1043 = vmatmul.mubr.f32.gmra.mrb[2].mxu0 %v336_v61 }
 0x12e   :  { %v10386_v63 = vpop.f32.mrb[9].mxu1  ;;  %1595 = vmatmul.mubr.f32.gmra.mrb[114].mxu1 %v454_v8  ;;  %1048 = vmatprep.mubr.f32.mxu0 %v10109_v0 }
 0x12f   :  { %1599 = vmatprep.mubr.f32.mxu1 %v458_v42  ;;  %v378_v42 = vld [vmem:[#allocation3 + $0x178] sm:$0xff] }
 0x131   :  { %v10389_v57 = vpop.f32.mrb[10].mxu1  ;;  %1049 = vmatmul.mubr.f32.gmra.mrb[4].mxu0 %v339_v52 }
 0x132   :  { %v10391_v2 = vpop.f32.mrb[11].mxu1  ;;  %1600 = vmatmul.mubr.f32.gmra.mrb[116].mxu1 %v457_v43  ;;  %1054 = vmatprep.mubr.f32.mxu0 %v10109_v0  ;;  %v381_v43 = vld [vmem:[#allocation3 + $0x190] sm:$0xff] }
 0x133   :  { %1604 = vmatprep.mubr.f32.mxu1 %v461_v13 }
 0x135   :  { %v10394_v4 = vpop.f32.mrb[12].mxu1  ;;  %1055 = vmatmul.mubr.f32.gmra.mrb[6].mxu0 %v342_v3 }
 0x136   :  { %v10396_v5 = vpop.f32.mrb[13].mxu1  ;;  %1605 = vmatmul.mubr.f32.gmra.mrb[118].mxu1 %v460_v45  ;;  %1060 = vmatprep.mubr.f32.mxu0 %v10109_v0 }
 0x137   :  { %1609 = vmatprep.mubr.f32.mxu1 %v464_v46  ;;  %v384_v46 = vld [vmem:[#allocation3 + $0x1a8] sm:$0xff] }
 0x139   :  { %v10399_v6 = vpop.f32.mrb[14].mxu1  ;;  %1061 = vmatmul.mubr.f32.gmra.mrb[8].mxu0 %v345_v1 }
 0x13a   :  { %v10401_v7 = vpop.f32.mrb[15].mxu1  ;;  %1610 = vmatmul.mubr.f32.gmra.mrb[120].mxu1 %v463_v47  ;;  %1066 = vmatprep.mubr.f32.mxu0 %v10109_v0  ;;  %v387_v47 = vld [vmem:[#allocation3 + $0x1c0] sm:$0xff] }
 0x13b   :  { %1614 = vmatprep.mubr.f32.mxu1 %v467_v48 }
 0x13d   :  { %v10404_v10 = vpop.f32.mrb[16].mxu1  ;;  %1067 = vmatmul.mubr.f32.gmra.mrb[10].mxu0 %v348_v9 }
 0x13e   :  { %v10406_v11 = vpop.f32.mrb[17].mxu1  ;;  %1615 = vmatmul.mubr.f32.gmra.mrb[122].mxu1 %v466_v18  ;;  %1072 = vmatprep.mubr.f32.mxu0 %v10109_v0 }
 0x13f   :  { %1619 = vmatprep.mubr.f32.mxu1 %v10363_v49  ;;  %v390_v49 = vld [vmem:[#allocation3 + $0x1d8] sm:$0xff] }
 0x141   :  { %v10410_v15 = vpop.f32.mrb[18].mxu1  ;;  %1073 = vmatmul.mubr.f32.gmra.mrb[12].mxu0 %v351_v12 }
 0x142   :  { %v10412_v21 = vpop.f32.mrb[19].mxu1  ;;  %1620 = vmatmul.mubr.f32.gmra.mrb[124].mxu1 %v469_v53  ;;  %1078 = vmatprep.mubr.f32.mxu0 %v10109_v0  ;;  %v393_v53 = vld [vmem:[#allocation3 + $0x1f0] sm:$0xff] }
 0x143   :  { %1624 = vmatprep.mubr.f32.mxu1 %v473_v26 }
 0x145   :  { %v10415_v17 = vpop.f32.mrb[20].mxu1  ;;  %1079 = vmatmul.mubr.f32.gmra.mrb[14].mxu0 %v354_v14 }
 0x146   :  { %v10417_v19 = vpop.f32.mrb[21].mxu1  ;;  %1625 = vmatmul.mubr.f32.gmra.mrb[126].mxu1 %v472_v55  ;;  %1084 = vmatprep.mubr.f32.mxu0 %v10109_v0 }
 0x147   :  { %9674 = vmatprep.mubr.f32.mxu1 %v333_v39  ;;  %v396_v39 = vld [vmem:[#allocation3 + $0x208] sm:$0xff] }
 0x149   :  { %v10420_v29 = vpop.f32.mrb[22].mxu1  ;;  %1085 = vmatmul.mubr.f32.gmra.mrb[16].mxu0 %v357_v56 }
 0x14a   :  { %v10422_v20 = vpop.f32.mrb[23].mxu1  ;;  %9675 = vmatmul.mubr.f32.vlgmr.msra.gmra.mrb[128].mxu1 %v336_v61  ;;  %1090 = vmatprep.mubr.f32.mxu0 %v10109_v0  ;;  %v399_v61 = vld [vmem:[#allocation3 + $0x220] sm:$0xff] }
 0x14b   :  { %9677 = vmatprep.mubr.f32.mxu1 %v339_v52 }
 0x14d   :  { %v10425_v16 = vpop.f32.mrb[24].mxu1  ;;  %1091 = vmatmul.mubr.f32.gmra.mrb[18].mxu0 %v360_v35 }
 0x14e   :  { %v10427_v22 = vpop.f32.mrb[25].mxu1  ;;  %9678 = vmatmul.mubr.f32.gmra.mrb[130].mxu1 %v342_v3  ;;  %1096 = vmatprep.mubr.f32.mxu0 %v10109_v0 }
 0x14f   :  { %9680 = vmatprep.mubr.f32.mxu1 %v345_v1  ;;  %v402_v1 = vld [vmem:[#allocation3 + $0x238] sm:$0xff] }
 0x151   :  { %v10430_v23 = vpop.f32.mrb[26].mxu1  ;;  %1097 = vmatmul.mubr.f32.gmra.mrb[20].mxu0 %v363_v41 }
 0x152   :  { %v10432_v24 = vpop.f32.mrb[27].mxu1  ;;  %9681 = vmatmul.mubr.f32.gmra.mrb[132].mxu1 %v348_v9  ;;  %1102 = vmatprep.mubr.f32.mxu0 %v10109_v0  ;;  %v405_v9 = vld [vmem:[#allocation3 + $0x250] sm:$0xff] }
 0x153   :  { %9683 = vmatprep.mubr.f32.mxu1 %v351_v12 }
 0x155   :  { %v10435_v27 = vpop.f32.mrb[28].mxu1  ;;  %1103 = vmatmul.mubr.f32.gmra.mrb[22].mxu0 %v366_v25 }
 0x156   :  { %v10437_v28 = vpop.f32.mrb[29].mxu1  ;;  %9684 = vmatmul.mubr.f32.gmra.mrb[134].mxu1 %v354_v14  ;;  %1108 = vmatprep.mubr.f32.mxu0 %v10109_v0 }
 0x157   :  { %9686 = vmatprep.mubr.f32.mxu1 %v357_v56  ;;  %v408_v56 = vld [vmem:[#allocation3 + $0x268] sm:$0xff] }
 0x159   :  { %v10440_v32 = vpop.f32.mrb[30].mxu1  ;;  %1109 = vmatmul.mubr.f32.gmra.mrb[24].mxu0 %v369_v30 }
 0x15a   :  { %v10442_v33 = vpop.f32.mrb[31].mxu1  ;;  %9687 = vmatmul.mubr.f32.gmra.mrb[136].mxu1 %v360_v35  ;;  %1114 = vmatprep.mubr.f32.mxu0 %v10109_v0  ;;  %v411_v35 = vld [vmem:[#allocation3 + $0x280] sm:$0xff] }
 0x15b   :  { %9689 = vmatprep.mubr.f32.mxu1 %v363_v41 }
 0x15d   :  { %v10445_v36 = vpop.f32.mrb[32].mxu1  ;;  %1115 = vmatmul.mubr.f32.gmra.mrb[26].mxu0 %v372_v34 }
 0x15e   :  { %v1393_v37 = vpop.f32.mrb[33].mxu1  ;;  %9690 = vmatmul.mubr.f32.gmra.mrb[138].mxu1 %v366_v25  ;;  %1120 = vmatprep.mubr.f32.mxu0 %v10109_v0 }
 0x15f   :  { %9692 = vmatprep.mubr.f32.mxu1 %v369_v30  ;;  %v414_v30 = vld [vmem:[#allocation3 + $0x298] sm:$0xff] }
 0x161   :  { %v10448_v40 = vpop.f32.mrb[34].mxu1  ;;  %1121 = vmatmul.mubr.f32.gmra.mrb[28].mxu0 %v375_v38 }
 0x162   :  { %v1398_v8 = vpop.f32.mrb[35].mxu1  ;;  %9693 = vmatmul.mubr.f32.gmra.mrb[140].mxu1 %v372_v34  ;;  %1126 = vmatprep.mubr.f32.mxu0 %v10109_v0  ;;  %v417_v34 = vld [vmem:[#allocation3 + $0x2b0] sm:$0xff] }
 0x163   :  { %9695 = vmatprep.mubr.f32.mxu1 %v375_v38  ;;  %v420_v8 = vld [vmem:[#allocation3 + $0x2c8] sm:$0xff] }
 0x165   :  { %v10451_v13 = vpop.f32.mrb[36].mxu1  ;;  %1127 = vmatmul.mubr.f32.gmra.mrb[30].mxu0 %v378_v42 }
 0x166   :  { %v1403_v45 = vpop.f32.mrb[37].mxu1  ;;  %9696 = vmatmul.mubr.f32.gmra.mrb[142].mxu1 %v378_v42  ;;  %1132 = vmatprep.mubr.f32.mxu0 %v10109_v0  ;;  %v10472_v42 = vld [vmem:[#allocation3 + $0x2e0] sm:$0xff] }
 0x167   :  { %9698 = vmatprep.mubr.f32.mxu1 %v381_v43 }
 0x169   :  { %v10454_v48 = vpop.f32.mrb[38].mxu1  ;;  %1133 = vmatmul.mubr.f32.gmra.mrb[32].mxu0 %v381_v43 }
 0x16a   :  { %v1408_v18 = vpop.f32.mrb[39].mxu1  ;;  %9699 = vmatmul.mubr.f32.gmra.mrb[144].mxu1 %v384_v46  ;;  %1138 = vmatprep.mubr.f32.mxu0 %v10109_v0 }
 0x16b   :  { %9701 = vmatprep.mubr.f32.mxu1 %v387_v47 }
 0x16d   :  { %v10457_v26 = vpop.f32.mrb[40].mxu1  ;;  %1139 = vmatmul.mubr.f32.gmra.mrb[34].mxu0 %v384_v46  ;;  %v10478_v46 = vld [vmem:[#allocation3 + $0x2f8] sm:$0xff] }
 0x16e   :  { %v1413_v55 = vpop.f32.mrb[41].mxu1  ;;  %9702 = vmatmul.mubr.f32.gmra.mrb[146].mxu1 %v390_v49  ;;  %1144 = vmatprep.mubr.f32.mxu0 %v10109_v0 }
 0x16f   :  { %9704 = vmatprep.mubr.f32.mxu1 %v393_v53 }
 0x171   :  { %v10460_v52 = vpop.f32.mrb[42].mxu1  ;;  %1145 = vmatmul.mubr.f32.gmra.mrb[36].mxu0 %v387_v47 }
 0x172   :  { %v1418_v3 = vpop.f32.mrb[43].mxu1  ;;  %9705 = vmatmul.mubr.f32.gmra.mrb[148].mxu1 %v396_v39  ;;  %1150 = vmatprep.mubr.f32.mxu0 %v10109_v0 }
 0x173   :  { %9707 = vmatprep.mubr.f32.mxu1 %v399_v61 }
 0x175   :  { %v10463_v12 = vpop.f32.mrb[44].mxu1  ;;  %1151 = vmatmul.mubr.f32.gmra.mrb[38].mxu0 %v390_v49  ;;  %v10041_v49 = vld [vmem:[#allocation3 + $0x310] sm:$0xff] }
 0x176   :  { %v1423_v14 = vpop.f32.mrb[45].mxu1  ;;  %9708 = vmatmul.mubr.f32.gmra.mrb[150].mxu1 %v402_v1  ;;  %1156 = vmatprep.mubr.f32.mxu0 %v10109_v0 }
 0x177   :  { %9710 = vmatprep.mubr.f32.mxu1 %v405_v9  ;;  %v10044_v14 = vld [vmem:[#allocation3 + $0x358] sm:$0xff] }
 0x179   :  { %v10466_v41 = vpop.f32.mrb[46].mxu1  ;;  %1157 = vmatmul.mubr.f32.gmra.mrb[40].mxu0 %v393_v53 }
 0x17a   :  { %v1428_v25 = vpop.f32.mrb[47].mxu1  ;;  %9711 = vmatmul.mubr.f32.gmra.mrb[152].mxu1 %v408_v56  ;;  %1162 = vmatprep.mubr.f32.mxu0 %v10109_v0 }
 0x17b   :  { %9713 = vmatprep.mubr.f32.mxu1 %v411_v35  ;;  %v10045_v25 = vld [vmem:[#allocation3 + $0x370] sm:$0xff] }
 0x17d   :  { %v10469_v37 = vpop.f32.mrb[48].mxu1  ;;  %1163 = vmatmul.mubr.f32.gmra.mrb[42].mxu0 %v396_v39  ;;  %v10042_v39 = vld [vmem:[#allocation3 + $0x328] sm:$0xff] }
 0x17e   :  { %v1433_v38 = vpop.f32.mrb[49].mxu1  ;;  %9714 = vmatmul.mubr.f32.gmra.mrb[154].mxu1 %v414_v30  ;;  %1168 = vmatprep.mubr.f32.mxu0 %v10109_v0 }
 0x17f   :  { %9716 = vmatprep.mubr.f32.mxu1 %v417_v34 }
 0x181   :  { %v10474_v43 = vpop.f32.mrb[50].mxu1  ;;  %1169 = vmatmul.mubr.f32.gmra.mrb[44].mxu0 %v399_v61  ;;  %v10043_v61 = vld [vmem:[#allocation3 + $0x340] sm:$0xff] }
 0x182   :  { %v1438_v45 = vpop.f32.mrb[51].mxu1  ;;  %9717 = vmatmul.mubr.f32.gmra.mrb[156].mxu1 %v420_v8  ;;  %1174 = vmatprep.mubr.f32.mxu0 %v10109_v0 }
 0x183   :  { %9719 = vmatprep.mubr.f32.mxu1 %v10472_v42  ;;  %v10046_v45 = vld [vmem:[#allocation3 + $0x388] sm:$0xff] }
 0x185   :  { %v10480_v47 = vpop.f32.mrb[52].mxu1  ;;  %1175 = vmatmul.mubr.f32.gmra.mrb[46].mxu0 %v402_v1 }
 0x186   :  { %v1443_v18 = vpop.f32.mrb[53].mxu1  ;;  %9720 = vmatmul.mubr.f32.gmra.mrb[158].mxu1 %v10478_v46  ;;  %1180 = vmatprep.mubr.f32.mxu0 %v10109_v0 }
 0x187   :  { %9722 = vmatprep.mubr.f32.mxu1 %v10041_v49  ;;  %v10047_v18 = vld [vmem:[#allocation3 + $0x3a0] sm:$0xff] }
 0x189   :  { %v10484_v53 = vpop.f32.mrb[54].mxu1  ;;  %1181 = vmatmul.mubr.f32.gmra.mrb[48].mxu0 %v405_v9 }
 0x18a   :  { %v1448_v55 = vpop.f32.mrb[55].mxu1  ;;  %9723 = vmatmul.mubr.f32.gmra.mrb[160].mxu1 %v10042_v39  ;;  %1186 = vmatprep.mubr.f32.mxu0 %v10109_v0  ;;  %v10049_v39 = vld [vmem:[#allocation3 + $0x3d0] sm:$0xff] }
 0x18b   :  { %9725 = vmatprep.mubr.f32.mxu1 %v10043_v61  ;;  %v10048_v55 = vld [vmem:[#allocation3 + $0x3b8] sm:$0xff] }
 0x18d   :  { %v10487_v3 = vpop.f32.mrb[56].mxu1  ;;  %1187 = vmatmul.mubr.f32.gmra.mrb[50].mxu0 %v408_v56 }
 0x18e   :  { %17954 = vst [vmem:[#allocation9_spill] sm:$0xff] %v10487_v3  ;;  %v1453_v1 = vpop.f32.mrb[57].mxu1  ;;  %9726 = vmatmul.mubr.f32.gmra.mrb[162].mxu1 %v10044_v14  ;;  %1192 = vmatprep.mubr.f32.mxu0 %v10109_v0  ;;  %v10051_v14 = vld [vmem:[#allocation3 + $0x400] sm:$0xff] }
 0x18f   :  { %9728 = vmatprep.mubr.f32.mxu1 %v10045_v25  ;;  %v10050_v1 = vld [vmem:[#allocation3 + $0x3e8] sm:$0xff] }
 0x191   :  { %v10490_v38 = vpop.f32.mrb[58].mxu1  ;;  %1193 = vmatmul.mubr.f32.gmra.mrb[52].mxu0 %v411_v35 }
 0x192   :  { %17955 = vst [vmem:[#allocation10_spill] sm:$0xff] %v10490_v38  ;;  %v1458_v9 = vpop.f32.mrb[59].mxu1  ;;  %9729 = vmatmul.mubr.f32.gmra.mrb[164].mxu1 %v10046_v45  ;;  %1198 = vmatprep.mubr.f32.mxu0 %v10109_v0  ;;  %v10053_v45 = vld [vmem:[#allocation3 + $0x430] sm:$0xff] }
 0x193   :  { %9731 = vmatprep.mubr.f32.mxu1 %v10047_v18  ;;  %v10052_v9 = vld [vmem:[#allocation3 + $0x418] sm:$0xff] }
 0x195   :  { %v10493_v49 = vpop.f32.mrb[60].mxu1  ;;  %1199 = vmatmul.mubr.f32.gmra.mrb[54].mxu0 %v414_v30 }
 0x196   :  { %17956 = vst [vmem:[#allocation11_spill] sm:$0xff] %v10493_v49  ;;  %v1463_v56 = vpop.f32.mrb[61].mxu1  ;;  %9732 = vmatmul.mubr.f32.gmra.mrb[166].mxu1 %v10048_v55  ;;  %1204 = vmatprep.mubr.f32.mxu0 %v10109_v0  ;;  %v10055_v55 = vld [vmem:[#allocation3 + $0x460] sm:$0xff] }
 0x197   :  { %9734 = vmatprep.mubr.f32.mxu1 %v10049_v39  ;;  %v10054_v56 = vld [vmem:[#allocation3 + $0x448] sm:$0xff] }
 0x199   :  { %v10496_v61 = vpop.f32.mrb[62].mxu1  ;;  %1205 = vmatmul.mubr.f32.gmra.mrb[56].mxu0 %v417_v34 }
 0x19a   :  { %17957 = vst [vmem:[#allocation12_spill] sm:$0xff] %v10496_v61  ;;  %v1468_v35 = vpop.f32.mrb[63].mxu1  ;;  %9735 = vmatmul.mubr.f32.gmra.mrb[168].mxu1 %v10050_v1  ;;  %1210 = vmatprep.mubr.f32.mxu0 %v10109_v0 }
 0x19b   :  { %9737 = vmatprep.mubr.f32.mxu1 %v10051_v14  ;;  %v10056_v35 = vld [vmem:[#allocation3 + $0x478] sm:$0xff] }
 0x19d   :  { %v10499_v25 = vpop.f32.mrb[64].mxu1  ;;  %1211 = vmatmul.mubr.f32.gmra.mrb[58].mxu0 %v420_v8 }
 0x19e   :  { %17958 = vst [vmem:[#allocation13_spill] sm:$0xff] %v10499_v25  ;;  %v1473_v30 = vpop.f32.mrb[65].mxu1  ;;  %9738 = vmatmul.mubr.f32.gmra.mrb[170].mxu1 %v10052_v9  ;;  %1216 = vmatprep.mubr.f32.mxu0 %v10109_v0 }
 0x19f   :  { %9740 = vmatprep.mubr.f32.mxu1 %v10053_v45 }
 0x1a1   :  { %v10502_v18 = vpop.f32.mrb[66].mxu1  ;;  %1217 = vmatmul.mubr.f32.gmra.mrb[60].mxu0 %v10472_v42 }
 0x1a2   :  { %17959 = vst [vmem:[#allocation14_spill] sm:$0xff] %v10502_v18  ;;  %v1478_v34 = vpop.f32.mrb[67].mxu1  ;;  %9741 = vmatmul.mubr.f32.gmra.mrb[172].mxu1 %v10054_v56  ;;  %1222 = vmatprep.mubr.f32.mxu0 %v10109_v0 }
 0x1a3   :  { %9743 = vmatprep.mubr.f32.mxu1 %v10055_v55 }
 0x1a5   :  { %v10506_v39 = vpop.f32.mrb[68].mxu1  ;;  %1223 = vmatmul.mubr.f32.gmra.mrb[62].mxu0 %v10478_v46 }
 0x1a6   :  { %17960 = vst [vmem:[#allocation15_spill] sm:$0xff] %v10506_v39  ;;  %v1483_v8 = vpop.f32.mrb[69].mxu1  ;;  %9744 = vmatmul.mubr.f32.gmra.mrb[174].mxu1 %v10056_v35 }
 0x1a9   :  { %v10509_v1 = vpop.f32.mrb[70].mxu1 }
 0x1aa   :  { %17961 = vst [vmem:[#allocation16_spill] sm:$0xff] %v10509_v1  ;;  %v1488_v14 = vpop.f32.mrb[71].mxu1 }
 0x1ad   :  { %v10511_v30 = vpop.f32.mrb[72].mxu1 }
 0x1ae   :  { %17962 = vst [vmem:[#allocation17_spill] sm:$0xff] %v10511_v30  ;;  %v1493_v42 = vpop.f32.mrb[73].mxu1  ;;  %v10111_v30 = vmov 1966171168  }
 0x1b1   :  { %v10513_v9 = vpop.f32.mrb[74].mxu1 }
 0x1b2   :  { %17963 = vst [vmem:[#allocation18_spill] sm:$0xff] %v10513_v9  ;;  %v1498_v45 = vpop.f32.mrb[75].mxu1  ;;  %v2518_v9 = vunpack.c.l.s4 %v10111_v30 }
 0x1b4   :  { %v2519_v18 = vunpack.c.0.s8 %v2518_v9 }
 0x1b5   :  { %v10515_v34 = vpop.f32.mrb[76].mxu1 }
 0x1b6   :  { %17964 = vst [vmem:[#allocation19_spill] sm:$0xff] %v10515_v34  ;;  %v1503_v0 = vpop.f32.mrb[77].mxu1 }
 0x1b9   :  { %v10517_v56 = vpop.f32.mrb[78].mxu1 }
 0x1ba   :  { %17965 = vst [vmem:[#allocation20_spill] sm:$0xff] %v10517_v56  ;;  %v1508_v55 = vpop.f32.mrb[79].mxu1 }
 0x1bc   :  { %v877_v39 = vpop.f32.mrb[64].mxu0 }
 0x1bd   :  { %v10520_v46 = vadd.f32 %v10365_v50, %v877_v39  ;;  %v10522_v8 = vpop.f32.mrb[80].mxu1  ;;  %v879_v35 = vpop.f32.mrb[65].mxu0 }
 0x1be   :  { %17966 = vst [vmem:[#allocation21_spill] sm:$0xff] %v10522_v8  ;;  %v10525_v14 = vadd.f32 %v10367_v51, %v879_v35  ;;  %v1513_v42 = vpop.f32.mrb[81].mxu1 }
 0x1c0   :  { %v883_v34 = vpop.f32.mrb[66].mxu0 }
 0x1c1   :  { %v10532_v55 = vadd.f32 %v10370_v31, %v883_v34  ;;  %v10534_v56 = vpop.f32.mrb[82].mxu1  ;;  %v885_v50 = vpop.f32.mrb[67].mxu0 }
 0x1c2   :  { %17967 = vst [vmem:[#allocation22_spill] sm:$0xff] %v10534_v56  ;;  %v10537_v39 = vadd.f32 %v10372_v54, %v885_v50  ;;  %v1518_v8 = vpop.f32.mrb[83].mxu1 }
 0x1c4   :  { %v889_v42 = vpop.f32.mrb[68].mxu0 }
 0x1c5   :  { %v10544_v0 = vadd.f32 %v10374_v58, %v889_v42  ;;  %v10546_v45 = vpop.f32.mrb[84].mxu1  ;;  %v891_v31 = vpop.f32.mrb[69].mxu0 }
 0x1c6   :  { %17968 = vst [vmem:[#allocation23_spill] sm:$0xff] %v10546_v45  ;;  %v10549_v34 = vadd.f32 %v10376_v59, %v891_v31  ;;  %v1523_v56 = vpop.f32.mrb[85].mxu1 }
 0x1c8   :  { %v895_v50 = vpop.f32.mrb[70].mxu0 }
 0x1c9   :  { %v10556_v35 = vadd.f32 %v10379_v44, %v895_v50  ;;  %v10558_v51 = vpop.f32.mrb[86].mxu1  ;;  %v897_v58 = vpop.f32.mrb[71].mxu0 }
 0x1ca   :  { %17969 = vst [vmem:[#allocation24_spill] sm:$0xff] %v10558_v51  ;;  %v10561_v42 = vadd.f32 %v10381_v60, %v897_v58  ;;  %v1528_v45 = vpop.f32.mrb[87].mxu1 }
 0x1cc   :  { %v901_v31 = vpop.f32.mrb[72].mxu0 }
 0x1cd   :  { %v10568_v8 = vadd.f32 %v10384_v62, %v901_v31  ;;  %v10570_v54 = vpop.f32.mrb[88].mxu1  ;;  %v903_v44 = vpop.f32.mrb[73].mxu0 }
 0x1ce   :  { %17970 = vst [vmem:[#allocation25_spill] sm:$0xff] %v10570_v54  ;;  %v10573_v50 = vadd.f32 %v10386_v63, %v903_v44  ;;  %v1533_v51 = vpop.f32.mrb[89].mxu1 }
 0x1d0   :  { %v907_v58 = vpop.f32.mrb[74].mxu0 }
 0x1d1   :  { %v10580_v56 = vadd.f32 %v10389_v57, %v907_v58  ;;  %v10582_v59 = vpop.f32.mrb[90].mxu1  ;;  %v909_v62 = vpop.f32.mrb[75].mxu0 }
 0x1d2   :  { %17971 = vst [vmem:[#allocation26_spill] sm:$0xff] %v10582_v59  ;;  %v10585_v31 = vadd.f32 %v10391_v2, %v909_v62  ;;  %v1538_v54 = vpop.f32.mrb[91].mxu1 }
 0x1d4   :  { %v913_v44 = vpop.f32.mrb[76].mxu0 }
 0x1d5   :  { %v10592_v45 = vadd.f32 %v10394_v4, %v913_v44  ;;  %v10594_v60 = vpop.f32.mrb[92].mxu1  ;;  %v915_v57 = vpop.f32.mrb[77].mxu0 }
 0x1d6   :  { %17972 = vst [vmem:[#allocation27_spill] sm:$0xff] %v10594_v60  ;;  %v10597_v58 = vadd.f32 %v10396_v5, %v915_v57  ;;  %v1543_v59 = vpop.f32.mrb[93].mxu1 }
 0x1d8   :  { %v919_v62 = vpop.f32.mrb[78].mxu0 }
 0x1d9   :  { %v10604_v51 = vadd.f32 %v10399_v6, %v919_v62  ;;  %v10606_v63 = vpop.f32.mrb[94].mxu1  ;;  %v921_v4 = vpop.f32.mrb[79].mxu0 }
 0x1da   :  { %17973 = vst [vmem:[#allocation28_spill] sm:$0xff] %v10606_v63  ;;  %v10609_v44 = vadd.f32 %v10401_v7, %v921_v4  ;;  %v1548_v60 = vpop.f32.mrb[95].mxu1 }
 0x1dc   :  { %v925_v57 = vpop.f32.mrb[80].mxu0 }
 0x1dd   :  { %v10616_v54 = vadd.f32 %v10404_v10, %v925_v57  ;;  %v10618_v2 = vpop.f32.mrb[96].mxu1  ;;  %v927_v6 = vpop.f32.mrb[81].mxu0 }
 0x1de   :  { %17974 = vst [vmem:[#allocation29_spill] sm:$0xff] %v10618_v2  ;;  %v10621_v62 = vadd.f32 %v10406_v11, %v927_v6  ;;  %v1553_v63 = vpop.f32.mrb[97].mxu1 }
 0x1e0   :  { %v931_v4 = vpop.f32.mrb[82].mxu0 }
 0x1e1   :  { %v10628_v59 = vadd.f32 %v10410_v15, %v931_v4  ;;  %v10630_v5 = vpop.f32.mrb[98].mxu1  ;;  %v933_v10 = vpop.f32.mrb[83].mxu0 }
 0x1e2   :  { %17975 = vst [vmem:[#allocation30_spill] sm:$0xff] %v10630_v5  ;;  %v10633_v57 = vadd.f32 %v10412_v21, %v933_v10  ;;  %v1558_v2 = vpop.f32.mrb[99].mxu1 }
 0x1e4   :  { %v937_v6 = vpop.f32.mrb[84].mxu0 }
 0x1e5   :  { %v10640_v60 = vadd.f32 %v10415_v17, %v937_v6  ;;  %v10642_v7 = vpop.f32.mrb[100].mxu1  ;;  %v939_v15 = vpop.f32.mrb[85].mxu0 }
 0x1e6   :  { %17976 = vst [vmem:[#allocation31_spill] sm:$0xff] %v10642_v7  ;;  %v10645_v4 = vadd.f32 %v10417_v19, %v939_v15  ;;  %v1563_v5 = vpop.f32.mrb[101].mxu1 }
 0x1e8   :  { %v943_v10 = vpop.f32.mrb[86].mxu0 }
 0x1e9   :  { %v10652_v63 = vadd.f32 %v10420_v29, %v943_v10  ;;  %v10654_v11 = vpop.f32.mrb[102].mxu1  ;;  %v945_v17 = vpop.f32.mrb[87].mxu0 }
 0x1ea   :  { %17977 = vst [vmem:[#allocation32_spill] sm:$0xff] %v10654_v11  ;;  %v10657_v6 = vadd.f32 %v10422_v20, %v945_v17  ;;  %v1568_v7 = vpop.f32.mrb[103].mxu1 }
 0x1ec   :  { %v949_v15 = vpop.f32.mrb[88].mxu0 }
 0x1ed   :  { %v10664_v2 = vadd.f32 %v10425_v16, %v949_v15  ;;  %v10666_v21 = vpop.f32.mrb[104].mxu1  ;;  %v951_v29 = vpop.f32.mrb[89].mxu0 }
 0x1ee   :  { %17978 = vst [vmem:[#allocation33_spill] sm:$0xff] %v10666_v21  ;;  %v10669_v10 = vadd.f32 %v10427_v22, %v951_v29  ;;  %v1573_v11 = vpop.f32.mrb[105].mxu1 }
 0x1f0   :  { %v955_v17 = vpop.f32.mrb[90].mxu0 }
 0x1f1   :  { %v10676_v5 = vadd.f32 %v10430_v23, %v955_v17  ;;  %v10678_v19 = vpop.f32.mrb[106].mxu1  ;;  %v957_v16 = vpop.f32.mrb[91].mxu0 }
 0x1f2   :  { %17979 = vst [vmem:[#allocation34_spill] sm:$0xff] %v10678_v19  ;;  %v10681_v15 = vadd.f32 %v10432_v24, %v957_v16  ;;  %v1578_v21 = vpop.f32.mrb[107].mxu1 }
 0x1f4   :  { %v961_v29 = vpop.f32.mrb[92].mxu0 }
 0x1f5   :  { %v10688_v7 = vadd.f32 %v10435_v27, %v961_v29  ;;  %v10690_v20 = vpop.f32.mrb[108].mxu1  ;;  %v963_v23 = vpop.f32.mrb[93].mxu0 }
 0x1f6   :  { %17981 = vst [vmem:[#allocation36_spill] sm:$0xff] %v10690_v20  ;;  %v10693_v17 = vadd.f32 %v10437_v28, %v963_v23  ;;  %v1583_v19 = vpop.f32.mrb[109].mxu1 }
 0x1f7   :  { %17980 = vst [vmem:[#allocation35_spill] sm:$0xff] %v10688_v7  ;;  %v17916_v19 = vlaneseq }
 0x1f8   :  { %17982 = vst [vmem:[#allocation37_spill] sm:$0xff] %v10693_v17  ;;  %v967_v16 = vpop.f32.mrb[94].mxu0 }
 0x1f9   :  { %v10700_v11 = vadd.f32 %v10440_v32, %v967_v16  ;;  %v10702_v22 = vpop.f32.mrb[110].mxu1  ;;  %v969_v27 = vpop.f32.mrb[95].mxu0 }
 0x1fa   :  { %17983 = vst [vmem:[#allocation38_spill] sm:$0xff] %v10702_v22  ;;  %v10705_v29 = vadd.f32 %v10442_v33, %v969_v27  ;;  %v1588_v20 = vpop.f32.mrb[111].mxu1  ;;  %v2521_v33 = vshrl.u32 %v17916_v19, 7 }
 0x1fc   :  { %v10711_v23 = vpop.f32.mrb[0].mxu0  ;;  %v10762_v3 = vsub.s32 %v2519_v18, %v2521_v33  ;;  %v17992_v18 = vcombine.high %v10520_v46, %v10525_v14 }
 0x1fd   :  { %v10713_v21 = vpop.f32.mrb[112].mxu1  ;;  %v10715_v24 = vpop.f32.mrb[1].mxu0 }
 0x1fe   :  { %17984 = vst [vmem:[#allocation39_spill] sm:$0xff] %v10713_v21  ;;  %v1593_v16 = vpop.f32.mrb[113].mxu1  ;;  %v10784_v33 = vrot.slane %v17992_v18, %v10762_v3  ;;  %v18000_v18 = vcombine.low %v10556_v35, %v10561_v42 }
 0x200   :  { %v10721_v20 = vpop.f32.mrb[2].mxu0  ;;  %17993 = vst [vmem:[#allocation46_spill] sm:$0xff] %v10784_v33 }
 0x201   :  { %v10723_v27 = vpop.f32.mrb[114].mxu1  ;;  %v10725_v28 = vpop.f32.mrb[3].mxu0 }
 0x202   :  { %17985 = vst [vmem:[#allocation40_spill] sm:$0xff] %v10723_v27  ;;  %v1598_v7 = vpop.f32.mrb[115].mxu1 }
 0x204   :  { %v10731_v21 = vpop.f32.mrb[4].mxu0 }
 0x205   :  { %v10733_v32 = vpop.f32.mrb[116].mxu1  ;;  %v10735_v22 = vpop.f32.mrb[5].mxu0 }
 0x206   :  { %17986 = vst [vmem:[#allocation41_spill] sm:$0xff] %v10733_v32  ;;  %v1603_v27 = vpop.f32.mrb[117].mxu1 }
 0x208   :  { %v10741_v1 = vpop.f32.mrb[6].mxu0 }
 0x209   :  { %v10743_v17 = vpop.f32.mrb[118].mxu1  ;;  %v10745_v7 = vpop.f32.mrb[7].mxu0 }
 0x20a   :  { %17987 = vst [vmem:[#allocation42_spill] sm:$0xff] %v10743_v17  ;;  %v1608_v16 = vpop.f32.mrb[119].mxu1 }
 0x20c   :  { %v10752_v27 = vpop.f32.mrb[8].mxu0 }
 0x20d   :  { %v10754_v30 = vpop.f32.mrb[120].mxu1  ;;  %v10756_v49 = vpop.f32.mrb[9].mxu0 }
 0x20e   :  { %17988 = vst [vmem:[#allocation43_spill] sm:$0xff] %v10754_v30  ;;  %v2782_v17 = vcombine.low %v10752_v27, %v10756_v49  ;;  %v2783_v61 = vcombine.high %v10752_v27, %v10756_v49  ;;  %v1613_v32 = vpop.f32.mrb[121].mxu1  ;;  %v17990_v49 = vcombine.low %v10520_v46, %v10525_v14  ;;  %v17994_v27 = vcombine.low %v10532_v55, %v10537_v39 }
 0x20f   :  { %v17998_v46 = vcombine.high %v10544_v0, %v10549_v34 }
 0x210   :  { %v10764_v25 = vpop.f32.mrb[10].mxu0  ;;  %v10778_v32 = vrot.slane %v17990_v49, %v10762_v3 }
 0x211   :  { %v10766_v9 = vpop.f32.mrb[122].mxu1  ;;  %v10768_v16 = vpop.f32.mrb[11].mxu0  ;;  %v10808_v14 = vrot.slane %v17998_v46, %v10762_v3 }
 0x212   :  { %17989 = vst [vmem:[#allocation44_spill] sm:$0xff] %v10766_v9  ;;  %v2849_v19 = vcombine.low %v10764_v25, %v10768_v16  ;;  %v2850_v30 = vcombine.high %v10764_v25, %v10768_v16  ;;  %v1618_v38 = vpop.f32.mrb[123].mxu1  ;;  %17991 = vst [vmem:[#allocation45_spill] sm:$0xff] %v10778_v32  ;;  %v10790_v9 = vrot.slane %v17994_v27, %v10762_v3 }
 0x213   :  { %v17995_v38 = vcombine.high %v10532_v55, %v10537_v39  ;;  %v17996_v16 = vcombine.low %v10544_v0, %v10549_v34  ;;  %17999 = vst [vmem:[#allocation48_spill] sm:$0xff] %v10808_v14  ;;  %v10814_v27 = vrot.slane %v18000_v18, %v10762_v3  ;;  %v18002_v39 = vcombine.high %v10556_v35, %v10561_v42 }
 0x214   :  { %v1074_v55 = vpop.f32.mrb[12].mxu0  ;;  %v18006_v34 = vcombine.high %v10568_v8, %v10573_v50  ;;  %v18008_v18 = vcombine.low %v10580_v56, %v10585_v31 }
 0x215   :  { %v10796_v25 = vrot.slane %v17995_v38, %v10762_v3  ;;  %v10802_v49 = vrot.slane %v17996_v16, %v10762_v3  ;;  %18001 = vst [vmem:[#allocation49_spill] sm:$0xff] %v10814_v27  ;;  %v10820_v38 = vrot.slane %v18002_v39, %v10762_v3  ;;  %v18004_v16 = vcombine.low %v10568_v8, %v10573_v50  ;;  %v10840_v35 = vpop.f32.mrb[124].mxu1  ;;  %v1076_v42 = vpop.f32.mrb[13].mxu0 }
 0x216   :  { %v10832_v46 = vrot.slane %v18006_v34, %v10762_v3  ;;  %v10838_v14 = vrot.slane %v18008_v18, %v10762_v3  ;;  %18010 = vst [vmem:[#allocation54_spill] sm:$0xff] %v10840_v35  ;;  %v18011_v39 = vcombine.high %v10580_v56, %v10585_v31  ;;  %v18013_v8 = vcombine.low %v10592_v45, %v10597_v58 }
 0x217   :  { %17997 = vst [vmem:[#allocation47_spill] sm:$0xff] %v10802_v49  ;;  %18003 = vst [vmem:[#allocation50_spill] sm:$0xff] %v10820_v38  ;;  %v10826_v0 = vrot.slane %v18004_v16, %v10762_v3  ;;  %v2916_v34 = vcombine.low %v1074_v55, %v1076_v42  ;;  %v18015_v18 = vcombine.high %v10592_v45, %v10597_v58 }
 0x218   :  { %18007 = vst [vmem:[#allocation52_spill] sm:$0xff] %v10832_v46  ;;  %18009 = vst [vmem:[#allocation53_spill] sm:$0xff] %v10838_v14  ;;  %v10846_v16 = vrot.slane %v18011_v39, %v10762_v3  ;;  %v10852_v50 = vrot.slane %v18013_v8, %v10762_v3  ;;  %v2917_v46 = vcombine.high %v1074_v55, %v1076_v42 }
 0x219   :  { %18005 = vst [vmem:[#allocation51_spill] sm:$0xff] %v10826_v0  ;;  %v1623_v0 = vpop.f32.mrb[125].mxu1  ;;  %v10858_v35 = vrot.slane %v18015_v18, %v10762_v3  ;;  %v18017_v56 = vcombine.low %v10604_v51, %v10609_v44  ;;  %v18019_v39 = vcombine.high %v10604_v51, %v10609_v44  ;;  %v18021_v55 = vcombine.low %v10616_v54, %v10621_v62 }
 0x21a   :  { %18012 = vst [vmem:[#allocation55_spill] sm:$0xff] %v10846_v16  ;;  %18014 = vst [vmem:[#allocation56_spill] sm:$0xff] %v10852_v50  ;;  %v18023_v45 = vcombine.high %v10616_v54, %v10621_v62  ;;  %v18025_v42 = vcombine.low %v10628_v59, %v10633_v57  ;;  %v18027_v51 = vcombine.high %v10628_v59, %v10633_v57  ;;  %v1080_v54 = vpop.f32.mrb[14].mxu0 }
 0x21b   :  { %18016 = vst [vmem:[#allocation57_spill] sm:$0xff] %v10858_v35  ;;  %v10864_v31 = vrot.slane %v18017_v56, %v10762_v3  ;;  %v10870_v8 = vrot.slane %v18019_v39, %v10762_v3  ;;  %v10876_v0 = vrot.slane %v18021_v55, %v10762_v3  ;;  %v18029_v56 = vcombine.low %v10640_v60, %v10645_v4 }
 0x21c   :  { %v10882_v58 = vrot.slane %v18023_v45, %v10762_v3  ;;  %v10888_v18 = vrot.slane %v18025_v42, %v10762_v3  ;;  %v10894_v44 = vrot.slane %v18027_v51, %v10762_v3  ;;  %v18031_v62 = vcombine.high %v10640_v60, %v10645_v4  ;;  %v10926_v60 = vpop.f32.mrb[126].mxu1  ;;  %v1082_v4 = vpop.f32.mrb[15].mxu0 }
 0x21d   :  { %18018 = vst [vmem:[#allocation58_spill] sm:$0xff] %v10864_v31  ;;  %18020 = vst [vmem:[#allocation59_spill] sm:$0xff] %v10870_v8  ;;  %v10900_v39 = vrot.slane %v18029_v56, %v10762_v3  ;;  %v18033_v45 = vcombine.low %v10652_v63, %v10657_v6  ;;  %v18035_v57 = vcombine.high %v10652_v63, %v10657_v6 }
 0x21e   :  { %18022 = vst [vmem:[#allocation60_spill] sm:$0xff] %v10876_v0  ;;  %18024 = vst [vmem:[#allocation61_spill] sm:$0xff] %v10882_v58  ;;  %v10906_v55 = vrot.slane %v18031_v62, %v10762_v3  ;;  %v18037_v51 = vcombine.low %v10664_v2, %v10669_v10  ;;  %v18040_v62 = vcombine.high %v10664_v2, %v10669_v10 }
 0x21f   :  { %18026 = vst [vmem:[#allocation62_spill] sm:$0xff] %v10888_v18  ;;  %18028 = vst [vmem:[#allocation63_spill] sm:$0xff] %v10894_v44  ;;  %v10912_v59 = vrot.slane %v18033_v45, %v10762_v3  ;;  %v10918_v42 = vrot.slane %v18035_v57, %v10762_v3  ;;  %v18042_v63 = vcombine.low %v10676_v5, %v10681_v15 }
 0x220   :  { %18030 = vst [vmem:[#allocation64_spill] sm:$0xff] %v10900_v39  ;;  %18032 = vst [vmem:[#allocation65_spill] sm:$0xff] %v10906_v55  ;;  %v10924_v56 = vrot.slane %v18037_v51, %v10762_v3  ;;  %v10932_v45 = vrot.slane %v18040_v62, %v10762_v3  ;;  %v2983_v57 = vcombine.low %v1080_v54, %v1082_v4  ;;  %v1628_v39 = vpop.f32.mrb[127].mxu1 }
 0x221   :  { %18034 = vst [vmem:[#allocation66_spill] sm:$0xff] %v10912_v59  ;;  %18036 = vst [vmem:[#allocation67_spill] sm:$0xff] %v10918_v42  ;;  %v10938_v6 = vrot.slane %v18042_v63, %v10762_v3  ;;  %v2984_v55 = vcombine.high %v1080_v54, %v1082_v4  ;;  %v18044_v51 = vcombine.high %v10676_v5, %v10681_v15  ;;  %v18050_v5 = vlaneseq }
 0x222   :  { %18038 = vst [vmem:[#allocation68_spill] sm:$0xff] %v10924_v56  ;;  %18039 = vst [vmem:[#allocation69_spill] sm:$0xff] %v10926_v60  ;;  %v18046_v2 = vcombine.low %v10700_v11, %v10705_v29  ;;  %v18048_v62 = vcombine.low %v10711_v23, %v10715_v24  ;;  %v18049_v39 = vcombine.high %v10711_v23, %v10715_v24 }
 0x223   :  { %18041 = vst [vmem:[#allocation70_spill] sm:$0xff] %v10932_v45  ;;  %18043 = vst [vmem:[#allocation71_spill] sm:$0xff] %v10938_v6  ;;  %v10944_v56 = vrot.slane %v18044_v51, %v10762_v3  ;;  %vm10963_vm0 = vcmp.lt.s32.totalorder %v18050_v5, 384  ;;  %v18053_v4 = vcombine.low %v10721_v20, %v10725_v28  ;;  %v18055_v24 = vcombine.low %v10731_v21, %v10735_v22 }
 0x224   :  { %v10950_v10 = vrot.slane %v18046_v2, %v10762_v3  ;;  %v2523_v63 = vrot.slane %v18048_v62, %v10762_v3  ;;  %v10960_v54 = vrot.slane %v18049_v39, %v10762_v3  ;;  %v18054_v2 = vcombine.high %v10721_v20, %v10725_v28 }
 0x225   :  { %18045 = vst [vmem:[#allocation72_spill] sm:$0xff] %v10944_v56  ;;  %v2590_v51 = vrot.slane %v18053_v4, %v10762_v3  ;;  %v10979_v23 = vrot.slane %v18055_v24, %v10762_v3  ;;  %v18056_v39 = vcombine.high %v10731_v21, %v10735_v22  ;;  %v18057_v4 = vcombine.low %v10741_v1, %v10745_v7  ;;  %v9676_v21 = vpop.f32.mrb[128].mxu1 }
 0x226   :  { %18047 = vst [vmem:[#allocation73_spill] sm:$0xff] %v10950_v10  ;;  %v2597_v62 = vrot.slane %v18054_v2, %v10762_v3  ;;  %v1086_v10 = vpop.f32.mrb[16].mxu0  ;;  %v18058_v28 = vcombine.high %v10741_v1, %v10745_v7  ;;  %v11000_v2 = vrot.slane %v2782_v17, %v10762_v3  ;;  %v11003_v22 = vrot.slane %v2783_v61, %v10762_v3  ;;  %v1696_v6 = vpop.f32.mrb[129].mxu1 }
 0x227   :  { %v10985_v5 = vrot.slane %v18056_v39, %v10762_v3  ;;  %v10991_v45 = vrot.slane %v18057_v4, %v10762_v3  ;;  %v1088_v24 = vpop.f32.mrb[17].mxu0  ;;  %v11006_v39 = vrot.slane %v2849_v19, %v10762_v3  ;;  %v1702_v4 = vadd.f32 %v9676_v21, %v10448_v40 }
 0x228   :  { %v10997_v20 = vrot.slane %v18058_v28, %v10762_v3  ;;  %v3050_v60 = vcombine.low %v1086_v10, %v1088_v24  ;;  %v3051_v56 = vcombine.high %v1086_v10, %v1088_v24  ;;  %v11010_v1 = vrot.slane %v2850_v30, %v10762_v3  ;;  %v11026_v21 = vpop.f32.mrb[18].mxu0 }
 0x229   :  { %v11013_v7 = vrot.slane %v2916_v34, %v10762_v3  ;;  %v11016_v17 = vrot.slane %v2917_v46, %v10762_v3  ;;  %v1697_v61 = vadd.f32 %v1696_v6, %v10445_v36  ;;  %v11020_v28 = vrot.slane %v2983_v57, %v10762_v3  ;;  %v9679_v6 = vpop.f32.mrb[130].mxu1  ;;  %v11035_v57 = vpop.f32.mrb[19].mxu0 }
 0x22a   :  { %v11023_v19 = vrot.slane %v2984_v55, %v10762_v3  ;;  %v2583_v40 = vcombine.high %v1702_v4, %v1702_v4  ;;  %v2604_v10 = vrot.slane %v1702_v4, %v10762_v3  ;;  %v11029_v30 = vrot.slane %v3050_v60, %v10762_v3  ;;  %v11041_v59 = vpop.f32.mrb[131].mxu1  ;;  %v11048_v35 = vpop.f32.mrb[20].mxu0 }
 0x22b   :  { %v11032_v34 = vrot.slane %v3051_v56, %v10762_v3  ;;  %v2516_v46 = vcombine.high %v1697_v61, %v1697_v61  ;;  %v2537_v36 = vrot.slane %v1697_v61, %v10762_v3  ;;  %v11039_v4 = vadd.f32 %v9679_v6, %v10454_v48 }
 0x22c   :  { %v2611_v55 = vrot.slane %v2583_v40, %v10762_v3  ;;  %v2612_v24 = vcombine.low %v2590_v51, %v2604_v10  ;;  %v2613_v42 = vcombine.high %v2590_v51, %v2604_v10  ;;  %v3117_v0 = vcombine.low %v11026_v21, %v11035_v57 }
 0x22d   :  { %v2544_v60 = vrot.slane %v2516_v46, %v10762_v3  ;;  %v2545_v58 = vcombine.low %v2523_v63, %v2537_v36  ;;  %v2546_v56 = vcombine.high %v2523_v63, %v2537_v36  ;;  %v11054_v63 = vpop.f32.mrb[132].mxu1  ;;  %v11056_v36 = vpop.f32.mrb[21].mxu0 }
 0x22e   :  { %v2614_v61 = vcombine.low %v2597_v62, %v2611_v55  ;;  %v2615_v44 = vcombine.high %v2597_v62, %v2611_v55  ;;  %v2622_v18 = vrot.slane %v2612_v24, %v10762_v3  ;;  %v2636_v40 = vrot.slane %v2613_v42, %v10762_v3 }
 0x22f   :  { %v2547_v48 = vcombine.low %v10960_v54, %v2544_v60  ;;  %v2548_v51 = vcombine.high %v10960_v54, %v2544_v60  ;;  %v2555_v10 = vrot.slane %v2545_v58, %v10762_v3  ;;  %v2569_v46 = vrot.slane %v2546_v56, %v10762_v3  ;;  %v11090_v58 = vpop.f32.mrb[133].mxu1 }
 0x230   :  { %v2629_v62 = vrot.slane %v2614_v61, %v10762_v3  ;;  %v2643_v6 = vrot.slane %v2615_v44, %v10762_v3  ;;  %v2644_v55 = vcombine.high %v2622_v18, %v2622_v18  ;;  %v2646_v42 = vcombine.high %v2636_v40, %v2636_v40  ;;  %8434 = vst.msk [vmem:[%s17911_s2 + $0x60] ss:$4 sm:$0x7] %vm10963_vm0, %v2622_v18 }
 0x231   :  { %8435 = vst.msk [vmem:[%s17911_s2 + $0x6c] ss:$4 sm:$0x7] %vm10963_vm0, %v2636_v40  ;;  %8818 = vst.msk [vmem:[%s17911_s2 + $0x61] ss:$4 sm:$0x7] %vm10963_vm0, %v2622_v18  ;;  %v2562_v44 = vrot.slane %v2547_v48, %v10762_v3  ;;  %v2576_v54 = vrot.slane %v2548_v51, %v10762_v3  ;;  %v2577_v24 = vcombine.high %v2555_v10, %v2555_v10 }
 0x232   :  { %8819 = vst.msk [vmem:[%s17911_s2 + $0x6d] ss:$4 sm:$0x7] %vm10963_vm0, %v2636_v40  ;;  %9202 = vst.msk [vmem:[%s17911_s2 + $0x62] ss:$4 sm:$0x7] %vm10963_vm0, %v2622_v18  ;;  %v2579_v60 = vcombine.high %v2569_v46, %v2569_v46  ;;  %v2645_v18 = vcombine.high %v2629_v62, %v2629_v62  ;;  %v2647_v56 = vcombine.high %v2643_v6, %v2643_v6 }
 0x233   :  { %9203 = vst.msk [vmem:[%s17911_s2 + $0x6e] ss:$4 sm:$0x7] %vm10963_vm0, %v2636_v40  ;;  %6118 = vst.msk [vmem:[%s17911_s2] ss:$4 sm:$0x7] %vm10963_vm0, %v2555_v10  ;;  %v2717_v61 = vcombine.high %v11039_v4, %v11039_v4  ;;  %v2738_v40 = vrot.slane %v11039_v4, %v10762_v3  ;;  %v2578_v51 = vcombine.high %v2562_v44, %v2562_v44 }
 0x234   :  { %8427 = vst.msk [vmem:[%s17911_s2 + $0xc] ss:$4 sm:$0x7] %vm10963_vm0, %v2569_v46  ;;  %8810 = vst.msk [vmem:[%s17911_s2 + $0x1] ss:$4 sm:$0x7] %vm10963_vm0, %v2555_v10  ;;  %v3118_v4 = vcombine.high %v11026_v21, %v11035_v57 }
 0x235   :  { %8811 = vst.msk [vmem:[%s17911_s2 + $0xd] ss:$4 sm:$0x7] %vm10963_vm0, %v2569_v46  ;;  %9194 = vst.msk [vmem:[%s17911_s2 + $0x2] ss:$4 sm:$0x7] %vm10963_vm0, %v2555_v10  ;;  %v2580_v10 = vcombine.high %v2576_v54, %v2576_v54  ;;  %v2746_v21 = vcombine.low %v10991_v45, %v2738_v40  ;;  %v2747_v57 = vcombine.high %v10991_v45, %v2738_v40 }
 0x236   :  { %9195 = vst.msk [vmem:[%s17911_s2 + $0xe] ss:$4 sm:$0x7] %vm10963_vm0, %v2569_v46  ;;  %8436 = vst.msk [vmem:[%s17911_s2 + $0x78] ss:$4 sm:$0x7] %vm10963_vm0, %v2644_v55  ;;  %v11256_v46 = vrot.slane %v3117_v0, %v10762_v3  ;;  %v2745_v0 = vrot.slane %v2717_v61, %v10762_v3 }
 0x237   :  { %8437 = vst.msk [vmem:[%s17911_s2 + $0x84] ss:$4 sm:$0x7] %vm10963_vm0, %v2646_v42  ;;  %8438 = vst.msk [vmem:[%s17911_s2 + $0x90] ss:$4 sm:$0x7] %vm10963_vm0, %v2629_v62 }
 0x238   :  { %8439 = vst.msk [vmem:[%s17911_s2 + $0x9c] ss:$4 sm:$0x7] %vm10963_vm0, %v2643_v6  ;;  %8820 = vst.msk [vmem:[%s17911_s2 + $0x79] ss:$4 sm:$0x7] %vm10963_vm0, %v2644_v55 }
 0x239   :  { %8821 = vst.msk [vmem:[%s17911_s2 + $0x85] ss:$4 sm:$0x7] %vm10963_vm0, %v2646_v42  ;;  %8822 = vst.msk [vmem:[%s17911_s2 + $0x91] ss:$4 sm:$0x7] %vm10963_vm0, %v2629_v62 }
 0x23a   :  { %8823 = vst.msk [vmem:[%s17911_s2 + $0x9d] ss:$4 sm:$0x7] %vm10963_vm0, %v2643_v6  ;;  %9204 = vst.msk [vmem:[%s17911_s2 + $0x7a] ss:$4 sm:$0x7] %vm10963_vm0, %v2644_v55  ;;  %v1707_v55 = vadd.f32 %v11041_v59, %v10451_v13  ;;  %v11330_v13 = vrot.slane %v3118_v4, %v10762_v3  ;;  %v1722_v59 = vadd.f32 %v11054_v63, %v10460_v52 }
 0x23b   :  { %9205 = vst.msk [vmem:[%s17911_s2 + $0x86] ss:$4 sm:$0x7] %vm10963_vm0, %v2646_v42  ;;  %9206 = vst.msk [vmem:[%s17911_s2 + $0x92] ss:$4 sm:$0x7] %vm10963_vm0, %v2629_v62 }
 0x23c   :  { %9207 = vst.msk [vmem:[%s17911_s2 + $0x9e] ss:$4 sm:$0x7] %vm10963_vm0, %v2643_v6  ;;  %v11188_v48 = vpop.f32.mrb[22].mxu0  ;;  %v11258_v62 = vpop.f32.mrb[134].mxu1  ;;  %v2650_v61 = vcombine.high %v1707_v55, %v1707_v55  ;;  %v2671_v40 = vrot.slane %v1707_v55, %v10762_v3  ;;  %v2851_v52 = vcombine.high %v1722_v59, %v1722_v59  ;;  %v2872_v63 = vrot.slane %v1722_v59, %v10762_v3 }
 0x23d   :  { %8428 = vst.msk [vmem:[%s17911_s2 + $0x18] ss:$4 sm:$0x7] %vm10963_vm0, %v2577_v24  ;;  %8429 = vst.msk [vmem:[%s17911_s2 + $0x24] ss:$4 sm:$0x7] %vm10963_vm0, %v2579_v60 }
 0x23e   :  { %8430 = vst.msk [vmem:[%s17911_s2 + $0x30] ss:$4 sm:$0x7] %vm10963_vm0, %v2562_v44  ;;  %8431 = vst.msk [vmem:[%s17911_s2 + $0x3c] ss:$4 sm:$0x7] %vm10963_vm0, %v2576_v54  ;;  %v2678_v55 = vrot.slane %v2650_v61, %v10762_v3  ;;  %v2679_v59 = vcombine.low %v10979_v23, %v2671_v40 }
 0x23f   :  { %8812 = vst.msk [vmem:[%s17911_s2 + $0x19] ss:$4 sm:$0x7] %vm10963_vm0, %v2577_v24  ;;  %8813 = vst.msk [vmem:[%s17911_s2 + $0x25] ss:$4 sm:$0x7] %vm10963_vm0, %v2579_v60 }
 0x240   :  { %8814 = vst.msk [vmem:[%s17911_s2 + $0x31] ss:$4 sm:$0x7] %vm10963_vm0, %v2562_v44  ;;  %8815 = vst.msk [vmem:[%s17911_s2 + $0x3d] ss:$4 sm:$0x7] %vm10963_vm0, %v2576_v54  ;;  %v2681_v61 = vcombine.low %v10985_v5, %v2678_v55 }
 0x241   :  { %9196 = vst.msk [vmem:[%s17911_s2 + $0x1a] ss:$4 sm:$0x7] %vm10963_vm0, %v2577_v24  ;;  %9197 = vst.msk [vmem:[%s17911_s2 + $0x26] ss:$4 sm:$0x7] %vm10963_vm0, %v2579_v60  ;;  %v2749_v24 = vcombine.high %v10997_v20, %v2745_v0  ;;  %v2756_v60 = vrot.slane %v2746_v21, %v10762_v3 }
 0x242   :  { %9198 = vst.msk [vmem:[%s17911_s2 + $0x32] ss:$4 sm:$0x7] %vm10963_vm0, %v2562_v44  ;;  %9199 = vst.msk [vmem:[%s17911_s2 + $0x3e] ss:$4 sm:$0x7] %vm10963_vm0, %v2576_v54  ;;  %v2748_v54 = vcombine.low %v10997_v20, %v2745_v0 }
 0x243   :  { %v11260_v6 = vpop.f32.mrb[23].mxu0  ;;  %8440 = vst.msk [vmem:[%s17911_s2 + $0xa8] ss:$4 sm:$0x7] %vm10963_vm0, %v2645_v18  ;;  %v11297_v42 = vpop.f32.mrb[135].mxu1  ;;  %v2777_v20 = vrot.slane %v2749_v24, %v10762_v3  ;;  %v2778_v0 = vcombine.high %v2756_v60, %v2756_v60  ;;  %v2879_v24 = vrot.slane %v2851_v52, %v10762_v3  ;;  %v2689_v52 = vrot.slane %v2679_v59, %v10762_v3 }
 0x244   :  { %8441 = vst.msk [vmem:[%s17911_s2 + $0xb4] ss:$4 sm:$0x7] %vm10963_vm0, %v2647_v56  ;;  %8824 = vst.msk [vmem:[%s17911_s2 + $0xa9] ss:$4 sm:$0x7] %vm10963_vm0, %v2645_v18  ;;  %v2763_v4 = vrot.slane %v2748_v54, %v10762_v3  ;;  %v2680_v54 = vcombine.high %v10979_v23, %v2671_v40  ;;  %v2880_v23 = vcombine.low %v11006_v39, %v2872_v63 }
 0x245   :  { %8825 = vst.msk [vmem:[%s17911_s2 + $0xb5] ss:$4 sm:$0x7] %vm10963_vm0, %v2647_v56  ;;  %9208 = vst.msk [vmem:[%s17911_s2 + $0xaa] ss:$4 sm:$0x7] %vm10963_vm0, %v2645_v18  ;;  %v2770_v18 = vrot.slane %v2747_v57, %v10762_v3  ;;  %v2781_v45 = vcombine.high %v2777_v20, %v2777_v20  ;;  %v2682_v40 = vcombine.high %v10985_v5, %v2678_v55 }
 0x246   :  { %9209 = vst.msk [vmem:[%s17911_s2 + $0xb6] ss:$4 sm:$0x7] %vm10963_vm0, %v2647_v56  ;;  %8432 = vst.msk [vmem:[%s17911_s2 + $0x48] ss:$4 sm:$0x7] %vm10963_vm0, %v2578_v51  ;;  %v2779_v44 = vcombine.high %v2763_v4, %v2763_v4  ;;  %v2882_v5 = vcombine.low %v11010_v1, %v2879_v24  ;;  %v2696_v59 = vrot.slane %v2681_v61, %v10762_v3 }
 0x247   :  { %8433 = vst.msk [vmem:[%s17911_s2 + $0x54] ss:$4 sm:$0x7] %vm10963_vm0, %v2580_v10  ;;  %8816 = vst.msk [vmem:[%s17911_s2 + $0x49] ss:$4 sm:$0x7] %vm10963_vm0, %v2578_v51  ;;  %v2780_v21 = vcombine.high %v2770_v18, %v2770_v18 }
 0x248   :  { %8817 = vst.msk [vmem:[%s17911_s2 + $0x55] ss:$4 sm:$0x7] %vm10963_vm0, %v2580_v10  ;;  %9200 = vst.msk [vmem:[%s17911_s2 + $0x4a] ss:$4 sm:$0x7] %vm10963_vm0, %v2578_v51  ;;  %v2712_v61 = vcombine.high %v2696_v59, %v2696_v59 }
 0x249   :  { %9201 = vst.msk [vmem:[%s17911_s2 + $0x56] ss:$4 sm:$0x7] %vm10963_vm0, %v2580_v10  ;;  %v11342_v56 = vpop.f32.mrb[24].mxu0  ;;  %v11346_v51 = vpop.f32.mrb[136].mxu1 }
 0x24a   :  { %v11348_v10 = vpop.f32.mrb[25].mxu0  ;;  %8450 = vst.msk [vmem:[%s17911_s2 + $0x120] ss:$4 sm:$0x7] %vm10963_vm0, %v2756_v60  ;;  %v11382_v57 = vpop.f32.mrb[137].mxu1 }
 0x24b   :  { %8451 = vst.msk [vmem:[%s17911_s2 + $0x12c] ss:$4 sm:$0x7] %vm10963_vm0, %v2770_v18  ;;  %8834 = vst.msk [vmem:[%s17911_s2 + $0x121] ss:$4 sm:$0x7] %vm10963_vm0, %v2756_v60 }
 0x24c   :  { %8835 = vst.msk [vmem:[%s17911_s2 + $0x12d] ss:$4 sm:$0x7] %vm10963_vm0, %v2770_v18  ;;  %9218 = vst.msk [vmem:[%s17911_s2 + $0x122] ss:$4 sm:$0x7] %vm10963_vm0, %v2756_v60  ;;  %v2881_v60 = vcombine.high %v11006_v39, %v2872_v63  ;;  %v2883_v39 = vcombine.high %v11010_v1, %v2879_v24  ;;  %v2890_v63 = vrot.slane %v2880_v23, %v10762_v3 }
 0x24d   :  { %9219 = vst.msk [vmem:[%s17911_s2 + $0x12e] ss:$4 sm:$0x7] %vm10963_vm0, %v2770_v18  ;;  %8452 = vst.msk [vmem:[%s17911_s2 + $0x138] ss:$4 sm:$0x7] %vm10963_vm0, %v2778_v0  ;;  %v2897_v1 = vrot.slane %v2882_v5, %v10762_v3 }
 0x24e   :  { %8453 = vst.msk [vmem:[%s17911_s2 + $0x144] ss:$4 sm:$0x7] %vm10963_vm0, %v2780_v21  ;;  %8454 = vst.msk [vmem:[%s17911_s2 + $0x150] ss:$4 sm:$0x7] %vm10963_vm0, %v2763_v4  ;;  %v2912_v24 = vcombine.high %v2890_v63, %v2890_v63 }
 0x24f   :  { %8455 = vst.msk [vmem:[%s17911_s2 + $0x15c] ss:$4 sm:$0x7] %vm10963_vm0, %v2777_v20  ;;  %8836 = vst.msk [vmem:[%s17911_s2 + $0x139] ss:$4 sm:$0x7] %vm10963_vm0, %v2778_v0 }
 0x250   :  { %8837 = vst.msk [vmem:[%s17911_s2 + $0x145] ss:$4 sm:$0x7] %vm10963_vm0, %v2780_v21  ;;  %8838 = vst.msk [vmem:[%s17911_s2 + $0x151] ss:$4 sm:$0x7] %vm10963_vm0, %v2763_v4 }
 0x251   :  { %8839 = vst.msk [vmem:[%s17911_s2 + $0x15d] ss:$4 sm:$0x7] %vm10963_vm0, %v2777_v20  ;;  %9220 = vst.msk [vmem:[%s17911_s2 + $0x13a] ss:$4 sm:$0x7] %vm10963_vm0, %v2778_v0 }
 0x252   :  { %9221 = vst.msk [vmem:[%s17911_s2 + $0x146] ss:$4 sm:$0x7] %vm10963_vm0, %v2780_v21  ;;  %9222 = vst.msk [vmem:[%s17911_s2 + $0x152] ss:$4 sm:$0x7] %vm10963_vm0, %v2763_v4  ;;  %v2703_v4 = vrot.slane %v2680_v54, %v10762_v3  ;;  %v2711_v54 = vcombine.high %v2689_v52, %v2689_v52 }
 0x253   :  { %9223 = vst.msk [vmem:[%s17911_s2 + $0x15e] ss:$4 sm:$0x7] %vm10963_vm0, %v2777_v20  ;;  %v11450_v18 = vpop.f32.mrb[26].mxu0  ;;  %v11456_v0 = vpop.f32.mrb[138].mxu1  ;;  %v2904_v20 = vrot.slane %v2881_v60, %v10762_v3 }
 0x254   :  { %v11458_v21 = vpop.f32.mrb[27].mxu0  ;;  %8456 = vst.msk [vmem:[%s17911_s2 + $0x168] ss:$4 sm:$0x7] %vm10963_vm0, %v2779_v44  ;;  %v11494_v55 = vpop.f32.mrb[139].mxu1  ;;  %v2713_v50 = vcombine.high %v2703_v4, %v2703_v4 }
 0x255   :  { %8457 = vst.msk [vmem:[%s17911_s2 + $0x174] ss:$4 sm:$0x7] %vm10963_vm0, %v2781_v45  ;;  %8840 = vst.msk [vmem:[%s17911_s2 + $0x169] ss:$4 sm:$0x7] %vm10963_vm0, %v2779_v44  ;;  %v2914_v23 = vcombine.high %v2904_v20, %v2904_v20 }
 0x256   :  { %8841 = vst.msk [vmem:[%s17911_s2 + $0x175] ss:$4 sm:$0x7] %vm10963_vm0, %v2781_v45  ;;  %9224 = vst.msk [vmem:[%s17911_s2 + $0x16a] ss:$4 sm:$0x7] %vm10963_vm0, %v2779_v44  ;;  %v2710_v44 = vrot.slane %v2682_v40, %v10762_v3 }
 0x257   :  { %9225 = vst.msk [vmem:[%s17911_s2 + $0x176] ss:$4 sm:$0x7] %vm10963_vm0, %v2781_v45  ;;  %8442 = vst.msk [vmem:[%s17911_s2 + $0xc0] ss:$4 sm:$0x7] %vm10963_vm0, %v2689_v52  ;;  %v2911_v45 = vrot.slane %v2883_v39, %v10762_v3 }
 0x258   :  { %8443 = vst.msk [vmem:[%s17911_s2 + $0xcc] ss:$4 sm:$0x7] %vm10963_vm0, %v2703_v4  ;;  %8826 = vst.msk [vmem:[%s17911_s2 + $0xc1] ss:$4 sm:$0x7] %vm10963_vm0, %v2689_v52  ;;  %v2714_v40 = vcombine.high %v2710_v44, %v2710_v44 }
 0x259   :  { %8827 = vst.msk [vmem:[%s17911_s2 + $0xcd] ss:$4 sm:$0x7] %vm10963_vm0, %v2703_v4  ;;  %9210 = vst.msk [vmem:[%s17911_s2 + $0xc2] ss:$4 sm:$0x7] %vm10963_vm0, %v2689_v52  ;;  %v18059_v52 = vcombine.low %v11048_v35, %v11056_v36 }
 0x25a   :  { %9211 = vst.msk [vmem:[%s17911_s2 + $0xce] ss:$4 sm:$0x7] %vm10963_vm0, %v2703_v4  ;;  %8466 = vst.msk [vmem:[%s17911_s2 + $0x1e0] ss:$4 sm:$0x7] %vm10963_vm0, %v2890_v63 }
 0x25b   :  { %8467 = vst.msk [vmem:[%s17911_s2 + $0x1ec] ss:$4 sm:$0x7] %vm10963_vm0, %v2904_v20  ;;  %8850 = vst.msk [vmem:[%s17911_s2 + $0x1e1] ss:$4 sm:$0x7] %vm10963_vm0, %v2890_v63  ;;  %v11626_v4 = vrot.slane %v18059_v52, %v10762_v3 }
 0x25c   :  { %8851 = vst.msk [vmem:[%s17911_s2 + $0x1ed] ss:$4 sm:$0x7] %vm10963_vm0, %v2904_v20  ;;  %9234 = vst.msk [vmem:[%s17911_s2 + $0x1e2] ss:$4 sm:$0x7] %vm10963_vm0, %v2890_v63 }
 0x25d   :  { %9235 = vst.msk [vmem:[%s17911_s2 + $0x1ee] ss:$4 sm:$0x7] %vm10963_vm0, %v2904_v20  ;;  %v11560_v60 = vpop.f32.mrb[28].mxu0  ;;  %v11634_v39 = vpop.f32.mrb[140].mxu1  ;;  %v2913_v20 = vcombine.high %v2897_v1, %v2897_v1 }
 0x25e   :  { %8444 = vst.msk [vmem:[%s17911_s2 + $0xd8] ss:$4 sm:$0x7] %vm10963_vm0, %v2711_v54  ;;  %8445 = vst.msk [vmem:[%s17911_s2 + $0xe4] ss:$4 sm:$0x7] %vm10963_vm0, %v2713_v50 }
 0x25f   :  { %8446 = vst.msk [vmem:[%s17911_s2 + $0xf0] ss:$4 sm:$0x7] %vm10963_vm0, %v2696_v59  ;;  %8447 = vst.msk [vmem:[%s17911_s2 + $0xfc] ss:$4 sm:$0x7] %vm10963_vm0, %v2710_v44 }
 0x260   :  { %8828 = vst.msk [vmem:[%s17911_s2 + $0xd9] ss:$4 sm:$0x7] %vm10963_vm0, %v2711_v54  ;;  %8829 = vst.msk [vmem:[%s17911_s2 + $0xe5] ss:$4 sm:$0x7] %vm10963_vm0, %v2713_v50 }
 0x261   :  { %8830 = vst.msk [vmem:[%s17911_s2 + $0xf1] ss:$4 sm:$0x7] %vm10963_vm0, %v2696_v59  ;;  %8831 = vst.msk [vmem:[%s17911_s2 + $0xfd] ss:$4 sm:$0x7] %vm10963_vm0, %v2710_v44 }
 0x262   :  { %9212 = vst.msk [vmem:[%s17911_s2 + $0xda] ss:$4 sm:$0x7] %vm10963_vm0, %v2711_v54  ;;  %9213 = vst.msk [vmem:[%s17911_s2 + $0xe6] ss:$4 sm:$0x7] %vm10963_vm0, %v2713_v50  ;;  %v18060_v50 = vcombine.high %v11048_v35, %v11056_v36  ;;  %v1717_v35 = vadd.f32 %v11090_v58, %v10457_v26  ;;  %v1732_v36 = vadd.f32 %v11258_v62, %v10466_v41 }
 0x263   :  { %9214 = vst.msk [vmem:[%s17911_s2 + $0xf2] ss:$4 sm:$0x7] %vm10963_vm0, %v2696_v59  ;;  %9215 = vst.msk [vmem:[%s17911_s2 + $0xfe] ss:$4 sm:$0x7] %vm10963_vm0, %v2710_v44  ;;  %v2915_v59 = vcombine.high %v2911_v45, %v2911_v45  ;;  %v3251_v26 = vcombine.low %v11188_v48, %v11260_v6  ;;  %v3252_v41 = vcombine.high %v11188_v48, %v11260_v6 }
 0x264   :  { %v11632_v5 = vrot.slane %v18060_v50, %v10762_v3  ;;  %v11636_v63 = vpop.f32.mrb[29].mxu0  ;;  %8468 = vst.msk [vmem:[%s17911_s2 + $0x1f8] ss:$4 sm:$0x7] %vm10963_vm0, %v2912_v24  ;;  %v11702_v44 = vpop.f32.mrb[141].mxu1  ;;  %v1727_v58 = vadd.f32 %v11297_v42, %v10463_v12  ;;  %v11742_v62 = vadd.f32 %v11346_v51, %v10474_v43  ;;  %v2784_v12 = vcombine.high %v1717_v35, %v1717_v35 }
 0x265   :  { %8469 = vst.msk [vmem:[%s17911_s2 + $0x204] ss:$4 sm:$0x7] %vm10963_vm0, %v2914_v23  ;;  %8470 = vst.msk [vmem:[%s17911_s2 + $0x210] ss:$4 sm:$0x7] %vm10963_vm0, %v2897_v1  ;;  %v2805_v43 = vrot.slane %v1717_v35, %v10762_v3  ;;  %v2985_v48 = vcombine.high %v1732_v36, %v1732_v36  ;;  %v3006_v6 = vrot.slane %v1732_v36, %v10762_v3 }
 0x266   :  { %8471 = vst.msk [vmem:[%s17911_s2 + $0x21c] ss:$4 sm:$0x7] %vm10963_vm0, %v2911_v45  ;;  %8852 = vst.msk [vmem:[%s17911_s2 + $0x1f9] ss:$4 sm:$0x7] %vm10963_vm0, %v2912_v24  ;;  %v11779_v51 = vrot.slane %v3251_v26, %v10762_v3  ;;  %v11782_v54 = vrot.slane %v3252_v41, %v10762_v3 }
 0x267   :  { %8853 = vst.msk [vmem:[%s17911_s2 + $0x205] ss:$4 sm:$0x7] %vm10963_vm0, %v2914_v23  ;;  %8854 = vst.msk [vmem:[%s17911_s2 + $0x211] ss:$4 sm:$0x7] %vm10963_vm0, %v2897_v1  ;;  %v2814_v52 = vcombine.high %v11000_v2, %v2805_v43  ;;  %v3013_v50 = vrot.slane %v2985_v48, %v10762_v3  ;;  %v3015_v35 = vcombine.high %v11020_v28, %v3006_v6 }
 0x268   :  { %8855 = vst.msk [vmem:[%s17911_s2 + $0x21d] ss:$4 sm:$0x7] %vm10963_vm0, %v2911_v45  ;;  %9236 = vst.msk [vmem:[%s17911_s2 + $0x1fa] ss:$4 sm:$0x7] %vm10963_vm0, %v2912_v24 }
 0x269   :  { %9237 = vst.msk [vmem:[%s17911_s2 + $0x206] ss:$4 sm:$0x7] %vm10963_vm0, %v2914_v23  ;;  %9238 = vst.msk [vmem:[%s17911_s2 + $0x212] ss:$4 sm:$0x7] %vm10963_vm0, %v2897_v1  ;;  %v2918_v1 = vcombine.high %v1727_v58, %v1727_v58  ;;  %v3016_v48 = vcombine.low %v11023_v19, %v3013_v50 }
 0x26a   :  { %9239 = vst.msk [vmem:[%s17911_s2 + $0x21e] ss:$4 sm:$0x7] %vm10963_vm0, %v2911_v45  ;;  %8448 = vst.msk [vmem:[%s17911_s2 + $0x108] ss:$4 sm:$0x7] %vm10963_vm0, %v2712_v61  ;;  %v11785_v45 = vrot.slane %v1727_v58, %v10762_v3 }
 0x26b   :  { %8449 = vst.msk [vmem:[%s17911_s2 + $0x114] ss:$4 sm:$0x7] %vm10963_vm0, %v2714_v40  ;;  %8832 = vst.msk [vmem:[%s17911_s2 + $0x109] ss:$4 sm:$0x7] %vm10963_vm0, %v2712_v61  ;;  %v11800_v36 = vrot.slane %v2918_v1, %v10762_v3  ;;  %v3038_v1 = vrot.slane %v3015_v35, %v10762_v3 }
 0x26c   :  { %8833 = vst.msk [vmem:[%s17911_s2 + $0x115] ss:$4 sm:$0x7] %vm10963_vm0, %v2714_v40  ;;  %9216 = vst.msk [vmem:[%s17911_s2 + $0x10a] ss:$4 sm:$0x7] %vm10963_vm0, %v2712_v61  ;;  %v2812_v61 = vrot.slane %v2784_v12, %v10762_v3  ;;  %v2837_v12 = vrot.slane %v2814_v52, %v10762_v3 }
 0x26d   :  { %9217 = vst.msk [vmem:[%s17911_s2 + $0x116] ss:$4 sm:$0x7] %vm10963_vm0, %v2714_v40  ;;  %8472 = vst.msk [vmem:[%s17911_s2 + $0x228] ss:$4 sm:$0x7] %vm10963_vm0, %v2913_v20  ;;  %v2813_v40 = vcombine.low %v11000_v2, %v2805_v43 }
 0x26e   :  { %8473 = vst.msk [vmem:[%s17911_s2 + $0x234] ss:$4 sm:$0x7] %vm10963_vm0, %v2915_v59  ;;  %8856 = vst.msk [vmem:[%s17911_s2 + $0x229] ss:$4 sm:$0x7] %vm10963_vm0, %v2913_v20  ;;  %v2815_v41 = vcombine.low %v11003_v22, %v2812_v61  ;;  %v2816_v58 = vcombine.high %v11003_v22, %v2812_v61  ;;  %v2847_v52 = vcombine.high %v2837_v12, %v2837_v12 }
 0x26f   :  { %8857 = vst.msk [vmem:[%s17911_s2 + $0x235] ss:$4 sm:$0x7] %vm10963_vm0, %v2915_v59  ;;  %9240 = vst.msk [vmem:[%s17911_s2 + $0x22a] ss:$4 sm:$0x7] %vm10963_vm0, %v2913_v20  ;;  %v2823_v2 = vrot.slane %v2813_v40, %v10762_v3 }
 0x270   :  { %9241 = vst.msk [vmem:[%s17911_s2 + $0x236] ss:$4 sm:$0x7] %vm10963_vm0, %v2915_v59  ;;  %v11776_v42 = vpop.f32.mrb[30].mxu0  ;;  %v11787_v24 = vpop.f32.mrb[142].mxu1  ;;  %v3014_v59 = vcombine.low %v11020_v28, %v3006_v6  ;;  %v3017_v28 = vcombine.high %v11023_v19, %v3013_v50  ;;  %v2830_v22 = vrot.slane %v2815_v41, %v10762_v3  ;;  %v2844_v61 = vrot.slane %v2816_v58, %v10762_v3 }
 0x271   :  { %v11789_v23 = vpop.f32.mrb[31].mxu0  ;;  %v11795_v20 = vpop.f32.mrb[143].mxu1  ;;  %v2845_v40 = vcombine.high %v2823_v2, %v2823_v2  ;;  %8458 = vst.msk [vmem:[%s17911_s2 + $0x180] ss:$4 sm:$0x7] %vm10963_vm0, %v2823_v2  ;;  %v3031_v50 = vrot.slane %v3016_v48, %v10762_v3  ;;  %v3048_v41 = vcombine.high %v3038_v1, %v3038_v1  ;;  %v2949_v48 = vcombine.low %v11016_v17, %v11800_v36 }
 0x272   :  { %v11808_v43 = vpop.f32.mrb[32].mxu0  ;;  %v3024_v6 = vrot.slane %v3014_v59, %v10762_v3  ;;  %v11814_v8 = vpop.f32.mrb[144].mxu1  ;;  %8459 = vst.msk [vmem:[%s17911_s2 + $0x18c] ss:$4 sm:$0x7] %vm10963_vm0, %v2837_v12  ;;  %v3045_v59 = vrot.slane %v3017_v28, %v10762_v3  ;;  %v2846_v58 = vcombine.high %v2830_v22, %v2830_v22 }
 0x273   :  { %v11816_v26 = vpop.f32.mrb[33].mxu0  ;;  %8842 = vst.msk [vmem:[%s17911_s2 + $0x181] ss:$4 sm:$0x7] %vm10963_vm0, %v2823_v2  ;;  %v11850_v19 = vpop.f32.mrb[145].mxu1 }
 0x274   :  { %8843 = vst.msk [vmem:[%s17911_s2 + $0x18d] ss:$4 sm:$0x7] %vm10963_vm0, %v2837_v12  ;;  %9226 = vst.msk [vmem:[%s17911_s2 + $0x182] ss:$4 sm:$0x7] %vm10963_vm0, %v2823_v2  ;;  %v3046_v35 = vcombine.high %v3024_v6, %v3024_v6  ;;  %v2848_v2 = vcombine.high %v2844_v61, %v2844_v61 }
 0x275   :  { %9227 = vst.msk [vmem:[%s17911_s2 + $0x18e] ss:$4 sm:$0x7] %vm10963_vm0, %v2837_v12  ;;  %8482 = vst.msk [vmem:[%s17911_s2 + $0x2a0] ss:$4 sm:$0x7] %vm10963_vm0, %v3024_v6  ;;  %v2948_v12 = vcombine.high %v11013_v7, %v11785_v45 }
 0x276   :  { %8483 = vst.msk [vmem:[%s17911_s2 + $0x2ac] ss:$4 sm:$0x7] %vm10963_vm0, %v3038_v1  ;;  %8866 = vst.msk [vmem:[%s17911_s2 + $0x2a1] ss:$4 sm:$0x7] %vm10963_vm0, %v3024_v6 }
 0x277   :  { %8867 = vst.msk [vmem:[%s17911_s2 + $0x2ad] ss:$4 sm:$0x7] %vm10963_vm0, %v3038_v1  ;;  %9250 = vst.msk [vmem:[%s17911_s2 + $0x2a2] ss:$4 sm:$0x7] %vm10963_vm0, %v3024_v6  ;;  %v3047_v6 = vcombine.high %v3031_v50, %v3031_v50 }
 0x278   :  { %9251 = vst.msk [vmem:[%s17911_s2 + $0x2ae] ss:$4 sm:$0x7] %vm10963_vm0, %v3038_v1  ;;  %8460 = vst.msk [vmem:[%s17911_s2 + $0x198] ss:$4 sm:$0x7] %vm10963_vm0, %v2845_v40  ;;  %v3049_v1 = vcombine.high %v3045_v59, %v3045_v59 }
 0x279   :  { %8461 = vst.msk [vmem:[%s17911_s2 + $0x1a4] ss:$4 sm:$0x7] %vm10963_vm0, %v2847_v52  ;;  %8462 = vst.msk [vmem:[%s17911_s2 + $0x1b0] ss:$4 sm:$0x7] %vm10963_vm0, %v2830_v22 }
 0x27a   :  { %8463 = vst.msk [vmem:[%s17911_s2 + $0x1bc] ss:$4 sm:$0x7] %vm10963_vm0, %v2844_v61  ;;  %8844 = vst.msk [vmem:[%s17911_s2 + $0x199] ss:$4 sm:$0x7] %vm10963_vm0, %v2845_v40 }
 0x27b   :  { %8845 = vst.msk [vmem:[%s17911_s2 + $0x1a5] ss:$4 sm:$0x7] %vm10963_vm0, %v2847_v52  ;;  %8846 = vst.msk [vmem:[%s17911_s2 + $0x1b1] ss:$4 sm:$0x7] %vm10963_vm0, %v2830_v22 }
 0x27c   :  { %8847 = vst.msk [vmem:[%s17911_s2 + $0x1bd] ss:$4 sm:$0x7] %vm10963_vm0, %v2844_v61  ;;  %9228 = vst.msk [vmem:[%s17911_s2 + $0x19a] ss:$4 sm:$0x7] %vm10963_vm0, %v2845_v40 }
 0x27d   :  { %9229 = vst.msk [vmem:[%s17911_s2 + $0x1a6] ss:$4 sm:$0x7] %vm10963_vm0, %v2847_v52  ;;  %9230 = vst.msk [vmem:[%s17911_s2 + $0x1b2] ss:$4 sm:$0x7] %vm10963_vm0, %v2830_v22  ;;  %v2950_v22 = vcombine.high %v11016_v17, %v11800_v36  ;;  %v2971_v17 = vrot.slane %v2948_v12, %v10762_v3  ;;  %v3140_v36 = vrot.slane %v11742_v62, %v10762_v3 }
 0x27e   :  { %9231 = vst.msk [vmem:[%s17911_s2 + $0x1be] ss:$4 sm:$0x7] %vm10963_vm0, %v2844_v61  ;;  %v11948_v28 = vpop.f32.mrb[34].mxu0  ;;  %v18061_v61 = vcombine.low %v11013_v7, %v11785_v45  ;;  %v12016_v52 = vpop.f32.mrb[146].mxu1  ;;  %v2964_v7 = vrot.slane %v2949_v48, %v10762_v3  ;;  %v3119_v45 = vcombine.high %v11742_v62, %v11742_v62 }
 0x27f   :  { %8484 = vst.msk [vmem:[%s17911_s2 + $0x2b8] ss:$4 sm:$0x7] %vm10963_vm0, %v3046_v35  ;;  %8485 = vst.msk [vmem:[%s17911_s2 + $0x2c4] ss:$4 sm:$0x7] %vm10963_vm0, %v3048_v41  ;;  %v2978_v62 = vrot.slane %v2950_v22, %v10762_v3  ;;  %v2981_v12 = vcombine.high %v2971_v17, %v2971_v17 }
 0x280   :  { %8486 = vst.msk [vmem:[%s17911_s2 + $0x2d0] ss:$4 sm:$0x7] %vm10963_vm0, %v3031_v50  ;;  %8487 = vst.msk [vmem:[%s17911_s2 + $0x2dc] ss:$4 sm:$0x7] %vm10963_vm0, %v3045_v59  ;;  %v2957_v40 = vrot.slane %v18061_v61, %v10762_v3 }
 0x281   :  { %8868 = vst.msk [vmem:[%s17911_s2 + $0x2b9] ss:$4 sm:$0x7] %vm10963_vm0, %v3046_v35  ;;  %8869 = vst.msk [vmem:[%s17911_s2 + $0x2c5] ss:$4 sm:$0x7] %vm10963_vm0, %v3048_v41 }
 0x282   :  { %8870 = vst.msk [vmem:[%s17911_s2 + $0x2d1] ss:$4 sm:$0x7] %vm10963_vm0, %v3031_v50  ;;  %8871 = vst.msk [vmem:[%s17911_s2 + $0x2dd] ss:$4 sm:$0x7] %vm10963_vm0, %v3045_v59 }
 0x283   :  { %9252 = vst.msk [vmem:[%s17911_s2 + $0x2ba] ss:$4 sm:$0x7] %vm10963_vm0, %v3046_v35  ;;  %9253 = vst.msk [vmem:[%s17911_s2 + $0x2c6] ss:$4 sm:$0x7] %vm10963_vm0, %v3048_v41  ;;  %v3318_v41 = vcombine.low %v11342_v56, %v11348_v10 }
 0x284   :  { %9254 = vst.msk [vmem:[%s17911_s2 + $0x2d2] ss:$4 sm:$0x7] %vm10963_vm0, %v3031_v50  ;;  %9255 = vst.msk [vmem:[%s17911_s2 + $0x2de] ss:$4 sm:$0x7] %vm10963_vm0, %v3045_v59  ;;  %v2979_v59 = vcombine.high %v2957_v40, %v2957_v40 }
 0x285   :  { %v12018_v35 = vpop.f32.mrb[35].mxu0  ;;  %8464 = vst.msk [vmem:[%s17911_s2 + $0x1c8] ss:$4 sm:$0x7] %vm10963_vm0, %v2846_v58  ;;  %v12056_v50 = vpop.f32.mrb[147].mxu1  ;;  %v12174_v22 = vrot.slane %v3318_v41, %v10762_v3 }
 0x286   :  { %8465 = vst.msk [vmem:[%s17911_s2 + $0x1d4] ss:$4 sm:$0x7] %vm10963_vm0, %v2848_v2  ;;  %8848 = vst.msk [vmem:[%s17911_s2 + $0x1c9] ss:$4 sm:$0x7] %vm10963_vm0, %v2846_v58 }
 0x287   :  { %8849 = vst.msk [vmem:[%s17911_s2 + $0x1d5] ss:$4 sm:$0x7] %vm10963_vm0, %v2848_v2  ;;  %9232 = vst.msk [vmem:[%s17911_s2 + $0x1ca] ss:$4 sm:$0x7] %vm10963_vm0, %v2846_v58  ;;  %v3319_v58 = vcombine.high %v11342_v56, %v11348_v10  ;;  %v3147_v56 = vrot.slane %v3119_v45, %v10762_v3  ;;  %v3148_v10 = vcombine.low %v11256_v46, %v3140_v36 }
 0x288   :  { %9233 = vst.msk [vmem:[%s17911_s2 + $0x1d6] ss:$4 sm:$0x7] %vm10963_vm0, %v2848_v2  ;;  %8488 = vst.msk [vmem:[%s17911_s2 + $0x2e8] ss:$4 sm:$0x7] %vm10963_vm0, %v3047_v6  ;;  %v2980_v2 = vcombine.high %v2964_v7, %v2964_v7 }
 0x289   :  { %8489 = vst.msk [vmem:[%s17911_s2 + $0x2f4] ss:$4 sm:$0x7] %vm10963_vm0, %v3049_v1  ;;  %8872 = vst.msk [vmem:[%s17911_s2 + $0x2e9] ss:$4 sm:$0x7] %vm10963_vm0, %v3047_v6  ;;  %v12177_v61 = vrot.slane %v3319_v58, %v10762_v3  ;;  %v3158_v45 = vrot.slane %v3148_v10, %v10762_v3 }
 0x28a   :  { %8873 = vst.msk [vmem:[%s17911_s2 + $0x2f5] ss:$4 sm:$0x7] %vm10963_vm0, %v3049_v1  ;;  %9256 = vst.msk [vmem:[%s17911_s2 + $0x2ea] ss:$4 sm:$0x7] %vm10963_vm0, %v3047_v6  ;;  %v2982_v6 = vcombine.high %v2978_v62, %v2978_v62 }
 0x28b   :  { %9257 = vst.msk [vmem:[%s17911_s2 + $0x2f6] ss:$4 sm:$0x7] %vm10963_vm0, %v3049_v1  ;;  %8474 = vst.msk [vmem:[%s17911_s2 + $0x240] ss:$4 sm:$0x7] %vm10963_vm0, %v2957_v40  ;;  %v3149_v1 = vcombine.high %v11256_v46, %v3140_v36  ;;  %v3150_v46 = vcombine.low %v11330_v13, %v3147_v56  ;;  %v1737_v36 = vadd.f32 %v11382_v57, %v10469_v37 }
 0x28c   :  { %8858 = vst.msk [vmem:[%s17911_s2 + $0x241] ss:$4 sm:$0x7] %vm10963_vm0, %v2957_v40  ;;  %9242 = vst.msk [vmem:[%s17911_s2 + $0x242] ss:$4 sm:$0x7] %vm10963_vm0, %v2957_v40  ;;  %v3385_v57 = vcombine.low %v11450_v18, %v11458_v21 }
 0x28d   :  { %8475 = vst.msk [vmem:[%s17911_s2 + $0x24c] ss:$4 sm:$0x7] %vm10963_vm0, %v2971_v17  ;;  %8478 = vst.msk [vmem:[%s17911_s2 + $0x270] ss:$4 sm:$0x7] %vm10963_vm0, %v2964_v7  ;;  %v3172_v37 = vrot.slane %v3149_v1, %v10762_v3  ;;  %v3165_v41 = vrot.slane %v3150_v46, %v10762_v3 }
 0x28e   :  { %8859 = vst.msk [vmem:[%s17911_s2 + $0x24d] ss:$4 sm:$0x7] %vm10963_vm0, %v2971_v17  ;;  %8862 = vst.msk [vmem:[%s17911_s2 + $0x271] ss:$4 sm:$0x7] %vm10963_vm0, %v2964_v7 }
 0x28f   :  { %9243 = vst.msk [vmem:[%s17911_s2 + $0x24e] ss:$4 sm:$0x7] %vm10963_vm0, %v2971_v17  ;;  %9246 = vst.msk [vmem:[%s17911_s2 + $0x272] ss:$4 sm:$0x7] %vm10963_vm0, %v2964_v7  ;;  %v3151_v17 = vcombine.high %v11330_v13, %v3147_v56  ;;  %v1752_v13 = vadd.f32 %v11456_v0, %v10484_v53  ;;  %v3052_v53 = vcombine.high %v1737_v36, %v1737_v36 }
 0x290   :  { %v12140_v48 = vpop.f32.mrb[36].mxu0  ;;  %8476 = vst.msk [vmem:[%s17911_s2 + $0x258] ss:$4 sm:$0x7] %vm10963_vm0, %v2979_v59  ;;  %v12179_v40 = vpop.f32.mrb[148].mxu1  ;;  %v3182_v0 = vcombine.high %v3172_v37, %v3172_v37  ;;  %v3181_v1 = vcombine.high %v3165_v41, %v3165_v41 }
 0x291   :  { %8479 = vst.msk [vmem:[%s17911_s2 + $0x27c] ss:$4 sm:$0x7] %vm10963_vm0, %v2978_v62  ;;  %8860 = vst.msk [vmem:[%s17911_s2 + $0x259] ss:$4 sm:$0x7] %vm10963_vm0, %v2979_v59  ;;  %v3179_v58 = vrot.slane %v3151_v17, %v10762_v3  ;;  %v3274_v56 = vrot.slane %v1752_v13, %v10762_v3  ;;  %v3080_v17 = vrot.slane %v3052_v53, %v10762_v3 }
 0x292   :  { %8863 = vst.msk [vmem:[%s17911_s2 + $0x27d] ss:$4 sm:$0x7] %vm10963_vm0, %v2978_v62  ;;  %9244 = vst.msk [vmem:[%s17911_s2 + $0x25a] ss:$4 sm:$0x7] %vm10963_vm0, %v2979_v59  ;;  %v3386_v59 = vcombine.high %v11450_v18, %v11458_v21  ;;  %v3073_v21 = vrot.slane %v1737_v36, %v10762_v3 }
 0x293   :  { %9247 = vst.msk [vmem:[%s17911_s2 + $0x27e] ss:$4 sm:$0x7] %vm10963_vm0, %v2978_v62  ;;  %v12181_v7 = vpop.f32.mrb[37].mxu0  ;;  %v12218_v62 = vpop.f32.mrb[149].mxu1  ;;  %v3183_v46 = vcombine.high %v3179_v58, %v3179_v58 }
 0x294   :  { %8477 = vst.msk [vmem:[%s17911_s2 + $0x264] ss:$4 sm:$0x7] %vm10963_vm0, %v2981_v12  ;;  %8480 = vst.msk [vmem:[%s17911_s2 + $0x288] ss:$4 sm:$0x7] %vm10963_vm0, %v2980_v2  ;;  %v12386_v53 = vrot.slane %v3386_v59, %v10762_v3 }
 0x295   :  { %8861 = vst.msk [vmem:[%s17911_s2 + $0x265] ss:$4 sm:$0x7] %vm10963_vm0, %v2981_v12  ;;  %8864 = vst.msk [vmem:[%s17911_s2 + $0x289] ss:$4 sm:$0x7] %vm10963_vm0, %v2980_v2 }
 0x296   :  { %9245 = vst.msk [vmem:[%s17911_s2 + $0x266] ss:$4 sm:$0x7] %vm10963_vm0, %v2981_v12  ;;  %9248 = vst.msk [vmem:[%s17911_s2 + $0x28a] ss:$4 sm:$0x7] %vm10963_vm0, %v2980_v2  ;;  %v3180_v2 = vcombine.high %v3158_v45, %v3158_v45  ;;  %v3253_v12 = vcombine.high %v1752_v13, %v1752_v13  ;;  %v3082_v13 = vcombine.high %v11029_v30, %v3073_v21 }
 0x297   :  { %8481 = vst.msk [vmem:[%s17911_s2 + $0x294] ss:$4 sm:$0x7] %vm10963_vm0, %v2982_v6  ;;  %8865 = vst.msk [vmem:[%s17911_s2 + $0x295] ss:$4 sm:$0x7] %vm10963_vm0, %v2982_v6 }
 0x298   :  { %9249 = vst.msk [vmem:[%s17911_s2 + $0x296] ss:$4 sm:$0x7] %vm10963_vm0, %v2982_v6  ;;  %8498 = vst.msk [vmem:[%s17911_s2 + $0x360] ss:$4 sm:$0x7] %vm10963_vm0, %v3158_v45 }
 0x299   :  { %8882 = vst.msk [vmem:[%s17911_s2 + $0x361] ss:$4 sm:$0x7] %vm10963_vm0, %v3158_v45  ;;  %9266 = vst.msk [vmem:[%s17911_s2 + $0x362] ss:$4 sm:$0x7] %vm10963_vm0, %v3158_v45  ;;  %v12329_v45 = vrot.slane %v3385_v57, %v10762_v3  ;;  %v3281_v57 = vrot.slane %v3253_v12, %v10762_v3  ;;  %v3105_v12 = vrot.slane %v3082_v13, %v10762_v3 }
 0x29a   :  { %v12259_v18 = vpop.f32.mrb[38].mxu0  ;;  %8499 = vst.msk [vmem:[%s17911_s2 + $0x36c] ss:$4 sm:$0x7] %vm10963_vm0, %v3172_v37  ;;  %v12278_v10 = vpop.f32.mrb[150].mxu1 }
 0x29b   :  { %8883 = vst.msk [vmem:[%s17911_s2 + $0x36d] ss:$4 sm:$0x7] %vm10963_vm0, %v3172_v37  ;;  %9267 = vst.msk [vmem:[%s17911_s2 + $0x36e] ss:$4 sm:$0x7] %vm10963_vm0, %v3172_v37  ;;  %v3081_v37 = vcombine.low %v11029_v30, %v3073_v21  ;;  %v3083_v30 = vcombine.low %v11032_v34, %v3080_v17  ;;  %v3285_v31 = vcombine.high %v11782_v54, %v3281_v57 }
 0x29c   :  { %v12280_v6 = vpop.f32.mrb[39].mxu0  ;;  %8500 = vst.msk [vmem:[%s17911_s2 + $0x378] ss:$4 sm:$0x7] %vm10963_vm0, %v3180_v2  ;;  %v12331_v36 = vpop.f32.mrb[151].mxu1  ;;  %v3115_v13 = vcombine.high %v3105_v12, %v3105_v12 }
 0x29d   :  { %8502 = vst.msk [vmem:[%s17911_s2 + $0x390] ss:$4 sm:$0x7] %vm10963_vm0, %v3165_v41  ;;  %8503 = vst.msk [vmem:[%s17911_s2 + $0x39c] ss:$4 sm:$0x7] %vm10963_vm0, %v3179_v58  ;;  %v3091_v21 = vrot.slane %v3081_v37, %v10762_v3 }
 0x29e   :  { %8884 = vst.msk [vmem:[%s17911_s2 + $0x379] ss:$4 sm:$0x7] %vm10963_vm0, %v3180_v2  ;;  %8886 = vst.msk [vmem:[%s17911_s2 + $0x391] ss:$4 sm:$0x7] %vm10963_vm0, %v3165_v41 }
 0x29f   :  { %8887 = vst.msk [vmem:[%s17911_s2 + $0x39d] ss:$4 sm:$0x7] %vm10963_vm0, %v3179_v58  ;;  %9268 = vst.msk [vmem:[%s17911_s2 + $0x37a] ss:$4 sm:$0x7] %vm10963_vm0, %v3180_v2  ;;  %v3283_v2 = vcombine.high %v11779_v51, %v3274_v56  ;;  %v3113_v37 = vcombine.high %v3091_v21, %v3091_v21 }
 0x2a0   :  { %9270 = vst.msk [vmem:[%s17911_s2 + $0x392] ss:$4 sm:$0x7] %vm10963_vm0, %v3165_v41  ;;  %9271 = vst.msk [vmem:[%s17911_s2 + $0x39e] ss:$4 sm:$0x7] %vm10963_vm0, %v3179_v58  ;;  %v3282_v41 = vcombine.low %v11779_v51, %v3274_v56  ;;  %v3084_v58 = vcombine.high %v11032_v34, %v3080_v17  ;;  %v3098_v34 = vrot.slane %v3083_v30, %v10762_v3 }
 0x2a1   :  { %8501 = vst.msk [vmem:[%s17911_s2 + $0x384] ss:$4 sm:$0x7] %vm10963_vm0, %v3182_v0  ;;  %8885 = vst.msk [vmem:[%s17911_s2 + $0x385] ss:$4 sm:$0x7] %vm10963_vm0, %v3182_v0  ;;  %v3306_v56 = vrot.slane %v3283_v2, %v10762_v3 }
 0x2a2   :  { %9269 = vst.msk [vmem:[%s17911_s2 + $0x386] ss:$4 sm:$0x7] %vm10963_vm0, %v3182_v0  ;;  %8504 = vst.msk [vmem:[%s17911_s2 + $0x3a8] ss:$4 sm:$0x7] %vm10963_vm0, %v3181_v1  ;;  %v3112_v51 = vrot.slane %v3084_v58, %v10762_v3  ;;  %v3292_v59 = vrot.slane %v3282_v41, %v10762_v3  ;;  %v3114_v41 = vcombine.high %v3098_v34, %v3098_v34 }
 0x2a3   :  { %8505 = vst.msk [vmem:[%s17911_s2 + $0x3b4] ss:$4 sm:$0x7] %vm10963_vm0, %v3183_v46  ;;  %8888 = vst.msk [vmem:[%s17911_s2 + $0x3a9] ss:$4 sm:$0x7] %vm10963_vm0, %v3181_v1  ;;  %v3316_v58 = vcombine.high %v3306_v56, %v3306_v56 }
 0x2a4   :  { %8889 = vst.msk [vmem:[%s17911_s2 + $0x3b5] ss:$4 sm:$0x7] %vm10963_vm0, %v3183_v46  ;;  %9272 = vst.msk [vmem:[%s17911_s2 + $0x3aa] ss:$4 sm:$0x7] %vm10963_vm0, %v3181_v1  ;;  %v3284_v1 = vcombine.low %v11782_v54, %v3281_v57  ;;  %v3313_v57 = vrot.slane %v3285_v31, %v10762_v3  ;;  %v3116_v30 = vcombine.high %v3112_v51, %v3112_v51 }
 0x2a5   :  { %9273 = vst.msk [vmem:[%s17911_s2 + $0x3b6] ss:$4 sm:$0x7] %vm10963_vm0, %v3183_v46  ;;  %v12388_v0 = vpop.f32.mrb[40].mxu0  ;;  %v12394_v46 = vpop.f32.mrb[152].mxu1  ;;  %v3314_v31 = vcombine.high %v3292_v59, %v3292_v59 }
 0x2a6   :  { %v12396_v16 = vpop.f32.mrb[41].mxu0  ;;  %v12402_v17 = vpop.f32.mrb[153].mxu1  ;;  %8490 = vst.msk [vmem:[%s17911_s2 + $0x300] ss:$4 sm:$0x7] %vm10963_vm0, %v3091_v21  ;;  %v3299_v54 = vrot.slane %v3284_v1, %v10762_v3  ;;  %v1747_v1 = vadd.f32 %v11494_v55, %v10480_v47  ;;  %v3452_v47 = vcombine.low %v11560_v60, %v11636_v63  ;;  %v3453_v55 = vcombine.high %v11560_v60, %v11636_v63 }
 0x2a7   :  { %8491 = vst.msk [vmem:[%s17911_s2 + $0x30c] ss:$4 sm:$0x7] %vm10963_vm0, %v3105_v12  ;;  %8874 = vst.msk [vmem:[%s17911_s2 + $0x301] ss:$4 sm:$0x7] %vm10963_vm0, %v3091_v21 }
 0x2a8   :  { %8875 = vst.msk [vmem:[%s17911_s2 + $0x30d] ss:$4 sm:$0x7] %vm10963_vm0, %v3105_v12  ;;  %9258 = vst.msk [vmem:[%s17911_s2 + $0x302] ss:$4 sm:$0x7] %vm10963_vm0, %v3091_v21  ;;  %v3315_v21 = vcombine.high %v3299_v54, %v3299_v54  ;;  %v3186_v60 = vcombine.high %v1747_v1, %v1747_v1  ;;  %v3207_v63 = vrot.slane %v1747_v1, %v10762_v3 }
 0x2a9   :  { %9259 = vst.msk [vmem:[%s17911_s2 + $0x30e] ss:$4 sm:$0x7] %vm10963_vm0, %v3105_v12  ;;  %8494 = vst.msk [vmem:[%s17911_s2 + $0x330] ss:$4 sm:$0x7] %vm10963_vm0, %v3098_v34  ;;  %v3317_v12 = vcombine.high %v3313_v57, %v3313_v57 }
 0x2aa   :  { %8495 = vst.msk [vmem:[%s17911_s2 + $0x33c] ss:$4 sm:$0x7] %vm10963_vm0, %v3112_v51  ;;  %8878 = vst.msk [vmem:[%s17911_s2 + $0x331] ss:$4 sm:$0x7] %vm10963_vm0, %v3098_v34  ;;  %v3216_v1 = vcombine.high %v11626_v4, %v3207_v63 }
 0x2ab   :  { %8879 = vst.msk [vmem:[%s17911_s2 + $0x33d] ss:$4 sm:$0x7] %vm10963_vm0, %v3112_v51  ;;  %9262 = vst.msk [vmem:[%s17911_s2 + $0x332] ss:$4 sm:$0x7] %vm10963_vm0, %v3098_v34 }
 0x2ac   :  { %9263 = vst.msk [vmem:[%s17911_s2 + $0x33e] ss:$4 sm:$0x7] %vm10963_vm0, %v3112_v51  ;;  %8514 = vst.msk [vmem:[%s17911_s2 + $0x420] ss:$4 sm:$0x7] %vm10963_vm0, %v3292_v59  ;;  %v3239_v49 = vrot.slane %v3216_v1, %v10762_v3 }
 0x2ad   :  { %8515 = vst.msk [vmem:[%s17911_s2 + $0x42c] ss:$4 sm:$0x7] %vm10963_vm0, %v3306_v56  ;;  %8898 = vst.msk [vmem:[%s17911_s2 + $0x421] ss:$4 sm:$0x7] %vm10963_vm0, %v3292_v59 }
 0x2ae   :  { %8899 = vst.msk [vmem:[%s17911_s2 + $0x42d] ss:$4 sm:$0x7] %vm10963_vm0, %v3306_v56  ;;  %9282 = vst.msk [vmem:[%s17911_s2 + $0x422] ss:$4 sm:$0x7] %vm10963_vm0, %v3292_v59 }
 0x2af   :  { %9283 = vst.msk [vmem:[%s17911_s2 + $0x42e] ss:$4 sm:$0x7] %vm10963_vm0, %v3306_v56  ;;  %v12496_v2 = vpop.f32.mrb[42].mxu0  ;;  %v18062_v34 = vld [vmem:[#allocation10_spill] sm:$0xff]  ;;  %v12562_v59 = vpop.f32.mrb[154].mxu1 }
 0x2b0   :  { %8492 = vst.msk [vmem:[%s17911_s2 + $0x318] ss:$4 sm:$0x7] %vm10963_vm0, %v3113_v37  ;;  %8493 = vst.msk [vmem:[%s17911_s2 + $0x324] ss:$4 sm:$0x7] %vm10963_vm0, %v3115_v13  ;;  %v1762_v51 = vadd.f32 %v11634_v39, %v18062_v34  ;;  %v3215_v34 = vcombine.low %v11626_v4, %v3207_v63 }
 0x2b1   :  { %8876 = vst.msk [vmem:[%s17911_s2 + $0x319] ss:$4 sm:$0x7] %vm10963_vm0, %v3113_v37  ;;  %8877 = vst.msk [vmem:[%s17911_s2 + $0x325] ss:$4 sm:$0x7] %vm10963_vm0, %v3115_v13 }
 0x2b2   :  { %9260 = vst.msk [vmem:[%s17911_s2 + $0x31a] ss:$4 sm:$0x7] %vm10963_vm0, %v3113_v37  ;;  %9261 = vst.msk [vmem:[%s17911_s2 + $0x326] ss:$4 sm:$0x7] %vm10963_vm0, %v3115_v13 }
 0x2b3   :  { %8518 = vst.msk [vmem:[%s17911_s2 + $0x450] ss:$4 sm:$0x7] %vm10963_vm0, %v3299_v54  ;;  %8519 = vst.msk [vmem:[%s17911_s2 + $0x45c] ss:$4 sm:$0x7] %vm10963_vm0, %v3313_v57 }
 0x2b4   :  { %8902 = vst.msk [vmem:[%s17911_s2 + $0x451] ss:$4 sm:$0x7] %vm10963_vm0, %v3299_v54  ;;  %8903 = vst.msk [vmem:[%s17911_s2 + $0x45d] ss:$4 sm:$0x7] %vm10963_vm0, %v3313_v57 }
 0x2b5   :  { %9286 = vst.msk [vmem:[%s17911_s2 + $0x452] ss:$4 sm:$0x7] %vm10963_vm0, %v3299_v54  ;;  %9287 = vst.msk [vmem:[%s17911_s2 + $0x45e] ss:$4 sm:$0x7] %vm10963_vm0, %v3313_v57 }
 0x2b6   :  { %v12564_v56 = vpop.f32.mrb[43].mxu0  ;;  %8496 = vst.msk [vmem:[%s17911_s2 + $0x348] ss:$4 sm:$0x7] %vm10963_vm0, %v3114_v41  ;;  %v18063_v39 = vld [vmem:[#allocation9_spill] sm:$0xff]  ;;  %v18064_v13 = vld [vmem:[#allocation12_spill] sm:$0xff] }
 0x2b7   :  { %8497 = vst.msk [vmem:[%s17911_s2 + $0x354] ss:$4 sm:$0x7] %vm10963_vm0, %v3116_v30  ;;  %8880 = vst.msk [vmem:[%s17911_s2 + $0x349] ss:$4 sm:$0x7] %vm10963_vm0, %v3114_v41  ;;  %v1757_v37 = vadd.f32 %v11702_v44, %v18063_v39  ;;  %v12634_v54 = vadd.f32 %v11787_v24, %v18064_v13  ;;  %v3387_v44 = vcombine.high %v1762_v51, %v1762_v51 }
 0x2b8   :  { %8881 = vst.msk [vmem:[%s17911_s2 + $0x355] ss:$4 sm:$0x7] %vm10963_vm0, %v3116_v30  ;;  %9264 = vst.msk [vmem:[%s17911_s2 + $0x34a] ss:$4 sm:$0x7] %vm10963_vm0, %v3114_v41  ;;  %v3408_v24 = vrot.slane %v1762_v51, %v10762_v3  ;;  %v12671_v41 = vrot.slane %v3452_v47, %v10762_v3 }
 0x2b9   :  { %9265 = vst.msk [vmem:[%s17911_s2 + $0x356] ss:$4 sm:$0x7] %vm10963_vm0, %v3116_v30  ;;  %8516 = vst.msk [vmem:[%s17911_s2 + $0x438] ss:$4 sm:$0x7] %vm10963_vm0, %v3314_v31  ;;  %v12674_v30 = vrot.slane %v3453_v55, %v10762_v3  ;;  %v3415_v51 = vrot.slane %v3387_v44, %v10762_v3  ;;  %v3225_v44 = vrot.slane %v3215_v34, %v10762_v3 }
 0x2ba   :  { %8517 = vst.msk [vmem:[%s17911_s2 + $0x444] ss:$4 sm:$0x7] %vm10963_vm0, %v3316_v58  ;;  %8900 = vst.msk [vmem:[%s17911_s2 + $0x439] ss:$4 sm:$0x7] %vm10963_vm0, %v3314_v31  ;;  %v3416_v55 = vcombine.low %v12329_v45, %v3408_v24  ;;  %v3417_v13 = vcombine.high %v12329_v45, %v3408_v24 }
 0x2bb   :  { %8901 = vst.msk [vmem:[%s17911_s2 + $0x445] ss:$4 sm:$0x7] %vm10963_vm0, %v3316_v58  ;;  %9284 = vst.msk [vmem:[%s17911_s2 + $0x43a] ss:$4 sm:$0x7] %vm10963_vm0, %v3314_v31  ;;  %v3320_v31 = vcombine.high %v1757_v37, %v1757_v37  ;;  %v3418_v38 = vcombine.low %v12386_v53, %v3415_v51  ;;  %v3419_v45 = vcombine.high %v12386_v53, %v3415_v51 }
 0x2bc   :  { %9285 = vst.msk [vmem:[%s17911_s2 + $0x446] ss:$4 sm:$0x7] %vm10963_vm0, %v3316_v58  ;;  %v12636_v57 = vpop.f32.mrb[155].mxu1  ;;  %v12677_v58 = vrot.slane %v1757_v37, %v10762_v3  ;;  %v3426_v24 = vrot.slane %v3416_v55, %v10762_v3  ;;  %v3247_v32 = vcombine.high %v3225_v44, %v3225_v44 }
 0x2bd   :  { %8520 = vst.msk [vmem:[%s17911_s2 + $0x468] ss:$4 sm:$0x7] %vm10963_vm0, %v3315_v21  ;;  %8521 = vst.msk [vmem:[%s17911_s2 + $0x474] ss:$4 sm:$0x7] %vm10963_vm0, %v3317_v12  ;;  %v12692_v37 = vrot.slane %v3320_v31, %v10762_v3  ;;  %v3440_v31 = vrot.slane %v3417_v13, %v10762_v3  ;;  %v3433_v34 = vrot.slane %v3418_v38, %v10762_v3 }
 0x2be   :  { %8904 = vst.msk [vmem:[%s17911_s2 + $0x469] ss:$4 sm:$0x7] %vm10963_vm0, %v3315_v21  ;;  %8905 = vst.msk [vmem:[%s17911_s2 + $0x475] ss:$4 sm:$0x7] %vm10963_vm0, %v3317_v12  ;;  %v3447_v1 = vrot.slane %v3419_v45, %v10762_v3  ;;  %v3448_v51 = vcombine.high %v3426_v24, %v3426_v24 }
 0x2bf   :  { %9288 = vst.msk [vmem:[%s17911_s2 + $0x46a] ss:$4 sm:$0x7] %vm10963_vm0, %v3315_v21  ;;  %9289 = vst.msk [vmem:[%s17911_s2 + $0x476] ss:$4 sm:$0x7] %vm10963_vm0, %v3317_v12  ;;  %v3214_v12 = vrot.slane %v3186_v60, %v10762_v3  ;;  %v3450_v55 = vcombine.high %v3440_v31, %v3440_v31 }
 0x2c0   :  { %v12679_v21 = vpop.f32.mrb[44].mxu0  ;;  %v12685_v39 = vpop.f32.mrb[156].mxu1  ;;  %8506 = vst.msk [vmem:[%s17911_s2 + $0x3c0] ss:$4 sm:$0x7] %vm10963_vm0, %v3225_v44 }
 0x2c1   :  { %v12687_v47 = vpop.f32.mrb[45].mxu0  ;;  %v12696_v14 = vpop.f32.mrb[157].mxu1  ;;  %v3217_v4 = vcombine.low %v11632_v5, %v3214_v12  ;;  %v3218_v63 = vcombine.high %v11632_v5, %v3214_v12  ;;  %v3249_v5 = vcombine.high %v3239_v49, %v3239_v49  ;;  %8507 = vst.msk [vmem:[%s17911_s2 + $0x3cc] ss:$4 sm:$0x7] %vm10963_vm0, %v3239_v49 }
 0x2c2   :  { %v12706_v27 = vpop.f32.mrb[46].mxu0  ;;  %8890 = vst.msk [vmem:[%s17911_s2 + $0x3c1] ss:$4 sm:$0x7] %vm10963_vm0, %v3225_v44  ;;  %v12740_v53 = vpop.f32.mrb[158].mxu1 }
 0x2c3   :  { %v3232_v60 = vrot.slane %v3217_v4, %v10762_v3  ;;  %v3246_v33 = vrot.slane %v3218_v63, %v10762_v3  ;;  %8891 = vst.msk [vmem:[%s17911_s2 + $0x3cd] ss:$4 sm:$0x7] %vm10963_vm0, %v3239_v49  ;;  %9274 = vst.msk [vmem:[%s17911_s2 + $0x3c2] ss:$4 sm:$0x7] %vm10963_vm0, %v3225_v44  ;;  %v3351_v4 = vcombine.low %v12177_v61, %v12692_v37 }
 0x2c4   :  { %9275 = vst.msk [vmem:[%s17911_s2 + $0x3ce] ss:$4 sm:$0x7] %vm10963_vm0, %v3239_v49  ;;  %v12742_v12 = vpop.f32.mrb[47].mxu0  ;;  %v12776_v49 = vpop.f32.mrb[159].mxu1  ;;  %v3449_v63 = vcombine.high %v3433_v34, %v3433_v34  ;;  %v3451_v44 = vcombine.high %v3447_v1, %v3447_v1 }
 0x2c5   :  { %8530 = vst.msk [vmem:[%s17911_s2 + $0x4e0] ss:$4 sm:$0x7] %vm10963_vm0, %v3426_v24  ;;  %8531 = vst.msk [vmem:[%s17911_s2 + $0x4ec] ss:$4 sm:$0x7] %vm10963_vm0, %v3440_v31  ;;  %v3248_v38 = vcombine.high %v3232_v60, %v3232_v60  ;;  %v3250_v13 = vcombine.high %v3246_v33, %v3246_v33 }
 0x2c6   :  { %8914 = vst.msk [vmem:[%s17911_s2 + $0x4e1] ss:$4 sm:$0x7] %vm10963_vm0, %v3426_v24  ;;  %8915 = vst.msk [vmem:[%s17911_s2 + $0x4ed] ss:$4 sm:$0x7] %vm10963_vm0, %v3440_v31 }
 0x2c7   :  { %9298 = vst.msk [vmem:[%s17911_s2 + $0x4e2] ss:$4 sm:$0x7] %vm10963_vm0, %v3426_v24  ;;  %9299 = vst.msk [vmem:[%s17911_s2 + $0x4ee] ss:$4 sm:$0x7] %vm10963_vm0, %v3440_v31 }
 0x2c8   :  { %8508 = vst.msk [vmem:[%s17911_s2 + $0x3d8] ss:$4 sm:$0x7] %vm10963_vm0, %v3247_v32  ;;  %8509 = vst.msk [vmem:[%s17911_s2 + $0x3e4] ss:$4 sm:$0x7] %vm10963_vm0, %v3249_v5 }
 0x2c9   :  { %8510 = vst.msk [vmem:[%s17911_s2 + $0x3f0] ss:$4 sm:$0x7] %vm10963_vm0, %v3232_v60  ;;  %8511 = vst.msk [vmem:[%s17911_s2 + $0x3fc] ss:$4 sm:$0x7] %vm10963_vm0, %v3246_v33 }
 0x2ca   :  { %8892 = vst.msk [vmem:[%s17911_s2 + $0x3d9] ss:$4 sm:$0x7] %vm10963_vm0, %v3247_v32  ;;  %8893 = vst.msk [vmem:[%s17911_s2 + $0x3e5] ss:$4 sm:$0x7] %vm10963_vm0, %v3249_v5 }
 0x2cb   :  { %8894 = vst.msk [vmem:[%s17911_s2 + $0x3f1] ss:$4 sm:$0x7] %vm10963_vm0, %v3232_v60  ;;  %8895 = vst.msk [vmem:[%s17911_s2 + $0x3fd] ss:$4 sm:$0x7] %vm10963_vm0, %v3246_v33 }
 0x2cc   :  { %9276 = vst.msk [vmem:[%s17911_s2 + $0x3da] ss:$4 sm:$0x7] %vm10963_vm0, %v3247_v32  ;;  %9277 = vst.msk [vmem:[%s17911_s2 + $0x3e6] ss:$4 sm:$0x7] %vm10963_vm0, %v3249_v5  ;;  %v3350_v32 = vcombine.high %v12174_v22, %v12677_v58 }
 0x2cd   :  { %9278 = vst.msk [vmem:[%s17911_s2 + $0x3f2] ss:$4 sm:$0x7] %vm10963_vm0, %v3232_v60  ;;  %9279 = vst.msk [vmem:[%s17911_s2 + $0x3fe] ss:$4 sm:$0x7] %vm10963_vm0, %v3246_v33  ;;  %v3352_v33 = vcombine.high %v12177_v61, %v12692_v37  ;;  %v18065_v60 = vcombine.low %v12174_v22, %v12677_v58  ;;  %v3366_v22 = vrot.slane %v3351_v4, %v10762_v3 }
 0x2ce   :  { %8532 = vst.msk [vmem:[%s17911_s2 + $0x4f8] ss:$4 sm:$0x7] %vm10963_vm0, %v3448_v51  ;;  %8533 = vst.msk [vmem:[%s17911_s2 + $0x504] ss:$4 sm:$0x7] %vm10963_vm0, %v3450_v55  ;;  %v3373_v61 = vrot.slane %v3350_v32, %v10762_v3  ;;  %v3521_v58 = vcombine.high %v12634_v54, %v12634_v54  ;;  %v12946_v37 = vrot.slane %v12634_v54, %v10762_v3 }
 0x2cf   :  { %8534 = vst.msk [vmem:[%s17911_s2 + $0x510] ss:$4 sm:$0x7] %vm10963_vm0, %v3433_v34  ;;  %8535 = vst.msk [vmem:[%s17911_s2 + $0x51c] ss:$4 sm:$0x7] %vm10963_vm0, %v3447_v1  ;;  %v3359_v45 = vrot.slane %v18065_v60, %v10762_v3  ;;  %v3380_v54 = vrot.slane %v3352_v33, %v10762_v3 }
 0x2d0   :  { %8916 = vst.msk [vmem:[%s17911_s2 + $0x4f9] ss:$4 sm:$0x7] %vm10963_vm0, %v3448_v51  ;;  %8917 = vst.msk [vmem:[%s17911_s2 + $0x505] ss:$4 sm:$0x7] %vm10963_vm0, %v3450_v55 }
 0x2d1   :  { %8918 = vst.msk [vmem:[%s17911_s2 + $0x511] ss:$4 sm:$0x7] %vm10963_vm0, %v3433_v34  ;;  %8919 = vst.msk [vmem:[%s17911_s2 + $0x51d] ss:$4 sm:$0x7] %vm10963_vm0, %v3447_v1  ;;  %v3384_v4 = vcombine.high %v3380_v54, %v3380_v54 }
 0x2d2   :  { %9300 = vst.msk [vmem:[%s17911_s2 + $0x4fa] ss:$4 sm:$0x7] %vm10963_vm0, %v3448_v51  ;;  %9301 = vst.msk [vmem:[%s17911_s2 + $0x506] ss:$4 sm:$0x7] %vm10963_vm0, %v3450_v55  ;;  %v3520_v51 = vcombine.high %v11776_v42, %v11789_v23 }
 0x2d3   :  { %9302 = vst.msk [vmem:[%s17911_s2 + $0x512] ss:$4 sm:$0x7] %vm10963_vm0, %v3433_v34  ;;  %9303 = vst.msk [vmem:[%s17911_s2 + $0x51e] ss:$4 sm:$0x7] %vm10963_vm0, %v3447_v1  ;;  %v3381_v34 = vcombine.high %v3359_v45, %v3359_v45  ;;  %v3519_v1 = vcombine.low %v11776_v42, %v11789_v23  ;;  %v3549_v42 = vrot.slane %v3521_v58, %v10762_v3 }
 0x2d4   :  { %v12908_v24 = vpop.f32.mrb[48].mxu0  ;;  %8512 = vst.msk [vmem:[%s17911_s2 + $0x408] ss:$4 sm:$0x7] %vm10963_vm0, %v3248_v38  ;;  %v12948_v31 = vpop.f32.mrb[160].mxu1  ;;  %v18066_v23 = vld [vmem:[#allocation11_spill] sm:$0xff] }
 0x2d5   :  { %8513 = vst.msk [vmem:[%s17911_s2 + $0x414] ss:$4 sm:$0x7] %vm10963_vm0, %v3250_v13  ;;  %8896 = vst.msk [vmem:[%s17911_s2 + $0x409] ss:$4 sm:$0x7] %vm10963_vm0, %v3248_v38  ;;  %v1767_v32 = vadd.f32 %v11795_v20, %v18066_v23  ;;  %v3528_v20 = vrot.slane %v3519_v1, %v10762_v3 }
 0x2d6   :  { %8897 = vst.msk [vmem:[%s17911_s2 + $0x415] ss:$4 sm:$0x7] %vm10963_vm0, %v3250_v13  ;;  %9280 = vst.msk [vmem:[%s17911_s2 + $0x40a] ss:$4 sm:$0x7] %vm10963_vm0, %v3248_v38  ;;  %v3382_v38 = vcombine.high %v3366_v22, %v3366_v22 }
 0x2d7   :  { %9281 = vst.msk [vmem:[%s17911_s2 + $0x416] ss:$4 sm:$0x7] %vm10963_vm0, %v3250_v13  ;;  %v12950_v5 = vpop.f32.mrb[49].mxu0  ;;  %v13002_v55 = vpop.f32.mrb[161].mxu1  ;;  %v3383_v13 = vcombine.high %v3373_v61, %v3373_v61  ;;  %v3551_v1 = vcombine.high %v3528_v20, %v12946_v37 }
 0x2d8   :  { %8536 = vst.msk [vmem:[%s17911_s2 + $0x528] ss:$4 sm:$0x7] %vm10963_vm0, %v3449_v63  ;;  %8537 = vst.msk [vmem:[%s17911_s2 + $0x534] ss:$4 sm:$0x7] %vm10963_vm0, %v3451_v44 }
 0x2d9   :  { %8920 = vst.msk [vmem:[%s17911_s2 + $0x529] ss:$4 sm:$0x7] %vm10963_vm0, %v3449_v63  ;;  %8921 = vst.msk [vmem:[%s17911_s2 + $0x535] ss:$4 sm:$0x7] %vm10963_vm0, %v3451_v44 }
 0x2da   :  { %9304 = vst.msk [vmem:[%s17911_s2 + $0x52a] ss:$4 sm:$0x7] %vm10963_vm0, %v3449_v63  ;;  %9305 = vst.msk [vmem:[%s17911_s2 + $0x536] ss:$4 sm:$0x7] %vm10963_vm0, %v3451_v44  ;;  %v3535_v63 = vrot.slane %v3520_v51, %v10762_v3 }
 0x2db   :  { %8522 = vst.msk [vmem:[%s17911_s2 + $0x480] ss:$4 sm:$0x7] %vm10963_vm0, %v3359_v45  ;;  %8906 = vst.msk [vmem:[%s17911_s2 + $0x481] ss:$4 sm:$0x7] %vm10963_vm0, %v3359_v45 }
 0x2dc   :  { %9290 = vst.msk [vmem:[%s17911_s2 + $0x482] ss:$4 sm:$0x7] %vm10963_vm0, %v3359_v45  ;;  %8523 = vst.msk [vmem:[%s17911_s2 + $0x48c] ss:$4 sm:$0x7] %vm10963_vm0, %v3373_v61  ;;  %v3475_v45 = vrot.slane %v1767_v32, %v10762_v3  ;;  %v3552_v51 = vcombine.low %v3535_v63, %v3549_v42 }
 0x2dd   :  { %8526 = vst.msk [vmem:[%s17911_s2 + $0x4b0] ss:$4 sm:$0x7] %vm10963_vm0, %v3366_v22  ;;  %8907 = vst.msk [vmem:[%s17911_s2 + $0x48d] ss:$4 sm:$0x7] %vm10963_vm0, %v3373_v61 }
 0x2de   :  { %8910 = vst.msk [vmem:[%s17911_s2 + $0x4b1] ss:$4 sm:$0x7] %vm10963_vm0, %v3366_v22  ;;  %9291 = vst.msk [vmem:[%s17911_s2 + $0x48e] ss:$4 sm:$0x7] %vm10963_vm0, %v3373_v61 }
 0x2df   :  { %9294 = vst.msk [vmem:[%s17911_s2 + $0x4b2] ss:$4 sm:$0x7] %vm10963_vm0, %v3366_v22  ;;  %8524 = vst.msk [vmem:[%s17911_s2 + $0x498] ss:$4 sm:$0x7] %vm10963_vm0, %v3381_v34 }
 0x2e0   :  { %8527 = vst.msk [vmem:[%s17911_s2 + $0x4bc] ss:$4 sm:$0x7] %vm10963_vm0, %v3380_v54  ;;  %8908 = vst.msk [vmem:[%s17911_s2 + $0x499] ss:$4 sm:$0x7] %vm10963_vm0, %v3381_v34 }
 0x2e1   :  { %8911 = vst.msk [vmem:[%s17911_s2 + $0x4bd] ss:$4 sm:$0x7] %vm10963_vm0, %v3380_v54  ;;  %9292 = vst.msk [vmem:[%s17911_s2 + $0x49a] ss:$4 sm:$0x7] %vm10963_vm0, %v3381_v34  ;;  %v3550_v34 = vcombine.low %v3528_v20, %v12946_v37 }
 0x2e2   :  { %9295 = vst.msk [vmem:[%s17911_s2 + $0x4be] ss:$4 sm:$0x7] %vm10963_vm0, %v3380_v54  ;;  %v18067_v44 = vld [vmem:[#allocation14_spill] sm:$0xff]  ;;  %v13073_v60 = vpop.f32.mrb[50].mxu0  ;;  %v13110_v58 = vpop.f32.mrb[162].mxu1 }
 0x2e3   :  { %v13071_v33 = vadd.f32 %v11814_v8, %v18067_v44  ;;  %18068 = vst [vmem:[#allocation10_spill] sm:$0xff] %v13073_v60  ;;  %8525 = vst.msk [vmem:[%s17911_s2 + $0x4a4] ss:$4 sm:$0x7] %vm10963_vm0, %v3383_v13  ;;  %v3454_v8 = vcombine.high %v1767_v32, %v1767_v32  ;;  %v13112_v54 = vpop.f32.mrb[51].mxu0  ;;  %v3483_v32 = vcombine.low %v12671_v41, %v3475_v45 }
 0x2e4   :  { %8528 = vst.msk [vmem:[%s17911_s2 + $0x4c8] ss:$4 sm:$0x7] %vm10963_vm0, %v3382_v38  ;;  %8909 = vst.msk [vmem:[%s17911_s2 + $0x4a5] ss:$4 sm:$0x7] %vm10963_vm0, %v3383_v13  ;;  %v3484_v44 = vcombine.high %v12671_v41, %v3475_v45  ;;  %v3560_v22 = vrot.slane %v3550_v34, %v10762_v3  ;;  %v3574_v60 = vrot.slane %v3551_v1, %v10762_v3 }
 0x2e5   :  { %8912 = vst.msk [vmem:[%s17911_s2 + $0x4c9] ss:$4 sm:$0x7] %vm10963_vm0, %v3382_v38  ;;  %9293 = vst.msk [vmem:[%s17911_s2 + $0x4a6] ss:$4 sm:$0x7] %vm10963_vm0, %v3383_v13  ;;  %v3482_v23 = vrot.slane %v3454_v8, %v10762_v3  ;;  %v3655_v61 = vcombine.high %v13071_v33, %v13071_v33  ;;  %v3493_v8 = vrot.slane %v3483_v32, %v10762_v3 }
 0x2e6   :  { %9296 = vst.msk [vmem:[%s17911_s2 + $0x4ca] ss:$4 sm:$0x7] %vm10963_vm0, %v3382_v38  ;;  %18069 = vst [vmem:[#allocation9_spill] sm:$0xff] %v13112_v54  ;;  %v3553_v38 = vcombine.high %v3535_v63, %v3549_v42  ;;  %v13131_v13 = vpop.f32.mrb[163].mxu1  ;;  %v13142_v42 = vpop.f32.mrb[52].mxu0  ;;  %v3507_v41 = vrot.slane %v3484_v44, %v10762_v3  ;;  %v3582_v34 = vcombine.high %v3560_v22, %v3560_v22 }
 0x2e7   :  { %8529 = vst.msk [vmem:[%s17911_s2 + $0x4d4] ss:$4 sm:$0x7] %vm10963_vm0, %v3384_v4  ;;  %8913 = vst.msk [vmem:[%s17911_s2 + $0x4d5] ss:$4 sm:$0x7] %vm10963_vm0, %v3384_v4  ;;  %v3485_v20 = vcombine.low %v12674_v30, %v3482_v23  ;;  %v3486_v63 = vcombine.high %v12674_v30, %v3482_v23  ;;  %v3584_v54 = vcombine.high %v3574_v60, %v3574_v60 }
 0x2e8   :  { %9297 = vst.msk [vmem:[%s17911_s2 + $0x4d6] ss:$4 sm:$0x7] %vm10963_vm0, %v3384_v4  ;;  %18070 = vst [vmem:[#allocation12_spill] sm:$0xff] %v13131_v13  ;;  %v3567_v4 = vrot.slane %v3552_v51, %v10762_v3  ;;  %v3581_v37 = vrot.slane %v3553_v38, %v10762_v3  ;;  %v13148_v45 = vpop.f32.mrb[164].mxu1  ;;  %v13150_v13 = vpop.f32.mrb[53].mxu0  ;;  %v3515_v23 = vcombine.high %v3493_v8, %v3493_v8 }
 0x2e9   :  { %8546 = vst.msk [vmem:[%s17911_s2 + $0x5a0] ss:$4 sm:$0x7] %vm10963_vm0, %v3560_v22  ;;  %8547 = vst.msk [vmem:[%s17911_s2 + $0x5ac] ss:$4 sm:$0x7] %vm10963_vm0, %v3574_v60  ;;  %v3514_v38 = vrot.slane %v3486_v63, %v10762_v3  ;;  %v18071_v32 = vcombine.high %v10700_v11, %v10705_v29  ;;  %v3676_v11 = vrot.slane %v13071_v33, %v10762_v3 }
 0x2ea   :  { %v3583_v51 = vcombine.high %v3567_v4, %v3567_v4  ;;  %v3585_v1 = vcombine.high %v3581_v37, %v3581_v37  ;;  %8550 = vst.msk [vmem:[%s17911_s2 + $0x5d0] ss:$4 sm:$0x7] %vm10963_vm0, %v3567_v4  ;;  %8551 = vst.msk [vmem:[%s17911_s2 + $0x5dc] ss:$4 sm:$0x7] %vm10963_vm0, %v3581_v37  ;;  %v3683_v29 = vrot.slane %v3655_v61, %v10762_v3 }
 0x2eb   :  { %8930 = vst.msk [vmem:[%s17911_s2 + $0x5a1] ss:$4 sm:$0x7] %vm10963_vm0, %v3560_v22  ;;  %8931 = vst.msk [vmem:[%s17911_s2 + $0x5ad] ss:$4 sm:$0x7] %vm10963_vm0, %v3574_v60  ;;  %v13250_v44 = vrot.slane %v18071_v32, %v10762_v3  ;;  %v3518_v63 = vcombine.high %v3514_v38, %v3514_v38 }
 0x2ec   :  { %8934 = vst.msk [vmem:[%s17911_s2 + $0x5d1] ss:$4 sm:$0x7] %vm10963_vm0, %v3567_v4  ;;  %8935 = vst.msk [vmem:[%s17911_s2 + $0x5dd] ss:$4 sm:$0x7] %vm10963_vm0, %v3581_v37 }
 0x2ed   :  { %9314 = vst.msk [vmem:[%s17911_s2 + $0x5a2] ss:$4 sm:$0x7] %vm10963_vm0, %v3560_v22  ;;  %9315 = vst.msk [vmem:[%s17911_s2 + $0x5ae] ss:$4 sm:$0x7] %vm10963_vm0, %v3574_v60  ;;  %v3500_v22 = vrot.slane %v3485_v20, %v10762_v3  ;;  %v3517_v60 = vcombine.high %v3507_v41, %v3507_v41 }
 0x2ee   :  { %9318 = vst.msk [vmem:[%s17911_s2 + $0x5d2] ss:$4 sm:$0x7] %vm10963_vm0, %v3567_v4  ;;  %9319 = vst.msk [vmem:[%s17911_s2 + $0x5de] ss:$4 sm:$0x7] %vm10963_vm0, %v3581_v37 }
 0x2ef   :  { %v13212_v30 = vpop.f32.mrb[165].mxu1  ;;  %8538 = vst.msk [vmem:[%s17911_s2 + $0x540] ss:$4 sm:$0x7] %vm10963_vm0, %v3493_v8  ;;  %18072 = vst [vmem:[#allocation11_spill] sm:$0xff] %v13250_v44  ;;  %v13319_v37 = vpop.f32.mrb[54].mxu0  ;;  %v3516_v20 = vcombine.high %v3500_v22, %v3500_v22 }
 0x2f0   :  { %8539 = vst.msk [vmem:[%s17911_s2 + $0x54c] ss:$4 sm:$0x7] %vm10963_vm0, %v3507_v41  ;;  %8922 = vst.msk [vmem:[%s17911_s2 + $0x541] ss:$4 sm:$0x7] %vm10963_vm0, %v3493_v8 }
 0x2f1   :  { %8923 = vst.msk [vmem:[%s17911_s2 + $0x54d] ss:$4 sm:$0x7] %vm10963_vm0, %v3507_v41  ;;  %9306 = vst.msk [vmem:[%s17911_s2 + $0x542] ss:$4 sm:$0x7] %vm10963_vm0, %v3493_v8 }
 0x2f2   :  { %9307 = vst.msk [vmem:[%s17911_s2 + $0x54e] ss:$4 sm:$0x7] %vm10963_vm0, %v3507_v41  ;;  %8548 = vst.msk [vmem:[%s17911_s2 + $0x5b8] ss:$4 sm:$0x7] %vm10963_vm0, %v3582_v34 }
 0x2f3   :  { %8549 = vst.msk [vmem:[%s17911_s2 + $0x5c4] ss:$4 sm:$0x7] %vm10963_vm0, %v3584_v54  ;;  %8552 = vst.msk [vmem:[%s17911_s2 + $0x5e8] ss:$4 sm:$0x7] %vm10963_vm0, %v3583_v51 }
 0x2f4   :  { %8553 = vst.msk [vmem:[%s17911_s2 + $0x5f4] ss:$4 sm:$0x7] %vm10963_vm0, %v3585_v1  ;;  %8932 = vst.msk [vmem:[%s17911_s2 + $0x5b9] ss:$4 sm:$0x7] %vm10963_vm0, %v3582_v34 }
 0x2f5   :  { %8933 = vst.msk [vmem:[%s17911_s2 + $0x5c5] ss:$4 sm:$0x7] %vm10963_vm0, %v3584_v54  ;;  %8936 = vst.msk [vmem:[%s17911_s2 + $0x5e9] ss:$4 sm:$0x7] %vm10963_vm0, %v3583_v51 }
 0x2f6   :  { %8937 = vst.msk [vmem:[%s17911_s2 + $0x5f5] ss:$4 sm:$0x7] %vm10963_vm0, %v3585_v1  ;;  %9316 = vst.msk [vmem:[%s17911_s2 + $0x5ba] ss:$4 sm:$0x7] %vm10963_vm0, %v3582_v34 }
 0x2f7   :  { %9317 = vst.msk [vmem:[%s17911_s2 + $0x5c6] ss:$4 sm:$0x7] %vm10963_vm0, %v3584_v54  ;;  %9320 = vst.msk [vmem:[%s17911_s2 + $0x5ea] ss:$4 sm:$0x7] %vm10963_vm0, %v3583_v51  ;;  %v18073_v54 = vcombine.low %v11808_v43, %v11816_v26 }
 0x2f8   :  { %9321 = vst.msk [vmem:[%s17911_s2 + $0x5f6] ss:$4 sm:$0x7] %vm10963_vm0, %v3585_v1  ;;  %18074 = vst [vmem:[#allocation14_spill] sm:$0xff] %v13319_v37  ;;  %v18075_v33 = vld [vmem:[#allocation13_spill] sm:$0xff]  ;;  %v18076_v8 = vld [vmem:[#allocation16_spill] sm:$0xff]  ;;  %v3653_v1 = vcombine.low %v11948_v28, %v12018_v35 }
 0x2f9   :  { %v3595_v4 = vrot.slane %v18073_v54, %v10762_v3  ;;  %8540 = vst.msk [vmem:[%s17911_s2 + $0x558] ss:$4 sm:$0x7] %vm10963_vm0, %v3515_v23  ;;  %8541 = vst.msk [vmem:[%s17911_s2 + $0x564] ss:$4 sm:$0x7] %vm10963_vm0, %v3517_v60  ;;  %v1777_v61 = vadd.f32 %v11850_v19, %v18075_v33  ;;  %v13385_v41 = vadd.f32 %v12016_v52, %v18076_v8 }
 0x2fa   :  { %8542 = vst.msk [vmem:[%s17911_s2 + $0x570] ss:$4 sm:$0x7] %vm10963_vm0, %v3500_v22  ;;  %8543 = vst.msk [vmem:[%s17911_s2 + $0x57c] ss:$4 sm:$0x7] %vm10963_vm0, %v3514_v38 }
 0x2fb   :  { %8924 = vst.msk [vmem:[%s17911_s2 + $0x559] ss:$4 sm:$0x7] %vm10963_vm0, %v3515_v23  ;;  %8925 = vst.msk [vmem:[%s17911_s2 + $0x565] ss:$4 sm:$0x7] %vm10963_vm0, %v3517_v60  ;;  %v13444_v54 = vrot.slane %v13385_v41, %v10762_v3 }
 0x2fc   :  { %8926 = vst.msk [vmem:[%s17911_s2 + $0x571] ss:$4 sm:$0x7] %vm10963_vm0, %v3500_v22  ;;  %8927 = vst.msk [vmem:[%s17911_s2 + $0x57d] ss:$4 sm:$0x7] %vm10963_vm0, %v3514_v38 }
 0x2fd   :  { %9308 = vst.msk [vmem:[%s17911_s2 + $0x55a] ss:$4 sm:$0x7] %vm10963_vm0, %v3515_v23  ;;  %9309 = vst.msk [vmem:[%s17911_s2 + $0x566] ss:$4 sm:$0x7] %vm10963_vm0, %v3517_v60 }
 0x2fe   :  { %9310 = vst.msk [vmem:[%s17911_s2 + $0x572] ss:$4 sm:$0x7] %vm10963_vm0, %v3500_v22  ;;  %9311 = vst.msk [vmem:[%s17911_s2 + $0x57e] ss:$4 sm:$0x7] %vm10963_vm0, %v3514_v38  ;;  %v3654_v22 = vcombine.high %v11948_v28, %v12018_v35  ;;  %v18081_v28 = vcombine.high %v11808_v43, %v11816_v26 }
 0x2ff   :  { %v13387_v34 = vpop.f32.mrb[166].mxu1  ;;  %v13389_v51 = vpop.f32.mrb[55].mxu0  ;;  %v18078_v23 = vld [vmem:[#allocation15_spill] sm:$0xff]  ;;  %v18079_v60 = vld [vmem:[#allocation18_spill] sm:$0xff] }
 0x300   :  { %18077 = vst [vmem:[#allocation13_spill] sm:$0xff] %v13389_v51  ;;  %v13397_v38 = vadd.f32 %v12056_v50, %v18078_v23  ;;  %v13401_v19 = vadd.f32 %v12179_v40, %v18079_v60  ;;  %v13403_v52 = vpop.f32.mrb[167].mxu1  ;;  %8544 = vst.msk [vmem:[%s17911_s2 + $0x588] ss:$4 sm:$0x7] %vm10963_vm0, %v3516_v20  ;;  %v3602_v35 = vrot.slane %v18081_v28, %v10762_v3  ;;  %v13450_v8 = vpop.f32.mrb[56].mxu0 }
 0x301   :  { %18080 = vst [vmem:[#allocation16_spill] sm:$0xff] %v13403_v52  ;;  %8545 = vst.msk [vmem:[%s17911_s2 + $0x594] ss:$4 sm:$0x7] %vm10963_vm0, %v3518_v63  ;;  %v3588_v50 = vcombine.high %v1777_v61, %v1777_v61  ;;  %v3609_v40 = vrot.slane %v1777_v61, %v10762_v3  ;;  %v3669_v33 = vrot.slane %v3654_v22, %v10762_v3  ;;  %v13457_v60 = vpop.f32.mrb[168].mxu1  ;;  %v13459_v28 = vpop.f32.mrb[57].mxu0 }
 0x302   :  { %8928 = vst.msk [vmem:[%s17911_s2 + $0x589] ss:$4 sm:$0x7] %vm10963_vm0, %v3516_v20  ;;  %8929 = vst.msk [vmem:[%s17911_s2 + $0x595] ss:$4 sm:$0x7] %vm10963_vm0, %v3518_v63  ;;  %v13455_v23 = vrot.slane %v13397_v38, %v10762_v3 }
 0x303   :  { %9312 = vst.msk [vmem:[%s17911_s2 + $0x58a] ss:$4 sm:$0x7] %vm10963_vm0, %v3516_v20  ;;  %9313 = vst.msk [vmem:[%s17911_s2 + $0x596] ss:$4 sm:$0x7] %vm10963_vm0, %v3518_v63  ;;  %v3662_v20 = vrot.slane %v3653_v1, %v10762_v3  ;;  %v3616_v26 = vrot.slane %v3588_v50, %v10762_v3  ;;  %v3617_v43 = vcombine.low %v3595_v4, %v3609_v40 }
 0x304   :  { %18082 = vst [vmem:[#allocation15_spill] sm:$0xff] %v13450_v8  ;;  %v3618_v61 = vcombine.high %v3595_v4, %v3609_v40  ;;  %18083 = vst [vmem:[#allocation18_spill] sm:$0xff] %v13457_v60  ;;  %v3686_v22 = vcombine.low %v3669_v33, %v3683_v29  ;;  %v3687_v44 = vcombine.high %v3669_v33, %v3683_v29  ;;  %v13461_v52 = vpop.f32.mrb[169].mxu1  ;;  %v13469_v51 = vpop.f32.mrb[58].mxu0 }
 0x305   :  { %18084 = vst [vmem:[#allocation74_spill] sm:$0xff] %v13459_v28  ;;  %v3684_v1 = vcombine.low %v3662_v20, %v3676_v11  ;;  %v3685_v32 = vcombine.high %v3662_v20, %v3676_v11  ;;  %v3619_v63 = vcombine.low %v3602_v35, %v3616_v26  ;;  %v3620_v8 = vcombine.high %v3602_v35, %v3616_v26 }
 0x306   :  { %v3627_v50 = vrot.slane %v3617_v43, %v10762_v3  ;;  %v3641_v4 = vrot.slane %v3618_v61, %v10762_v3  ;;  %v3701_v37 = vrot.slane %v3686_v22, %v10762_v3  ;;  %v3715_v28 = vrot.slane %v3687_v44, %v10762_v3  ;;  %v13503_v44 = vpop.f32.mrb[170].mxu1 }
 0x307   :  { %v3694_v40 = vrot.slane %v3684_v1, %v10762_v3  ;;  %v3708_v60 = vrot.slane %v3685_v32, %v10762_v3  ;;  %v3634_v11 = vrot.slane %v3619_v63, %v10762_v3  ;;  %v3648_v29 = vrot.slane %v3620_v8, %v10762_v3  ;;  %v13505_v32 = vpop.f32.mrb[59].mxu0  ;;  %v13567_v43 = vpop.f32.mrb[171].mxu1 }
 0x308   :  { %v3649_v20 = vcombine.high %v3627_v50, %v3627_v50  ;;  %v3651_v35 = vcombine.high %v3641_v4, %v3641_v4  ;;  %8554 = vst.msk [vmem:[%s17911_s2 + $0x600] ss:$4 sm:$0x7] %vm10963_vm0, %v3627_v50  ;;  %8555 = vst.msk [vmem:[%s17911_s2 + $0x60c] ss:$4 sm:$0x7] %vm10963_vm0, %v3641_v4  ;;  %v3717_v63 = vcombine.high %v3701_v37, %v3701_v37 }
 0x309   :  { %8938 = vst.msk [vmem:[%s17911_s2 + $0x601] ss:$4 sm:$0x7] %vm10963_vm0, %v3627_v50  ;;  %8939 = vst.msk [vmem:[%s17911_s2 + $0x60d] ss:$4 sm:$0x7] %vm10963_vm0, %v3641_v4  ;;  %v3716_v33 = vcombine.high %v3694_v40, %v3694_v40  ;;  %v3718_v8 = vcombine.high %v3708_v60, %v3708_v60  ;;  %v3719_v26 = vcombine.high %v3715_v28, %v3715_v28 }
 0x30a   :  { %9322 = vst.msk [vmem:[%s17911_s2 + $0x602] ss:$4 sm:$0x7] %vm10963_vm0, %v3627_v50  ;;  %9323 = vst.msk [vmem:[%s17911_s2 + $0x60e] ss:$4 sm:$0x7] %vm10963_vm0, %v3641_v4  ;;  %v3650_v61 = vcombine.high %v3634_v11, %v3634_v11  ;;  %v3652_v1 = vcombine.high %v3648_v29, %v3648_v29  ;;  %v3720_v50 = vcombine.low %v12140_v48, %v12181_v7 }
 0x30b   :  { %8562 = vst.msk [vmem:[%s17911_s2 + $0x660] ss:$4 sm:$0x7] %vm10963_vm0, %v3694_v40  ;;  %8563 = vst.msk [vmem:[%s17911_s2 + $0x66c] ss:$4 sm:$0x7] %vm10963_vm0, %v3708_v60  ;;  %v3721_v4 = vcombine.high %v12140_v48, %v12181_v7  ;;  %v13741_v48 = vrot.slane %v13401_v19, %v10762_v3 }
 0x30c   :  { %8566 = vst.msk [vmem:[%s17911_s2 + $0x690] ss:$4 sm:$0x7] %vm10963_vm0, %v3701_v37  ;;  %8567 = vst.msk [vmem:[%s17911_s2 + $0x69c] ss:$4 sm:$0x7] %vm10963_vm0, %v3715_v28 }
 0x30d   :  { %8946 = vst.msk [vmem:[%s17911_s2 + $0x661] ss:$4 sm:$0x7] %vm10963_vm0, %v3694_v40  ;;  %8947 = vst.msk [vmem:[%s17911_s2 + $0x66d] ss:$4 sm:$0x7] %vm10963_vm0, %v3708_v60 }
 0x30e   :  { %8950 = vst.msk [vmem:[%s17911_s2 + $0x691] ss:$4 sm:$0x7] %vm10963_vm0, %v3701_v37  ;;  %8951 = vst.msk [vmem:[%s17911_s2 + $0x69d] ss:$4 sm:$0x7] %vm10963_vm0, %v3715_v28 }
 0x30f   :  { %9330 = vst.msk [vmem:[%s17911_s2 + $0x662] ss:$4 sm:$0x7] %vm10963_vm0, %v3694_v40  ;;  %9331 = vst.msk [vmem:[%s17911_s2 + $0x66e] ss:$4 sm:$0x7] %vm10963_vm0, %v3708_v60 }
 0x310   :  { %9334 = vst.msk [vmem:[%s17911_s2 + $0x692] ss:$4 sm:$0x7] %vm10963_vm0, %v3701_v37  ;;  %9335 = vst.msk [vmem:[%s17911_s2 + $0x69e] ss:$4 sm:$0x7] %vm10963_vm0, %v3715_v28  ;;  %v18085_v37 = vcombine.high %v13385_v41, %v13385_v41  ;;  %v3923_v28 = vcombine.high %v13401_v19, %v13401_v19  ;;  %v18086_v41 = vcombine.high %v13397_v38, %v13397_v38 }
 0x311   :  { %8556 = vst.msk [vmem:[%s17911_s2 + $0x618] ss:$4 sm:$0x7] %vm10963_vm0, %v3649_v20  ;;  %8557 = vst.msk [vmem:[%s17911_s2 + $0x624] ss:$4 sm:$0x7] %vm10963_vm0, %v3651_v35  ;;  %v3787_v38 = vcombine.low %v12259_v18, %v12280_v6  ;;  %v3729_v19 = vrot.slane %v3720_v50, %v10762_v3 }
 0x312   :  { %8558 = vst.msk [vmem:[%s17911_s2 + $0x630] ss:$4 sm:$0x7] %vm10963_vm0, %v3634_v11  ;;  %8559 = vst.msk [vmem:[%s17911_s2 + $0x63c] ss:$4 sm:$0x7] %vm10963_vm0, %v3648_v29  ;;  %v13633_v60 = vrot.slane %v18085_v37, %v10762_v3  ;;  %v3750_v22 = vrot.slane %v18086_v41, %v10762_v3 }
 0x313   :  { %8940 = vst.msk [vmem:[%s17911_s2 + $0x619] ss:$4 sm:$0x7] %vm10963_vm0, %v3649_v20  ;;  %8941 = vst.msk [vmem:[%s17911_s2 + $0x625] ss:$4 sm:$0x7] %vm10963_vm0, %v3651_v35  ;;  %v3751_v37 = vcombine.low %v3729_v19, %v13455_v23 }
 0x314   :  { %8942 = vst.msk [vmem:[%s17911_s2 + $0x631] ss:$4 sm:$0x7] %vm10963_vm0, %v3634_v11  ;;  %8943 = vst.msk [vmem:[%s17911_s2 + $0x63d] ss:$4 sm:$0x7] %vm10963_vm0, %v3648_v29 }
 0x315   :  { %9324 = vst.msk [vmem:[%s17911_s2 + $0x61a] ss:$4 sm:$0x7] %vm10963_vm0, %v3649_v20  ;;  %9325 = vst.msk [vmem:[%s17911_s2 + $0x626] ss:$4 sm:$0x7] %vm10963_vm0, %v3651_v35  ;;  %v3788_v20 = vcombine.high %v12259_v18, %v12280_v6  ;;  %v3796_v6 = vrot.slane %v3787_v38, %v10762_v3 }
 0x316   :  { %9326 = vst.msk [vmem:[%s17911_s2 + $0x632] ss:$4 sm:$0x7] %vm10963_vm0, %v3634_v11  ;;  %9327 = vst.msk [vmem:[%s17911_s2 + $0x63e] ss:$4 sm:$0x7] %vm10963_vm0, %v3648_v29 }
 0x317   :  { %8564 = vst.msk [vmem:[%s17911_s2 + $0x678] ss:$4 sm:$0x7] %vm10963_vm0, %v3716_v33  ;;  %8565 = vst.msk [vmem:[%s17911_s2 + $0x684] ss:$4 sm:$0x7] %vm10963_vm0, %v3718_v8  ;;  %v3819_v38 = vcombine.high %v3796_v6, %v13444_v54 }
 0x318   :  { %8568 = vst.msk [vmem:[%s17911_s2 + $0x6a8] ss:$4 sm:$0x7] %vm10963_vm0, %v3717_v63  ;;  %8569 = vst.msk [vmem:[%s17911_s2 + $0x6b4] ss:$4 sm:$0x7] %vm10963_vm0, %v3719_v26 }
 0x319   :  { %8948 = vst.msk [vmem:[%s17911_s2 + $0x679] ss:$4 sm:$0x7] %vm10963_vm0, %v3716_v33  ;;  %8949 = vst.msk [vmem:[%s17911_s2 + $0x685] ss:$4 sm:$0x7] %vm10963_vm0, %v3718_v8 }
 0x31a   :  { %8952 = vst.msk [vmem:[%s17911_s2 + $0x6a9] ss:$4 sm:$0x7] %vm10963_vm0, %v3717_v63  ;;  %8953 = vst.msk [vmem:[%s17911_s2 + $0x6b5] ss:$4 sm:$0x7] %vm10963_vm0, %v3719_v26 }
 0x31b   :  { %9332 = vst.msk [vmem:[%s17911_s2 + $0x67a] ss:$4 sm:$0x7] %vm10963_vm0, %v3716_v33  ;;  %9333 = vst.msk [vmem:[%s17911_s2 + $0x686] ss:$4 sm:$0x7] %vm10963_vm0, %v3718_v8  ;;  %v3736_v8 = vrot.slane %v3721_v4, %v10762_v3 }
 0x31c   :  { %9336 = vst.msk [vmem:[%s17911_s2 + $0x6aa] ss:$4 sm:$0x7] %vm10963_vm0, %v3717_v63  ;;  %9337 = vst.msk [vmem:[%s17911_s2 + $0x6b6] ss:$4 sm:$0x7] %vm10963_vm0, %v3719_v26  ;;  %v13756_v63 = vrot.slane %v3923_v28, %v10762_v3  ;;  %v3752_v28 = vcombine.high %v3729_v19, %v13455_v23  ;;  %v3761_v23 = vrot.slane %v3751_v37, %v10762_v3 }
 0x31d   :  { %v18087_v40 = vld [vmem:[#allocation17_spill] sm:$0xff]  ;;  %v13707_v29 = vpop.f32.mrb[60].mxu0  ;;  %8560 = vst.msk [vmem:[%s17911_s2 + $0x648] ss:$4 sm:$0x7] %vm10963_vm0, %v3650_v61  ;;  %v18089_v7 = vld [vmem:[#allocation20_spill] sm:$0xff]  ;;  %v3753_v41 = vcombine.low %v3736_v8, %v3750_v22  ;;  %v3754_v50 = vcombine.high %v3736_v8, %v3750_v22 }
 0x31e   :  { %v1797_v11 = vadd.f32 %v12218_v62, %v18087_v40  ;;  %18088 = vst [vmem:[#allocation17_spill] sm:$0xff] %v13707_v29  ;;  %8561 = vst.msk [vmem:[%s17911_s2 + $0x654] ss:$4 sm:$0x7] %vm10963_vm0, %v3652_v1  ;;  %v13745_v62 = vadd.f32 %v12278_v10, %v18089_v7  ;;  %v13751_v35 = vpop.f32.mrb[172].mxu1  ;;  %v13753_v33 = vpop.f32.mrb[61].mxu0  ;;  %v3818_v7 = vcombine.low %v3796_v6, %v13444_v54 }
 0x31f   :  { %8944 = vst.msk [vmem:[%s17911_s2 + $0x649] ss:$4 sm:$0x7] %vm10963_vm0, %v3650_v61  ;;  %8945 = vst.msk [vmem:[%s17911_s2 + $0x655] ss:$4 sm:$0x7] %vm10963_vm0, %v3652_v1  ;;  %v3768_v22 = vrot.slane %v3753_v41, %v10762_v3  ;;  %v3775_v19 = vrot.slane %v3752_v28, %v10762_v3  ;;  %v3782_v8 = vrot.slane %v3754_v50, %v10762_v3 }
 0x320   :  { %9328 = vst.msk [vmem:[%s17911_s2 + $0x64a] ss:$4 sm:$0x7] %vm10963_vm0, %v3650_v61  ;;  %9329 = vst.msk [vmem:[%s17911_s2 + $0x656] ss:$4 sm:$0x7] %vm10963_vm0, %v3652_v1  ;;  %v3856_v26 = vcombine.high %v1797_v11, %v1797_v11  ;;  %v13763_v61 = vrot.slane %v1797_v11, %v10762_v3  ;;  %v3803_v1 = vrot.slane %v3788_v20, %v10762_v3 }
 0x321   :  { %v13760_v10 = vpop.f32.mrb[173].mxu1  ;;  %v13771_v4 = vpop.f32.mrb[62].mxu0  ;;  %v13778_v11 = vrot.slane %v13745_v62, %v10762_v3  ;;  %v3828_v54 = vrot.slane %v3818_v7, %v10762_v3  ;;  %v3842_v6 = vrot.slane %v3819_v38, %v10762_v3  ;;  %v3785_v29 = vcombine.high %v3775_v19, %v3775_v19  ;;  %8570 = vst.msk [vmem:[%s17911_s2 + $0x6c0] ss:$4 sm:$0x7] %vm10963_vm0, %v3761_v23 }
 0x322   :  { %18090 = vst [vmem:[#allocation20_spill] sm:$0xff] %v13760_v10  ;;  %18091 = vst [vmem:[#allocation75_spill] sm:$0xff] %v13771_v4  ;;  %v13774_v40 = vrot.slane %v3856_v26, %v10762_v3  ;;  %v13782_v20 = vpop.f32.mrb[174].mxu1  ;;  %v13784_v18 = vpop.f32.mrb[63].mxu0  ;;  %v3820_v4 = vcombine.low %v3803_v1, %v13633_v60  ;;  %v3821_v10 = vcombine.high %v3803_v1, %v13633_v60 }
 0x323   :  { %18092 = vst [vmem:[#allocation76_spill] sm:$0xff] %v13782_v20  ;;  %18093 = vst [vmem:[#allocation77_spill] sm:$0xff] %v13784_v18  ;;  %v13790_v26 = vpop.f32.mrb[175].mxu1  ;;  %v3783_v20 = vcombine.high %v3761_v23, %v3761_v23  ;;  %v3784_v18 = vcombine.high %v3768_v22, %v3768_v22  ;;  %v3786_v37 = vcombine.high %v3782_v8, %v3782_v8 }
 0x324   :  { %8571 = vst.msk [vmem:[%s17911_s2 + $0x6cc] ss:$4 sm:$0x7] %vm10963_vm0, %v3775_v19  ;;  %8574 = vst.msk [vmem:[%s17911_s2 + $0x6f0] ss:$4 sm:$0x7] %vm10963_vm0, %v3768_v22  ;;  %v3835_v60 = vrot.slane %v3820_v4, %v10762_v3  ;;  %v3849_v1 = vrot.slane %v3821_v10, %v10762_v3  ;;  %v3850_v28 = vcombine.high %v3828_v54, %v3828_v54 }
 0x325   :  { %8575 = vst.msk [vmem:[%s17911_s2 + $0x6fc] ss:$4 sm:$0x7] %vm10963_vm0, %v3782_v8  ;;  %8954 = vst.msk [vmem:[%s17911_s2 + $0x6c1] ss:$4 sm:$0x7] %vm10963_vm0, %v3761_v23  ;;  %v3852_v41 = vcombine.high %v3842_v6, %v3842_v6  ;;  %v3855_v38 = vcombine.high %v12388_v0, %v12396_v16 }
 0x326   :  { %8955 = vst.msk [vmem:[%s17911_s2 + $0x6cd] ss:$4 sm:$0x7] %vm10963_vm0, %v3775_v19  ;;  %8958 = vst.msk [vmem:[%s17911_s2 + $0x6f1] ss:$4 sm:$0x7] %vm10963_vm0, %v3768_v22 }
 0x327   :  { %8959 = vst.msk [vmem:[%s17911_s2 + $0x6fd] ss:$4 sm:$0x7] %vm10963_vm0, %v3782_v8  ;;  %9338 = vst.msk [vmem:[%s17911_s2 + $0x6c2] ss:$4 sm:$0x7] %vm10963_vm0, %v3761_v23  ;;  %v18098_v23 = vcombine.high %v13745_v62, %v13745_v62  ;;  %v3870_v62 = vrot.slane %v3855_v38, %v10762_v3  ;;  %v3921_v38 = vcombine.low %v12496_v2, %v12564_v56 }
 0x328   :  { %9339 = vst.msk [vmem:[%s17911_s2 + $0x6ce] ss:$4 sm:$0x7] %vm10963_vm0, %v3775_v19  ;;  %9342 = vst.msk [vmem:[%s17911_s2 + $0x6f2] ss:$4 sm:$0x7] %vm10963_vm0, %v3768_v22 }
 0x329   :  { %9343 = vst.msk [vmem:[%s17911_s2 + $0x6fe] ss:$4 sm:$0x7] %vm10963_vm0, %v3782_v8  ;;  %8578 = vst.msk [vmem:[%s17911_s2 + $0x720] ss:$4 sm:$0x7] %vm10963_vm0, %v3828_v54  ;;  %v14026_v22 = vrot.slane %v18098_v23, %v10762_v3 }
 0x32a   :  { %8579 = vst.msk [vmem:[%s17911_s2 + $0x72c] ss:$4 sm:$0x7] %vm10963_vm0, %v3842_v6  ;;  %8962 = vst.msk [vmem:[%s17911_s2 + $0x721] ss:$4 sm:$0x7] %vm10963_vm0, %v3828_v54 }
 0x32b   :  { %8963 = vst.msk [vmem:[%s17911_s2 + $0x72d] ss:$4 sm:$0x7] %vm10963_vm0, %v3842_v6  ;;  %9346 = vst.msk [vmem:[%s17911_s2 + $0x722] ss:$4 sm:$0x7] %vm10963_vm0, %v3828_v54 }
 0x32c   :  { %9347 = vst.msk [vmem:[%s17911_s2 + $0x72e] ss:$4 sm:$0x7] %vm10963_vm0, %v3842_v6  ;;  %8572 = vst.msk [vmem:[%s17911_s2 + $0x6d8] ss:$4 sm:$0x7] %vm10963_vm0, %v3783_v20 }
 0x32d   :  { %8573 = vst.msk [vmem:[%s17911_s2 + $0x6e4] ss:$4 sm:$0x7] %vm10963_vm0, %v3785_v29  ;;  %8576 = vst.msk [vmem:[%s17911_s2 + $0x708] ss:$4 sm:$0x7] %vm10963_vm0, %v3784_v18 }
 0x32e   :  { %8577 = vst.msk [vmem:[%s17911_s2 + $0x714] ss:$4 sm:$0x7] %vm10963_vm0, %v3786_v37  ;;  %8956 = vst.msk [vmem:[%s17911_s2 + $0x6d9] ss:$4 sm:$0x7] %vm10963_vm0, %v3783_v20 }
 0x32f   :  { %8957 = vst.msk [vmem:[%s17911_s2 + $0x6e5] ss:$4 sm:$0x7] %vm10963_vm0, %v3785_v29  ;;  %8960 = vst.msk [vmem:[%s17911_s2 + $0x709] ss:$4 sm:$0x7] %vm10963_vm0, %v3784_v18 }
 0x330   :  { %8961 = vst.msk [vmem:[%s17911_s2 + $0x715] ss:$4 sm:$0x7] %vm10963_vm0, %v3786_v37  ;;  %9340 = vst.msk [vmem:[%s17911_s2 + $0x6da] ss:$4 sm:$0x7] %vm10963_vm0, %v3783_v20  ;;  %v3851_v20 = vcombine.high %v3835_v60, %v3835_v60 }
 0x331   :  { %9341 = vst.msk [vmem:[%s17911_s2 + $0x6e6] ss:$4 sm:$0x7] %vm10963_vm0, %v3785_v29  ;;  %9344 = vst.msk [vmem:[%s17911_s2 + $0x70a] ss:$4 sm:$0x7] %vm10963_vm0, %v3784_v18  ;;  %v3854_v29 = vcombine.low %v12388_v0, %v12396_v16  ;;  %v3853_v18 = vcombine.high %v3849_v1, %v3849_v1 }
 0x332   :  { %9345 = vst.msk [vmem:[%s17911_s2 + $0x716] ss:$4 sm:$0x7] %vm10963_vm0, %v3786_v37  ;;  %v18094_v10 = vld [vmem:[#allocation19_spill] sm:$0xff]  ;;  %v18095_v4 = vld [vmem:[#allocation22_spill] sm:$0xff]  ;;  %v18096_v16 = vld [vmem:[#allocation21_spill] sm:$0xff] }
 0x333   :  { %v1807_v50 = vadd.f32 %v12331_v36, %v18094_v10  ;;  %v1822_v7 = vadd.f32 %v12394_v46, %v18095_v4  ;;  %8580 = vst.msk [vmem:[%s17911_s2 + $0x738] ss:$4 sm:$0x7] %vm10963_vm0, %v3850_v28  ;;  %8581 = vst.msk [vmem:[%s17911_s2 + $0x744] ss:$4 sm:$0x7] %vm10963_vm0, %v3852_v41  ;;  %v1817_v36 = vadd.f32 %v12402_v17, %v18096_v16 }
 0x334   :  { %8582 = vst.msk [vmem:[%s17911_s2 + $0x750] ss:$4 sm:$0x7] %vm10963_vm0, %v3835_v60  ;;  %8583 = vst.msk [vmem:[%s17911_s2 + $0x75c] ss:$4 sm:$0x7] %vm10963_vm0, %v3849_v1  ;;  %v3888_v4 = vcombine.high %v3870_v62, %v13774_v40 }
 0x335   :  { %8964 = vst.msk [vmem:[%s17911_s2 + $0x739] ss:$4 sm:$0x7] %vm10963_vm0, %v3850_v28  ;;  %8965 = vst.msk [vmem:[%s17911_s2 + $0x745] ss:$4 sm:$0x7] %vm10963_vm0, %v3852_v41  ;;  %v3990_v19 = vcombine.high %v1807_v50, %v1807_v50  ;;  %v14029_v8 = vrot.slane %v1807_v50, %v10762_v3  ;;  %v4191_v54 = vcombine.high %v1822_v7, %v1822_v7 }
 0x336   :  { %8966 = vst.msk [vmem:[%s17911_s2 + $0x751] ss:$4 sm:$0x7] %vm10963_vm0, %v3835_v60  ;;  %8967 = vst.msk [vmem:[%s17911_s2 + $0x75d] ss:$4 sm:$0x7] %vm10963_vm0, %v3849_v1  ;;  %v14062_v17 = vrot.slane %v1822_v7, %v10762_v3  ;;  %v4124_v6 = vcombine.high %v1817_v36, %v1817_v36  ;;  %v3887_v50 = vcombine.low %v3870_v62, %v13774_v40 }
 0x337   :  { %9348 = vst.msk [vmem:[%s17911_s2 + $0x73a] ss:$4 sm:$0x7] %vm10963_vm0, %v3850_v28  ;;  %9349 = vst.msk [vmem:[%s17911_s2 + $0x746] ss:$4 sm:$0x7] %vm10963_vm0, %v3852_v41  ;;  %v14067_v37 = vrot.slane %v3990_v19, %v10762_v3  ;;  %v3916_v40 = vrot.slane %v3888_v4, %v10762_v3 }
 0x338   :  { %9350 = vst.msk [vmem:[%s17911_s2 + $0x752] ss:$4 sm:$0x7] %vm10963_vm0, %v3835_v60  ;;  %9351 = vst.msk [vmem:[%s17911_s2 + $0x75e] ss:$4 sm:$0x7] %vm10963_vm0, %v3849_v1  ;;  %v14070_v60 = vrot.slane %v4191_v54, %v10762_v3  ;;  %v14073_v1 = vrot.slane %v1817_v36, %v10762_v3  ;;  %v14082_v7 = vrot.slane %v4124_v6, %v10762_v3 }
 0x339   :  { %v18097_v0 = vld [vmem:[#allocation24_spill] sm:$0xff]  ;;  %8584 = vst.msk [vmem:[%s17911_s2 + $0x768] ss:$4 sm:$0x7] %vm10963_vm0, %v3851_v20  ;;  %v3930_v36 = vrot.slane %v3921_v38, %v10762_v3  ;;  %v18100_v19 = vld [vmem:[#allocation26_spill] sm:$0xff]  ;;  %v3920_v62 = vcombine.high %v3916_v40, %v3916_v40 }
 0x33a   :  { %v14020_v46 = vadd.f32 %v12562_v59, %v18097_v0  ;;  %8585 = vst.msk [vmem:[%s17911_s2 + $0x774] ss:$4 sm:$0x7] %vm10963_vm0, %v3853_v18  ;;  %8968 = vst.msk [vmem:[%s17911_s2 + $0x769] ss:$4 sm:$0x7] %vm10963_vm0, %v3851_v20  ;;  %v3863_v59 = vrot.slane %v3854_v29, %v10762_v3  ;;  %v14102_v54 = vadd.f32 %v12685_v39, %v18100_v19 }
 0x33b   :  { %8969 = vst.msk [vmem:[%s17911_s2 + $0x775] ss:$4 sm:$0x7] %vm10963_vm0, %v3853_v18  ;;  %9352 = vst.msk [vmem:[%s17911_s2 + $0x76a] ss:$4 sm:$0x7] %vm10963_vm0, %v3851_v20  ;;  %v3922_v20 = vcombine.high %v12496_v2, %v12564_v56  ;;  %v3953_v39 = vcombine.high %v3930_v36, %v13741_v48 }
 0x33c   :  { %9353 = vst.msk [vmem:[%s17911_s2 + $0x776] ss:$4 sm:$0x7] %vm10963_vm0, %v3853_v18  ;;  %v4325_v28 = vcombine.high %v14020_v46, %v14020_v46  ;;  %v3885_v41 = vcombine.low %v3863_v59, %v13763_v61  ;;  %v3886_v10 = vcombine.high %v3863_v59, %v13763_v61  ;;  %v14086_v29 = vrot.slane %v14020_v46, %v10762_v3  ;;  %v18099_v46 = vld [vmem:[#allocation23_spill] sm:$0xff]  ;;  %v18101_v19 = vld [vmem:[#allocation25_spill] sm:$0xff] }
 0x33d   :  { %v3902_v61 = vrot.slane %v3887_v50, %v10762_v3  ;;  %v3937_v0 = vrot.slane %v3922_v20, %v10762_v3  ;;  %v1827_v23 = vadd.f32 %v12636_v57, %v18099_v46  ;;  %8591 = vst.msk [vmem:[%s17911_s2 + $0x7bc] ss:$4 sm:$0x7] %vm10963_vm0, %v3916_v40  ;;  %8975 = vst.msk [vmem:[%s17911_s2 + $0x7bd] ss:$4 sm:$0x7] %vm10963_vm0, %v3916_v40 }
 0x33e   :  { %v3895_v18 = vrot.slane %v3885_v41, %v10762_v3  ;;  %v3909_v16 = vrot.slane %v3886_v10, %v10762_v3  ;;  %9359 = vst.msk [vmem:[%s17911_s2 + $0x7be] ss:$4 sm:$0x7] %vm10963_vm0, %v3916_v40  ;;  %v3952_v57 = vcombine.low %v3930_v36, %v13741_v48  ;;  %8593 = vst.msk [vmem:[%s17911_s2 + $0x7d4] ss:$4 sm:$0x7] %vm10963_vm0, %v3920_v62 }
 0x33f   :  { %v3918_v56 = vcombine.high %v3902_v61, %v3902_v61  ;;  %8590 = vst.msk [vmem:[%s17911_s2 + $0x7b0] ss:$4 sm:$0x7] %vm10963_vm0, %v3902_v61  ;;  %8974 = vst.msk [vmem:[%s17911_s2 + $0x7b1] ss:$4 sm:$0x7] %vm10963_vm0, %v3902_v61  ;;  %v3954_v6 = vcombine.low %v3937_v0, %v13756_v63  ;;  %v3955_v41 = vcombine.high %v3937_v0, %v13756_v63 }
 0x340   :  { %v3917_v2 = vcombine.high %v3895_v18, %v3895_v18  ;;  %v3919_v59 = vcombine.high %v3909_v16, %v3909_v16  ;;  %8586 = vst.msk [vmem:[%s17911_s2 + $0x780] ss:$4 sm:$0x7] %vm10963_vm0, %v3895_v18  ;;  %8587 = vst.msk [vmem:[%s17911_s2 + $0x78c] ss:$4 sm:$0x7] %vm10963_vm0, %v3909_v16  ;;  %v14229_v48 = vrot.slane %v4325_v28, %v10762_v3 }
 0x341   :  { %8970 = vst.msk [vmem:[%s17911_s2 + $0x781] ss:$4 sm:$0x7] %vm10963_vm0, %v3895_v18  ;;  %8971 = vst.msk [vmem:[%s17911_s2 + $0x78d] ss:$4 sm:$0x7] %vm10963_vm0, %v3909_v16  ;;  %v4258_v63 = vcombine.high %v1827_v23, %v1827_v23  ;;  %v14232_v10 = vrot.slane %v1827_v23, %v10762_v3  ;;  %v4459_v50 = vcombine.high %v14102_v54, %v14102_v54 }
 0x342   :  { %9354 = vst.msk [vmem:[%s17911_s2 + $0x782] ss:$4 sm:$0x7] %vm10963_vm0, %v3895_v18  ;;  %9355 = vst.msk [vmem:[%s17911_s2 + $0x78e] ss:$4 sm:$0x7] %vm10963_vm0, %v3909_v16  ;;  %v3962_v4 = vrot.slane %v3952_v57, %v10762_v3  ;;  %v3969_v38 = vrot.slane %v3954_v6, %v10762_v3  ;;  %v3976_v20 = vrot.slane %v3953_v39, %v10762_v3 }
 0x343   :  { %9358 = vst.msk [vmem:[%s17911_s2 + $0x7b2] ss:$4 sm:$0x7] %vm10963_vm0, %v3902_v61  ;;  %8588 = vst.msk [vmem:[%s17911_s2 + $0x798] ss:$4 sm:$0x7] %vm10963_vm0, %v3917_v2  ;;  %v3983_v18 = vrot.slane %v3955_v41, %v10762_v3  ;;  %v14241_v61 = vrot.slane %v4258_v63, %v10762_v3  ;;  %v14245_v28 = vrot.slane %v14102_v54, %v10762_v3 }
 0x344   :  { %8589 = vst.msk [vmem:[%s17911_s2 + $0x7a4] ss:$4 sm:$0x7] %vm10963_vm0, %v3919_v59  ;;  %8592 = vst.msk [vmem:[%s17911_s2 + $0x7c8] ss:$4 sm:$0x7] %vm10963_vm0, %v3918_v56  ;;  %v3988_v16 = vcombine.low %v12679_v21, %v12687_v47  ;;  %v3989_v40 = vcombine.high %v12679_v21, %v12687_v47  ;;  %v3984_v36 = vcombine.high %v3962_v4, %v3962_v4 }
 0x345   :  { %8972 = vst.msk [vmem:[%s17911_s2 + $0x799] ss:$4 sm:$0x7] %vm10963_vm0, %v3917_v2  ;;  %8973 = vst.msk [vmem:[%s17911_s2 + $0x7a5] ss:$4 sm:$0x7] %vm10963_vm0, %v3919_v59  ;;  %v3985_v0 = vcombine.high %v3969_v38, %v3969_v38  ;;  %v3986_v46 = vcombine.high %v3976_v20, %v3976_v20  ;;  %v3987_v23 = vcombine.high %v3983_v18, %v3983_v18 }
 0x346   :  { %8976 = vst.msk [vmem:[%s17911_s2 + $0x7c9] ss:$4 sm:$0x7] %vm10963_vm0, %v3918_v56  ;;  %8977 = vst.msk [vmem:[%s17911_s2 + $0x7d5] ss:$4 sm:$0x7] %vm10963_vm0, %v3920_v62  ;;  %v3997_v21 = vrot.slane %v3988_v16, %v10762_v3  ;;  %v4004_v47 = vrot.slane %v3989_v40, %v10762_v3  ;;  %v1837_v54 = vadd.f32 %v12696_v14, %v18101_v19 }
 0x347   :  { %9356 = vst.msk [vmem:[%s17911_s2 + $0x79a] ss:$4 sm:$0x7] %vm10963_vm0, %v3917_v2  ;;  %9357 = vst.msk [vmem:[%s17911_s2 + $0x7a6] ss:$4 sm:$0x7] %vm10963_vm0, %v3919_v59  ;;  %v4055_v14 = vcombine.low %v12706_v27, %v12742_v12 }
 0x348   :  { %9360 = vst.msk [vmem:[%s17911_s2 + $0x7ca] ss:$4 sm:$0x7] %vm10963_vm0, %v3918_v56  ;;  %9361 = vst.msk [vmem:[%s17911_s2 + $0x7d6] ss:$4 sm:$0x7] %vm10963_vm0, %v3920_v62  ;;  %v4019_v6 = vcombine.low %v3997_v21, %v14029_v8  ;;  %v4020_v41 = vcombine.high %v3997_v21, %v14029_v8  ;;  %v4021_v63 = vcombine.low %v4004_v47, %v14067_v37 }
 0x349   :  { %8594 = vst.msk [vmem:[%s17911_s2 + $0x7e0] ss:$4 sm:$0x7] %vm10963_vm0, %v3962_v4  ;;  %8595 = vst.msk [vmem:[%s17911_s2 + $0x7ec] ss:$4 sm:$0x7] %vm10963_vm0, %v3976_v20  ;;  %v4064_v16 = vrot.slane %v4055_v14, %v10762_v3 }
 0x34a   :  { %8598 = vst.msk [vmem:[%s17911_s2 + $0x810] ss:$4 sm:$0x7] %vm10963_vm0, %v3969_v38  ;;  %8599 = vst.msk [vmem:[%s17911_s2 + $0x81c] ss:$4 sm:$0x7] %vm10963_vm0, %v3983_v18  ;;  %v4043_v8 = vrot.slane %v4020_v41, %v10762_v3 }
 0x34b   :  { %8978 = vst.msk [vmem:[%s17911_s2 + $0x7e1] ss:$4 sm:$0x7] %vm10963_vm0, %v3962_v4  ;;  %8979 = vst.msk [vmem:[%s17911_s2 + $0x7ed] ss:$4 sm:$0x7] %vm10963_vm0, %v3976_v20  ;;  %v4086_v21 = vcombine.low %v4064_v16, %v13778_v11 }
 0x34c   :  { %8982 = vst.msk [vmem:[%s17911_s2 + $0x811] ss:$4 sm:$0x7] %vm10963_vm0, %v3969_v38  ;;  %8983 = vst.msk [vmem:[%s17911_s2 + $0x81d] ss:$4 sm:$0x7] %vm10963_vm0, %v3983_v18 }
 0x34d   :  { %9362 = vst.msk [vmem:[%s17911_s2 + $0x7e2] ss:$4 sm:$0x7] %vm10963_vm0, %v3962_v4  ;;  %9363 = vst.msk [vmem:[%s17911_s2 + $0x7ee] ss:$4 sm:$0x7] %vm10963_vm0, %v3976_v20  ;;  %v4022_v4 = vcombine.high %v4004_v47, %v14067_v37  ;;  %v4392_v20 = vcombine.high %v1837_v54, %v1837_v54  ;;  %v4087_v47 = vcombine.high %v4064_v16, %v13778_v11 }
 0x34e   :  { %9366 = vst.msk [vmem:[%s17911_s2 + $0x812] ss:$4 sm:$0x7] %vm10963_vm0, %v3969_v38  ;;  %9367 = vst.msk [vmem:[%s17911_s2 + $0x81e] ss:$4 sm:$0x7] %vm10963_vm0, %v3983_v18  ;;  %v14392_v38 = vrot.slane %v4459_v50, %v10762_v3 }
 0x34f   :  { %v18102_v2 = vld [vmem:[#allocation28_spill] sm:$0xff]  ;;  %8596 = vst.msk [vmem:[%s17911_s2 + $0x7f8] ss:$4 sm:$0x7] %vm10963_vm0, %v3984_v36  ;;  %v18103_v59 = vld [vmem:[#allocation27_spill] sm:$0xff]  ;;  %v18104_v57 = vld [vmem:[#allocation30_spill] sm:$0xff]  ;;  %v4050_v18 = vrot.slane %v4022_v4, %v10762_v3  ;;  %v14404_v37 = vrot.slane %v4392_v20, %v10762_v3 }
 0x350   :  { %v14317_v56 = vadd.f32 %v12740_v53, %v18102_v2  ;;  %8597 = vst.msk [vmem:[%s17911_s2 + $0x804] ss:$4 sm:$0x7] %vm10963_vm0, %v3986_v46  ;;  %8600 = vst.msk [vmem:[%s17911_s2 + $0x828] ss:$4 sm:$0x7] %vm10963_vm0, %v3985_v0  ;;  %v4056_v53 = vcombine.high %v12706_v27, %v12742_v12  ;;  %v1847_v62 = vadd.f32 %v12776_v49, %v18103_v59 }
 0x351   :  { %8601 = vst.msk [vmem:[%s17911_s2 + $0x834] ss:$4 sm:$0x7] %vm10963_vm0, %v3987_v23  ;;  %8980 = vst.msk [vmem:[%s17911_s2 + $0x7f9] ss:$4 sm:$0x7] %vm10963_vm0, %v3984_v36  ;;  %v1862_v39 = vadd.f32 %v12948_v31, %v18104_v57  ;;  %v14395_v27 = vrot.slane %v1837_v54, %v10762_v3  ;;  %v4029_v49 = vrot.slane %v4019_v6, %v10762_v3 }
 0x352   :  { %8981 = vst.msk [vmem:[%s17911_s2 + $0x805] ss:$4 sm:$0x7] %vm10963_vm0, %v3986_v46  ;;  %8984 = vst.msk [vmem:[%s17911_s2 + $0x829] ss:$4 sm:$0x7] %vm10963_vm0, %v3985_v0  ;;  %v4593_v12 = vcombine.high %v14317_v56, %v14317_v56  ;;  %v4036_v31 = vrot.slane %v4021_v63, %v10762_v3  ;;  %v14408_v50 = vrot.slane %v14317_v56, %v10762_v3 }
 0x353   :  { %8985 = vst.msk [vmem:[%s17911_s2 + $0x835] ss:$4 sm:$0x7] %vm10963_vm0, %v3987_v23  ;;  %9364 = vst.msk [vmem:[%s17911_s2 + $0x7fa] ss:$4 sm:$0x7] %vm10963_vm0, %v3984_v36  ;;  %v4071_v40 = vrot.slane %v4056_v53, %v10762_v3  ;;  %v4051_v36 = vcombine.high %v4029_v49, %v4029_v49  ;;  %v4526_v11 = vcombine.high %v1847_v62, %v1847_v62 }
 0x354   :  { %9365 = vst.msk [vmem:[%s17911_s2 + $0x806] ss:$4 sm:$0x7] %vm10963_vm0, %v3986_v46  ;;  %9368 = vst.msk [vmem:[%s17911_s2 + $0x82a] ss:$4 sm:$0x7] %vm10963_vm0, %v3985_v0  ;;  %v4052_v0 = vcombine.high %v4036_v31, %v4036_v31  ;;  %v4053_v46 = vcombine.high %v4043_v8, %v4043_v8  ;;  %v4727_v2 = vcombine.high %v1862_v39, %v1862_v39 }
 0x355   :  { %9369 = vst.msk [vmem:[%s17911_s2 + $0x836] ss:$4 sm:$0x7] %vm10963_vm0, %v3987_v23  ;;  %v4054_v23 = vcombine.high %v4050_v18, %v4050_v18  ;;  %8602 = vst.msk [vmem:[%s17911_s2 + $0x840] ss:$4 sm:$0x7] %vm10963_vm0, %v4029_v49  ;;  %v4088_v19 = vcombine.low %v4071_v40, %v14026_v22  ;;  %v4089_v54 = vcombine.high %v4071_v40, %v14026_v22 }
 0x356   :  { %8603 = vst.msk [vmem:[%s17911_s2 + $0x84c] ss:$4 sm:$0x7] %vm10963_vm0, %v4043_v8  ;;  %8606 = vst.msk [vmem:[%s17911_s2 + $0x870] ss:$4 sm:$0x7] %vm10963_vm0, %v4036_v31  ;;  %v14537_v22 = vrot.slane %v1847_v62, %v10762_v3  ;;  %v4748_v14 = vrot.slane %v1862_v39, %v10762_v3  ;;  %v4096_v53 = vrot.slane %v4086_v21, %v10762_v3 }
 0x357   :  { %8607 = vst.msk [vmem:[%s17911_s2 + $0x87c] ss:$4 sm:$0x7] %vm10963_vm0, %v4050_v18  ;;  %8986 = vst.msk [vmem:[%s17911_s2 + $0x841] ss:$4 sm:$0x7] %vm10963_vm0, %v4029_v49  ;;  %v4103_v59 = vrot.slane %v4088_v19, %v10762_v3  ;;  %v4110_v57 = vrot.slane %v4087_v47, %v10762_v3  ;;  %v4117_v6 = vrot.slane %v4089_v54, %v10762_v3 }
 0x358   :  { %8987 = vst.msk [vmem:[%s17911_s2 + $0x84d] ss:$4 sm:$0x7] %vm10963_vm0, %v4043_v8  ;;  %8990 = vst.msk [vmem:[%s17911_s2 + $0x871] ss:$4 sm:$0x7] %vm10963_vm0, %v4036_v31  ;;  %v14545_v41 = vrot.slane %v4526_v11, %v10762_v3  ;;  %v4755_v63 = vrot.slane %v4727_v2, %v10762_v3  ;;  %v4756_v4 = vcombine.low %v10790_v9, %v4748_v14 }
 0x359   :  { %8991 = vst.msk [vmem:[%s17911_s2 + $0x87d] ss:$4 sm:$0x7] %vm10963_vm0, %v4050_v18  ;;  %9370 = vst.msk [vmem:[%s17911_s2 + $0x842] ss:$4 sm:$0x7] %vm10963_vm0, %v4029_v49  ;;  %v4757_v62 = vcombine.high %v10790_v9, %v4748_v14  ;;  %v4118_v20 = vcombine.high %v4096_v53, %v4096_v53  ;;  %v4119_v49 = vcombine.high %v4103_v59, %v4103_v59 }
 0x35a   :  { %9371 = vst.msk [vmem:[%s17911_s2 + $0x84e] ss:$4 sm:$0x7] %vm10963_vm0, %v4043_v8  ;;  %9374 = vst.msk [vmem:[%s17911_s2 + $0x872] ss:$4 sm:$0x7] %vm10963_vm0, %v4036_v31  ;;  %v4120_v39 = vcombine.high %v4110_v57, %v4110_v57  ;;  %v4121_v31 = vcombine.high %v4117_v6, %v4117_v6  ;;  %v4758_v9 = vcombine.low %v10796_v25, %v4755_v63 }
 0x35b   :  { %9375 = vst.msk [vmem:[%s17911_s2 + $0x87e] ss:$4 sm:$0x7] %vm10963_vm0, %v4050_v18  ;;  %8604 = vst.msk [vmem:[%s17911_s2 + $0x858] ss:$4 sm:$0x7] %vm10963_vm0, %v4051_v36  ;;  %v4759_v8 = vcombine.high %v10796_v25, %v4755_v63  ;;  %v4766_v18 = vrot.slane %v4756_v4, %v10762_v3  ;;  %v4780_v16 = vrot.slane %v4757_v62, %v10762_v3 }
 0x35c   :  { %8605 = vst.msk [vmem:[%s17911_s2 + $0x864] ss:$4 sm:$0x7] %vm10963_vm0, %v4053_v46  ;;  %8608 = vst.msk [vmem:[%s17911_s2 + $0x888] ss:$4 sm:$0x7] %vm10963_vm0, %v4052_v0  ;;  %v4122_v25 = vcombine.low %v12908_v24, %v12950_v5  ;;  %v4123_v40 = vcombine.high %v12908_v24, %v12950_v5  ;;  %v4773_v21 = vrot.slane %v4758_v9, %v10762_v3 }
 0x35d   :  { %8609 = vst.msk [vmem:[%s17911_s2 + $0x894] ss:$4 sm:$0x7] %vm10963_vm0, %v4054_v23  ;;  %8988 = vst.msk [vmem:[%s17911_s2 + $0x859] ss:$4 sm:$0x7] %vm10963_vm0, %v4051_v36  ;;  %v4787_v47 = vrot.slane %v4759_v8, %v10762_v3  ;;  %v4788_v19 = vcombine.high %v4766_v18, %v4766_v18  ;;  %v4790_v54 = vcombine.high %v4780_v16, %v4780_v16 }
 0x35e   :  { %8989 = vst.msk [vmem:[%s17911_s2 + $0x865] ss:$4 sm:$0x7] %vm10963_vm0, %v4053_v46  ;;  %8992 = vst.msk [vmem:[%s17911_s2 + $0x889] ss:$4 sm:$0x7] %vm10963_vm0, %v4052_v0  ;;  %v4131_v24 = vrot.slane %v4122_v25, %v10762_v3  ;;  %v4138_v5 = vrot.slane %v4123_v40, %v10762_v3  ;;  %v4789_v11 = vcombine.high %v4773_v21, %v4773_v21 }
 0x35f   :  { %8993 = vst.msk [vmem:[%s17911_s2 + $0x895] ss:$4 sm:$0x7] %vm10963_vm0, %v4054_v23  ;;  %9372 = vst.msk [vmem:[%s17911_s2 + $0x85a] ss:$4 sm:$0x7] %vm10963_vm0, %v4051_v36  ;;  %v4791_v2 = vcombine.high %v4787_v47, %v4787_v47 }
 0x360   :  { %9373 = vst.msk [vmem:[%s17911_s2 + $0x866] ss:$4 sm:$0x7] %vm10963_vm0, %v4053_v46  ;;  %9376 = vst.msk [vmem:[%s17911_s2 + $0x88a] ss:$4 sm:$0x7] %vm10963_vm0, %v4052_v0  ;;  %v4156_v63 = vcombine.high %v4138_v5, %v14082_v7 }
 0x361   :  { %9377 = vst.msk [vmem:[%s17911_s2 + $0x896] ss:$4 sm:$0x7] %vm10963_vm0, %v4054_v23  ;;  %8610 = vst.msk [vmem:[%s17911_s2 + $0x8a0] ss:$4 sm:$0x7] %vm10963_vm0, %v4096_v53 }
 0x362   :  { %8611 = vst.msk [vmem:[%s17911_s2 + $0x8ac] ss:$4 sm:$0x7] %vm10963_vm0, %v4110_v57  ;;  %8614 = vst.msk [vmem:[%s17911_s2 + $0x8d0] ss:$4 sm:$0x7] %vm10963_vm0, %v4103_v59  ;;  %v4184_v9 = vrot.slane %v4156_v63, %v10762_v3 }
 0x363   :  { %8615 = vst.msk [vmem:[%s17911_s2 + $0x8dc] ss:$4 sm:$0x7] %vm10963_vm0, %v4117_v6  ;;  %8994 = vst.msk [vmem:[%s17911_s2 + $0x8a1] ss:$4 sm:$0x7] %vm10963_vm0, %v4096_v53 }
 0x364   :  { %8995 = vst.msk [vmem:[%s17911_s2 + $0x8ad] ss:$4 sm:$0x7] %vm10963_vm0, %v4110_v57  ;;  %8998 = vst.msk [vmem:[%s17911_s2 + $0x8d1] ss:$4 sm:$0x7] %vm10963_vm0, %v4103_v59 }
 0x365   :  { %8999 = vst.msk [vmem:[%s17911_s2 + $0x8dd] ss:$4 sm:$0x7] %vm10963_vm0, %v4117_v6  ;;  %9378 = vst.msk [vmem:[%s17911_s2 + $0x8a2] ss:$4 sm:$0x7] %vm10963_vm0, %v4096_v53 }
 0x366   :  { %9379 = vst.msk [vmem:[%s17911_s2 + $0x8ae] ss:$4 sm:$0x7] %vm10963_vm0, %v4110_v57  ;;  %9382 = vst.msk [vmem:[%s17911_s2 + $0x8d2] ss:$4 sm:$0x7] %vm10963_vm0, %v4103_v59  ;;  %v4153_v59 = vcombine.low %v4131_v24, %v14073_v1  ;;  %v4154_v57 = vcombine.high %v4131_v24, %v14073_v1 }
 0x367   :  { %9383 = vst.msk [vmem:[%s17911_s2 + $0x8de] ss:$4 sm:$0x7] %vm10963_vm0, %v4117_v6  ;;  %8612 = vst.msk [vmem:[%s17911_s2 + $0x8b8] ss:$4 sm:$0x7] %vm10963_vm0, %v4118_v20  ;;  %v4155_v6 = vcombine.low %v4138_v5, %v14082_v7 }
 0x368   :  { %8613 = vst.msk [vmem:[%s17911_s2 + $0x8c4] ss:$4 sm:$0x7] %vm10963_vm0, %v4120_v39  ;;  %8616 = vst.msk [vmem:[%s17911_s2 + $0x8e8] ss:$4 sm:$0x7] %vm10963_vm0, %v4119_v49 }
 0x369   :  { %8617 = vst.msk [vmem:[%s17911_s2 + $0x8f4] ss:$4 sm:$0x7] %vm10963_vm0, %v4121_v31  ;;  %8996 = vst.msk [vmem:[%s17911_s2 + $0x8b9] ss:$4 sm:$0x7] %vm10963_vm0, %v4118_v20 }
 0x36a   :  { %8997 = vst.msk [vmem:[%s17911_s2 + $0x8c5] ss:$4 sm:$0x7] %vm10963_vm0, %v4120_v39  ;;  %9000 = vst.msk [vmem:[%s17911_s2 + $0x8e9] ss:$4 sm:$0x7] %vm10963_vm0, %v4119_v49 }
 0x36b   :  { %9001 = vst.msk [vmem:[%s17911_s2 + $0x8f5] ss:$4 sm:$0x7] %vm10963_vm0, %v4121_v31  ;;  %9380 = vst.msk [vmem:[%s17911_s2 + $0x8ba] ss:$4 sm:$0x7] %vm10963_vm0, %v4118_v20 }
 0x36c   :  { %9381 = vst.msk [vmem:[%s17911_s2 + $0x8c6] ss:$4 sm:$0x7] %vm10963_vm0, %v4120_v39  ;;  %9384 = vst.msk [vmem:[%s17911_s2 + $0x8ea] ss:$4 sm:$0x7] %vm10963_vm0, %v4119_v49  ;;  %v4163_v49 = vrot.slane %v4153_v59, %v10762_v3  ;;  %v4170_v39 = vrot.slane %v4155_v6, %v10762_v3 }
 0x36d   :  { %9385 = vst.msk [vmem:[%s17911_s2 + $0x8f6] ss:$4 sm:$0x7] %vm10963_vm0, %v4121_v31  ;;  %v18105_v36 = vld [vmem:[#allocation29_spill] sm:$0xff]  ;;  %v18106_v46 = vld [vmem:[#allocation32_spill] sm:$0xff]  ;;  %v4177_v31 = vrot.slane %v4154_v57, %v10762_v3  ;;  %v18108_v8 = vld [vmem:[#allocation46_spill] sm:$0xff] }
 0x36e   :  { %v1857_v0 = vadd.f32 %v13002_v55, %v18105_v36  ;;  %v1872_v23 = vadd.f32 %v13110_v58, %v18106_v46  ;;  %8690 = vst.msk [vmem:[%s17911_s2 + $0xc60] ss:$4 sm:$0x7] %vm10963_vm0, %v4766_v18  ;;  %8691 = vst.msk [vmem:[%s17911_s2 + $0xc6c] ss:$4 sm:$0x7] %vm10963_vm0, %v4780_v16  ;;  %v4185_v36 = vcombine.high %v4163_v49, %v4163_v49 }
 0x36f   :  { %9074 = vst.msk [vmem:[%s17911_s2 + $0xc61] ss:$4 sm:$0x7] %vm10963_vm0, %v4766_v18  ;;  %9075 = vst.msk [vmem:[%s17911_s2 + $0xc6d] ss:$4 sm:$0x7] %vm10963_vm0, %v4780_v16  ;;  %v4187_v46 = vcombine.high %v4177_v31, %v4177_v31 }
 0x370   :  { %9458 = vst.msk [vmem:[%s17911_s2 + $0xc62] ss:$4 sm:$0x7] %vm10963_vm0, %v4766_v18  ;;  %9459 = vst.msk [vmem:[%s17911_s2 + $0xc6e] ss:$4 sm:$0x7] %vm10963_vm0, %v4780_v16  ;;  %v4660_v55 = vcombine.high %v1857_v0, %v1857_v0  ;;  %v4681_v58 = vrot.slane %v1857_v0, %v10762_v3  ;;  %v4861_v14 = vcombine.high %v1872_v23, %v1872_v23 }
 0x371   :  { %8692 = vst.msk [vmem:[%s17911_s2 + $0xc78] ss:$4 sm:$0x7] %vm10963_vm0, %v4788_v19  ;;  %8693 = vst.msk [vmem:[%s17911_s2 + $0xc84] ss:$4 sm:$0x7] %vm10963_vm0, %v4790_v54  ;;  %v14778_v53 = vrot.slane %v1872_v23, %v10762_v3  ;;  %v4186_v0 = vcombine.high %v4170_v39, %v4170_v39  ;;  %v4188_v23 = vcombine.high %v4184_v9, %v4184_v9 }
 0x372   :  { %8694 = vst.msk [vmem:[%s17911_s2 + $0xc90] ss:$4 sm:$0x7] %vm10963_vm0, %v4773_v21  ;;  %8695 = vst.msk [vmem:[%s17911_s2 + $0xc9c] ss:$4 sm:$0x7] %vm10963_vm0, %v4787_v47  ;;  %v4688_v1 = vrot.slane %v4660_v55, %v10762_v3  ;;  %v14818_v20 = vrot.slane %v4861_v14, %v10762_v3 }
 0x373   :  { %9076 = vst.msk [vmem:[%s17911_s2 + $0xc79] ss:$4 sm:$0x7] %vm10963_vm0, %v4788_v19  ;;  %9077 = vst.msk [vmem:[%s17911_s2 + $0xc85] ss:$4 sm:$0x7] %vm10963_vm0, %v4790_v54 }
 0x374   :  { %9078 = vst.msk [vmem:[%s17911_s2 + $0xc91] ss:$4 sm:$0x7] %vm10963_vm0, %v4773_v21  ;;  %9079 = vst.msk [vmem:[%s17911_s2 + $0xc9d] ss:$4 sm:$0x7] %vm10963_vm0, %v4787_v47  ;;  %v4691_v18 = vcombine.low %v18108_v8, %v4688_v1  ;;  %v4692_v16 = vcombine.high %v18108_v8, %v4688_v1 }
 0x375   :  { %9460 = vst.msk [vmem:[%s17911_s2 + $0xc7a] ss:$4 sm:$0x7] %vm10963_vm0, %v4788_v19  ;;  %9461 = vst.msk [vmem:[%s17911_s2 + $0xc86] ss:$4 sm:$0x7] %vm10963_vm0, %v4790_v54 }
 0x376   :  { %9462 = vst.msk [vmem:[%s17911_s2 + $0xc92] ss:$4 sm:$0x7] %vm10963_vm0, %v4773_v21  ;;  %9463 = vst.msk [vmem:[%s17911_s2 + $0xc9e] ss:$4 sm:$0x7] %vm10963_vm0, %v4787_v47  ;;  %v4706_v21 = vrot.slane %v4691_v18, %v10762_v3  ;;  %v4720_v47 = vrot.slane %v4692_v16, %v10762_v3 }
 0x377   :  { %8696 = vst.msk [vmem:[%s17911_s2 + $0xca8] ss:$4 sm:$0x7] %vm10963_vm0, %v4789_v11  ;;  %8697 = vst.msk [vmem:[%s17911_s2 + $0xcb4] ss:$4 sm:$0x7] %vm10963_vm0, %v4791_v2 }
 0x378   :  { %9080 = vst.msk [vmem:[%s17911_s2 + $0xca9] ss:$4 sm:$0x7] %vm10963_vm0, %v4789_v11  ;;  %9081 = vst.msk [vmem:[%s17911_s2 + $0xcb5] ss:$4 sm:$0x7] %vm10963_vm0, %v4791_v2  ;;  %v4722_v14 = vcombine.high %v4706_v21, %v4706_v21  ;;  %v4724_v59 = vcombine.high %v4720_v47, %v4720_v47 }
 0x379   :  { %9464 = vst.msk [vmem:[%s17911_s2 + $0xcaa] ss:$4 sm:$0x7] %vm10963_vm0, %v4789_v11  ;;  %9465 = vst.msk [vmem:[%s17911_s2 + $0xcb6] ss:$4 sm:$0x7] %vm10963_vm0, %v4791_v2 }
 0x37a   :  { %v18107_v7 = vld [vmem:[#allocation45_spill] sm:$0xff]  ;;  %8618 = vst.msk [vmem:[%s17911_s2 + $0x900] ss:$4 sm:$0x7] %vm10963_vm0, %v4163_v49  ;;  %v18112_v57 = vld [vmem:[#allocation10_spill] sm:$0xff] }
 0x37b   :  { %v4689_v4 = vcombine.low %v18107_v7, %v4681_v58  ;;  %v4690_v62 = vcombine.high %v18107_v7, %v4681_v58  ;;  %8619 = vst.msk [vmem:[%s17911_s2 + $0x90c] ss:$4 sm:$0x7] %vm10963_vm0, %v4177_v31  ;;  %8622 = vst.msk [vmem:[%s17911_s2 + $0x930] ss:$4 sm:$0x7] %vm10963_vm0, %v4170_v39 }
 0x37c   :  { %8623 = vst.msk [vmem:[%s17911_s2 + $0x93c] ss:$4 sm:$0x7] %vm10963_vm0, %v4184_v9  ;;  %9002 = vst.msk [vmem:[%s17911_s2 + $0x901] ss:$4 sm:$0x7] %vm10963_vm0, %v4163_v49 }
 0x37d   :  { %v4699_v25 = vrot.slane %v4689_v4, %v10762_v3  ;;  %v4713_v40 = vrot.slane %v4690_v62, %v10762_v3  ;;  %9003 = vst.msk [vmem:[%s17911_s2 + $0x90d] ss:$4 sm:$0x7] %vm10963_vm0, %v4177_v31  ;;  %9006 = vst.msk [vmem:[%s17911_s2 + $0x931] ss:$4 sm:$0x7] %vm10963_vm0, %v4170_v39 }
 0x37e   :  { %9007 = vst.msk [vmem:[%s17911_s2 + $0x93d] ss:$4 sm:$0x7] %vm10963_vm0, %v4184_v9  ;;  %9386 = vst.msk [vmem:[%s17911_s2 + $0x902] ss:$4 sm:$0x7] %vm10963_vm0, %v4163_v49 }
 0x37f   :  { %9387 = vst.msk [vmem:[%s17911_s2 + $0x90e] ss:$4 sm:$0x7] %vm10963_vm0, %v4177_v31  ;;  %9390 = vst.msk [vmem:[%s17911_s2 + $0x932] ss:$4 sm:$0x7] %vm10963_vm0, %v4170_v39  ;;  %v4721_v19 = vcombine.high %v4699_v25, %v4699_v25  ;;  %v4723_v54 = vcombine.high %v4713_v40, %v4713_v40 }
 0x380   :  { %9391 = vst.msk [vmem:[%s17911_s2 + $0x93e] ss:$4 sm:$0x7] %vm10963_vm0, %v4184_v9  ;;  %8682 = vst.msk [vmem:[%s17911_s2 + $0xc00] ss:$4 sm:$0x7] %vm10963_vm0, %v4699_v25 }
 0x381   :  { %8683 = vst.msk [vmem:[%s17911_s2 + $0xc0c] ss:$4 sm:$0x7] %vm10963_vm0, %v4713_v40  ;;  %9066 = vst.msk [vmem:[%s17911_s2 + $0xc01] ss:$4 sm:$0x7] %vm10963_vm0, %v4699_v25 }
 0x382   :  { %9067 = vst.msk [vmem:[%s17911_s2 + $0xc0d] ss:$4 sm:$0x7] %vm10963_vm0, %v4713_v40  ;;  %9450 = vst.msk [vmem:[%s17911_s2 + $0xc02] ss:$4 sm:$0x7] %vm10963_vm0, %v4699_v25 }
 0x383   :  { %9451 = vst.msk [vmem:[%s17911_s2 + $0xc0e] ss:$4 sm:$0x7] %vm10963_vm0, %v4713_v40  ;;  %8620 = vst.msk [vmem:[%s17911_s2 + $0x918] ss:$4 sm:$0x7] %vm10963_vm0, %v4185_v36 }
 0x384   :  { %8621 = vst.msk [vmem:[%s17911_s2 + $0x924] ss:$4 sm:$0x7] %vm10963_vm0, %v4187_v46  ;;  %8624 = vst.msk [vmem:[%s17911_s2 + $0x948] ss:$4 sm:$0x7] %vm10963_vm0, %v4186_v0 }
 0x385   :  { %8625 = vst.msk [vmem:[%s17911_s2 + $0x954] ss:$4 sm:$0x7] %vm10963_vm0, %v4188_v23  ;;  %9004 = vst.msk [vmem:[%s17911_s2 + $0x919] ss:$4 sm:$0x7] %vm10963_vm0, %v4185_v36 }
 0x386   :  { %9005 = vst.msk [vmem:[%s17911_s2 + $0x925] ss:$4 sm:$0x7] %vm10963_vm0, %v4187_v46  ;;  %9008 = vst.msk [vmem:[%s17911_s2 + $0x949] ss:$4 sm:$0x7] %vm10963_vm0, %v4186_v0 }
 0x387   :  { %9009 = vst.msk [vmem:[%s17911_s2 + $0x955] ss:$4 sm:$0x7] %vm10963_vm0, %v4188_v23  ;;  %9388 = vst.msk [vmem:[%s17911_s2 + $0x91a] ss:$4 sm:$0x7] %vm10963_vm0, %v4185_v36 }
 0x388   :  { %9389 = vst.msk [vmem:[%s17911_s2 + $0x926] ss:$4 sm:$0x7] %vm10963_vm0, %v4187_v46  ;;  %9392 = vst.msk [vmem:[%s17911_s2 + $0x94a] ss:$4 sm:$0x7] %vm10963_vm0, %v4186_v0 }
 0x389   :  { %9393 = vst.msk [vmem:[%s17911_s2 + $0x956] ss:$4 sm:$0x7] %vm10963_vm0, %v4188_v23  ;;  %v18109_v24 = vld [vmem:[#allocation49_spill] sm:$0xff]  ;;  %v18110_v58 = vld [vmem:[#allocation50_spill] sm:$0xff]  ;;  %v18113_v39 = vld [vmem:[#allocation31_spill] sm:$0xff] }
 0x38a   :  { %v4890_v5 = vcombine.low %v18109_v24, %v14778_v53  ;;  %v4891_v55 = vcombine.high %v18109_v24, %v14778_v53  ;;  %v4892_v11 = vcombine.low %v18110_v58, %v14818_v20  ;;  %v4893_v2 = vcombine.high %v18110_v58, %v14818_v20  ;;  %8684 = vst.msk [vmem:[%s17911_s2 + $0xc18] ss:$4 sm:$0x7] %vm10963_vm0, %v4721_v19  ;;  %v18111_v53 = vld [vmem:[#allocation9_spill] sm:$0xff]  ;;  %v18114_v31 = vld [vmem:[#allocation12_spill] sm:$0xff]  ;;  %v18115_v8 = vld [vmem:[#allocation34_spill] sm:$0xff] }
 0x38b   :  { %8685 = vst.msk [vmem:[%s17911_s2 + $0xc24] ss:$4 sm:$0x7] %vm10963_vm0, %v4723_v54  ;;  %8686 = vst.msk [vmem:[%s17911_s2 + $0xc30] ss:$4 sm:$0x7] %vm10963_vm0, %v4706_v21  ;;  %v4189_v6 = vcombine.low %v18112_v57, %v18111_v53  ;;  %v4190_v63 = vcombine.high %v18112_v57, %v18111_v53  ;;  %v1867_v9 = vadd.f32 %v18114_v31, %v18113_v39 }
 0x38c   :  { %8687 = vst.msk [vmem:[%s17911_s2 + $0xc3c] ss:$4 sm:$0x7] %vm10963_vm0, %v4720_v47  ;;  %9068 = vst.msk [vmem:[%s17911_s2 + $0xc19] ss:$4 sm:$0x7] %vm10963_vm0, %v4721_v19  ;;  %v4900_v1 = vrot.slane %v4890_v5, %v10762_v3  ;;  %v4907_v7 = vrot.slane %v4892_v11, %v10762_v3  ;;  %v4914_v4 = vrot.slane %v4891_v55, %v10762_v3 }
 0x38d   :  { %9069 = vst.msk [vmem:[%s17911_s2 + $0xc25] ss:$4 sm:$0x7] %vm10963_vm0, %v4723_v54  ;;  %9070 = vst.msk [vmem:[%s17911_s2 + $0xc31] ss:$4 sm:$0x7] %vm10963_vm0, %v4706_v21  ;;  %v4921_v62 = vrot.slane %v4893_v2, %v10762_v3  ;;  %v4198_v20 = vrot.slane %v4189_v6, %v10762_v3  ;;  %v4205_v49 = vrot.slane %v4190_v63, %v10762_v3 }
 0x38e   :  { %9071 = vst.msk [vmem:[%s17911_s2 + $0xc3d] ss:$4 sm:$0x7] %vm10963_vm0, %v4720_v47  ;;  %9452 = vst.msk [vmem:[%s17911_s2 + $0xc1a] ss:$4 sm:$0x7] %vm10963_vm0, %v4721_v19  ;;  %v1882_v18 = vadd.f32 %v13148_v45, %v18115_v8  ;;  %v4922_v16 = vcombine.high %v4900_v1, %v4900_v1  ;;  %v4923_v25 = vcombine.high %v4907_v7, %v4907_v7 }
 0x38f   :  { %9453 = vst.msk [vmem:[%s17911_s2 + $0xc26] ss:$4 sm:$0x7] %vm10963_vm0, %v4723_v54  ;;  %9454 = vst.msk [vmem:[%s17911_s2 + $0xc32] ss:$4 sm:$0x7] %vm10963_vm0, %v4706_v21  ;;  %v4924_v40 = vcombine.high %v4914_v4, %v4914_v4  ;;  %v4925_v36 = vcombine.high %v4921_v62, %v4921_v62  ;;  %v4220_v45 = vcombine.low %v4198_v20, %v14062_v17 }
 0x390   :  { %9455 = vst.msk [vmem:[%s17911_s2 + $0xc3e] ss:$4 sm:$0x7] %vm10963_vm0, %v4720_v47  ;;  %8688 = vst.msk [vmem:[%s17911_s2 + $0xc48] ss:$4 sm:$0x7] %vm10963_vm0, %v4722_v14  ;;  %v4221_v0 = vcombine.high %v4198_v20, %v14062_v17  ;;  %v4222_v46 = vcombine.low %v4205_v49, %v14070_v60  ;;  %v4223_v23 = vcombine.high %v4205_v49, %v14070_v60 }
 0x391   :  { %8689 = vst.msk [vmem:[%s17911_s2 + $0xc54] ss:$4 sm:$0x7] %vm10963_vm0, %v4724_v59  ;;  %9072 = vst.msk [vmem:[%s17911_s2 + $0xc49] ss:$4 sm:$0x7] %vm10963_vm0, %v4722_v14  ;;  %v4794_v17 = vcombine.high %v1867_v9, %v1867_v9  ;;  %v4815_v60 = vrot.slane %v1867_v9, %v10762_v3  ;;  %v4995_v21 = vcombine.high %v1882_v18, %v1882_v18 }
 0x392   :  { %9073 = vst.msk [vmem:[%s17911_s2 + $0xc55] ss:$4 sm:$0x7] %vm10963_vm0, %v4724_v59  ;;  %9456 = vst.msk [vmem:[%s17911_s2 + $0xc4a] ss:$4 sm:$0x7] %vm10963_vm0, %v4722_v14  ;;  %v5016_v47 = vrot.slane %v1882_v18, %v10762_v3  ;;  %v4230_v19 = vrot.slane %v4220_v45, %v10762_v3  ;;  %v4237_v54 = vrot.slane %v4222_v46, %v10762_v3 }
 0x393   :  { %9457 = vst.msk [vmem:[%s17911_s2 + $0xc56] ss:$4 sm:$0x7] %vm10963_vm0, %v4724_v59  ;;  %8706 = vst.msk [vmem:[%s17911_s2 + $0xd20] ss:$4 sm:$0x7] %vm10963_vm0, %v4900_v1  ;;  %v4244_v24 = vrot.slane %v4221_v0, %v10762_v3  ;;  %v4251_v5 = vrot.slane %v4223_v23, %v10762_v3  ;;  %v4822_v55 = vrot.slane %v4794_v17, %v10762_v3 }
 0x394   :  { %8707 = vst.msk [vmem:[%s17911_s2 + $0xd2c] ss:$4 sm:$0x7] %vm10963_vm0, %v4914_v4  ;;  %8710 = vst.msk [vmem:[%s17911_s2 + $0xd50] ss:$4 sm:$0x7] %vm10963_vm0, %v4907_v7  ;;  %v5023_v14 = vrot.slane %v4995_v21, %v10762_v3  ;;  %v4252_v59 = vcombine.high %v4230_v19, %v4230_v19  ;;  %v4253_v53 = vcombine.high %v4237_v54, %v4237_v54 }
 0x395   :  { %8711 = vst.msk [vmem:[%s17911_s2 + $0xd5c] ss:$4 sm:$0x7] %vm10963_vm0, %v4921_v62  ;;  %9090 = vst.msk [vmem:[%s17911_s2 + $0xd21] ss:$4 sm:$0x7] %vm10963_vm0, %v4900_v1  ;;  %v4254_v57 = vcombine.high %v4244_v24, %v4244_v24  ;;  %v4255_v6 = vcombine.high %v4251_v5, %v4251_v5  ;;  %v4257_v21 = vcombine.high %v13142_v42, %v13150_v13 }
 0x396   :  { %9091 = vst.msk [vmem:[%s17911_s2 + $0xd2d] ss:$4 sm:$0x7] %vm10963_vm0, %v4914_v4  ;;  %9094 = vst.msk [vmem:[%s17911_s2 + $0xd51] ss:$4 sm:$0x7] %vm10963_vm0, %v4907_v7 }
 0x397   :  { %9095 = vst.msk [vmem:[%s17911_s2 + $0xd5d] ss:$4 sm:$0x7] %vm10963_vm0, %v4921_v62  ;;  %9474 = vst.msk [vmem:[%s17911_s2 + $0xd22] ss:$4 sm:$0x7] %vm10963_vm0, %v4900_v1 }
 0x398   :  { %9475 = vst.msk [vmem:[%s17911_s2 + $0xd2e] ss:$4 sm:$0x7] %vm10963_vm0, %v4914_v4  ;;  %9478 = vst.msk [vmem:[%s17911_s2 + $0xd52] ss:$4 sm:$0x7] %vm10963_vm0, %v4907_v7 }
 0x399   :  { %9479 = vst.msk [vmem:[%s17911_s2 + $0xd5e] ss:$4 sm:$0x7] %vm10963_vm0, %v4921_v62  ;;  %8708 = vst.msk [vmem:[%s17911_s2 + $0xd38] ss:$4 sm:$0x7] %vm10963_vm0, %v4922_v16 }
 0x39a   :  { %8709 = vst.msk [vmem:[%s17911_s2 + $0xd44] ss:$4 sm:$0x7] %vm10963_vm0, %v4924_v40  ;;  %8712 = vst.msk [vmem:[%s17911_s2 + $0xd68] ss:$4 sm:$0x7] %vm10963_vm0, %v4923_v25 }
 0x39b   :  { %8713 = vst.msk [vmem:[%s17911_s2 + $0xd74] ss:$4 sm:$0x7] %vm10963_vm0, %v4925_v36  ;;  %9092 = vst.msk [vmem:[%s17911_s2 + $0xd39] ss:$4 sm:$0x7] %vm10963_vm0, %v4922_v16 }
 0x39c   :  { %9093 = vst.msk [vmem:[%s17911_s2 + $0xd45] ss:$4 sm:$0x7] %vm10963_vm0, %v4924_v40  ;;  %9096 = vst.msk [vmem:[%s17911_s2 + $0xd69] ss:$4 sm:$0x7] %vm10963_vm0, %v4923_v25 }
 0x39d   :  { %9097 = vst.msk [vmem:[%s17911_s2 + $0xd75] ss:$4 sm:$0x7] %vm10963_vm0, %v4925_v36  ;;  %9476 = vst.msk [vmem:[%s17911_s2 + $0xd3a] ss:$4 sm:$0x7] %vm10963_vm0, %v4922_v16 }
 0x39e   :  { %9477 = vst.msk [vmem:[%s17911_s2 + $0xd46] ss:$4 sm:$0x7] %vm10963_vm0, %v4924_v40  ;;  %9480 = vst.msk [vmem:[%s17911_s2 + $0xd6a] ss:$4 sm:$0x7] %vm10963_vm0, %v4923_v25 }
 0x39f   :  { %9481 = vst.msk [vmem:[%s17911_s2 + $0xd76] ss:$4 sm:$0x7] %vm10963_vm0, %v4925_v36  ;;  %v18116_v58 = vld [vmem:[#allocation47_spill] sm:$0xff]  ;;  %v18117_v63 = vld [vmem:[#allocation48_spill] sm:$0xff]  ;;  %v18118_v20 = vld [vmem:[#allocation53_spill] sm:$0xff] }
 0x3a0   :  { %v4823_v11 = vcombine.low %v18116_v58, %v4815_v60  ;;  %v4824_v2 = vcombine.high %v18116_v58, %v4815_v60  ;;  %8626 = vst.msk [vmem:[%s17911_s2 + $0x960] ss:$4 sm:$0x7] %vm10963_vm0, %v4230_v19  ;;  %8627 = vst.msk [vmem:[%s17911_s2 + $0x96c] ss:$4 sm:$0x7] %vm10963_vm0, %v4244_v24  ;;  %v4825_v1 = vcombine.low %v18117_v63, %v4822_v55 }
 0x3a1   :  { %8630 = vst.msk [vmem:[%s17911_s2 + $0x990] ss:$4 sm:$0x7] %vm10963_vm0, %v4237_v54  ;;  %8631 = vst.msk [vmem:[%s17911_s2 + $0x99c] ss:$4 sm:$0x7] %vm10963_vm0, %v4251_v5  ;;  %v4826_v7 = vcombine.high %v18117_v63, %v4822_v55  ;;  %v5024_v49 = vcombine.low %v18118_v20, %v5016_v47  ;;  %v5025_v39 = vcombine.high %v18118_v20, %v5016_v47 }
 0x3a2   :  { %9010 = vst.msk [vmem:[%s17911_s2 + $0x961] ss:$4 sm:$0x7] %vm10963_vm0, %v4230_v19  ;;  %9011 = vst.msk [vmem:[%s17911_s2 + $0x96d] ss:$4 sm:$0x7] %vm10963_vm0, %v4244_v24  ;;  %v4833_v4 = vrot.slane %v4823_v11, %v10762_v3  ;;  %v4847_v62 = vrot.slane %v4824_v2, %v10762_v3  ;;  %v4840_v18 = vrot.slane %v4825_v1, %v10762_v3 }
 0x3a3   :  { %9014 = vst.msk [vmem:[%s17911_s2 + $0x991] ss:$4 sm:$0x7] %vm10963_vm0, %v4237_v54  ;;  %9015 = vst.msk [vmem:[%s17911_s2 + $0x99d] ss:$4 sm:$0x7] %vm10963_vm0, %v4251_v5  ;;  %v4854_v16 = vrot.slane %v4826_v7, %v10762_v3  ;;  %v5034_v36 = vrot.slane %v5024_v49, %v10762_v3  ;;  %v5048_v0 = vrot.slane %v5025_v39, %v10762_v3 }
 0x3a4   :  { %9394 = vst.msk [vmem:[%s17911_s2 + $0x962] ss:$4 sm:$0x7] %vm10963_vm0, %v4230_v19  ;;  %9395 = vst.msk [vmem:[%s17911_s2 + $0x96e] ss:$4 sm:$0x7] %vm10963_vm0, %v4244_v24  ;;  %v4855_v25 = vcombine.high %v4833_v4, %v4833_v4  ;;  %v4857_v40 = vcombine.high %v4847_v62, %v4847_v62  ;;  %v4856_v23 = vcombine.high %v4840_v18, %v4840_v18 }
 0x3a5   :  { %9398 = vst.msk [vmem:[%s17911_s2 + $0x992] ss:$4 sm:$0x7] %vm10963_vm0, %v4237_v54  ;;  %9399 = vst.msk [vmem:[%s17911_s2 + $0x99e] ss:$4 sm:$0x7] %vm10963_vm0, %v4251_v5  ;;  %v4858_v17 = vcombine.high %v4854_v16, %v4854_v16  ;;  %v4256_v60 = vcombine.low %v13142_v42, %v13150_v13  ;;  %v5056_v47 = vcombine.high %v5034_v36, %v5034_v36 }
 0x3a6   :  { %8628 = vst.msk [vmem:[%s17911_s2 + $0x978] ss:$4 sm:$0x7] %vm10963_vm0, %v4252_v59  ;;  %8629 = vst.msk [vmem:[%s17911_s2 + $0x984] ss:$4 sm:$0x7] %vm10963_vm0, %v4254_v57  ;;  %v5058_v54 = vcombine.high %v5048_v0, %v5048_v0  ;;  %v4272_v42 = vrot.slane %v4257_v21, %v10762_v3 }
 0x3a7   :  { %8632 = vst.msk [vmem:[%s17911_s2 + $0x9a8] ss:$4 sm:$0x7] %vm10963_vm0, %v4253_v53  ;;  %8633 = vst.msk [vmem:[%s17911_s2 + $0x9b4] ss:$4 sm:$0x7] %vm10963_vm0, %v4255_v6  ;;  %v4265_v13 = vrot.slane %v4256_v60, %v10762_v3 }
 0x3a8   :  { %9012 = vst.msk [vmem:[%s17911_s2 + $0x979] ss:$4 sm:$0x7] %vm10963_vm0, %v4252_v59  ;;  %9013 = vst.msk [vmem:[%s17911_s2 + $0x985] ss:$4 sm:$0x7] %vm10963_vm0, %v4254_v57  ;;  %v4290_v20 = vcombine.high %v4272_v42, %v14241_v61 }
 0x3a9   :  { %9016 = vst.msk [vmem:[%s17911_s2 + $0x9a9] ss:$4 sm:$0x7] %vm10963_vm0, %v4253_v53  ;;  %9017 = vst.msk [vmem:[%s17911_s2 + $0x9b5] ss:$4 sm:$0x7] %vm10963_vm0, %v4255_v6  ;;  %v4287_v7 = vcombine.low %v4265_v13, %v14232_v10 }
 0x3aa   :  { %9396 = vst.msk [vmem:[%s17911_s2 + $0x97a] ss:$4 sm:$0x7] %vm10963_vm0, %v4252_v59  ;;  %9397 = vst.msk [vmem:[%s17911_s2 + $0x986] ss:$4 sm:$0x7] %vm10963_vm0, %v4254_v57 }
 0x3ab   :  { %9400 = vst.msk [vmem:[%s17911_s2 + $0x9aa] ss:$4 sm:$0x7] %vm10963_vm0, %v4253_v53  ;;  %9401 = vst.msk [vmem:[%s17911_s2 + $0x9b6] ss:$4 sm:$0x7] %vm10963_vm0, %v4255_v6 }
 0x3ac   :  { %v18119_v31 = vld [vmem:[#allocation55_spill] sm:$0xff]  ;;  %8698 = vst.msk [vmem:[%s17911_s2 + $0xcc0] ss:$4 sm:$0x7] %vm10963_vm0, %v4833_v4  ;;  %v18120_v5 = vld [vmem:[#allocation33_spill] sm:$0xff]  ;;  %v18121_v58 = vld [vmem:[#allocation38_spill] sm:$0xff] }
 0x3ad   :  { %v5026_v9 = vcombine.low %v18119_v31, %v5023_v14  ;;  %v5027_v8 = vcombine.high %v18119_v31, %v5023_v14  ;;  %8699 = vst.msk [vmem:[%s17911_s2 + $0xccc] ss:$4 sm:$0x7] %vm10963_vm0, %v4847_v62  ;;  %9082 = vst.msk [vmem:[%s17911_s2 + $0xcc1] ss:$4 sm:$0x7] %vm10963_vm0, %v4833_v4  ;;  %v1877_v55 = vadd.f32 %v13212_v30, %v18120_v5 }
 0x3ae   :  { %9083 = vst.msk [vmem:[%s17911_s2 + $0xccd] ss:$4 sm:$0x7] %vm10963_vm0, %v4847_v62  ;;  %9466 = vst.msk [vmem:[%s17911_s2 + $0xcc2] ss:$4 sm:$0x7] %vm10963_vm0, %v4833_v4  ;;  %v1892_v11 = vadd.f32 %v13387_v34, %v18121_v58  ;;  %v4288_v4 = vcombine.high %v4265_v13, %v14232_v10 }
 0x3af   :  { %9467 = vst.msk [vmem:[%s17911_s2 + $0xcce] ss:$4 sm:$0x7] %vm10963_vm0, %v4847_v62  ;;  %v5041_v45 = vrot.slane %v5026_v9, %v10762_v3  ;;  %v5055_v46 = vrot.slane %v5027_v8, %v10762_v3  ;;  %8700 = vst.msk [vmem:[%s17911_s2 + $0xcd8] ss:$4 sm:$0x7] %vm10963_vm0, %v4855_v25  ;;  %v4289_v62 = vcombine.low %v4272_v42, %v14241_v61 }
 0x3b0   :  { %8701 = vst.msk [vmem:[%s17911_s2 + $0xce4] ss:$4 sm:$0x7] %vm10963_vm0, %v4857_v40  ;;  %8702 = vst.msk [vmem:[%s17911_s2 + $0xcf0] ss:$4 sm:$0x7] %vm10963_vm0, %v4840_v18  ;;  %v4928_v49 = vcombine.high %v1877_v55, %v1877_v55  ;;  %v4949_v39 = vrot.slane %v1877_v55, %v10762_v3  ;;  %v5129_v31 = vcombine.high %v1892_v11, %v1892_v11 }
 0x3b1   :  { %8703 = vst.msk [vmem:[%s17911_s2 + $0xcfc] ss:$4 sm:$0x7] %vm10963_vm0, %v4854_v16  ;;  %9084 = vst.msk [vmem:[%s17911_s2 + $0xcd9] ss:$4 sm:$0x7] %vm10963_vm0, %v4855_v25  ;;  %v5057_v19 = vcombine.high %v5041_v45, %v5041_v45  ;;  %v5059_v24 = vcombine.high %v5055_v46, %v5055_v46  ;;  %v5150_v9 = vrot.slane %v1892_v11, %v10762_v3 }
 0x3b2   :  { %9085 = vst.msk [vmem:[%s17911_s2 + $0xce5] ss:$4 sm:$0x7] %vm10963_vm0, %v4857_v40  ;;  %9086 = vst.msk [vmem:[%s17911_s2 + $0xcf1] ss:$4 sm:$0x7] %vm10963_vm0, %v4840_v18  ;;  %v4297_v8 = vrot.slane %v4287_v7, %v10762_v3  ;;  %v4956_v10 = vrot.slane %v4928_v49, %v10762_v3 }
 0x3b3   :  { %9087 = vst.msk [vmem:[%s17911_s2 + $0xcfd] ss:$4 sm:$0x7] %vm10963_vm0, %v4854_v16  ;;  %9468 = vst.msk [vmem:[%s17911_s2 + $0xcda] ss:$4 sm:$0x7] %vm10963_vm0, %v4855_v25  ;;  %v4318_v25 = vrot.slane %v4290_v20, %v10762_v3 }
 0x3b4   :  { %9469 = vst.msk [vmem:[%s17911_s2 + $0xce6] ss:$4 sm:$0x7] %vm10963_vm0, %v4857_v40  ;;  %9470 = vst.msk [vmem:[%s17911_s2 + $0xcf2] ss:$4 sm:$0x7] %vm10963_vm0, %v4840_v18  ;;  %v4304_v18 = vrot.slane %v4289_v62, %v10762_v3 }
 0x3b5   :  { %9471 = vst.msk [vmem:[%s17911_s2 + $0xcfe] ss:$4 sm:$0x7] %vm10963_vm0, %v4854_v16  ;;  %8722 = vst.msk [vmem:[%s17911_s2 + $0xde0] ss:$4 sm:$0x7] %vm10963_vm0, %v5034_v36  ;;  %v4311_v16 = vrot.slane %v4288_v4, %v10762_v3 }
 0x3b6   :  { %8723 = vst.msk [vmem:[%s17911_s2 + $0xdec] ss:$4 sm:$0x7] %vm10963_vm0, %v5048_v0  ;;  %8726 = vst.msk [vmem:[%s17911_s2 + $0xe10] ss:$4 sm:$0x7] %vm10963_vm0, %v5041_v45 }
 0x3b7   :  { %8727 = vst.msk [vmem:[%s17911_s2 + $0xe1c] ss:$4 sm:$0x7] %vm10963_vm0, %v5055_v46  ;;  %9106 = vst.msk [vmem:[%s17911_s2 + $0xde1] ss:$4 sm:$0x7] %vm10963_vm0, %v5034_v36 }
 0x3b8   :  { %9107 = vst.msk [vmem:[%s17911_s2 + $0xded] ss:$4 sm:$0x7] %vm10963_vm0, %v5048_v0  ;;  %9110 = vst.msk [vmem:[%s17911_s2 + $0xe11] ss:$4 sm:$0x7] %vm10963_vm0, %v5041_v45 }
 0x3b9   :  { %9111 = vst.msk [vmem:[%s17911_s2 + $0xe1d] ss:$4 sm:$0x7] %vm10963_vm0, %v5055_v46  ;;  %9490 = vst.msk [vmem:[%s17911_s2 + $0xde2] ss:$4 sm:$0x7] %vm10963_vm0, %v5034_v36 }
 0x3ba   :  { %9491 = vst.msk [vmem:[%s17911_s2 + $0xdee] ss:$4 sm:$0x7] %vm10963_vm0, %v5048_v0  ;;  %9494 = vst.msk [vmem:[%s17911_s2 + $0xe12] ss:$4 sm:$0x7] %vm10963_vm0, %v5041_v45  ;;  %v5157_v45 = vrot.slane %v5129_v31, %v10762_v3  ;;  %v4319_v0 = vcombine.high %v4297_v8, %v4297_v8 }
 0x3bb   :  { %9495 = vst.msk [vmem:[%s17911_s2 + $0xe1e] ss:$4 sm:$0x7] %vm10963_vm0, %v5055_v46  ;;  %8704 = vst.msk [vmem:[%s17911_s2 + $0xd08] ss:$4 sm:$0x7] %vm10963_vm0, %v4856_v23  ;;  %v4320_v46 = vcombine.high %v4304_v18, %v4304_v18 }
 0x3bc   :  { %8705 = vst.msk [vmem:[%s17911_s2 + $0xd14] ss:$4 sm:$0x7] %vm10963_vm0, %v4858_v17  ;;  %9088 = vst.msk [vmem:[%s17911_s2 + $0xd09] ss:$4 sm:$0x7] %vm10963_vm0, %v4856_v23 }
 0x3bd   :  { %9089 = vst.msk [vmem:[%s17911_s2 + $0xd15] ss:$4 sm:$0x7] %vm10963_vm0, %v4858_v17  ;;  %9472 = vst.msk [vmem:[%s17911_s2 + $0xd0a] ss:$4 sm:$0x7] %vm10963_vm0, %v4856_v23  ;;  %v4321_v23 = vcombine.high %v4311_v16, %v4311_v16 }
 0x3be   :  { %9473 = vst.msk [vmem:[%s17911_s2 + $0xd16] ss:$4 sm:$0x7] %vm10963_vm0, %v4858_v17  ;;  %8724 = vst.msk [vmem:[%s17911_s2 + $0xdf8] ss:$4 sm:$0x7] %vm10963_vm0, %v5056_v47  ;;  %v4322_v17 = vcombine.high %v4318_v25, %v4318_v25 }
 0x3bf   :  { %8725 = vst.msk [vmem:[%s17911_s2 + $0xe04] ss:$4 sm:$0x7] %vm10963_vm0, %v5058_v54  ;;  %8728 = vst.msk [vmem:[%s17911_s2 + $0xe28] ss:$4 sm:$0x7] %vm10963_vm0, %v5057_v19 }
 0x3c0   :  { %8729 = vst.msk [vmem:[%s17911_s2 + $0xe34] ss:$4 sm:$0x7] %vm10963_vm0, %v5059_v24  ;;  %9108 = vst.msk [vmem:[%s17911_s2 + $0xdf9] ss:$4 sm:$0x7] %vm10963_vm0, %v5056_v47 }
 0x3c1   :  { %9109 = vst.msk [vmem:[%s17911_s2 + $0xe05] ss:$4 sm:$0x7] %vm10963_vm0, %v5058_v54  ;;  %9112 = vst.msk [vmem:[%s17911_s2 + $0xe29] ss:$4 sm:$0x7] %vm10963_vm0, %v5057_v19 }
 0x3c2   :  { %9113 = vst.msk [vmem:[%s17911_s2 + $0xe35] ss:$4 sm:$0x7] %vm10963_vm0, %v5059_v24  ;;  %9492 = vst.msk [vmem:[%s17911_s2 + $0xdfa] ss:$4 sm:$0x7] %vm10963_vm0, %v5056_v47 }
 0x3c3   :  { %9493 = vst.msk [vmem:[%s17911_s2 + $0xe06] ss:$4 sm:$0x7] %vm10963_vm0, %v5058_v54  ;;  %9496 = vst.msk [vmem:[%s17911_s2 + $0xe2a] ss:$4 sm:$0x7] %vm10963_vm0, %v5057_v19 }
 0x3c4   :  { %9497 = vst.msk [vmem:[%s17911_s2 + $0xe36] ss:$4 sm:$0x7] %vm10963_vm0, %v5059_v24  ;;  %v18122_v30 = vld [vmem:[#allocation13_spill] sm:$0xff]  ;;  %v18123_v34 = vld [vmem:[#allocation14_spill] sm:$0xff]  ;;  %v18124_v59 = vld [vmem:[#allocation36_spill] sm:$0xff] }
 0x3c5   :  { %v4323_v2 = vcombine.low %v18123_v34, %v18122_v30  ;;  %v4324_v14 = vcombine.high %v18123_v34, %v18122_v30  ;;  %v18125_v53 = vld [vmem:[#allocation16_spill] sm:$0xff]  ;;  %v18127_v63 = vld [vmem:[#allocation18_spill] sm:$0xff]  ;;  %v18128_v40 = vld [vmem:[#allocation51_spill] sm:$0xff]  ;;  %8634 = vst.msk [vmem:[%s17911_s2 + $0x9c0] ss:$4 sm:$0x7] %vm10963_vm0, %v4297_v8 }
 0x3c6   :  { %v15616_v57 = vadd.f32 %v18125_v53, %v18124_v59  ;;  %v18126_v6 = vld [vmem:[#allocation40_spill] sm:$0xff]  ;;  %v4957_v36 = vcombine.low %v18128_v40, %v4949_v39  ;;  %v4958_v61 = vcombine.high %v18128_v40, %v4949_v39  ;;  %8635 = vst.msk [vmem:[%s17911_s2 + $0x9cc] ss:$4 sm:$0x7] %vm10963_vm0, %v4311_v16  ;;  %v18130_v24 = vld [vmem:[#allocation58_spill] sm:$0xff]  ;;  %v18131_v5 = vld [vmem:[#allocation59_spill] sm:$0xff] }
 0x3c7   :  { %v15620_v1 = vadd.f32 %v18127_v63, %v18126_v6  ;;  %8638 = vst.msk [vmem:[%s17911_s2 + $0x9f0] ss:$4 sm:$0x7] %vm10963_vm0, %v4304_v18  ;;  %8639 = vst.msk [vmem:[%s17911_s2 + $0x9fc] ss:$4 sm:$0x7] %vm10963_vm0, %v4318_v25  ;;  %v5158_v13 = vcombine.low %v18130_v24, %v5150_v9  ;;  %v5159_v42 = vcombine.high %v18130_v24, %v5150_v9 }
 0x3c8   :  { %9018 = vst.msk [vmem:[%s17911_s2 + $0x9c1] ss:$4 sm:$0x7] %vm10963_vm0, %v4297_v8  ;;  %9019 = vst.msk [vmem:[%s17911_s2 + $0x9cd] ss:$4 sm:$0x7] %vm10963_vm0, %v4311_v16  ;;  %v4967_v19 = vrot.slane %v4957_v36, %v10762_v3  ;;  %v4981_v54 = vrot.slane %v4958_v61, %v10762_v3  ;;  %v5160_v55 = vcombine.low %v18131_v5, %v5157_v45 }
 0x3c9   :  { %9022 = vst.msk [vmem:[%s17911_s2 + $0x9f1] ss:$4 sm:$0x7] %vm10963_vm0, %v4304_v18  ;;  %9023 = vst.msk [vmem:[%s17911_s2 + $0x9fd] ss:$4 sm:$0x7] %vm10963_vm0, %v4318_v25  ;;  %v5161_v58 = vcombine.high %v18131_v5, %v5157_v45  ;;  %v5168_v63 = vrot.slane %v5158_v13, %v10762_v3  ;;  %v5182_v4 = vrot.slane %v5159_v42, %v10762_v3 }
 0x3ca   :  { %9402 = vst.msk [vmem:[%s17911_s2 + $0x9c2] ss:$4 sm:$0x7] %vm10963_vm0, %v4297_v8  ;;  %9403 = vst.msk [vmem:[%s17911_s2 + $0x9ce] ss:$4 sm:$0x7] %vm10963_vm0, %v4311_v16  ;;  %v4989_v53 = vcombine.high %v4967_v19, %v4967_v19  ;;  %v4991_v6 = vcombine.high %v4981_v54, %v4981_v54  ;;  %v5175_v7 = vrot.slane %v5160_v55, %v10762_v3 }
 0x3cb   :  { %9406 = vst.msk [vmem:[%s17911_s2 + $0x9f2] ss:$4 sm:$0x7] %vm10963_vm0, %v4304_v18  ;;  %9407 = vst.msk [vmem:[%s17911_s2 + $0x9fe] ss:$4 sm:$0x7] %vm10963_vm0, %v4318_v25  ;;  %v5189_v62 = vrot.slane %v5161_v58, %v10762_v3  ;;  %v4332_v39 = vrot.slane %v4323_v2, %v10762_v3  ;;  %v4339_v31 = vrot.slane %v4324_v14, %v10762_v3 }
 0x3cc   :  { %v18129_v60 = vld [vmem:[#allocation52_spill] sm:$0xff]  ;;  %8636 = vst.msk [vmem:[%s17911_s2 + $0x9d8] ss:$4 sm:$0x7] %vm10963_vm0, %v4319_v0  ;;  %v5190_v9 = vcombine.high %v5168_v63, %v5168_v63  ;;  %v5191_v8 = vcombine.high %v5175_v7, %v5175_v7  ;;  %v5192_v18 = vcombine.high %v5182_v4, %v5182_v4  ;;  %v5263_v25 = vcombine.high %v15620_v1, %v15620_v1  ;;  %v18134_v5 = vld [vmem:[#allocation62_spill] sm:$0xff]  ;;  %v18155_v56 = vld [vmem:[#allocation77_spill] sm:$0xff] }
 0x3cd   :  { %v4959_v21 = vcombine.low %v18129_v60, %v4956_v10  ;;  %v4960_v47 = vcombine.high %v18129_v60, %v4956_v10  ;;  %8637 = vst.msk [vmem:[%s17911_s2 + $0x9e4] ss:$4 sm:$0x7] %vm10963_vm0, %v4321_v23  ;;  %8640 = vst.msk [vmem:[%s17911_s2 + $0xa08] ss:$4 sm:$0x7] %vm10963_vm0, %v4320_v46  ;;  %v5193_v16 = vcombine.high %v5189_v62, %v5189_v62 }
 0x3ce   :  { %8641 = vst.msk [vmem:[%s17911_s2 + $0xa14] ss:$4 sm:$0x7] %vm10963_vm0, %v4322_v17  ;;  %9020 = vst.msk [vmem:[%s17911_s2 + $0x9d9] ss:$4 sm:$0x7] %vm10963_vm0, %v4319_v0  ;;  %v4354_v30 = vcombine.low %v4332_v39, %v14086_v29  ;;  %v4355_v34 = vcombine.high %v4332_v39, %v14086_v29  ;;  %v4356_v2 = vcombine.low %v4339_v31, %v14229_v48 }
 0x3cf   :  { %9021 = vst.msk [vmem:[%s17911_s2 + $0x9e5] ss:$4 sm:$0x7] %vm10963_vm0, %v4321_v23  ;;  %9024 = vst.msk [vmem:[%s17911_s2 + $0xa09] ss:$4 sm:$0x7] %vm10963_vm0, %v4320_v46  ;;  %v4974_v11 = vrot.slane %v4959_v21, %v10762_v3  ;;  %v4988_v59 = vrot.slane %v4960_v47, %v10762_v3  ;;  %v4357_v14 = vcombine.high %v4339_v31, %v14229_v48 }
 0x3d0   :  { %9025 = vst.msk [vmem:[%s17911_s2 + $0xa15] ss:$4 sm:$0x7] %vm10963_vm0, %v4322_v17  ;;  %9404 = vst.msk [vmem:[%s17911_s2 + $0x9da] ss:$4 sm:$0x7] %vm10963_vm0, %v4319_v0  ;;  %v5062_v29 = vcombine.high %v15616_v57, %v15616_v57  ;;  %v5083_v48 = vrot.slane %v15616_v57, %v10762_v3  ;;  %v5284_v10 = vrot.slane %v15620_v1, %v10762_v3 }
 0x3d1   :  { %9405 = vst.msk [vmem:[%s17911_s2 + $0x9e6] ss:$4 sm:$0x7] %vm10963_vm0, %v4321_v23  ;;  %9408 = vst.msk [vmem:[%s17911_s2 + $0xa0a] ss:$4 sm:$0x7] %vm10963_vm0, %v4320_v46  ;;  %v4990_v20 = vcombine.high %v4974_v11, %v4974_v11  ;;  %v4992_v49 = vcombine.high %v4988_v59, %v4988_v59  ;;  %v4364_v40 = vrot.slane %v4354_v30, %v10762_v3 }
 0x3d2   :  { %9409 = vst.msk [vmem:[%s17911_s2 + $0xa16] ss:$4 sm:$0x7] %vm10963_vm0, %v4322_v17  ;;  %8714 = vst.msk [vmem:[%s17911_s2 + $0xd80] ss:$4 sm:$0x7] %vm10963_vm0, %v4967_v19  ;;  %v4371_v36 = vrot.slane %v4356_v2, %v10762_v3  ;;  %v4378_v61 = vrot.slane %v4355_v34, %v10762_v3  ;;  %v4385_v45 = vrot.slane %v4357_v14, %v10762_v3 }
 0x3d3   :  { %8715 = vst.msk [vmem:[%s17911_s2 + $0xd8c] ss:$4 sm:$0x7] %vm10963_vm0, %v4981_v54  ;;  %9098 = vst.msk [vmem:[%s17911_s2 + $0xd81] ss:$4 sm:$0x7] %vm10963_vm0, %v4967_v19  ;;  %v5090_v0 = vrot.slane %v5062_v29, %v10762_v3  ;;  %v5291_v17 = vrot.slane %v5263_v25, %v10762_v3  ;;  %v4386_v60 = vcombine.high %v4364_v40, %v4364_v40 }
 0x3d4   :  { %9099 = vst.msk [vmem:[%s17911_s2 + $0xd8d] ss:$4 sm:$0x7] %vm10963_vm0, %v4981_v54  ;;  %9482 = vst.msk [vmem:[%s17911_s2 + $0xd82] ss:$4 sm:$0x7] %vm10963_vm0, %v4967_v19  ;;  %v4387_v21 = vcombine.high %v4371_v36, %v4371_v36  ;;  %v4388_v47 = vcombine.high %v4378_v61, %v4378_v61  ;;  %v4389_v1 = vcombine.high %v4385_v45, %v4385_v45 }
 0x3d5   :  { %9483 = vst.msk [vmem:[%s17911_s2 + $0xd8e] ss:$4 sm:$0x7] %vm10963_vm0, %v4981_v54  ;;  %8716 = vst.msk [vmem:[%s17911_s2 + $0xd98] ss:$4 sm:$0x7] %vm10963_vm0, %v4989_v53  ;;  %v5292_v55 = vcombine.low %v18134_v5, %v5284_v10  ;;  %v5293_v58 = vcombine.high %v18134_v5, %v5284_v10 }
 0x3d6   :  { %8717 = vst.msk [vmem:[%s17911_s2 + $0xda4] ss:$4 sm:$0x7] %vm10963_vm0, %v4991_v6  ;;  %8718 = vst.msk [vmem:[%s17911_s2 + $0xdb0] ss:$4 sm:$0x7] %vm10963_vm0, %v4974_v11 }
 0x3d7   :  { %8719 = vst.msk [vmem:[%s17911_s2 + $0xdbc] ss:$4 sm:$0x7] %vm10963_vm0, %v4988_v59  ;;  %9100 = vst.msk [vmem:[%s17911_s2 + $0xd99] ss:$4 sm:$0x7] %vm10963_vm0, %v4989_v53 }
 0x3d8   :  { %9101 = vst.msk [vmem:[%s17911_s2 + $0xda5] ss:$4 sm:$0x7] %vm10963_vm0, %v4991_v6  ;;  %9102 = vst.msk [vmem:[%s17911_s2 + $0xdb1] ss:$4 sm:$0x7] %vm10963_vm0, %v4974_v11 }
 0x3d9   :  { %9103 = vst.msk [vmem:[%s17911_s2 + $0xdbd] ss:$4 sm:$0x7] %vm10963_vm0, %v4988_v59  ;;  %9484 = vst.msk [vmem:[%s17911_s2 + $0xd9a] ss:$4 sm:$0x7] %vm10963_vm0, %v4989_v53 }
 0x3da   :  { %9485 = vst.msk [vmem:[%s17911_s2 + $0xda6] ss:$4 sm:$0x7] %vm10963_vm0, %v4991_v6  ;;  %9486 = vst.msk [vmem:[%s17911_s2 + $0xdb2] ss:$4 sm:$0x7] %vm10963_vm0, %v4974_v11 }
 0x3db   :  { %9487 = vst.msk [vmem:[%s17911_s2 + $0xdbe] ss:$4 sm:$0x7] %vm10963_vm0, %v4988_v59  ;;  %8738 = vst.msk [vmem:[%s17911_s2 + $0xea0] ss:$4 sm:$0x7] %vm10963_vm0, %v5168_v63 }
 0x3dc   :  { %8739 = vst.msk [vmem:[%s17911_s2 + $0xeac] ss:$4 sm:$0x7] %vm10963_vm0, %v5182_v4  ;;  %8742 = vst.msk [vmem:[%s17911_s2 + $0xed0] ss:$4 sm:$0x7] %vm10963_vm0, %v5175_v7 }
 0x3dd   :  { %8743 = vst.msk [vmem:[%s17911_s2 + $0xedc] ss:$4 sm:$0x7] %vm10963_vm0, %v5189_v62  ;;  %9122 = vst.msk [vmem:[%s17911_s2 + $0xea1] ss:$4 sm:$0x7] %vm10963_vm0, %v5168_v63 }
 0x3de   :  { %9123 = vst.msk [vmem:[%s17911_s2 + $0xead] ss:$4 sm:$0x7] %vm10963_vm0, %v5182_v4  ;;  %9126 = vst.msk [vmem:[%s17911_s2 + $0xed1] ss:$4 sm:$0x7] %vm10963_vm0, %v5175_v7 }
 0x3df   :  { %9127 = vst.msk [vmem:[%s17911_s2 + $0xedd] ss:$4 sm:$0x7] %vm10963_vm0, %v5189_v62  ;;  %9506 = vst.msk [vmem:[%s17911_s2 + $0xea2] ss:$4 sm:$0x7] %vm10963_vm0, %v5168_v63 }
 0x3e0   :  { %9507 = vst.msk [vmem:[%s17911_s2 + $0xeae] ss:$4 sm:$0x7] %vm10963_vm0, %v5182_v4  ;;  %9510 = vst.msk [vmem:[%s17911_s2 + $0xed2] ss:$4 sm:$0x7] %vm10963_vm0, %v5175_v7 }
 0x3e1   :  { %9511 = vst.msk [vmem:[%s17911_s2 + $0xede] ss:$4 sm:$0x7] %vm10963_vm0, %v5189_v62  ;;  %8720 = vst.msk [vmem:[%s17911_s2 + $0xdc8] ss:$4 sm:$0x7] %vm10963_vm0, %v4990_v20  ;;  %v5302_v62 = vrot.slane %v5292_v55, %v10762_v3 }
 0x3e2   :  { %8721 = vst.msk [vmem:[%s17911_s2 + $0xdd4] ss:$4 sm:$0x7] %vm10963_vm0, %v4992_v49  ;;  %9104 = vst.msk [vmem:[%s17911_s2 + $0xdc9] ss:$4 sm:$0x7] %vm10963_vm0, %v4990_v20 }
 0x3e3   :  { %9105 = vst.msk [vmem:[%s17911_s2 + $0xdd5] ss:$4 sm:$0x7] %vm10963_vm0, %v4992_v49  ;;  %9488 = vst.msk [vmem:[%s17911_s2 + $0xdca] ss:$4 sm:$0x7] %vm10963_vm0, %v4990_v20  ;;  %v5324_v34 = vcombine.high %v5302_v62, %v5302_v62 }
 0x3e4   :  { %9489 = vst.msk [vmem:[%s17911_s2 + $0xdd6] ss:$4 sm:$0x7] %vm10963_vm0, %v4992_v49  ;;  %8740 = vst.msk [vmem:[%s17911_s2 + $0xeb8] ss:$4 sm:$0x7] %vm10963_vm0, %v5190_v9  ;;  %v5316_v49 = vrot.slane %v5293_v58, %v10762_v3 }
 0x3e5   :  { %8741 = vst.msk [vmem:[%s17911_s2 + $0xec4] ss:$4 sm:$0x7] %vm10963_vm0, %v5192_v18  ;;  %8744 = vst.msk [vmem:[%s17911_s2 + $0xee8] ss:$4 sm:$0x7] %vm10963_vm0, %v5191_v8 }
 0x3e6   :  { %8745 = vst.msk [vmem:[%s17911_s2 + $0xef4] ss:$4 sm:$0x7] %vm10963_vm0, %v5193_v16  ;;  %9124 = vst.msk [vmem:[%s17911_s2 + $0xeb9] ss:$4 sm:$0x7] %vm10963_vm0, %v5190_v9  ;;  %v5326_v14 = vcombine.high %v5316_v49, %v5316_v49 }
 0x3e7   :  { %9125 = vst.msk [vmem:[%s17911_s2 + $0xec5] ss:$4 sm:$0x7] %vm10963_vm0, %v5192_v18  ;;  %9128 = vst.msk [vmem:[%s17911_s2 + $0xee9] ss:$4 sm:$0x7] %vm10963_vm0, %v5191_v8 }
 0x3e8   :  { %9129 = vst.msk [vmem:[%s17911_s2 + $0xef5] ss:$4 sm:$0x7] %vm10963_vm0, %v5193_v16  ;;  %9508 = vst.msk [vmem:[%s17911_s2 + $0xeba] ss:$4 sm:$0x7] %vm10963_vm0, %v5190_v9 }
 0x3e9   :  { %9509 = vst.msk [vmem:[%s17911_s2 + $0xec6] ss:$4 sm:$0x7] %vm10963_vm0, %v5192_v18  ;;  %9512 = vst.msk [vmem:[%s17911_s2 + $0xeea] ss:$4 sm:$0x7] %vm10963_vm0, %v5191_v8 }
 0x3ea   :  { %9513 = vst.msk [vmem:[%s17911_s2 + $0xef6] ss:$4 sm:$0x7] %vm10963_vm0, %v5193_v16  ;;  %v18132_v46 = vld [vmem:[#allocation56_spill] sm:$0xff]  ;;  %v18133_v19 = vld [vmem:[#allocation57_spill] sm:$0xff]  ;;  %v18135_v11 = vld [vmem:[#allocation63_spill] sm:$0xff] }
 0x3eb   :  { %v5091_v23 = vcombine.low %v18132_v46, %v5083_v48  ;;  %v5092_v57 = vcombine.high %v18132_v46, %v5083_v48  ;;  %8642 = vst.msk [vmem:[%s17911_s2 + $0xa20] ss:$4 sm:$0x7] %vm10963_vm0, %v4364_v40  ;;  %8643 = vst.msk [vmem:[%s17911_s2 + $0xa2c] ss:$4 sm:$0x7] %vm10963_vm0, %v4378_v61  ;;  %v5093_v54 = vcombine.low %v18133_v19, %v5090_v0 }
 0x3ec   :  { %8646 = vst.msk [vmem:[%s17911_s2 + $0xa50] ss:$4 sm:$0x7] %vm10963_vm0, %v4371_v36  ;;  %8647 = vst.msk [vmem:[%s17911_s2 + $0xa5c] ss:$4 sm:$0x7] %vm10963_vm0, %v4385_v45  ;;  %v5094_v24 = vcombine.high %v18133_v19, %v5090_v0  ;;  %v5294_v59 = vcombine.low %v18135_v11, %v5291_v17  ;;  %v5295_v53 = vcombine.high %v18135_v11, %v5291_v17 }
 0x3ed   :  { %9026 = vst.msk [vmem:[%s17911_s2 + $0xa21] ss:$4 sm:$0x7] %vm10963_vm0, %v4364_v40  ;;  %9027 = vst.msk [vmem:[%s17911_s2 + $0xa2d] ss:$4 sm:$0x7] %vm10963_vm0, %v4378_v61  ;;  %v5101_v13 = vrot.slane %v5091_v23, %v10762_v3  ;;  %v5115_v42 = vrot.slane %v5092_v57, %v10762_v3  ;;  %v5108_v6 = vrot.slane %v5093_v54, %v10762_v3 }
 0x3ee   :  { %9030 = vst.msk [vmem:[%s17911_s2 + $0xa51] ss:$4 sm:$0x7] %vm10963_vm0, %v4371_v36  ;;  %9031 = vst.msk [vmem:[%s17911_s2 + $0xa5d] ss:$4 sm:$0x7] %vm10963_vm0, %v4385_v45  ;;  %v5122_v63 = vrot.slane %v5094_v24, %v10762_v3  ;;  %v5309_v20 = vrot.slane %v5294_v59, %v10762_v3  ;;  %v5323_v39 = vrot.slane %v5295_v53, %v10762_v3 }
 0x3ef   :  { %9410 = vst.msk [vmem:[%s17911_s2 + $0xa22] ss:$4 sm:$0x7] %vm10963_vm0, %v4364_v40  ;;  %9411 = vst.msk [vmem:[%s17911_s2 + $0xa2e] ss:$4 sm:$0x7] %vm10963_vm0, %v4378_v61  ;;  %v5123_v7 = vcombine.high %v5101_v13, %v5101_v13  ;;  %v5125_v4 = vcombine.high %v5115_v42, %v5115_v42  ;;  %v5124_v31 = vcombine.high %v5108_v6, %v5108_v6 }
 0x3f0   :  { %9414 = vst.msk [vmem:[%s17911_s2 + $0xa52] ss:$4 sm:$0x7] %vm10963_vm0, %v4371_v36  ;;  %9415 = vst.msk [vmem:[%s17911_s2 + $0xa5e] ss:$4 sm:$0x7] %vm10963_vm0, %v4385_v45  ;;  %v5126_v9 = vcombine.high %v5122_v63, %v5122_v63  ;;  %v5325_v2 = vcombine.high %v5309_v20, %v5309_v20  ;;  %v5327_v29 = vcombine.high %v5323_v39, %v5323_v39 }
 0x3f1   :  { %8644 = vst.msk [vmem:[%s17911_s2 + $0xa38] ss:$4 sm:$0x7] %vm10963_vm0, %v4386_v60  ;;  %8645 = vst.msk [vmem:[%s17911_s2 + $0xa44] ss:$4 sm:$0x7] %vm10963_vm0, %v4388_v47 }
 0x3f2   :  { %8648 = vst.msk [vmem:[%s17911_s2 + $0xa68] ss:$4 sm:$0x7] %vm10963_vm0, %v4387_v21  ;;  %8649 = vst.msk [vmem:[%s17911_s2 + $0xa74] ss:$4 sm:$0x7] %vm10963_vm0, %v4389_v1 }
 0x3f3   :  { %9028 = vst.msk [vmem:[%s17911_s2 + $0xa39] ss:$4 sm:$0x7] %vm10963_vm0, %v4386_v60  ;;  %9029 = vst.msk [vmem:[%s17911_s2 + $0xa45] ss:$4 sm:$0x7] %vm10963_vm0, %v4388_v47 }
 0x3f4   :  { %9032 = vst.msk [vmem:[%s17911_s2 + $0xa69] ss:$4 sm:$0x7] %vm10963_vm0, %v4387_v21  ;;  %9033 = vst.msk [vmem:[%s17911_s2 + $0xa75] ss:$4 sm:$0x7] %vm10963_vm0, %v4389_v1 }
 0x3f5   :  { %9412 = vst.msk [vmem:[%s17911_s2 + $0xa3a] ss:$4 sm:$0x7] %vm10963_vm0, %v4386_v60  ;;  %9413 = vst.msk [vmem:[%s17911_s2 + $0xa46] ss:$4 sm:$0x7] %vm10963_vm0, %v4388_v47 }
 0x3f6   :  { %9416 = vst.msk [vmem:[%s17911_s2 + $0xa6a] ss:$4 sm:$0x7] %vm10963_vm0, %v4387_v21  ;;  %9417 = vst.msk [vmem:[%s17911_s2 + $0xa76] ss:$4 sm:$0x7] %vm10963_vm0, %v4389_v1 }
 0x3f7   :  { %8730 = vst.msk [vmem:[%s17911_s2 + $0xe40] ss:$4 sm:$0x7] %vm10963_vm0, %v5101_v13  ;;  %8731 = vst.msk [vmem:[%s17911_s2 + $0xe4c] ss:$4 sm:$0x7] %vm10963_vm0, %v5115_v42 }
 0x3f8   :  { %9114 = vst.msk [vmem:[%s17911_s2 + $0xe41] ss:$4 sm:$0x7] %vm10963_vm0, %v5101_v13  ;;  %9115 = vst.msk [vmem:[%s17911_s2 + $0xe4d] ss:$4 sm:$0x7] %vm10963_vm0, %v5115_v42 }
 0x3f9   :  { %9498 = vst.msk [vmem:[%s17911_s2 + $0xe42] ss:$4 sm:$0x7] %vm10963_vm0, %v5101_v13  ;;  %9499 = vst.msk [vmem:[%s17911_s2 + $0xe4e] ss:$4 sm:$0x7] %vm10963_vm0, %v5115_v42 }
 0x3fa   :  { %8732 = vst.msk [vmem:[%s17911_s2 + $0xe58] ss:$4 sm:$0x7] %vm10963_vm0, %v5123_v7  ;;  %8733 = vst.msk [vmem:[%s17911_s2 + $0xe64] ss:$4 sm:$0x7] %vm10963_vm0, %v5125_v4 }
 0x3fb   :  { %8734 = vst.msk [vmem:[%s17911_s2 + $0xe70] ss:$4 sm:$0x7] %vm10963_vm0, %v5108_v6  ;;  %8735 = vst.msk [vmem:[%s17911_s2 + $0xe7c] ss:$4 sm:$0x7] %vm10963_vm0, %v5122_v63 }
 0x3fc   :  { %9116 = vst.msk [vmem:[%s17911_s2 + $0xe59] ss:$4 sm:$0x7] %vm10963_vm0, %v5123_v7  ;;  %9117 = vst.msk [vmem:[%s17911_s2 + $0xe65] ss:$4 sm:$0x7] %vm10963_vm0, %v5125_v4 }
 0x3fd   :  { %9118 = vst.msk [vmem:[%s17911_s2 + $0xe71] ss:$4 sm:$0x7] %vm10963_vm0, %v5108_v6  ;;  %9119 = vst.msk [vmem:[%s17911_s2 + $0xe7d] ss:$4 sm:$0x7] %vm10963_vm0, %v5122_v63 }
 0x3fe   :  { %9500 = vst.msk [vmem:[%s17911_s2 + $0xe5a] ss:$4 sm:$0x7] %vm10963_vm0, %v5123_v7  ;;  %9501 = vst.msk [vmem:[%s17911_s2 + $0xe66] ss:$4 sm:$0x7] %vm10963_vm0, %v5125_v4 }
 0x3ff   :  { %9502 = vst.msk [vmem:[%s17911_s2 + $0xe72] ss:$4 sm:$0x7] %vm10963_vm0, %v5108_v6  ;;  %9503 = vst.msk [vmem:[%s17911_s2 + $0xe7e] ss:$4 sm:$0x7] %vm10963_vm0, %v5122_v63 }
 0x400   :  { %v18136_v8 = vld [vmem:[#allocation74_spill] sm:$0xff]  ;;  %v18137_v18 = vld [vmem:[#allocation15_spill] sm:$0xff]  ;;  %8754 = vst.msk [vmem:[%s17911_s2 + $0xf60] ss:$4 sm:$0x7] %vm10963_vm0, %v5302_v62  ;;  %v18140_v45 = vld [vmem:[#allocation41_spill] sm:$0xff] }
 0x401   :  { %v4390_v16 = vcombine.low %v18137_v18, %v18136_v8  ;;  %v4391_v30 = vcombine.high %v18137_v18, %v18136_v8  ;;  %8755 = vst.msk [vmem:[%s17911_s2 + $0xf6c] ss:$4 sm:$0x7] %vm10963_vm0, %v5316_v49  ;;  %8758 = vst.msk [vmem:[%s17911_s2 + $0xf90] ss:$4 sm:$0x7] %vm10963_vm0, %v5309_v20  ;;  %v16428_v0 = vadd.f32 %v13567_v43, %v18140_v45 }
 0x402   :  { %8759 = vst.msk [vmem:[%s17911_s2 + $0xf9c] ss:$4 sm:$0x7] %vm10963_vm0, %v5323_v39  ;;  %9138 = vst.msk [vmem:[%s17911_s2 + $0xf61] ss:$4 sm:$0x7] %vm10963_vm0, %v5302_v62 }
 0x403   :  { %9139 = vst.msk [vmem:[%s17911_s2 + $0xf6d] ss:$4 sm:$0x7] %vm10963_vm0, %v5316_v49  ;;  %9142 = vst.msk [vmem:[%s17911_s2 + $0xf91] ss:$4 sm:$0x7] %vm10963_vm0, %v5309_v20  ;;  %v4399_v48 = vrot.slane %v4390_v16, %v10762_v3  ;;  %v4406_v25 = vrot.slane %v4391_v30, %v10762_v3 }
 0x404   :  { %9143 = vst.msk [vmem:[%s17911_s2 + $0xf9d] ss:$4 sm:$0x7] %vm10963_vm0, %v5323_v39  ;;  %9522 = vst.msk [vmem:[%s17911_s2 + $0xf62] ss:$4 sm:$0x7] %vm10963_vm0, %v5302_v62 }
 0x405   :  { %9523 = vst.msk [vmem:[%s17911_s2 + $0xf6e] ss:$4 sm:$0x7] %vm10963_vm0, %v5316_v49  ;;  %9526 = vst.msk [vmem:[%s17911_s2 + $0xf92] ss:$4 sm:$0x7] %vm10963_vm0, %v5309_v20  ;;  %v4421_v57 = vcombine.low %v4399_v48, %v14395_v27  ;;  %v4422_v17 = vcombine.high %v4399_v48, %v14395_v27  ;;  %v4423_v60 = vcombine.low %v4406_v25, %v14404_v37 }
 0x406   :  { %9527 = vst.msk [vmem:[%s17911_s2 + $0xf9e] ss:$4 sm:$0x7] %vm10963_vm0, %v5323_v39  ;;  %8736 = vst.msk [vmem:[%s17911_s2 + $0xe88] ss:$4 sm:$0x7] %vm10963_vm0, %v5124_v31  ;;  %v4424_v21 = vcombine.high %v4406_v25, %v14404_v37 }
 0x407   :  { %8737 = vst.msk [vmem:[%s17911_s2 + $0xe94] ss:$4 sm:$0x7] %vm10963_vm0, %v5126_v9  ;;  %9120 = vst.msk [vmem:[%s17911_s2 + $0xe89] ss:$4 sm:$0x7] %vm10963_vm0, %v5124_v31  ;;  %v4431_v43 = vrot.slane %v4421_v57, %v10762_v3  ;;  %v4438_v24 = vrot.slane %v4423_v60, %v10762_v3 }
 0x408   :  { %9121 = vst.msk [vmem:[%s17911_s2 + $0xe95] ss:$4 sm:$0x7] %vm10963_vm0, %v5126_v9  ;;  %9504 = vst.msk [vmem:[%s17911_s2 + $0xe8a] ss:$4 sm:$0x7] %vm10963_vm0, %v5124_v31  ;;  %v4452_v13 = vrot.slane %v4424_v21, %v10762_v3 }
 0x409   :  { %9505 = vst.msk [vmem:[%s17911_s2 + $0xe96] ss:$4 sm:$0x7] %vm10963_vm0, %v5126_v9  ;;  %v18138_v10 = vld [vmem:[#allocation39_spill] sm:$0xff]  ;;  %v18139_v36 = vld [vmem:[#allocation42_spill] sm:$0xff]  ;;  %v18141_v46 = vld [vmem:[#allocation44_spill] sm:$0xff]  ;;  %v4453_v58 = vcombine.high %v4431_v43, %v4431_v43  ;;  %v4454_v11 = vcombine.high %v4438_v24, %v4438_v24 }
 0x40a   :  { %v1897_v40 = vadd.f32 %v13461_v52, %v18138_v10  ;;  %v1912_v61 = vadd.f32 %v13503_v44, %v18139_v36  ;;  %8756 = vst.msk [vmem:[%s17911_s2 + $0xf78] ss:$4 sm:$0x7] %vm10963_vm0, %v5324_v34  ;;  %8757 = vst.msk [vmem:[%s17911_s2 + $0xf84] ss:$4 sm:$0x7] %vm10963_vm0, %v5326_v14  ;;  %v4457_v52 = vcombine.low %v13469_v51, %v13505_v32 }
 0x40b   :  { %8760 = vst.msk [vmem:[%s17911_s2 + $0xfa8] ss:$4 sm:$0x7] %vm10963_vm0, %v5325_v2  ;;  %8761 = vst.msk [vmem:[%s17911_s2 + $0xfb4] ss:$4 sm:$0x7] %vm10963_vm0, %v5327_v29  ;;  %v4458_v44 = vcombine.high %v13469_v51, %v13505_v32  ;;  %v16432_v23 = vadd.f32 %v13751_v35, %v18141_v46  ;;  %v4445_v35 = vrot.slane %v4422_v17, %v10762_v3 }
 0x40c   :  { %9140 = vst.msk [vmem:[%s17911_s2 + $0xf79] ss:$4 sm:$0x7] %vm10963_vm0, %v5324_v34  ;;  %9141 = vst.msk [vmem:[%s17911_s2 + $0xf85] ss:$4 sm:$0x7] %vm10963_vm0, %v5326_v14  ;;  %v5196_v47 = vcombine.high %v1897_v40, %v1897_v40  ;;  %v5217_v1 = vrot.slane %v1897_v40, %v10762_v3  ;;  %v5397_v19 = vcombine.high %v1912_v61, %v1912_v61 }
 0x40d   :  { %9144 = vst.msk [vmem:[%s17911_s2 + $0xfa9] ss:$4 sm:$0x7] %vm10963_vm0, %v5325_v2  ;;  %9145 = vst.msk [vmem:[%s17911_s2 + $0xfb5] ss:$4 sm:$0x7] %vm10963_vm0, %v5327_v29  ;;  %v5418_v54 = vrot.slane %v1912_v61, %v10762_v3  ;;  %v4455_v59 = vcombine.high %v4445_v35, %v4445_v35  ;;  %v4456_v53 = vcombine.high %v4452_v13, %v4452_v13 }
 0x40e   :  { %9524 = vst.msk [vmem:[%s17911_s2 + $0xf7a] ss:$4 sm:$0x7] %vm10963_vm0, %v5324_v34  ;;  %9525 = vst.msk [vmem:[%s17911_s2 + $0xf86] ss:$4 sm:$0x7] %vm10963_vm0, %v5326_v14  ;;  %v5224_v27 = vrot.slane %v5196_v47, %v10762_v3  ;;  %v5425_v55 = vrot.slane %v5397_v19, %v10762_v3  ;;  %v4466_v40 = vrot.slane %v4457_v52, %v10762_v3 }
 0x40f   :  { %9528 = vst.msk [vmem:[%s17911_s2 + $0xfaa] ss:$4 sm:$0x7] %vm10963_vm0, %v5325_v2  ;;  %9529 = vst.msk [vmem:[%s17911_s2 + $0xfb6] ss:$4 sm:$0x7] %vm10963_vm0, %v5327_v29  ;;  %v4473_v36 = vrot.slane %v4458_v44, %v10762_v3  ;;  %v5531_v17 = vcombine.high %v16432_v23, %v16432_v23  ;;  %v5552_v60 = vrot.slane %v16432_v23, %v10762_v3 }
 0x410   :  { %v18142_v42 = vld [vmem:[#allocation60_spill] sm:$0xff]  ;;  %8650 = vst.msk [vmem:[%s17911_s2 + $0xa80] ss:$4 sm:$0x7] %vm10963_vm0, %v4431_v43  ;;  %v18143_v6 = vld [vmem:[#allocation61_spill] sm:$0xff]  ;;  %v18144_v20 = vld [vmem:[#allocation66_spill] sm:$0xff]  ;;  %v4488_v51 = vcombine.low %v4466_v40, %v14245_v28  ;;  %v4489_v32 = vcombine.high %v4466_v40, %v14245_v28  ;;  %v5330_v28 = vcombine.high %v16428_v0, %v16428_v0 }
 0x411   :  { %v5225_v5 = vcombine.low %v18142_v42, %v5217_v1  ;;  %v5226_v37 = vcombine.high %v18142_v42, %v5217_v1  ;;  %8651 = vst.msk [vmem:[%s17911_s2 + $0xa8c] ss:$4 sm:$0x7] %vm10963_vm0, %v4445_v35  ;;  %8654 = vst.msk [vmem:[%s17911_s2 + $0xab0] ss:$4 sm:$0x7] %vm10963_vm0, %v4438_v24  ;;  %v5227_v63 = vcombine.low %v18143_v6, %v5224_v27 }
 0x412   :  { %8655 = vst.msk [vmem:[%s17911_s2 + $0xabc] ss:$4 sm:$0x7] %vm10963_vm0, %v4452_v13  ;;  %9034 = vst.msk [vmem:[%s17911_s2 + $0xa81] ss:$4 sm:$0x7] %vm10963_vm0, %v4431_v43  ;;  %v5228_v7 = vcombine.high %v18143_v6, %v5224_v27  ;;  %v5426_v49 = vcombine.low %v18144_v20, %v5418_v54  ;;  %v5427_v39 = vcombine.high %v18144_v20, %v5418_v54 }
 0x413   :  { %9035 = vst.msk [vmem:[%s17911_s2 + $0xa8d] ss:$4 sm:$0x7] %vm10963_vm0, %v4445_v35  ;;  %9038 = vst.msk [vmem:[%s17911_s2 + $0xab1] ss:$4 sm:$0x7] %vm10963_vm0, %v4438_v24  ;;  %v5235_v4 = vrot.slane %v5225_v5, %v10762_v3  ;;  %v5249_v62 = vrot.slane %v5226_v37, %v10762_v3  ;;  %v5242_v18 = vrot.slane %v5227_v63, %v10762_v3 }
 0x414   :  { %9039 = vst.msk [vmem:[%s17911_s2 + $0xabd] ss:$4 sm:$0x7] %vm10963_vm0, %v4452_v13  ;;  %9418 = vst.msk [vmem:[%s17911_s2 + $0xa82] ss:$4 sm:$0x7] %vm10963_vm0, %v4431_v43  ;;  %v5256_v16 = vrot.slane %v5228_v7, %v10762_v3  ;;  %v5436_v2 = vrot.slane %v5426_v49, %v10762_v3  ;;  %v5450_v29 = vrot.slane %v5427_v39, %v10762_v3 }
 0x415   :  { %9419 = vst.msk [vmem:[%s17911_s2 + $0xa8e] ss:$4 sm:$0x7] %vm10963_vm0, %v4445_v35  ;;  %9422 = vst.msk [vmem:[%s17911_s2 + $0xab2] ss:$4 sm:$0x7] %vm10963_vm0, %v4438_v24  ;;  %v5257_v30 = vcombine.high %v5235_v4, %v5235_v4  ;;  %v5259_v34 = vcombine.high %v5249_v62, %v5249_v62  ;;  %v5258_v25 = vcombine.high %v5242_v18, %v5242_v18 }
 0x416   :  { %9423 = vst.msk [vmem:[%s17911_s2 + $0xabe] ss:$4 sm:$0x7] %vm10963_vm0, %v4452_v13  ;;  %8652 = vst.msk [vmem:[%s17911_s2 + $0xa98] ss:$4 sm:$0x7] %vm10963_vm0, %v4453_v58  ;;  %v5260_v10 = vcombine.high %v5256_v16, %v5256_v16  ;;  %v5458_v61 = vcombine.high %v5436_v2, %v5436_v2  ;;  %v5460_v46 = vcombine.high %v5450_v29, %v5450_v29 }
 0x417   :  { %8653 = vst.msk [vmem:[%s17911_s2 + $0xaa4] ss:$4 sm:$0x7] %vm10963_vm0, %v4455_v59  ;;  %8656 = vst.msk [vmem:[%s17911_s2 + $0xac8] ss:$4 sm:$0x7] %vm10963_vm0, %v4454_v11  ;;  %v4490_v52 = vcombine.low %v4473_v36, %v14392_v38  ;;  %v4491_v44 = vcombine.high %v4473_v36, %v14392_v38  ;;  %v5351_v38 = vrot.slane %v16428_v0, %v10762_v3 }
 0x418   :  { %8657 = vst.msk [vmem:[%s17911_s2 + $0xad4] ss:$4 sm:$0x7] %vm10963_vm0, %v4456_v53  ;;  %9036 = vst.msk [vmem:[%s17911_s2 + $0xa99] ss:$4 sm:$0x7] %vm10963_vm0, %v4453_v58  ;;  %v4498_v21 = vrot.slane %v4488_v51, %v10762_v3  ;;  %v4512_v1 = vrot.slane %v4489_v32, %v10762_v3  ;;  %v5358_v54 = vrot.slane %v5330_v28, %v10762_v3 }
 0x419   :  { %9037 = vst.msk [vmem:[%s17911_s2 + $0xaa5] ss:$4 sm:$0x7] %vm10963_vm0, %v4455_v59  ;;  %9040 = vst.msk [vmem:[%s17911_s2 + $0xac9] ss:$4 sm:$0x7] %vm10963_vm0, %v4454_v11  ;;  %v4505_v47 = vrot.slane %v4490_v52, %v10762_v3  ;;  %v4519_v19 = vrot.slane %v4491_v44, %v10762_v3  ;;  %v5559_v35 = vrot.slane %v5531_v17, %v10762_v3 }
 0x41a   :  { %9041 = vst.msk [vmem:[%s17911_s2 + $0xad5] ss:$4 sm:$0x7] %vm10963_vm0, %v4456_v53  ;;  %9420 = vst.msk [vmem:[%s17911_s2 + $0xa9a] ss:$4 sm:$0x7] %vm10963_vm0, %v4453_v58  ;;  %v4520_v13 = vcombine.high %v4498_v21, %v4498_v21  ;;  %v4522_v42 = vcombine.high %v4512_v1, %v4512_v1  ;;  %v17178_v32 = vrot.slane %v4593_v12, %v10762_v3 }
 0x41b   :  { %9421 = vst.msk [vmem:[%s17911_s2 + $0xaa6] ss:$4 sm:$0x7] %vm10963_vm0, %v4455_v59  ;;  %9424 = vst.msk [vmem:[%s17911_s2 + $0xaca] ss:$4 sm:$0x7] %vm10963_vm0, %v4454_v11  ;;  %v4521_v27 = vcombine.high %v4505_v47, %v4505_v47  ;;  %v4523_v23 = vcombine.high %v4519_v19, %v4519_v19 }
 0x41c   :  { %9425 = vst.msk [vmem:[%s17911_s2 + $0xad6] ss:$4 sm:$0x7] %vm10963_vm0, %v4456_v53  ;;  %v18145_v31 = vld [vmem:[#allocation67_spill] sm:$0xff]  ;;  %v18146_v43 = vld [vmem:[#allocation64_spill] sm:$0xff]  ;;  %v18147_v5 = vld [vmem:[#allocation65_spill] sm:$0xff] }
 0x41d   :  { %v5428_v9 = vcombine.low %v18145_v31, %v5425_v55  ;;  %v5429_v8 = vcombine.high %v18145_v31, %v5425_v55  ;;  %8746 = vst.msk [vmem:[%s17911_s2 + $0xf00] ss:$4 sm:$0x7] %vm10963_vm0, %v5235_v4  ;;  %8747 = vst.msk [vmem:[%s17911_s2 + $0xf0c] ss:$4 sm:$0x7] %vm10963_vm0, %v5249_v62  ;;  %v5359_v24 = vcombine.low %v18146_v43, %v5351_v38 }
 0x41e   :  { %9130 = vst.msk [vmem:[%s17911_s2 + $0xf01] ss:$4 sm:$0x7] %vm10963_vm0, %v5235_v4  ;;  %9131 = vst.msk [vmem:[%s17911_s2 + $0xf0d] ss:$4 sm:$0x7] %vm10963_vm0, %v5249_v62  ;;  %v5360_v0 = vcombine.high %v18146_v43, %v5351_v38  ;;  %v5361_v37 = vcombine.low %v18147_v5, %v5358_v54  ;;  %v5362_v55 = vcombine.high %v18147_v5, %v5358_v54 }
 0x41f   :  { %9514 = vst.msk [vmem:[%s17911_s2 + $0xf02] ss:$4 sm:$0x7] %vm10963_vm0, %v5235_v4  ;;  %9515 = vst.msk [vmem:[%s17911_s2 + $0xf0e] ss:$4 sm:$0x7] %vm10963_vm0, %v5249_v62  ;;  %v5443_v14 = vrot.slane %v5428_v9, %v10762_v3  ;;  %v5457_v48 = vrot.slane %v5429_v8, %v10762_v3  ;;  %v5369_v58 = vrot.slane %v5359_v24, %v10762_v3 }
 0x420   :  { %8748 = vst.msk [vmem:[%s17911_s2 + $0xf18] ss:$4 sm:$0x7] %vm10963_vm0, %v5257_v30  ;;  %8749 = vst.msk [vmem:[%s17911_s2 + $0xf24] ss:$4 sm:$0x7] %vm10963_vm0, %v5259_v34  ;;  %v5383_v11 = vrot.slane %v5360_v0, %v10762_v3  ;;  %v5376_v62 = vrot.slane %v5361_v37, %v10762_v3  ;;  %v5390_v20 = vrot.slane %v5362_v55, %v10762_v3 }
 0x421   :  { %8750 = vst.msk [vmem:[%s17911_s2 + $0xf30] ss:$4 sm:$0x7] %vm10963_vm0, %v5242_v18  ;;  %8751 = vst.msk [vmem:[%s17911_s2 + $0xf3c] ss:$4 sm:$0x7] %vm10963_vm0, %v5256_v16  ;;  %v5459_v45 = vcombine.high %v5443_v14, %v5443_v14  ;;  %v5461_v57 = vcombine.high %v5457_v48, %v5457_v48  ;;  %v5391_v49 = vcombine.high %v5369_v58, %v5369_v58 }
 0x422   :  { %9132 = vst.msk [vmem:[%s17911_s2 + $0xf19] ss:$4 sm:$0x7] %vm10963_vm0, %v5257_v30  ;;  %9133 = vst.msk [vmem:[%s17911_s2 + $0xf25] ss:$4 sm:$0x7] %vm10963_vm0, %v5259_v34  ;;  %v5393_v39 = vcombine.high %v5383_v11, %v5383_v11 }
 0x423   :  { %9134 = vst.msk [vmem:[%s17911_s2 + $0xf31] ss:$4 sm:$0x7] %vm10963_vm0, %v5242_v18  ;;  %9135 = vst.msk [vmem:[%s17911_s2 + $0xf3d] ss:$4 sm:$0x7] %vm10963_vm0, %v5256_v16 }
 0x424   :  { %9516 = vst.msk [vmem:[%s17911_s2 + $0xf1a] ss:$4 sm:$0x7] %vm10963_vm0, %v5257_v30  ;;  %9517 = vst.msk [vmem:[%s17911_s2 + $0xf26] ss:$4 sm:$0x7] %vm10963_vm0, %v5259_v34  ;;  %v5394_v30 = vcombine.high %v5390_v20, %v5390_v20 }
 0x425   :  { %9518 = vst.msk [vmem:[%s17911_s2 + $0xf32] ss:$4 sm:$0x7] %vm10963_vm0, %v5242_v18  ;;  %9519 = vst.msk [vmem:[%s17911_s2 + $0xf3e] ss:$4 sm:$0x7] %vm10963_vm0, %v5256_v16  ;;  %v5392_v16 = vcombine.high %v5376_v62, %v5376_v62 }
 0x426   :  { %8770 = vst.msk [vmem:[%s17911_s2 + $0x1020] ss:$4 sm:$0x7] %vm10963_vm0, %v5436_v2  ;;  %8771 = vst.msk [vmem:[%s17911_s2 + $0x102c] ss:$4 sm:$0x7] %vm10963_vm0, %v5450_v29 }
 0x427   :  { %8774 = vst.msk [vmem:[%s17911_s2 + $0x1050] ss:$4 sm:$0x7] %vm10963_vm0, %v5443_v14  ;;  %8775 = vst.msk [vmem:[%s17911_s2 + $0x105c] ss:$4 sm:$0x7] %vm10963_vm0, %v5457_v48 }
 0x428   :  { %9154 = vst.msk [vmem:[%s17911_s2 + $0x1021] ss:$4 sm:$0x7] %vm10963_vm0, %v5436_v2  ;;  %9155 = vst.msk [vmem:[%s17911_s2 + $0x102d] ss:$4 sm:$0x7] %vm10963_vm0, %v5450_v29 }
 0x429   :  { %9158 = vst.msk [vmem:[%s17911_s2 + $0x1051] ss:$4 sm:$0x7] %vm10963_vm0, %v5443_v14  ;;  %9159 = vst.msk [vmem:[%s17911_s2 + $0x105d] ss:$4 sm:$0x7] %vm10963_vm0, %v5457_v48 }
 0x42a   :  { %9538 = vst.msk [vmem:[%s17911_s2 + $0x1022] ss:$4 sm:$0x7] %vm10963_vm0, %v5436_v2  ;;  %9539 = vst.msk [vmem:[%s17911_s2 + $0x102e] ss:$4 sm:$0x7] %vm10963_vm0, %v5450_v29 }
 0x42b   :  { %9542 = vst.msk [vmem:[%s17911_s2 + $0x1052] ss:$4 sm:$0x7] %vm10963_vm0, %v5443_v14  ;;  %9543 = vst.msk [vmem:[%s17911_s2 + $0x105e] ss:$4 sm:$0x7] %vm10963_vm0, %v5457_v48 }
 0x42c   :  { %8752 = vst.msk [vmem:[%s17911_s2 + $0xf48] ss:$4 sm:$0x7] %vm10963_vm0, %v5258_v25  ;;  %8753 = vst.msk [vmem:[%s17911_s2 + $0xf54] ss:$4 sm:$0x7] %vm10963_vm0, %v5260_v10 }
 0x42d   :  { %9136 = vst.msk [vmem:[%s17911_s2 + $0xf49] ss:$4 sm:$0x7] %vm10963_vm0, %v5258_v25  ;;  %9137 = vst.msk [vmem:[%s17911_s2 + $0xf55] ss:$4 sm:$0x7] %vm10963_vm0, %v5260_v10 }
 0x42e   :  { %9520 = vst.msk [vmem:[%s17911_s2 + $0xf4a] ss:$4 sm:$0x7] %vm10963_vm0, %v5258_v25  ;;  %9521 = vst.msk [vmem:[%s17911_s2 + $0xf56] ss:$4 sm:$0x7] %vm10963_vm0, %v5260_v10 }
 0x42f   :  { %8772 = vst.msk [vmem:[%s17911_s2 + $0x1038] ss:$4 sm:$0x7] %vm10963_vm0, %v5458_v61  ;;  %8773 = vst.msk [vmem:[%s17911_s2 + $0x1044] ss:$4 sm:$0x7] %vm10963_vm0, %v5460_v46 }
 0x430   :  { %8776 = vst.msk [vmem:[%s17911_s2 + $0x1068] ss:$4 sm:$0x7] %vm10963_vm0, %v5459_v45  ;;  %8777 = vst.msk [vmem:[%s17911_s2 + $0x1074] ss:$4 sm:$0x7] %vm10963_vm0, %v5461_v57 }
 0x431   :  { %9156 = vst.msk [vmem:[%s17911_s2 + $0x1039] ss:$4 sm:$0x7] %vm10963_vm0, %v5458_v61  ;;  %9157 = vst.msk [vmem:[%s17911_s2 + $0x1045] ss:$4 sm:$0x7] %vm10963_vm0, %v5460_v46 }
 0x432   :  { %9160 = vst.msk [vmem:[%s17911_s2 + $0x1069] ss:$4 sm:$0x7] %vm10963_vm0, %v5459_v45  ;;  %9161 = vst.msk [vmem:[%s17911_s2 + $0x1075] ss:$4 sm:$0x7] %vm10963_vm0, %v5461_v57 }
 0x433   :  { %9540 = vst.msk [vmem:[%s17911_s2 + $0x103a] ss:$4 sm:$0x7] %vm10963_vm0, %v5458_v61  ;;  %9541 = vst.msk [vmem:[%s17911_s2 + $0x1046] ss:$4 sm:$0x7] %vm10963_vm0, %v5460_v46 }
 0x434   :  { %9544 = vst.msk [vmem:[%s17911_s2 + $0x106a] ss:$4 sm:$0x7] %vm10963_vm0, %v5459_v45  ;;  %9545 = vst.msk [vmem:[%s17911_s2 + $0x1076] ss:$4 sm:$0x7] %vm10963_vm0, %v5461_v57 }
 0x435   :  { %8658 = vst.msk [vmem:[%s17911_s2 + $0xae0] ss:$4 sm:$0x7] %vm10963_vm0, %v4498_v21  ;;  %8659 = vst.msk [vmem:[%s17911_s2 + $0xaec] ss:$4 sm:$0x7] %vm10963_vm0, %v4512_v1 }
 0x436   :  { %8662 = vst.msk [vmem:[%s17911_s2 + $0xb10] ss:$4 sm:$0x7] %vm10963_vm0, %v4505_v47  ;;  %8663 = vst.msk [vmem:[%s17911_s2 + $0xb1c] ss:$4 sm:$0x7] %vm10963_vm0, %v4519_v19 }
 0x437   :  { %9042 = vst.msk [vmem:[%s17911_s2 + $0xae1] ss:$4 sm:$0x7] %vm10963_vm0, %v4498_v21  ;;  %9043 = vst.msk [vmem:[%s17911_s2 + $0xaed] ss:$4 sm:$0x7] %vm10963_vm0, %v4512_v1 }
 0x438   :  { %9046 = vst.msk [vmem:[%s17911_s2 + $0xb11] ss:$4 sm:$0x7] %vm10963_vm0, %v4505_v47  ;;  %9047 = vst.msk [vmem:[%s17911_s2 + $0xb1d] ss:$4 sm:$0x7] %vm10963_vm0, %v4519_v19 }
 0x439   :  { %9426 = vst.msk [vmem:[%s17911_s2 + $0xae2] ss:$4 sm:$0x7] %vm10963_vm0, %v4498_v21  ;;  %9427 = vst.msk [vmem:[%s17911_s2 + $0xaee] ss:$4 sm:$0x7] %vm10963_vm0, %v4512_v1 }
 0x43a   :  { %9430 = vst.msk [vmem:[%s17911_s2 + $0xb12] ss:$4 sm:$0x7] %vm10963_vm0, %v4505_v47  ;;  %9431 = vst.msk [vmem:[%s17911_s2 + $0xb1e] ss:$4 sm:$0x7] %vm10963_vm0, %v4519_v19 }
 0x43b   :  { %8660 = vst.msk [vmem:[%s17911_s2 + $0xaf8] ss:$4 sm:$0x7] %vm10963_vm0, %v4520_v13  ;;  %8661 = vst.msk [vmem:[%s17911_s2 + $0xb04] ss:$4 sm:$0x7] %vm10963_vm0, %v4522_v42 }
 0x43c   :  { %8664 = vst.msk [vmem:[%s17911_s2 + $0xb28] ss:$4 sm:$0x7] %vm10963_vm0, %v4521_v27  ;;  %8665 = vst.msk [vmem:[%s17911_s2 + $0xb34] ss:$4 sm:$0x7] %vm10963_vm0, %v4523_v23 }
 0x43d   :  { %9044 = vst.msk [vmem:[%s17911_s2 + $0xaf9] ss:$4 sm:$0x7] %vm10963_vm0, %v4520_v13  ;;  %9045 = vst.msk [vmem:[%s17911_s2 + $0xb05] ss:$4 sm:$0x7] %vm10963_vm0, %v4522_v42 }
 0x43e   :  { %9048 = vst.msk [vmem:[%s17911_s2 + $0xb29] ss:$4 sm:$0x7] %vm10963_vm0, %v4521_v27  ;;  %9049 = vst.msk [vmem:[%s17911_s2 + $0xb35] ss:$4 sm:$0x7] %vm10963_vm0, %v4523_v23 }
 0x43f   :  { %9428 = vst.msk [vmem:[%s17911_s2 + $0xafa] ss:$4 sm:$0x7] %vm10963_vm0, %v4520_v13  ;;  %9429 = vst.msk [vmem:[%s17911_s2 + $0xb06] ss:$4 sm:$0x7] %vm10963_vm0, %v4522_v42 }
 0x440   :  { %9432 = vst.msk [vmem:[%s17911_s2 + $0xb2a] ss:$4 sm:$0x7] %vm10963_vm0, %v4521_v27  ;;  %9433 = vst.msk [vmem:[%s17911_s2 + $0xb36] ss:$4 sm:$0x7] %vm10963_vm0, %v4523_v23 }
 0x441   :  { %v18148_v59 = vld [vmem:[#allocation71_spill] sm:$0xff]  ;;  %v18149_v63 = vld [vmem:[#allocation72_spill] sm:$0xff]  ;;  %8762 = vst.msk [vmem:[%s17911_s2 + $0xfc0] ss:$4 sm:$0x7] %vm10963_vm0, %v5369_v58  ;;  %v18150_v34 = vld [vmem:[#allocation17_spill] sm:$0xff] }
 0x442   :  { %v5560_v53 = vcombine.low %v18148_v59, %v5552_v60  ;;  %v5561_v6 = vcombine.high %v18148_v59, %v5552_v60  ;;  %v5562_v7 = vcombine.low %v18149_v63, %v5559_v35  ;;  %v5563_v4 = vcombine.high %v18149_v63, %v5559_v35  ;;  %8763 = vst.msk [vmem:[%s17911_s2 + $0xfcc] ss:$4 sm:$0x7] %vm10963_vm0, %v5383_v11  ;;  %v18151_v36 = vld [vmem:[#allocation43_spill] sm:$0xff]  ;;  %v18152_v61 = vld [vmem:[#allocation20_spill] sm:$0xff]  ;;  %v18153_v46 = vld [vmem:[#allocation69_spill] sm:$0xff] }
 0x443   :  { %9146 = vst.msk [vmem:[%s17911_s2 + $0xfc1] ss:$4 sm:$0x7] %vm10963_vm0, %v5369_v58  ;;  %9147 = vst.msk [vmem:[%s17911_s2 + $0xfcd] ss:$4 sm:$0x7] %vm10963_vm0, %v5383_v11  ;;  %v4524_v2 = vcombine.low %v18150_v34, %v13753_v33  ;;  %v4525_v14 = vcombine.high %v18150_v34, %v13753_v33  ;;  %v1917_v45 = vadd.f32 %v18152_v61, %v18151_v36 }
 0x444   :  { %9530 = vst.msk [vmem:[%s17911_s2 + $0xfc2] ss:$4 sm:$0x7] %vm10963_vm0, %v5369_v58  ;;  %9531 = vst.msk [vmem:[%s17911_s2 + $0xfce] ss:$4 sm:$0x7] %vm10963_vm0, %v5383_v11  ;;  %v5570_v31 = vrot.slane %v5560_v53, %v10762_v3  ;;  %v5577_v9 = vrot.slane %v5562_v7, %v10762_v3  ;;  %v5584_v8 = vrot.slane %v5561_v6, %v10762_v3 }
 0x445   :  { %v5591_v18 = vrot.slane %v5563_v4, %v10762_v3  ;;  %8764 = vst.msk [vmem:[%s17911_s2 + $0xfd8] ss:$4 sm:$0x7] %vm10963_vm0, %v5391_v49  ;;  %8765 = vst.msk [vmem:[%s17911_s2 + $0xfe4] ss:$4 sm:$0x7] %vm10963_vm0, %v5393_v39  ;;  %v4533_v33 = vrot.slane %v4524_v2, %v10762_v3  ;;  %v4540_v40 = vrot.slane %v4525_v14, %v10762_v3 }
 0x446   :  { %8766 = vst.msk [vmem:[%s17911_s2 + $0xff0] ss:$4 sm:$0x7] %vm10963_vm0, %v5376_v62  ;;  %8767 = vst.msk [vmem:[%s17911_s2 + $0xffc] ss:$4 sm:$0x7] %vm10963_vm0, %v5390_v20  ;;  %v5592_v29 = vcombine.high %v5570_v31, %v5570_v31  ;;  %v5593_v48 = vcombine.high %v5577_v9, %v5577_v9  ;;  %v5594_v25 = vcombine.high %v5584_v8, %v5584_v8 }
 0x447   :  { %9148 = vst.msk [vmem:[%s17911_s2 + $0xfd9] ss:$4 sm:$0x7] %vm10963_vm0, %v5391_v49  ;;  %9149 = vst.msk [vmem:[%s17911_s2 + $0xfe5] ss:$4 sm:$0x7] %vm10963_vm0, %v5393_v39  ;;  %v5595_v10 = vcombine.high %v5591_v18, %v5591_v18  ;;  %v4555_v17 = vcombine.low %v4533_v33, %v14537_v22  ;;  %v4556_v60 = vcombine.high %v4533_v33, %v14537_v22 }
 0x448   :  { %9150 = vst.msk [vmem:[%s17911_s2 + $0xff1] ss:$4 sm:$0x7] %vm10963_vm0, %v5376_v62  ;;  %9151 = vst.msk [vmem:[%s17911_s2 + $0xffd] ss:$4 sm:$0x7] %vm10963_vm0, %v5390_v20  ;;  %v4557_v21 = vcombine.low %v4540_v40, %v14545_v41  ;;  %v4558_v47 = vcombine.high %v4540_v40, %v14545_v41  ;;  %v5464_v1 = vcombine.high %v1917_v45, %v1917_v45 }
 0x449   :  { %9532 = vst.msk [vmem:[%s17911_s2 + $0xfda] ss:$4 sm:$0x7] %vm10963_vm0, %v5391_v49  ;;  %9533 = vst.msk [vmem:[%s17911_s2 + $0xfe6] ss:$4 sm:$0x7] %vm10963_vm0, %v5393_v39  ;;  %v5485_v19 = vrot.slane %v1917_v45, %v10762_v3  ;;  %v4565_v24 = vrot.slane %v4555_v17, %v10762_v3 }
 0x44a   :  { %9534 = vst.msk [vmem:[%s17911_s2 + $0xff2] ss:$4 sm:$0x7] %vm10963_vm0, %v5376_v62  ;;  %9535 = vst.msk [vmem:[%s17911_s2 + $0xffe] ss:$4 sm:$0x7] %vm10963_vm0, %v5390_v20  ;;  %v4572_v0 = vrot.slane %v4557_v21, %v10762_v3  ;;  %v4586_v35 = vrot.slane %v4558_v47, %v10762_v3  ;;  %v5492_v22 = vrot.slane %v5464_v1, %v10762_v3 }
 0x44b   :  { %8786 = vst.msk [vmem:[%s17911_s2 + $0x10e0] ss:$4 sm:$0x7] %vm10963_vm0, %v5570_v31  ;;  %8787 = vst.msk [vmem:[%s17911_s2 + $0x10ec] ss:$4 sm:$0x7] %vm10963_vm0, %v5584_v8  ;;  %v4587_v23 = vcombine.high %v4565_v24, %v4565_v24 }
 0x44c   :  { %8790 = vst.msk [vmem:[%s17911_s2 + $0x1110] ss:$4 sm:$0x7] %vm10963_vm0, %v5577_v9  ;;  %8791 = vst.msk [vmem:[%s17911_s2 + $0x111c] ss:$4 sm:$0x7] %vm10963_vm0, %v5591_v18  ;;  %v4588_v5 = vcombine.high %v4572_v0, %v4572_v0  ;;  %v4590_v55 = vcombine.high %v4586_v35, %v4586_v35 }
 0x44d   :  { %9170 = vst.msk [vmem:[%s17911_s2 + $0x10e1] ss:$4 sm:$0x7] %vm10963_vm0, %v5570_v31  ;;  %9171 = vst.msk [vmem:[%s17911_s2 + $0x10ed] ss:$4 sm:$0x7] %vm10963_vm0, %v5584_v8 }
 0x44e   :  { %9174 = vst.msk [vmem:[%s17911_s2 + $0x1111] ss:$4 sm:$0x7] %vm10963_vm0, %v5577_v9  ;;  %9175 = vst.msk [vmem:[%s17911_s2 + $0x111d] ss:$4 sm:$0x7] %vm10963_vm0, %v5591_v18 }
 0x44f   :  { %9554 = vst.msk [vmem:[%s17911_s2 + $0x10e2] ss:$4 sm:$0x7] %vm10963_vm0, %v5570_v31  ;;  %9555 = vst.msk [vmem:[%s17911_s2 + $0x10ee] ss:$4 sm:$0x7] %vm10963_vm0, %v5584_v8 }
 0x450   :  { %9558 = vst.msk [vmem:[%s17911_s2 + $0x1112] ss:$4 sm:$0x7] %vm10963_vm0, %v5577_v9  ;;  %9559 = vst.msk [vmem:[%s17911_s2 + $0x111e] ss:$4 sm:$0x7] %vm10963_vm0, %v5591_v18 }
 0x451   :  { %8768 = vst.msk [vmem:[%s17911_s2 + $0x1008] ss:$4 sm:$0x7] %vm10963_vm0, %v5392_v16  ;;  %8769 = vst.msk [vmem:[%s17911_s2 + $0x1014] ss:$4 sm:$0x7] %vm10963_vm0, %v5394_v30 }
 0x452   :  { %9152 = vst.msk [vmem:[%s17911_s2 + $0x1009] ss:$4 sm:$0x7] %vm10963_vm0, %v5392_v16  ;;  %9153 = vst.msk [vmem:[%s17911_s2 + $0x1015] ss:$4 sm:$0x7] %vm10963_vm0, %v5394_v30 }
 0x453   :  { %9536 = vst.msk [vmem:[%s17911_s2 + $0x100a] ss:$4 sm:$0x7] %vm10963_vm0, %v5392_v16  ;;  %9537 = vst.msk [vmem:[%s17911_s2 + $0x1016] ss:$4 sm:$0x7] %vm10963_vm0, %v5394_v30 }
 0x454   :  { %v18154_v57 = vld [vmem:[#allocation76_spill] sm:$0xff]  ;;  %8788 = vst.msk [vmem:[%s17911_s2 + $0x10f8] ss:$4 sm:$0x7] %vm10963_vm0, %v5592_v29  ;;  %v18156_v12 = vld [vmem:[#allocation75_spill] sm:$0xff]  ;;  %v18157_v28 = vld [vmem:[#allocation54_spill] sm:$0xff] }
 0x455   :  { %v1932_v51 = vadd.f32 %v18154_v57, %v18153_v46  ;;  %8789 = vst.msk [vmem:[%s17911_s2 + $0x1104] ss:$4 sm:$0x7] %vm10963_vm0, %v5594_v25  ;;  %8792 = vst.msk [vmem:[%s17911_s2 + $0x1128] ss:$4 sm:$0x7] %vm10963_vm0, %v5593_v48  ;;  %v4591_v52 = vcombine.low %v18156_v12, %v18155_v56  ;;  %v4592_v44 = vcombine.high %v18156_v12, %v18155_v56 }
 0x456   :  { %8793 = vst.msk [vmem:[%s17911_s2 + $0x1134] ss:$4 sm:$0x7] %vm10963_vm0, %v5595_v10  ;;  %9172 = vst.msk [vmem:[%s17911_s2 + $0x10f9] ss:$4 sm:$0x7] %vm10963_vm0, %v5592_v29  ;;  %v17246_v38 = vadd.f32 %v13790_v26, %v18157_v28  ;;  %v4579_v26 = vrot.slane %v4556_v60, %v10762_v3 }
 0x457   :  { %9173 = vst.msk [vmem:[%s17911_s2 + $0x1105] ss:$4 sm:$0x7] %vm10963_vm0, %v5594_v25  ;;  %9176 = vst.msk [vmem:[%s17911_s2 + $0x1129] ss:$4 sm:$0x7] %vm10963_vm0, %v5593_v48  ;;  %v5665_v54 = vcombine.high %v1932_v51, %v1932_v51  ;;  %v5686_v43 = vrot.slane %v1932_v51, %v10762_v3 }
 0x458   :  { %9177 = vst.msk [vmem:[%s17911_s2 + $0x1135] ss:$4 sm:$0x7] %vm10963_vm0, %v5595_v10  ;;  %9556 = vst.msk [vmem:[%s17911_s2 + $0x10fa] ss:$4 sm:$0x7] %vm10963_vm0, %v5592_v29  ;;  %v4589_v37 = vcombine.high %v4579_v26, %v4579_v26  ;;  %v4600_v29 = vrot.slane %v4591_v52, %v10762_v3 }
 0x459   :  { %9557 = vst.msk [vmem:[%s17911_s2 + $0x1106] ss:$4 sm:$0x7] %vm10963_vm0, %v5594_v25  ;;  %9560 = vst.msk [vmem:[%s17911_s2 + $0x112a] ss:$4 sm:$0x7] %vm10963_vm0, %v5593_v48  ;;  %v5693_v42 = vrot.slane %v5665_v54, %v10762_v3  ;;  %v4607_v48 = vrot.slane %v4592_v44, %v10762_v3 }
 0x45a   :  { %9561 = vst.msk [vmem:[%s17911_s2 + $0x1136] ss:$4 sm:$0x7] %vm10963_vm0, %v5595_v10  ;;  %v18158_v13 = vld [vmem:[#allocation68_spill] sm:$0xff]  ;;  %v18159_v58 = vld [vmem:[#allocation70_spill] sm:$0xff]  ;;  %v18160_v63 = vld [vmem:[#allocation73_spill] sm:$0xff]  ;;  %v4622_v36 = vcombine.low %v4600_v29, %v14408_v50  ;;  %v4623_v61 = vcombine.high %v4600_v29, %v14408_v50  ;;  %v5598_v50 = vcombine.high %v17246_v38, %v17246_v38 }
 0x45b   :  { %v5493_v27 = vcombine.low %v18158_v13, %v5485_v19  ;;  %v5494_v41 = vcombine.high %v18158_v13, %v5485_v19  ;;  %8666 = vst.msk [vmem:[%s17911_s2 + $0xb40] ss:$4 sm:$0x7] %vm10963_vm0, %v4565_v24  ;;  %8667 = vst.msk [vmem:[%s17911_s2 + $0xb4c] ss:$4 sm:$0x7] %vm10963_vm0, %v4579_v26  ;;  %v5495_v11 = vcombine.low %v18159_v58, %v5492_v22 }
 0x45c   :  { %8670 = vst.msk [vmem:[%s17911_s2 + $0xb70] ss:$4 sm:$0x7] %vm10963_vm0, %v4572_v0  ;;  %8671 = vst.msk [vmem:[%s17911_s2 + $0xb7c] ss:$4 sm:$0x7] %vm10963_vm0, %v4586_v35  ;;  %v5496_v59 = vcombine.high %v18159_v58, %v5492_v22  ;;  %v5694_v7 = vcombine.low %v18160_v63, %v5686_v43  ;;  %v5695_v4 = vcombine.high %v18160_v63, %v5686_v43 }
 0x45d   :  { %9050 = vst.msk [vmem:[%s17911_s2 + $0xb41] ss:$4 sm:$0x7] %vm10963_vm0, %v4565_v24  ;;  %9051 = vst.msk [vmem:[%s17911_s2 + $0xb4d] ss:$4 sm:$0x7] %vm10963_vm0, %v4579_v26  ;;  %v5503_v53 = vrot.slane %v5493_v27, %v10762_v3  ;;  %v5517_v6 = vrot.slane %v5494_v41, %v10762_v3  ;;  %v5510_v39 = vrot.slane %v5495_v11, %v10762_v3 }
 0x45e   :  { %9054 = vst.msk [vmem:[%s17911_s2 + $0xb71] ss:$4 sm:$0x7] %vm10963_vm0, %v4572_v0  ;;  %9055 = vst.msk [vmem:[%s17911_s2 + $0xb7d] ss:$4 sm:$0x7] %vm10963_vm0, %v4586_v35  ;;  %v5524_v31 = vrot.slane %v5496_v59, %v10762_v3  ;;  %v5704_v18 = vrot.slane %v5694_v7, %v10762_v3  ;;  %v5718_v30 = vrot.slane %v5695_v4, %v10762_v3 }
 0x45f   :  { %9434 = vst.msk [vmem:[%s17911_s2 + $0xb42] ss:$4 sm:$0x7] %vm10963_vm0, %v4565_v24  ;;  %9435 = vst.msk [vmem:[%s17911_s2 + $0xb4e] ss:$4 sm:$0x7] %vm10963_vm0, %v4579_v26  ;;  %v5525_v9 = vcombine.high %v5503_v53, %v5503_v53  ;;  %v5527_v8 = vcombine.high %v5517_v6, %v5517_v6  ;;  %v5526_v2 = vcombine.high %v5510_v39, %v5510_v39 }
 0x460   :  { %9438 = vst.msk [vmem:[%s17911_s2 + $0xb72] ss:$4 sm:$0x7] %vm10963_vm0, %v4572_v0  ;;  %9439 = vst.msk [vmem:[%s17911_s2 + $0xb7e] ss:$4 sm:$0x7] %vm10963_vm0, %v4586_v35  ;;  %v5528_v14 = vcombine.high %v5524_v31, %v5524_v31  ;;  %v5726_v25 = vcombine.high %v5704_v18, %v5704_v18  ;;  %v5728_v33 = vcombine.high %v5718_v30, %v5718_v30 }
 0x461   :  { %8668 = vst.msk [vmem:[%s17911_s2 + $0xb58] ss:$4 sm:$0x7] %vm10963_vm0, %v4587_v23  ;;  %8669 = vst.msk [vmem:[%s17911_s2 + $0xb64] ss:$4 sm:$0x7] %vm10963_vm0, %v4589_v37  ;;  %v4624_v45 = vcombine.low %v4607_v48, %v17178_v32  ;;  %v4625_v46 = vcombine.high %v4607_v48, %v17178_v32  ;;  %v5619_v32 = vrot.slane %v17246_v38, %v10762_v3 }
 0x462   :  { %8672 = vst.msk [vmem:[%s17911_s2 + $0xb88] ss:$4 sm:$0x7] %vm10963_vm0, %v4588_v5  ;;  %8673 = vst.msk [vmem:[%s17911_s2 + $0xb94] ss:$4 sm:$0x7] %vm10963_vm0, %v4590_v55  ;;  %v4632_v52 = vrot.slane %v4622_v36, %v10762_v3  ;;  %v4646_v28 = vrot.slane %v4623_v61, %v10762_v3  ;;  %v5626_v47 = vrot.slane %v5598_v50, %v10762_v3 }
 0x463   :  { %9052 = vst.msk [vmem:[%s17911_s2 + $0xb59] ss:$4 sm:$0x7] %vm10963_vm0, %v4587_v23  ;;  %9053 = vst.msk [vmem:[%s17911_s2 + $0xb65] ss:$4 sm:$0x7] %vm10963_vm0, %v4589_v37  ;;  %v4639_v44 = vrot.slane %v4624_v45, %v10762_v3  ;;  %v4653_v17 = vrot.slane %v4625_v46, %v10762_v3 }
 0x464   :  { %9056 = vst.msk [vmem:[%s17911_s2 + $0xb89] ss:$4 sm:$0x7] %vm10963_vm0, %v4588_v5  ;;  %9057 = vst.msk [vmem:[%s17911_s2 + $0xb95] ss:$4 sm:$0x7] %vm10963_vm0, %v4590_v55  ;;  %v4654_v54 = vcombine.high %v4632_v52, %v4632_v52  ;;  %v4656_v38 = vcombine.high %v4646_v28, %v4646_v28 }
 0x465   :  { %9436 = vst.msk [vmem:[%s17911_s2 + $0xb5a] ss:$4 sm:$0x7] %vm10963_vm0, %v4587_v23  ;;  %9437 = vst.msk [vmem:[%s17911_s2 + $0xb66] ss:$4 sm:$0x7] %vm10963_vm0, %v4589_v37  ;;  %v4655_v43 = vcombine.high %v4639_v44, %v4639_v44  ;;  %v4657_v24 = vcombine.high %v4653_v17, %v4653_v17 }
 0x466   :  { %9440 = vst.msk [vmem:[%s17911_s2 + $0xb8a] ss:$4 sm:$0x7] %vm10963_vm0, %v4588_v5  ;;  %9441 = vst.msk [vmem:[%s17911_s2 + $0xb96] ss:$4 sm:$0x7] %vm10963_vm0, %v4590_v55 }
 0x467   :  { %v18161_v62 = vld [vmem:[#allocation11_spill] sm:$0xff]  ;;  %8778 = vst.msk [vmem:[%s17911_s2 + $0x1080] ss:$4 sm:$0x7] %vm10963_vm0, %v5503_v53  ;;  %v18163_v51 = vld [vmem:[#allocation37_spill] sm:$0xff] }
 0x468   :  { %v5696_v20 = vcombine.low %v18161_v62, %v5693_v42  ;;  %v5697_v49 = vcombine.high %v18161_v62, %v5693_v42  ;;  %8779 = vst.msk [vmem:[%s17911_s2 + $0x108c] ss:$4 sm:$0x7] %vm10963_vm0, %v5517_v6  ;;  %9162 = vst.msk [vmem:[%s17911_s2 + $0x1081] ss:$4 sm:$0x7] %vm10963_vm0, %v5503_v53 }
 0x469   :  { %9163 = vst.msk [vmem:[%s17911_s2 + $0x108d] ss:$4 sm:$0x7] %vm10963_vm0, %v5517_v6  ;;  %9546 = vst.msk [vmem:[%s17911_s2 + $0x1082] ss:$4 sm:$0x7] %vm10963_vm0, %v5503_v53 }
 0x46a   :  { %9547 = vst.msk [vmem:[%s17911_s2 + $0x108e] ss:$4 sm:$0x7] %vm10963_vm0, %v5517_v6  ;;  %v5711_v16 = vrot.slane %v5696_v20, %v10762_v3  ;;  %v5725_v34 = vrot.slane %v5697_v49, %v10762_v3  ;;  %8780 = vst.msk [vmem:[%s17911_s2 + $0x1098] ss:$4 sm:$0x7] %vm10963_vm0, %v5525_v9 }
 0x46b   :  { %8781 = vst.msk [vmem:[%s17911_s2 + $0x10a4] ss:$4 sm:$0x7] %vm10963_vm0, %v5527_v8  ;;  %8782 = vst.msk [vmem:[%s17911_s2 + $0x10b0] ss:$4 sm:$0x7] %vm10963_vm0, %v5510_v39 }
 0x46c   :  { %8783 = vst.msk [vmem:[%s17911_s2 + $0x10bc] ss:$4 sm:$0x7] %vm10963_vm0, %v5524_v31  ;;  %9164 = vst.msk [vmem:[%s17911_s2 + $0x1099] ss:$4 sm:$0x7] %vm10963_vm0, %v5525_v9  ;;  %v5727_v10 = vcombine.high %v5711_v16, %v5711_v16  ;;  %v5729_v40 = vcombine.high %v5725_v34, %v5725_v34 }
 0x46d   :  { %9165 = vst.msk [vmem:[%s17911_s2 + $0x10a5] ss:$4 sm:$0x7] %vm10963_vm0, %v5527_v8  ;;  %9166 = vst.msk [vmem:[%s17911_s2 + $0x10b1] ss:$4 sm:$0x7] %vm10963_vm0, %v5510_v39 }
 0x46e   :  { %9167 = vst.msk [vmem:[%s17911_s2 + $0x10bd] ss:$4 sm:$0x7] %vm10963_vm0, %v5524_v31  ;;  %9548 = vst.msk [vmem:[%s17911_s2 + $0x109a] ss:$4 sm:$0x7] %vm10963_vm0, %v5525_v9 }
 0x46f   :  { %9549 = vst.msk [vmem:[%s17911_s2 + $0x10a6] ss:$4 sm:$0x7] %vm10963_vm0, %v5527_v8  ;;  %9550 = vst.msk [vmem:[%s17911_s2 + $0x10b2] ss:$4 sm:$0x7] %vm10963_vm0, %v5510_v39 }
 0x470   :  { %9551 = vst.msk [vmem:[%s17911_s2 + $0x10be] ss:$4 sm:$0x7] %vm10963_vm0, %v5524_v31  ;;  %8802 = vst.msk [vmem:[%s17911_s2 + $0x11a0] ss:$4 sm:$0x7] %vm10963_vm0, %v5704_v18 }
 0x471   :  { %8803 = vst.msk [vmem:[%s17911_s2 + $0x11ac] ss:$4 sm:$0x7] %vm10963_vm0, %v5718_v30  ;;  %8806 = vst.msk [vmem:[%s17911_s2 + $0x11d0] ss:$4 sm:$0x7] %vm10963_vm0, %v5711_v16 }
 0x472   :  { %8807 = vst.msk [vmem:[%s17911_s2 + $0x11dc] ss:$4 sm:$0x7] %vm10963_vm0, %v5725_v34  ;;  %9186 = vst.msk [vmem:[%s17911_s2 + $0x11a1] ss:$4 sm:$0x7] %vm10963_vm0, %v5704_v18 }
 0x473   :  { %9187 = vst.msk [vmem:[%s17911_s2 + $0x11ad] ss:$4 sm:$0x7] %vm10963_vm0, %v5718_v30  ;;  %9190 = vst.msk [vmem:[%s17911_s2 + $0x11d1] ss:$4 sm:$0x7] %vm10963_vm0, %v5711_v16 }
 0x474   :  { %9191 = vst.msk [vmem:[%s17911_s2 + $0x11dd] ss:$4 sm:$0x7] %vm10963_vm0, %v5725_v34  ;;  %9570 = vst.msk [vmem:[%s17911_s2 + $0x11a2] ss:$4 sm:$0x7] %vm10963_vm0, %v5704_v18 }
 0x475   :  { %9571 = vst.msk [vmem:[%s17911_s2 + $0x11ae] ss:$4 sm:$0x7] %vm10963_vm0, %v5718_v30  ;;  %9574 = vst.msk [vmem:[%s17911_s2 + $0x11d2] ss:$4 sm:$0x7] %vm10963_vm0, %v5711_v16 }
 0x476   :  { %9575 = vst.msk [vmem:[%s17911_s2 + $0x11de] ss:$4 sm:$0x7] %vm10963_vm0, %v5725_v34  ;;  %8784 = vst.msk [vmem:[%s17911_s2 + $0x10c8] ss:$4 sm:$0x7] %vm10963_vm0, %v5526_v2 }
 0x477   :  { %8785 = vst.msk [vmem:[%s17911_s2 + $0x10d4] ss:$4 sm:$0x7] %vm10963_vm0, %v5528_v14  ;;  %9168 = vst.msk [vmem:[%s17911_s2 + $0x10c9] ss:$4 sm:$0x7] %vm10963_vm0, %v5526_v2 }
 0x478   :  { %9169 = vst.msk [vmem:[%s17911_s2 + $0x10d5] ss:$4 sm:$0x7] %vm10963_vm0, %v5528_v14  ;;  %9552 = vst.msk [vmem:[%s17911_s2 + $0x10ca] ss:$4 sm:$0x7] %vm10963_vm0, %v5526_v2 }
 0x479   :  { %9553 = vst.msk [vmem:[%s17911_s2 + $0x10d6] ss:$4 sm:$0x7] %vm10963_vm0, %v5528_v14  ;;  %v18162_v57 = vld [vmem:[#allocation35_spill] sm:$0xff] }
 0x47a   :  { %v18164_v56 = vcombine.low %v18162_v57, %v18163_v51  ;;  %8804 = vst.msk [vmem:[%s17911_s2 + $0x11b8] ss:$4 sm:$0x7] %vm10963_vm0, %v5726_v25  ;;  %8805 = vst.msk [vmem:[%s17911_s2 + $0x11c4] ss:$4 sm:$0x7] %vm10963_vm0, %v5728_v33  ;;  %v18165_v60 = vcombine.high %v18162_v57, %v18163_v51 }
 0x47b   :  { %8808 = vst.msk [vmem:[%s17911_s2 + $0x11e8] ss:$4 sm:$0x7] %vm10963_vm0, %v5727_v10  ;;  %8809 = vst.msk [vmem:[%s17911_s2 + $0x11f4] ss:$4 sm:$0x7] %vm10963_vm0, %v5729_v40 }
 0x47c   :  { %v5605_v12 = vrot.slane %v18164_v56, %v10762_v3  ;;  %9188 = vst.msk [vmem:[%s17911_s2 + $0x11b9] ss:$4 sm:$0x7] %vm10963_vm0, %v5726_v25  ;;  %9189 = vst.msk [vmem:[%s17911_s2 + $0x11c5] ss:$4 sm:$0x7] %vm10963_vm0, %v5728_v33  ;;  %v5612_v21 = vrot.slane %v18165_v60, %v10762_v3 }
 0x47d   :  { %9192 = vst.msk [vmem:[%s17911_s2 + $0x11e9] ss:$4 sm:$0x7] %vm10963_vm0, %v5727_v10  ;;  %9193 = vst.msk [vmem:[%s17911_s2 + $0x11f5] ss:$4 sm:$0x7] %vm10963_vm0, %v5729_v40 }
 0x47e   :  { %9572 = vst.msk [vmem:[%s17911_s2 + $0x11ba] ss:$4 sm:$0x7] %vm10963_vm0, %v5726_v25  ;;  %9573 = vst.msk [vmem:[%s17911_s2 + $0x11c6] ss:$4 sm:$0x7] %vm10963_vm0, %v5728_v33  ;;  %v5627_v1 = vcombine.low %v5605_v12, %v5619_v32  ;;  %v5628_v19 = vcombine.high %v5605_v12, %v5619_v32  ;;  %v5629_v0 = vcombine.low %v5612_v21, %v5626_v47 }
 0x47f   :  { %9576 = vst.msk [vmem:[%s17911_s2 + $0x11ea] ss:$4 sm:$0x7] %vm10963_vm0, %v5727_v10  ;;  %9577 = vst.msk [vmem:[%s17911_s2 + $0x11f6] ss:$4 sm:$0x7] %vm10963_vm0, %v5729_v40  ;;  %v5630_v26 = vcombine.high %v5612_v21, %v5626_v47 }
 0x480   :  { %8674 = vst.msk [vmem:[%s17911_s2 + $0xba0] ss:$4 sm:$0x7] %vm10963_vm0, %v4632_v52  ;;  %8675 = vst.msk [vmem:[%s17911_s2 + $0xbac] ss:$4 sm:$0x7] %vm10963_vm0, %v4646_v28  ;;  %v5637_v35 = vrot.slane %v5627_v1, %v10762_v3  ;;  %v5651_v22 = vrot.slane %v5628_v19, %v10762_v3  ;;  %v5644_v13 = vrot.slane %v5629_v0, %v10762_v3 }
 0x481   :  { %8678 = vst.msk [vmem:[%s17911_s2 + $0xbd0] ss:$4 sm:$0x7] %vm10963_vm0, %v4639_v44  ;;  %8679 = vst.msk [vmem:[%s17911_s2 + $0xbdc] ss:$4 sm:$0x7] %vm10963_vm0, %v4653_v17  ;;  %v5658_v27 = vrot.slane %v5630_v26, %v10762_v3 }
 0x482   :  { %9058 = vst.msk [vmem:[%s17911_s2 + $0xba1] ss:$4 sm:$0x7] %vm10963_vm0, %v4632_v52  ;;  %9059 = vst.msk [vmem:[%s17911_s2 + $0xbad] ss:$4 sm:$0x7] %vm10963_vm0, %v4646_v28  ;;  %v5659_v41 = vcombine.high %v5637_v35, %v5637_v35  ;;  %v5661_v42 = vcombine.high %v5651_v22, %v5651_v22  ;;  %v5660_v3 = vcombine.high %v5644_v13, %v5644_v13 }
 0x483   :  { %9062 = vst.msk [vmem:[%s17911_s2 + $0xbd1] ss:$4 sm:$0x7] %vm10963_vm0, %v4639_v44  ;;  %9063 = vst.msk [vmem:[%s17911_s2 + $0xbdd] ss:$4 sm:$0x7] %vm10963_vm0, %v4653_v17  ;;  %v5662_v23 = vcombine.high %v5658_v27, %v5658_v27 }
 0x484   :  { %9442 = vst.msk [vmem:[%s17911_s2 + $0xba2] ss:$4 sm:$0x7] %vm10963_vm0, %v4632_v52  ;;  %9443 = vst.msk [vmem:[%s17911_s2 + $0xbae] ss:$4 sm:$0x7] %vm10963_vm0, %v4646_v28 }
 0x485   :  { %9446 = vst.msk [vmem:[%s17911_s2 + $0xbd2] ss:$4 sm:$0x7] %vm10963_vm0, %v4639_v44  ;;  %9447 = vst.msk [vmem:[%s17911_s2 + $0xbde] ss:$4 sm:$0x7] %vm10963_vm0, %v4653_v17 }
 0x486   :  { %8676 = vst.msk [vmem:[%s17911_s2 + $0xbb8] ss:$4 sm:$0x7] %vm10963_vm0, %v4654_v54  ;;  %8677 = vst.msk [vmem:[%s17911_s2 + $0xbc4] ss:$4 sm:$0x7] %vm10963_vm0, %v4656_v38 }
 0x487   :  { %8680 = vst.msk [vmem:[%s17911_s2 + $0xbe8] ss:$4 sm:$0x7] %vm10963_vm0, %v4655_v43  ;;  %8681 = vst.msk [vmem:[%s17911_s2 + $0xbf4] ss:$4 sm:$0x7] %vm10963_vm0, %v4657_v24 }
 0x488   :  { %9060 = vst.msk [vmem:[%s17911_s2 + $0xbb9] ss:$4 sm:$0x7] %vm10963_vm0, %v4654_v54  ;;  %9061 = vst.msk [vmem:[%s17911_s2 + $0xbc5] ss:$4 sm:$0x7] %vm10963_vm0, %v4656_v38 }
 0x489   :  { %9064 = vst.msk [vmem:[%s17911_s2 + $0xbe9] ss:$4 sm:$0x7] %vm10963_vm0, %v4655_v43  ;;  %9065 = vst.msk [vmem:[%s17911_s2 + $0xbf5] ss:$4 sm:$0x7] %vm10963_vm0, %v4657_v24 }
 0x48a   :  { %9444 = vst.msk [vmem:[%s17911_s2 + $0xbba] ss:$4 sm:$0x7] %vm10963_vm0, %v4654_v54  ;;  %9445 = vst.msk [vmem:[%s17911_s2 + $0xbc6] ss:$4 sm:$0x7] %vm10963_vm0, %v4656_v38 }
 0x48b   :  { %9448 = vst.msk [vmem:[%s17911_s2 + $0xbea] ss:$4 sm:$0x7] %vm10963_vm0, %v4655_v43  ;;  %9449 = vst.msk [vmem:[%s17911_s2 + $0xbf6] ss:$4 sm:$0x7] %vm10963_vm0, %v4657_v24 }
 0x48c   :  { %8794 = vst.msk [vmem:[%s17911_s2 + $0x1140] ss:$4 sm:$0x7] %vm10963_vm0, %v5637_v35  ;;  %8795 = vst.msk [vmem:[%s17911_s2 + $0x114c] ss:$4 sm:$0x7] %vm10963_vm0, %v5651_v22 }
 0x48d   :  { %9178 = vst.msk [vmem:[%s17911_s2 + $0x1141] ss:$4 sm:$0x7] %vm10963_vm0, %v5637_v35  ;;  %9179 = vst.msk [vmem:[%s17911_s2 + $0x114d] ss:$4 sm:$0x7] %vm10963_vm0, %v5651_v22 }
 0x48e   :  { %9562 = vst.msk [vmem:[%s17911_s2 + $0x1142] ss:$4 sm:$0x7] %vm10963_vm0, %v5637_v35  ;;  %9563 = vst.msk [vmem:[%s17911_s2 + $0x114e] ss:$4 sm:$0x7] %vm10963_vm0, %v5651_v22 }
 0x48f   :  { %8796 = vst.msk [vmem:[%s17911_s2 + $0x1158] ss:$4 sm:$0x7] %vm10963_vm0, %v5659_v41  ;;  %8797 = vst.msk [vmem:[%s17911_s2 + $0x1164] ss:$4 sm:$0x7] %vm10963_vm0, %v5661_v42 }
 0x490   :  { %8798 = vst.msk [vmem:[%s17911_s2 + $0x1170] ss:$4 sm:$0x7] %vm10963_vm0, %v5644_v13  ;;  %8799 = vst.msk [vmem:[%s17911_s2 + $0x117c] ss:$4 sm:$0x7] %vm10963_vm0, %v5658_v27 }
 0x491   :  { %9180 = vst.msk [vmem:[%s17911_s2 + $0x1159] ss:$4 sm:$0x7] %vm10963_vm0, %v5659_v41  ;;  %9181 = vst.msk [vmem:[%s17911_s2 + $0x1165] ss:$4 sm:$0x7] %vm10963_vm0, %v5661_v42 }
 0x492   :  { %9182 = vst.msk [vmem:[%s17911_s2 + $0x1171] ss:$4 sm:$0x7] %vm10963_vm0, %v5644_v13  ;;  %9183 = vst.msk [vmem:[%s17911_s2 + $0x117d] ss:$4 sm:$0x7] %vm10963_vm0, %v5658_v27 }
 0x493   :  { %9564 = vst.msk [vmem:[%s17911_s2 + $0x115a] ss:$4 sm:$0x7] %vm10963_vm0, %v5659_v41  ;;  %9565 = vst.msk [vmem:[%s17911_s2 + $0x1166] ss:$4 sm:$0x7] %vm10963_vm0, %v5661_v42 }
 0x494   :  { %9566 = vst.msk [vmem:[%s17911_s2 + $0x1172] ss:$4 sm:$0x7] %vm10963_vm0, %v5644_v13  ;;  %9567 = vst.msk [vmem:[%s17911_s2 + $0x117e] ss:$4 sm:$0x7] %vm10963_vm0, %v5658_v27 }
 0x495   :  { %8800 = vst.msk [vmem:[%s17911_s2 + $0x1188] ss:$4 sm:$0x7] %vm10963_vm0, %v5660_v3  ;;  %8801 = vst.msk [vmem:[%s17911_s2 + $0x1194] ss:$4 sm:$0x7] %vm10963_vm0, %v5662_v23 }
 0x496   :  { %9184 = vst.msk [vmem:[%s17911_s2 + $0x1189] ss:$4 sm:$0x7] %vm10963_vm0, %v5660_v3  ;;  %9185 = vst.msk [vmem:[%s17911_s2 + $0x1195] ss:$4 sm:$0x7] %vm10963_vm0, %v5662_v23 }
 0x497   :  { %9568 = vst.msk [vmem:[%s17911_s2 + $0x118a] ss:$4 sm:$0x7] %vm10963_vm0, %v5660_v3  ;;  %9569 = vst.msk [vmem:[%s17911_s2 + $0x1196] ss:$4 sm:$0x7] %vm10963_vm0, %v5662_v23 }
 0x498   :  { %8425 = vsyncpa [#allocation4], 1 }
 0x499   :  { %8426 = vsyncpa [#allocation6], 1 }

</bundles_post_ra>
